<compile_context>
chip_gen: v6e
topology: v6e:2x2x1
jax: 0.10.0
libtpu: 0.0.40
codegen_flags: <defaults>
</compile_context>

<pallas_src>
import functools

import jax
import jax.numpy as jnp
from jax.experimental import pallas as pl
from jax.experimental.pallas import tpu as pltpu


# ----------------------------- fused attention kernel -----------------------------

def _attention_kernel(x_ref, wqkv_ref, wproj_ref, bproj_ref, o_ref, *, num_heads, scale):
    """Fused multi-head self-attention for one batch element.

    x_ref     : (1, N, C)   input tokens
    wqkv_ref  : (C, 3C)     fused qkv weight (input-major, == PyTorch W_qkv.T)
    wproj_ref : (C, C)      output projection weight (input-major)
    bproj_ref : (1, C)      output projection bias
    o_ref     : (1, N, C)   output tokens
    """
    x = x_ref[0]                                                    # (N, C)
    C = x.shape[-1]
    head_dim = C // num_heads

    # Fused QKV projection: one (N,C) x (C,3C) MXU matmul.
    qkv = jnp.dot(x, wqkv_ref[...], preferred_element_type=jnp.float32)      # (N, 3C)

    # Fold the attention scale into q once (cheaper than scaling the (N,N) score matrix).
    q = qkv[:, :C] * scale
    k = qkv[:, C:2 * C]
    v = qkv[:, 2 * C:]

    # Per-head attention, statically unrolled (num_heads is small). All intermediates
    # stay in VMEM/vregs; head outputs are re-packed into a lane-dense (N, C) slab.
    heads = []
    for h in range(num_heads):
        sl = slice(h * head_dim, (h + 1) * head_dim)
        qh, kh, vh = q[:, sl], k[:, sl], v[:, sl]                   # (N, head_dim)
        s = jnp.dot(qh, kh.T, preferred_element_type=jnp.float32)   # (N, N)
        s = s - jnp.max(s, axis=-1, keepdims=True)
        p = jnp.exp(s)
        # Reciprocal lowers to the EUP slot (essentially free) instead of a VPU divide.
        p = p * pl.reciprocal(jnp.sum(p, axis=-1, keepdims=True), approx=True)
        heads.append(jnp.dot(p, vh, preferred_element_type=jnp.float32))     # (N, head_dim)
    attn_out = jnp.concatenate(heads, axis=-1)                      # (N, C)

    # Output projection fused into the same kernel (no HBM round trip of attn_out).
    out = jnp.dot(attn_out, wproj_ref[...], preferred_element_type=jnp.float32)
    out = out + bproj_ref[...]
    # TODO(synk): attn_drop / proj_drop are nn.Dropout(0.0) in the reference -> identity.
    o_ref[0] = out.astype(o_ref.dtype)


def attention_forward(x, w_qkv, w_proj, b_proj, *, num_heads, qk_scale=None):
    """x: (B, N, C); w_qkv: (C, 3C); w_proj: (C, C); b_proj: (C,) -> (B, N, C).

    Weights are stored input-major (x @ W), i.e. the transpose of PyTorch nn.Linear.weight.
    qkv_bias=False as in the reference module, so no qkv bias input exists at all.
    """
    B, N, C = x.shape
    assert C % num_heads == 0, (C, num_heads)
    scale = qk_scale if qk_scale is not None else (C // num_heads) ** (-0.5)

    kernel = functools.partial(_attention_kernel, num_heads=num_heads, scale=scale)
    return pl.pallas_call(
        kernel,
        grid=(B,),
        in_specs=[
            pl.BlockSpec((1, N, C), lambda b: (b, 0, 0)),       # per-batch token block
            pl.BlockSpec((C, 3 * C), lambda b: (0, 0)),         # weights: same block every step
            pl.BlockSpec((C, C), lambda b: (0, 0)),
            pl.BlockSpec((1, C), lambda b: (0, 0)),
        ],
        out_specs=pl.BlockSpec((1, N, C), lambda b: (b, 0, 0)),
        out_shape=jax.ShapeDtypeStruct((B, N, C), jnp.float32),
        compiler_params=pltpu.CompilerParams(dimension_semantics=("parallel",)),
    )(x.astype(jnp.float32),
      w_qkv.astype(jnp.float32),
      w_proj.astype(jnp.float32),
      b_proj.reshape(1, C).astype(jnp.float32))


# ----------------------------- pure-JAX reference (mirrors the PyTorch forward) ----

def attention_reference(x, w_qkv, w_proj, b_proj, *, num_heads, qk_scale=None):
    B, N, C = x.shape
    head_dim = C // num_heads
    scale = qk_scale if qk_scale is not None else head_dim ** (-0.5)
    qkv = x @ w_qkv                                                  # (B, N, 3C)
    qkv = qkv.reshape(B, N, 3, num_heads, head_dim).transpose(2, 0, 3, 1, 4)
    q, k, v = qkv[0], qkv[1], qkv[2]                                 # (B, H, N, Dh)
    attn = (q @ jnp.swapaxes(k, -2, -1)) * scale
    attn = jax.nn.softmax(attn, axis=-1)
    o = (attn @ v).transpose(0, 2, 1, 3).reshape(B, N, C)
    return o @ w_proj + b_proj


# ----------------------------- main -----------------------------

if __name__ == "__main__":
    B, N, C, H = 2, 128, 128, 8          # batch, seq, dim, heads (head_dim = 16; lane-aligned)

    key = jax.random.PRNGKey(0)
    kx, kq, kp, kb = jax.random.split(key, 4)
    x = jax.random.normal(kx, (B, N, C), dtype=jnp.float32)
    w_qkv = 0.05 * jax.random.normal(kq, (C, 3 * C), dtype=jnp.float32)
    w_proj = 0.05 * jax.random.normal(kp, (C, C), dtype=jnp.float32)
    b_proj = 0.05 * jax.random.normal(kb, (C,), dtype=jnp.float32)

    fwd = jax.jit(functools.partial(attention_forward, num_heads=H))
    out = fwd(x, w_qkv, w_proj, b_proj)
    jax.block_until_ready(out)

    ref = attention_reference(x, w_qkv, w_proj, b_proj, num_heads=H)

    assert out.shape == (B, N, C), out.shape
    assert bool(jnp.all(jnp.isfinite(out)))
    max_err = float(jnp.max(jnp.abs(out - ref)))
    assert max_err < 2e-2, f"max abs error vs reference: {max_err}"
    print("KERNEL_OK")
</pallas_src>

<mosaic_0001>
module attributes {stable_mosaic.version = 11 : i64} {
  func.func @_attention_kernel(%arg0: i32, %arg1: memref<1x128x128xf32, #tpu.memory_space<vmem>>, %arg2: memref<128x384xf32, #tpu.memory_space<vmem>>, %arg3: memref<128x128xf32, #tpu.memory_space<vmem>>, %arg4: memref<1x128xf32, #tpu.memory_space<vmem>>, %arg5: memref<1x128x128xf32, #tpu.memory_space<vmem>>) attributes {dimension_semantics = [#tpu.dimension_semantics<parallel>], iteration_bounds = array<i64: 2>, scalar_prefetch = 0 : i64, scratch_operands = 0 : i64, tpu.core_type = #tpu.core_type<tc>, window_params = [{transform_indices = @transform_0, window_bounds = array<i64: 1, 128, 128>}, {pipeline_mode = #tpu.pipeline_mode<synchronous>, transform_indices = @transform_1, window_bounds = array<i64: 128, 384>}, {pipeline_mode = #tpu.pipeline_mode<synchronous>, transform_indices = @transform_2, window_bounds = array<i64: 128, 128>}, {pipeline_mode = #tpu.pipeline_mode<synchronous>, transform_indices = @transform_3, window_bounds = array<i64: 1, 128>}, {transform_indices = @transform_4, window_bounds = array<i64: 1, 128, 128>}]} {
    %c0 = arith.constant 0 : index
    %c0_0 = arith.constant 0 : index
    %c0_1 = arith.constant 0 : index
    %0 = vector.load %arg1[%c0, %c0_0, %c0_1] : memref<1x128x128xf32, #tpu.memory_space<vmem>>, vector<1x128x128xf32>
    %1 = vector.shape_cast %0 : vector<1x128x128xf32> to vector<128x128xf32>
    %c0_2 = arith.constant 0 : index
    %c0_3 = arith.constant 0 : index
    %2 = vector.load %arg2[%c0_2, %c0_3] : memref<128x384xf32, #tpu.memory_space<vmem>>, vector<128x384xf32>
    %cst = arith.constant dense<0.000000e+00> : vector<128x384xf32>
    %3 = tpu.matmul %1, %2, %cst {dimension_numbers = #tpu.dot_dimension_numbers<[1], [0], [0], [1], [0, 0, 1, 1], [], []>} : vector<128x128xf32>, vector<128x384xf32>, vector<128x384xf32> -> vector<128x384xf32>
    %4 = vector.extract_strided_slice %3 {offsets = [0, 0], sizes = [128, 128], strides = [1, 1]} : vector<128x384xf32> to vector<128x128xf32>
    %cst_4 = arith.constant 2.500000e-01 : f32
    %5 = vector.broadcast %cst_4 : f32 to vector<128x128xf32>
    %6 = arith.mulf %4, %5 : vector<128x128xf32>
    %7 = vector.extract_strided_slice %3 {offsets = [0, 128], sizes = [128, 128], strides = [1, 1]} : vector<128x384xf32> to vector<128x128xf32>
    %8 = vector.extract_strided_slice %3 {offsets = [0, 256], sizes = [128, 128], strides = [1, 1]} : vector<128x384xf32> to vector<128x128xf32>
    %9 = vector.extract_strided_slice %6 {offsets = [0, 0], sizes = [128, 16], strides = [1, 1]} : vector<128x128xf32> to vector<128x16xf32>
    %10 = vector.extract_strided_slice %7 {offsets = [0, 0], sizes = [128, 16], strides = [1, 1]} : vector<128x128xf32> to vector<128x16xf32>
    %11 = vector.extract_strided_slice %8 {offsets = [0, 0], sizes = [128, 16], strides = [1, 1]} : vector<128x128xf32> to vector<128x16xf32>
    %12 = tpu.transpose %10, [1, 0] : vector<128x16xf32> -> vector<16x128xf32>
    %cst_5 = arith.constant dense<0.000000e+00> : vector<128x128xf32>
    %13 = tpu.matmul %9, %12, %cst_5 {dimension_numbers = #tpu.dot_dimension_numbers<[1], [0], [0], [1], [0, 0, 1, 1], [], []>} : vector<128x16xf32>, vector<16x128xf32>, vector<128x128xf32> -> vector<128x128xf32>
    %cst_6 = arith.constant dense<0xFF800000> : vector<128xf32>
    %14 = vector.multi_reduction <maximumf>, %13, %cst_6 [1] : vector<128x128xf32> to vector<128xf32>
    %15 = vector.shape_cast %14 : vector<128xf32> to vector<128x1xf32>
    %16 = vector.broadcast %15 : vector<128x1xf32> to vector<128x128xf32>
    %17 = arith.subf %13, %16 : vector<128x128xf32>
    %18 = math.exp %17 : vector<128x128xf32>
    %cst_7 = arith.constant dense<0.000000e+00> : vector<128xf32>
    %19 = vector.multi_reduction <add>, %18, %cst_7 [1] : vector<128x128xf32> to vector<128xf32>
    %20 = vector.shape_cast %19 : vector<128xf32> to vector<128x1xf32>
    %21 = tpu.reciprocal %20 {approx = true} : vector<128x1xf32> -> vector<128x1xf32>
    %22 = vector.broadcast %21 : vector<128x1xf32> to vector<128x128xf32>
    %23 = arith.mulf %18, %22 : vector<128x128xf32>
    %cst_8 = arith.constant dense<0.000000e+00> : vector<128x16xf32>
    %24 = tpu.matmul %23, %11, %cst_8 {dimension_numbers = #tpu.dot_dimension_numbers<[1], [0], [0], [1], [0, 0, 1, 1], [], []>} : vector<128x128xf32>, vector<128x16xf32>, vector<128x16xf32> -> vector<128x16xf32>
    %25 = vector.extract_strided_slice %6 {offsets = [0, 16], sizes = [128, 16], strides = [1, 1]} : vector<128x128xf32> to vector<128x16xf32>
    %26 = vector.extract_strided_slice %7 {offsets = [0, 16], sizes = [128, 16], strides = [1, 1]} : vector<128x128xf32> to vector<128x16xf32>
    %27 = vector.extract_strided_slice %8 {offsets = [0, 16], sizes = [128, 16], strides = [1, 1]} : vector<128x128xf32> to vector<128x16xf32>
    %28 = tpu.transpose %26, [1, 0] : vector<128x16xf32> -> vector<16x128xf32>
    %cst_9 = arith.constant dense<0.000000e+00> : vector<128x128xf32>
    %29 = tpu.matmul %25, %28, %cst_9 {dimension_numbers = #tpu.dot_dimension_numbers<[1], [0], [0], [1], [0, 0, 1, 1], [], []>} : vector<128x16xf32>, vector<16x128xf32>, vector<128x128xf32> -> vector<128x128xf32>
    %cst_10 = arith.constant dense<0xFF800000> : vector<128xf32>
    %30 = vector.multi_reduction <maximumf>, %29, %cst_10 [1] : vector<128x128xf32> to vector<128xf32>
    %31 = vector.shape_cast %30 : vector<128xf32> to vector<128x1xf32>
    %32 = vector.broadcast %31 : vector<128x1xf32> to vector<128x128xf32>
    %33 = arith.subf %29, %32 : vector<128x128xf32>
    %34 = math.exp %33 : vector<128x128xf32>
    %cst_11 = arith.constant dense<0.000000e+00> : vector<128xf32>
    %35 = vector.multi_reduction <add>, %34, %cst_11 [1] : vector<128x128xf32> to vector<128xf32>
    %36 = vector.shape_cast %35 : vector<128xf32> to vector<128x1xf32>
    %37 = tpu.reciprocal %36 {approx = true} : vector<128x1xf32> -> vector<128x1xf32>
    %38 = vector.broadcast %37 : vector<128x1xf32> to vector<128x128xf32>
    %39 = arith.mulf %34, %38 : vector<128x128xf32>
    %cst_12 = arith.constant dense<0.000000e+00> : vector<128x16xf32>
    %40 = tpu.matmul %39, %27, %cst_12 {dimension_numbers = #tpu.dot_dimension_numbers<[1], [0], [0], [1], [0, 0, 1, 1], [], []>} : vector<128x128xf32>, vector<128x16xf32>, vector<128x16xf32> -> vector<128x16xf32>
    %41 = vector.extract_strided_slice %6 {offsets = [0, 32], sizes = [128, 16], strides = [1, 1]} : vector<128x128xf32> to vector<128x16xf32>
    %42 = vector.extract_strided_slice %7 {offsets = [0, 32], sizes = [128, 16], strides = [1, 1]} : vector<128x128xf32> to vector<128x16xf32>
    %43 = vector.extract_strided_slice %8 {offsets = [0, 32], sizes = [128, 16], strides = [1, 1]} : vector<128x128xf32> to vector<128x16xf32>
    %44 = tpu.transpose %42, [1, 0] : vector<128x16xf32> -> vector<16x128xf32>
    %cst_13 = arith.constant dense<0.000000e+00> : vector<128x128xf32>
    %45 = tpu.matmul %41, %44, %cst_13 {dimension_numbers = #tpu.dot_dimension_numbers<[1], [0], [0], [1], [0, 0, 1, 1], [], []>} : vector<128x16xf32>, vector<16x128xf32>, vector<128x128xf32> -> vector<128x128xf32>
    %cst_14 = arith.constant dense<0xFF800000> : vector<128xf32>
    %46 = vector.multi_reduction <maximumf>, %45, %cst_14 [1] : vector<128x128xf32> to vector<128xf32>
    %47 = vector.shape_cast %46 : vector<128xf32> to vector<128x1xf32>
    %48 = vector.broadcast %47 : vector<128x1xf32> to vector<128x128xf32>
    %49 = arith.subf %45, %48 : vector<128x128xf32>
    %50 = math.exp %49 : vector<128x128xf32>
    %cst_15 = arith.constant dense<0.000000e+00> : vector<128xf32>
    %51 = vector.multi_reduction <add>, %50, %cst_15 [1] : vector<128x128xf32> to vector<128xf32>
    %52 = vector.shape_cast %51 : vector<128xf32> to vector<128x1xf32>
    %53 = tpu.reciprocal %52 {approx = true} : vector<128x1xf32> -> vector<128x1xf32>
    %54 = vector.broadcast %53 : vector<128x1xf32> to vector<128x128xf32>
    %55 = arith.mulf %50, %54 : vector<128x128xf32>
    %cst_16 = arith.constant dense<0.000000e+00> : vector<128x16xf32>
    %56 = tpu.matmul %55, %43, %cst_16 {dimension_numbers = #tpu.dot_dimension_numbers<[1], [0], [0], [1], [0, 0, 1, 1], [], []>} : vector<128x128xf32>, vector<128x16xf32>, vector<128x16xf32> -> vector<128x16xf32>
    %57 = vector.extract_strided_slice %6 {offsets = [0, 48], sizes = [128, 16], strides = [1, 1]} : vector<128x128xf32> to vector<128x16xf32>
    %58 = vector.extract_strided_slice %7 {offsets = [0, 48], sizes = [128, 16], strides = [1, 1]} : vector<128x128xf32> to vector<128x16xf32>
    %59 = vector.extract_strided_slice %8 {offsets = [0, 48], sizes = [128, 16], strides = [1, 1]} : vector<128x128xf32> to vector<128x16xf32>
    %60 = tpu.transpose %58, [1, 0] : vector<128x16xf32> -> vector<16x128xf32>
    %cst_17 = arith.constant dense<0.000000e+00> : vector<128x128xf32>
    %61 = tpu.matmul %57, %60, %cst_17 {dimension_numbers = #tpu.dot_dimension_numbers<[1], [0], [0], [1], [0, 0, 1, 1], [], []>} : vector<128x16xf32>, vector<16x128xf32>, vector<128x128xf32> -> vector<128x128xf32>
    %cst_18 = arith.constant dense<0xFF800000> : vector<128xf32>
    %62 = vector.multi_reduction <maximumf>, %61, %cst_18 [1] : vector<128x128xf32> to vector<128xf32>
    %63 = vector.shape_cast %62 : vector<128xf32> to vector<128x1xf32>
    %64 = vector.broadcast %63 : vector<128x1xf32> to vector<128x128xf32>
    %65 = arith.subf %61, %64 : vector<128x128xf32>
    %66 = math.exp %65 : vector<128x128xf32>
    %cst_19 = arith.constant dense<0.000000e+00> : vector<128xf32>
    %67 = vector.multi_reduction <add>, %66, %cst_19 [1] : vector<128x128xf32> to vector<128xf32>
    %68 = vector.shape_cast %67 : vector<128xf32> to vector<128x1xf32>
    %69 = tpu.reciprocal %68 {approx = true} : vector<128x1xf32> -> vector<128x1xf32>
    %70 = vector.broadcast %69 : vector<128x1xf32> to vector<128x128xf32>
    %71 = arith.mulf %66, %70 : vector<128x128xf32>
    %cst_20 = arith.constant dense<0.000000e+00> : vector<128x16xf32>
    %72 = tpu.matmul %71, %59, %cst_20 {dimension_numbers = #tpu.dot_dimension_numbers<[1], [0], [0], [1], [0, 0, 1, 1], [], []>} : vector<128x128xf32>, vector<128x16xf32>, vector<128x16xf32> -> vector<128x16xf32>
    %73 = vector.extract_strided_slice %6 {offsets = [0, 64], sizes = [128, 16], strides = [1, 1]} : vector<128x128xf32> to vector<128x16xf32>
    %74 = vector.extract_strided_slice %7 {offsets = [0, 64], sizes = [128, 16], strides = [1, 1]} : vector<128x128xf32> to vector<128x16xf32>
    %75 = vector.extract_strided_slice %8 {offsets = [0, 64], sizes = [128, 16], strides = [1, 1]} : vector<128x128xf32> to vector<128x16xf32>
    %76 = tpu.transpose %74, [1, 0] : vector<128x16xf32> -> vector<16x128xf32>
    %cst_21 = arith.constant dense<0.000000e+00> : vector<128x128xf32>
    %77 = tpu.matmul %73, %76, %cst_21 {dimension_numbers = #tpu.dot_dimension_numbers<[1], [0], [0], [1], [0, 0, 1, 1], [], []>} : vector<128x16xf32>, vector<16x128xf32>, vector<128x128xf32> -> vector<128x128xf32>
    %cst_22 = arith.constant dense<0xFF800000> : vector<128xf32>
    %78 = vector.multi_reduction <maximumf>, %77, %cst_22 [1] : vector<128x128xf32> to vector<128xf32>
    %79 = vector.shape_cast %78 : vector<128xf32> to vector<128x1xf32>
    %80 = vector.broadcast %79 : vector<128x1xf32> to vector<128x128xf32>
    %81 = arith.subf %77, %80 : vector<128x128xf32>
    %82 = math.exp %81 : vector<128x128xf32>
    %cst_23 = arith.constant dense<0.000000e+00> : vector<128xf32>
    %83 = vector.multi_reduction <add>, %82, %cst_23 [1] : vector<128x128xf32> to vector<128xf32>
    %84 = vector.shape_cast %83 : vector<128xf32> to vector<128x1xf32>
    %85 = tpu.reciprocal %84 {approx = true} : vector<128x1xf32> -> vector<128x1xf32>
    %86 = vector.broadcast %85 : vector<128x1xf32> to vector<128x128xf32>
    %87 = arith.mulf %82, %86 : vector<128x128xf32>
    %cst_24 = arith.constant dense<0.000000e+00> : vector<128x16xf32>
    %88 = tpu.matmul %87, %75, %cst_24 {dimension_numbers = #tpu.dot_dimension_numbers<[1], [0], [0], [1], [0, 0, 1, 1], [], []>} : vector<128x128xf32>, vector<128x16xf32>, vector<128x16xf32> -> vector<128x16xf32>
    %89 = vector.extract_strided_slice %6 {offsets = [0, 80], sizes = [128, 16], strides = [1, 1]} : vector<128x128xf32> to vector<128x16xf32>
    %90 = vector.extract_strided_slice %7 {offsets = [0, 80], sizes = [128, 16], strides = [1, 1]} : vector<128x128xf32> to vector<128x16xf32>
    %91 = vector.extract_strided_slice %8 {offsets = [0, 80], sizes = [128, 16], strides = [1, 1]} : vector<128x128xf32> to vector<128x16xf32>
    %92 = tpu.transpose %90, [1, 0] : vector<128x16xf32> -> vector<16x128xf32>
    %cst_25 = arith.constant dense<0.000000e+00> : vector<128x128xf32>
    %93 = tpu.matmul %89, %92, %cst_25 {dimension_numbers = #tpu.dot_dimension_numbers<[1], [0], [0], [1], [0, 0, 1, 1], [], []>} : vector<128x16xf32>, vector<16x128xf32>, vector<128x128xf32> -> vector<128x128xf32>
    %cst_26 = arith.constant dense<0xFF800000> : vector<128xf32>
    %94 = vector.multi_reduction <maximumf>, %93, %cst_26 [1] : vector<128x128xf32> to vector<128xf32>
    %95 = vector.shape_cast %94 : vector<128xf32> to vector<128x1xf32>
    %96 = vector.broadcast %95 : vector<128x1xf32> to vector<128x128xf32>
    %97 = arith.subf %93, %96 : vector<128x128xf32>
    %98 = math.exp %97 : vector<128x128xf32>
    %cst_27 = arith.constant dense<0.000000e+00> : vector<128xf32>
    %99 = vector.multi_reduction <add>, %98, %cst_27 [1] : vector<128x128xf32> to vector<128xf32>
    %100 = vector.shape_cast %99 : vector<128xf32> to vector<128x1xf32>
    %101 = tpu.reciprocal %100 {approx = true} : vector<128x1xf32> -> vector<128x1xf32>
    %102 = vector.broadcast %101 : vector<128x1xf32> to vector<128x128xf32>
    %103 = arith.mulf %98, %102 : vector<128x128xf32>
    %cst_28 = arith.constant dense<0.000000e+00> : vector<128x16xf32>
    %104 = tpu.matmul %103, %91, %cst_28 {dimension_numbers = #tpu.dot_dimension_numbers<[1], [0], [0], [1], [0, 0, 1, 1], [], []>} : vector<128x128xf32>, vector<128x16xf32>, vector<128x16xf32> -> vector<128x16xf32>
    %105 = vector.extract_strided_slice %6 {offsets = [0, 96], sizes = [128, 16], strides = [1, 1]} : vector<128x128xf32> to vector<128x16xf32>
    %106 = vector.extract_strided_slice %7 {offsets = [0, 96], sizes = [128, 16], strides = [1, 1]} : vector<128x128xf32> to vector<128x16xf32>
    %107 = vector.extract_strided_slice %8 {offsets = [0, 96], sizes = [128, 16], strides = [1, 1]} : vector<128x128xf32> to vector<128x16xf32>
    %108 = tpu.transpose %106, [1, 0] : vector<128x16xf32> -> vector<16x128xf32>
    %cst_29 = arith.constant dense<0.000000e+00> : vector<128x128xf32>
    %109 = tpu.matmul %105, %108, %cst_29 {dimension_numbers = #tpu.dot_dimension_numbers<[1], [0], [0], [1], [0, 0, 1, 1], [], []>} : vector<128x16xf32>, vector<16x128xf32>, vector<128x128xf32> -> vector<128x128xf32>
    %cst_30 = arith.constant dense<0xFF800000> : vector<128xf32>
    %110 = vector.multi_reduction <maximumf>, %109, %cst_30 [1] : vector<128x128xf32> to vector<128xf32>
    %111 = vector.shape_cast %110 : vector<128xf32> to vector<128x1xf32>
    %112 = vector.broadcast %111 : vector<128x1xf32> to vector<128x128xf32>
    %113 = arith.subf %109, %112 : vector<128x128xf32>
    %114 = math.exp %113 : vector<128x128xf32>
    %cst_31 = arith.constant dense<0.000000e+00> : vector<128xf32>
    %115 = vector.multi_reduction <add>, %114, %cst_31 [1] : vector<128x128xf32> to vector<128xf32>
    %116 = vector.shape_cast %115 : vector<128xf32> to vector<128x1xf32>
    %117 = tpu.reciprocal %116 {approx = true} : vector<128x1xf32> -> vector<128x1xf32>
    %118 = vector.broadcast %117 : vector<128x1xf32> to vector<128x128xf32>
    %119 = arith.mulf %114, %118 : vector<128x128xf32>
    %cst_32 = arith.constant dense<0.000000e+00> : vector<128x16xf32>
    %120 = tpu.matmul %119, %107, %cst_32 {dimension_numbers = #tpu.dot_dimension_numbers<[1], [0], [0], [1], [0, 0, 1, 1], [], []>} : vector<128x128xf32>, vector<128x16xf32>, vector<128x16xf32> -> vector<128x16xf32>
    %121 = vector.extract_strided_slice %6 {offsets = [0, 112], sizes = [128, 16], strides = [1, 1]} : vector<128x128xf32> to vector<128x16xf32>
    %122 = vector.extract_strided_slice %7 {offsets = [0, 112], sizes = [128, 16], strides = [1, 1]} : vector<128x128xf32> to vector<128x16xf32>
    %123 = vector.extract_strided_slice %8 {offsets = [0, 112], sizes = [128, 16], strides = [1, 1]} : vector<128x128xf32> to vector<128x16xf32>
    %124 = tpu.transpose %122, [1, 0] : vector<128x16xf32> -> vector<16x128xf32>
    %cst_33 = arith.constant dense<0.000000e+00> : vector<128x128xf32>
    %125 = tpu.matmul %121, %124, %cst_33 {dimension_numbers = #tpu.dot_dimension_numbers<[1], [0], [0], [1], [0, 0, 1, 1], [], []>} : vector<128x16xf32>, vector<16x128xf32>, vector<128x128xf32> -> vector<128x128xf32>
    %cst_34 = arith.constant dense<0xFF800000> : vector<128xf32>
    %126 = vector.multi_reduction <maximumf>, %125, %cst_34 [1] : vector<128x128xf32> to vector<128xf32>
    %127 = vector.shape_cast %126 : vector<128xf32> to vector<128x1xf32>
    %128 = vector.broadcast %127 : vector<128x1xf32> to vector<128x128xf32>
    %129 = arith.subf %125, %128 : vector<128x128xf32>
    %130 = math.exp %129 : vector<128x128xf32>
    %cst_35 = arith.constant dense<0.000000e+00> : vector<128xf32>
    %131 = vector.multi_reduction <add>, %130, %cst_35 [1] : vector<128x128xf32> to vector<128xf32>
    %132 = vector.shape_cast %131 : vector<128xf32> to vector<128x1xf32>
    %133 = tpu.reciprocal %132 {approx = true} : vector<128x1xf32> -> vector<128x1xf32>
    %134 = vector.broadcast %133 : vector<128x1xf32> to vector<128x128xf32>
    %135 = arith.mulf %130, %134 : vector<128x128xf32>
    %cst_36 = arith.constant dense<0.000000e+00> : vector<128x16xf32>
    %136 = tpu.matmul %135, %123, %cst_36 {dimension_numbers = #tpu.dot_dimension_numbers<[1], [0], [0], [1], [0, 0, 1, 1], [], []>} : vector<128x128xf32>, vector<128x16xf32>, vector<128x16xf32> -> vector<128x16xf32>
    %137 = tpu.concatenate %24, %40, %56, %72, %88, %104, %120, %136 in 1 : vector<128x16xf32>, vector<128x16xf32>, vector<128x16xf32>, vector<128x16xf32>, vector<128x16xf32>, vector<128x16xf32>, vector<128x16xf32>, vector<128x16xf32> -> vector<128x128xf32>
    %c0_37 = arith.constant 0 : index
    %c0_38 = arith.constant 0 : index
    %138 = vector.load %arg3[%c0_37, %c0_38] : memref<128x128xf32, #tpu.memory_space<vmem>>, vector<128x128xf32>
    %cst_39 = arith.constant dense<0.000000e+00> : vector<128x128xf32>
    %139 = tpu.matmul %137, %138, %cst_39 {dimension_numbers = #tpu.dot_dimension_numbers<[1], [0], [0], [1], [0, 0, 1, 1], [], []>} : vector<128x128xf32>, vector<128x128xf32>, vector<128x128xf32> -> vector<128x128xf32>
    %c0_40 = arith.constant 0 : index
    %c0_41 = arith.constant 0 : index
    %140 = vector.load %arg4[%c0_40, %c0_41] : memref<1x128xf32, #tpu.memory_space<vmem>>, vector<1x128xf32>
    %141 = vector.broadcast %140 : vector<1x128xf32> to vector<128x128xf32>
    %142 = arith.addf %139, %141 : vector<128x128xf32>
    %c0_42 = arith.constant 0 : index
    %c0_43 = arith.constant 0 : index
    %c0_44 = arith.constant 0 : index
    %143 = vector.load %arg5[%c0_42, %c0_43, %c0_44] : memref<1x128x128xf32, #tpu.memory_space<vmem>>, vector<1x128x128xf32>
    %144 = vector.shape_cast %143 : vector<1x128x128xf32> to vector<128x128xf32>
    %145 = vector.shape_cast %142 : vector<128x128xf32> to vector<1x128x128xf32>
    tpu.vector_store %arg5[%c0_42, %c0_43, %c0_44], %145 {strides = array<i32>} : memref<1x128x128xf32, #tpu.memory_space<vmem>>, vector<1x128x128xf32>,
    return
  }
  func.func @transform_0(%arg0: i32) -> (i32, i32, i32) {
    %c0_i32 = arith.constant 0 : i32
    %c0_i32_0 = arith.constant 0 : i32
    %c0_i32_1 = arith.constant 0 : i32
    return %arg0, %c0_i32, %c0_i32_0 : i32, i32, i32
  }
  func.func @transform_1(%arg0: i32) -> (i32, i32) {
    %c0_i32 = arith.constant 0 : i32
    %c0_i32_0 = arith.constant 0 : i32
    %c0_i32_1 = arith.constant 0 : i32
    return %c0_i32, %c0_i32_0 : i32, i32
  }
  func.func @transform_2(%arg0: i32) -> (i32, i32) {
    %c0_i32 = arith.constant 0 : i32
    %c0_i32_0 = arith.constant 0 : i32
    %c0_i32_1 = arith.constant 0 : i32
    return %c0_i32, %c0_i32_0 : i32, i32
  }
  func.func @transform_3(%arg0: i32) -> (i32, i32) {
    %c0_i32 = arith.constant 0 : i32
    %c0_i32_0 = arith.constant 0 : i32
    %c0_i32_1 = arith.constant 0 : i32
    return %c0_i32, %c0_i32_0 : i32, i32
  }
  func.func @transform_4(%arg0: i32) -> (i32, i32, i32) {
    %c0_i32 = arith.constant 0 : i32
    %c0_i32_0 = arith.constant 0 : i32
    %c0_i32_1 = arith.constant 0 : i32
    return %arg0, %c0_i32, %c0_i32_0 : i32, i32, i32
  }
}

</mosaic_0001>

<bundles_post_ra>
// kernel: attention_forward.1
= control target key start
LH: loop header
LB: loop body
LE: loop exit
PB: predicated region body
PF: predicated region fallthrough
CT: control target
= control target key end

     0   :  { %9 = vsyncpa [#allocation3], 0  ;;  %s12640_s0 = inlined_call_operand.hbm [shape: f32[2,128,128], index: 0, kind: input, shape index: {}]   ;;  %s12641_s1 = inlined_call_operand.hbm [shape: f32[128,384], index: 1, kind: input, shape index: {}]   ;;  %s12642_s2 = inlined_call_operand.hbm [shape: f32[128,128], index: 2, kind: input, shape index: {}]   ;;  %s12643_s3 = inlined_call_operand.vmem [shape: f32[1,128], index: 3, kind: input, shape index: {}]   ;;  %s12644_s4 = inlined_call_operand.hbm [shape: f32[2,128,128], index: 4, kind: output, shape index: {}]  }
   0x1   :  { %11 = vsyncpa [#allocation3 + $0x1], 0 }
   0x2   :  { %12 = vsyncpa [#allocation6], 0 }
   0x3   :  { %13 = vsyncpa [#allocation4], 0 }
   0x4   :  { %15 = vsyncpa [#allocation4 + $0x1], 0  ;;  %s9263_s15 = smov 0   ;;  %s9265_s16 = smov 0  }
   0x5   :  { %s9267_s17 = smov 0   ;;  %s9269_s18 = smov 0  }
   0x6 LB: > { %s9284_s19 = sadd.s32 4294967295, %s9218_s18   ;;  %s6304_s20 = sadd.s32 4294967294, %s9218_s18   ;;  %s9218_s18 = sphi %s9269_s18, %s13214_s18   ;;  %s9214_s17 = sphi %s9267_s17, %s13213_s17   ;;  %s9210_s16 = sphi %s9265_s16, %s13212_s16   ;;  %s9206_s15 = sphi %s9263_s15, %s13211_s15  }
   0x7   : > { %p41_p0 = scmp.ne.s32.totalorder %s9210_s16, %s9206_s15  ;;  %p12645_p1 = scmp.eq.s32.totalorder %s9284_s19, 0 }
   0x8   : > { %p134_p3 = scmp.eq.s32.totalorder %s6304_s20, 1  ;;  %p6305_p5 = scmp.ge.s32.totalorder %s9218_s18, 1 }
   0x9   : > { %p9293_p4 = por %p12645_p1, %p41_p0  ;;  %p141_p7 = scmp.lt.s32.totalorder %s9218_s18, 3 }
   0xa   : > { %p9298_p6 = por %p134_p3, %p41_p0  ;;  %s9220_s24 = smov [#allocation5]  }
   0xb   : > { %s12754_s21 = scalar_select %p9293_p4, 1, 0 }
   0xc   : > { %s12755_s22 = scalar_select %p9298_p6, 1, 0 }
   0xd   : > { %p9303_p8 = pnand %p6305_p5, %p141_p7  ;;  %s153_s25 = sshll.u32 %s9220_s24, 4  ;;  %s154_s25 = int_to_ptr.vmem [resolvable:$true] %s153_s25 }
   0xe   : > { %s9221_s27 = smov [#allocation7]   ;;  %s9081_s29 = scalar_lea.vmem %s154_s25, 6144 }
   0xf   : > { %s12756_s23 = scalar_select %p9303_p8, 1, 0 }
  0x10   : > { %p8209_p9 = pneg %p9303_p8  ;;  %s166_s28 = sshll.u32 %s9221_s27, 4  ;;  %s167_s28 = int_to_ptr.vmem [resolvable:$true] %s166_s28 }
  0x11   : > { %p9082_p13 = scmp.ne.s32.totalorder %s154_s25, %s9081_s29  ;;  %p9089_p5 = scmp.lt.s32.totalorder %s154_s25, %s154_s25 }
  0x12   : > { %p9312_p11 = pnand %p8209_p9, %p12645_p1  ;;  %p9090_p7 = scmp.lt.s32.totalorder %s9081_s29, %s9081_s29 }
  0x14   : > { %p9072_p12 = pneg %p9312_p11  ;;  %p9091_p10 = por %p9090_p7, %p9089_p5 }
  0x16   : > { %p9084_p0 = pnand %p9082_p13, %p9072_p12 }
  0x18   : > { %p9085_p3 = pneg %p9084_p0 }
  0x1a   : > { %p9092_p9 = pnand %p9091_p10, %p9085_p3 }
  0x1c   : > { %9095 = shalt.err (!%p9092_p9)
}
  0x1d   : > { %s9222_s30 = smov 384   ;;  %s9223_s5 = smov 24  }
  0x1e   : > { %8212 = dma.hbm_to_vmem [thread:$0]  (!%p9312_p11), %s12641_s1, 6144, %s154_s25, [#allocation6], %s9222_s30, %s9222_s30, %s9223_s5  }
  0x1f   : > { %s9107_s8 = scalar_lea.vmem %s167_s28, 2048  ;;  %p9115_p2 = scmp.lt.s32.totalorder %s167_s28, %s167_s28 }
  0x20   : > { %p9108_p1 = scmp.ne.s32.totalorder %s167_s28, %s9107_s8  ;;  %p9116_p6 = scmp.lt.s32.totalorder %s9107_s8, %s9107_s8 }
  0x22   : > { %p9110_p13 = pnand %p9108_p1, %p9072_p12  ;;  %p9117_p5 = por %p9116_p6, %p9115_p2 }
  0x24   : > { %p9111_p0 = pneg %p9110_p13 }
  0x26   : > { %p9118_p10 = pnand %p9117_p5, %p9111_p0 }
  0x28   : > { %9121 = shalt.err (!%p9118_p10)
}
  0x29   : > { %s9224_s9 = smov 128   ;;  %s9225_s10 = smov 8  }
  0x2a   : > { %8215 = dma.hbm_to_vmem [thread:$0]  (!%p9312_p11), %s12642_s2, 2048, %s167_s28, [#allocation6], %s9224_s9, %s9224_s9, %s9225_s10  }
  0x2b   : > { %s9338_s13 = sadd.s32 1, %s9218_s18   ;;  %s28_s20 = sadd.s32 1, %s9214_s17 }
  0x2c   : > { %s25_s14 = ssub.s32 %s9218_s18, %s9338_s13  ;;  %p35_p2 = scmp.ne.s32.totalorder %s9214_s17, %s9210_s16 }
  0x2d   : > { %p26_p1 = scmp.eq.s32.totalorder %s25_s14, 0  ;;  %p36_p6 = scmp.eq.s32.totalorder %s9218_s18, 0 }
  0x2e   : > { %p12758_p3 = scmp.eq.s32.totalorder %s9284_s19, 1  ;;  %p8226_p9 = scmp.lt.s32.totalorder %s9218_s18, 2 }
  0x2f   : > { %s9347_s24 = scalar_select %p26_p1, %s9214_s17, %s28_s20  }
  0x30   : > { %p37_p12 = por %p36_p6, %p35_p2  ;;  %p9351_p7 = por %p12758_p3, %p35_p2 }
  0x31   : > { %s183_s26 = sand.u32 1, %s9214_s17   ;;  %s6579_s28 = sshll.u32 %s9218_s18, 11 }
  0x32   : > { %s12759_s25 = scalar_select %p9351_p7, 1, 0 }
  0x33   : > { %s6309_s27 = sshll.u32 %s183_s26, 7  ;;  %s9361_s5 = scalar_lea.hbm %s12640_s0, %s6579_s28 }
  0x34   : > { %s187_s6 = scalar_lea.vmem [#allocation2], %s6309_s27  ;;  %p9365_p11 = pnand %p8226_p9, %p37_p12 }
  0x35   : > { %s194_s7 = sshll.u32 %s187_s6, 4  ;;  %s9369_s11 = scalar_lea.sflag [#allocation3], %s183_s26  ;;  %s9363_s7 = int_to_ptr.vmem [resolvable:$true] %s194_s7 }
  0x36   : > { %s9122_s12 = scalar_lea.hbm %s9361_s5, 2048  ;;  %p9124_p0 = pneg %p9365_p11 }
  0x37   : > { %p9123_p13 = scmp.ne.s32.totalorder %s9361_s5, %s9122_s12  ;;  %s9127_s27 = scalar_lea.hbm %s12640_s0, 4096 }
  0x38   : > { %p9128_p1 = scmp.lt.s32.totalorder %s9361_s5, %s12640_s0  ;;  %p9129_p2 = scmp.lt.s32.totalorder %s9127_s27, %s9122_s12 }
  0x39   : > { %p9125_p5 = pnand %p9124_p0, %p9123_p13 }
  0x3a   : > { %p9130_p6 = por %p9129_p2, %p9128_p1 }
  0x3b   : > { %p9126_p10 = pneg %p9125_p5 }
  0x3d   : > { %p9131_p12 = pnand %p9130_p6, %p9126_p10 }
  0x3f   : > { %9134 = shalt.err (!%p9131_p12)
}
  0x40   : > { %s9135_s26 = scalar_lea.vmem %s9363_s7, 2048  ;;  %s9226_s30 = smov [#allocation2]  }
  0x41   : > { %p9136_p3 = scmp.ne.s32.totalorder %s9363_s7, %s9135_s26  ;;  %s9140_s6 = sshll.u32 %s9226_s30, 4  ;;  %s9141_s6 = int_to_ptr.vmem [resolvable:$false] %s9140_s6 }
  0x42   : > { %s9142_s14 = scalar_lea.vmem %s9141_s6, 4096  ;;  %p9143_p5 = scmp.lt.s32.totalorder %s9363_s7, %s9141_s6 }
  0x43   : > { %p9138_p9 = pnand %p9136_p3, %p9124_p0  ;;  %p9144_p7 = scmp.lt.s32.totalorder %s9142_s14, %s9135_s26 }
  0x45   : > { %p9139_p13 = pneg %p9138_p9  ;;  %p9145_p4 = por %p9144_p7, %p9143_p5 }
  0x47   : > { %p9146_p8 = pnand %p9145_p4, %p9139_p13 }
  0x49   : > { %9149 = shalt.err (!%p9146_p8)
}
  0x4a   : > { %8219 = dma.hbm_to_vmem [thread:$0]  (!%p9365_p11), %s9361_s5, 2048, %s9363_s7, %s9369_s11, %s9224_s9, %s9224_s9, %s9225_s10  }
  0x4b   : > { %p12761_p0 = scmp.ne.s32.totalorder %s12756_s23, 0 }
  0x4d   : > { %206 = sbr.rel (%p12761_p0) target bundleno = 6051 (0x17a3), region = 36 }
  0x52   : > { %s9396_s12 = sand.u32 1, %s9210_s16   ;;  %p12762_p4 = scmp.ne.s32.totalorder %s12754_s21, 0 }
  0x53   : > { %s6313_s20 = sshll.u32 %s9396_s12, 7  ;;  %s209_s27 = scalar_lea.sflag [#allocation3], %s9396_s12 }
  0x54   : > { %s9402_s8 = scalar_lea.vmem [#allocation2], %s6313_s20 }
  0x55   : > { %9193 = dma.done.wait (%p12762_p4), %s209_s27, 2048  }
  0x56   : > { %9195 = vsyncadd (%p12762_p4), %s209_s27, 4294965248  ;;  %p12763_p8 = scmp.eq.s32.totalorder %s9284_s19, 0 }
  0x58   : > { %9197 = dma.done.wait (%p12763_p8), [#allocation6], 8192   ;;  %p12764_p7 = pmov %p12763_p8 }
  0x59   : > { %v9227_v0 = vmov 0.0   ;;  %v307_v1 = vld [vmem:[#allocation5 + $0x170] sm:$0xff]  ;;  %v306_v2 = vld [vmem:[#allocation5 + $0x168] sm:$0xff]  ;;  %v304_v3 = vld [vmem:[#allocation5 + $0x158] sm:$0xff]  ;;  %vm631_vm0 = vcmask 130048   ;;  %s9228_s21 = smov 112  }
  0x5a   : > { %9199 = vsyncadd (%p12764_p7), [#allocation6], 4294959104  ;;  %373 = vmatprep.mubr.f32.mxu0 %v9227_v0  ;;  %309 = vmatprep.subr.mxu0 %v307_v1  ;;  %v303_v4 = vld [vmem:[#allocation5 + $0x150] sm:$0xff]  ;;  %v301_v5 = vld [vmem:[#allocation5 + $0x140] sm:$0xff]  ;;  %s9229_s23 = smov 96   ;;  %s9230_s9 = smov 80  }
  0x5b   : > { %310 = vmatpush1.msra.mxu0 %v306_v2  ;;  %v300_v6 = vld [vmem:[#allocation5 + $0x138] sm:$0xff]  ;;  %v298_v7 = vld [vmem:[#allocation5 + $0x128] sm:$0xff]  ;;  %v297_v8 = vld [vmem:[#allocation5 + $0x120] sm:$0xff]  ;;  %s9231_s10 = smov 64   ;;  %s9232_s5 = smov 48   ;;  %vm5912_vm1 = vcmask 261120  }
  0x5c   : > { %311 = vmatprep.subr.mxu0 %v304_v3  ;;  %v295_v9 = vld [vmem:[#allocation5 + $0x110] sm:$0xff]  ;;  %v294_v10 = vld [vmem:[#allocation5 + $0x108] sm:$0xff]  ;;  %v292_v11 = vld [vmem:[#allocation5 + $0xf8] sm:$0xff]  ;;  %s9233_s7 = smov 32   ;;  %s9234_s11 = smov 16   ;;  %vm5929_vm2 = vcmask 392192  }
  0x5d   : > { %312 = vmatpush1.msra.mxu0 %v303_v4  ;;  %v291_v12 = vld [vmem:[#allocation5 + $0xf0] sm:$0xff]  ;;  %v289_v13 = vld [vmem:[#allocation5 + $0xe0] sm:$0xff]  ;;  %v288_v15 = vld [vmem:[#allocation5 + $0xd8] sm:$0xff]  ;;  %vm5946_vm3 = vcmask 523264   ;;  %vm5963_vm4 = vcmask 654336   ;;  %vm5980_vm5 = vcmask 785408  }
  0x5e   : > { %313 = vmatprep.subr.mxu0 %v301_v5  ;;  %v9414_v14 = vld [vmem:[%s9402_s8] sm:$0xff]  ;;  %v286_v16 = vld [vmem:[#allocation5 + $0xc8] sm:$0xff]  ;;  %v283_v18 = vld [vmem:[#allocation5 + $0xb0] sm:$0xff]  ;;  %vm5997_vm6 = vcmask 916480   ;;  %s12572_s26 = scalar_lea.vmem [#allocation8], %s6313_s20  ;;  %s6580_s30 = sshll.u32 %s9284_s19, 11 }
  0x5f   : > { %314 = vmatpush1.msra.mxu0 %v300_v6  ;;  %7189 = vmatprep.mubr.f32.mxu1 %v9414_v14  ;;  %v285_v17 = vld [vmem:[#allocation5 + $0xc0] sm:$0xff]  ;;  %v282_v19 = vld [vmem:[#allocation5 + $0xa8] sm:$0xff]  ;;  %v280_v20 = vld [vmem:[#allocation5 + $0x98] sm:$0xff]  ;;  %s6212_s6 = sshll.u32 %s12572_s26, 4  ;;  %s12591_s27 = scalar_lea.hbm %s12644_s4, %s6580_s30  ;;  %s12593_s6 = int_to_ptr.vmem [resolvable:$true] %s6212_s6 }
  0x60   : > { %315 = vmatprep.subr.mxu0 %v298_v7  ;;  %v308_v21 = vld [vmem:[#allocation5 + $0x178] sm:$0xff]  ;;  %v305_v22 = vld [vmem:[#allocation5 + $0x160] sm:$0xff]  ;;  %v279_v23 = vld [vmem:[#allocation5 + $0x90] sm:$0xff]  ;;  %s6199_s19 = scalar_lea.sflag [#allocation4], %s9396_s12  ;;  %p13208_p10 = scmp.ne.s32.totalorder %s12759_s25, 0 }
  0x61   : > { %316 = vmatpush1.msra.mxu0 %v297_v8  ;;  %7157 = vmatprep.subr.mxu1 %v308_v21  ;;  %v277_v24 = vld [vmem:[#allocation5 + $0x80] sm:$0xff]  ;;  %v302_v25 = vld [vmem:[#allocation5 + $0x148] sm:$0xff]  ;;  %v276_v26 = vld [vmem:[#allocation5 + $0x78] sm:$0xff] }
  0x62   : > { %317 = vmatprep.subr.mxu0 %v295_v9  ;;  %7158 = vmatpush3.msra.mxu1 %v308_v21  ;;  %v274_v27 = vld [vmem:[#allocation5 + $0x68] sm:$0xff]  ;;  %v299_v28 = vld [vmem:[#allocation5 + $0x130] sm:$0xff]  ;;  %v273_v29 = vld [vmem:[#allocation5 + $0x60] sm:$0xff] }
  0x63   : > { %318 = vmatpush1.msra.mxu0 %v294_v10  ;;  %7159 = vmatprep.subr.mxu1 %v305_v22  ;;  %v271_v30 = vld [vmem:[#allocation5 + $0x50] sm:$0xff]  ;;  %v296_v31 = vld [vmem:[#allocation5 + $0x118] sm:$0xff]  ;;  %v270_v32 = vld [vmem:[#allocation5 + $0x48] sm:$0xff] }
  0x64   : > { %319 = vmatprep.subr.mxu0 %v292_v11  ;;  %7160 = vmatpush3.msra.mxu1 %v305_v22  ;;  %v268_v33 = vld [vmem:[#allocation5 + $0x38] sm:$0xff]  ;;  %v293_v34 = vld [vmem:[#allocation5 + $0x100] sm:$0xff]  ;;  %v267_v35 = vld [vmem:[#allocation5 + $0x30] sm:$0xff] }
  0x65   : > { %320 = vmatpush1.msra.mxu0 %v291_v12  ;;  %7161 = vmatprep.subr.mxu1 %v302_v25  ;;  %v265_v36 = vld [vmem:[#allocation5 + $0x20] sm:$0xff]  ;;  %v290_v37 = vld [vmem:[#allocation5 + $0xe8] sm:$0xff]  ;;  %v264_v38 = vld [vmem:[#allocation5 + $0x18] sm:$0xff] }
  0x66   : > { %321 = vmatprep.subr.mxu0 %v289_v13  ;;  %7162 = vmatpush3.msra.mxu1 %v302_v25  ;;  %v262_v39 = vld [vmem:[#allocation5 + $0x8] sm:$0xff]  ;;  %v287_v40 = vld [vmem:[#allocation5 + $0xd0] sm:$0xff]  ;;  %v261_v41 = vld [vmem:[#allocation5] sm:$0xff] }
  0x67   : > { %322 = vmatpush1.msra.mxu0 %v288_v15  ;;  %7163 = vmatprep.subr.mxu1 %v299_v28  ;;  %v284_v42 = vld [vmem:[#allocation5 + $0xb8] sm:$0xff]  ;;  %v281_v43 = vld [vmem:[#allocation5 + $0xa0] sm:$0xff]  ;;  %v246_v44 = vld [vmem:[%s9402_s8 + $0x8] sm:$0xff] }
  0x68   : > { %323 = vmatprep.subr.mxu0 %v286_v16  ;;  %7164 = vmatpush3.msra.mxu1 %v299_v28  ;;  %v278_v45 = vld [vmem:[#allocation5 + $0x88] sm:$0xff]  ;;  %v275_v46 = vld [vmem:[#allocation5 + $0x70] sm:$0xff]  ;;  %v272_v48 = vld [vmem:[#allocation5 + $0x58] sm:$0xff] }
  0x69   : > { %324 = vmatpush1.msra.mxu0 %v285_v17  ;;  %7165 = vmatprep.subr.mxu1 %v296_v31  ;;  %v247_v47 = vld [vmem:[%s9402_s8 + $0x10] sm:$0xff]  ;;  %v269_v49 = vld [vmem:[#allocation5 + $0x40] sm:$0xff]  ;;  %v248_v50 = vld [vmem:[%s9402_s8 + $0x18] sm:$0xff] }
  0x6a   : > { %325 = vmatprep.subr.mxu0 %v283_v18  ;;  %7166 = vmatpush3.msra.mxu1 %v296_v31  ;;  %v266_v51 = vld [vmem:[#allocation5 + $0x28] sm:$0xff]  ;;  %v263_v52 = vld [vmem:[#allocation5 + $0x10] sm:$0xff]  ;;  %v249_v53 = vld [vmem:[%s9402_s8 + $0x20] sm:$0xff] }
  0x6b   : > { %326 = vmatpush1.msra.mxu0 %v282_v19  ;;  %7167 = vmatprep.subr.mxu1 %v293_v34  ;;  %v250_v54 = vld [vmem:[%s9402_s8 + $0x28] sm:$0xff]  ;;  %v251_v55 = vld [vmem:[%s9402_s8 + $0x30] sm:$0xff]  ;;  %v252_v56 = vld [vmem:[%s9402_s8 + $0x38] sm:$0xff] }
  0x6c   : > { %327 = vmatprep.subr.mxu0 %v280_v20  ;;  %7168 = vmatpush3.msra.mxu1 %v293_v34  ;;  %v253_v57 = vld [vmem:[%s9402_s8 + $0x40] sm:$0xff]  ;;  %v254_v58 = vld [vmem:[%s9402_s8 + $0x48] sm:$0xff]  ;;  %v255_v59 = vld [vmem:[%s9402_s8 + $0x50] sm:$0xff] }
  0x6d   : > { %328 = vmatpush1.msra.mxu0 %v279_v23  ;;  %7169 = vmatprep.subr.mxu1 %v290_v37  ;;  %v256_v60 = vld [vmem:[%s9402_s8 + $0x58] sm:$0xff]  ;;  %v257_v61 = vld [vmem:[%s9402_s8 + $0x60] sm:$0xff]  ;;  %v258_v62 = vld [vmem:[%s9402_s8 + $0x68] sm:$0xff] }
  0x6e   : > { %329 = vmatprep.subr.mxu0 %v277_v24  ;;  %7170 = vmatpush3.msra.mxu1 %v290_v37  ;;  %v259_v63 = vld [vmem:[%s9402_s8 + $0x70] sm:$0xff]  ;;  %v260_v1 = vld [vmem:[%s9402_s8 + $0x78] sm:$0xff]  ;;  %s9150_s8 = scalar_lea.vmem %s12593_s6, 2048 }
  0x6f   : > { %330 = vmatpush1.msra.mxu0 %v276_v26  ;;  %7171 = vmatprep.subr.mxu1 %v287_v40  ;;  %p9151_p11 = scmp.ne.s32.totalorder %s12593_s6, %s9150_s8 }
  0x70   : > { %331 = vmatprep.subr.mxu0 %v274_v27  ;;  %7172 = vmatpush3.msra.mxu1 %v287_v40 }
  0x71   : > { %332 = vmatpush1.msra.mxu0 %v273_v29  ;;  %7173 = vmatprep.subr.mxu1 %v284_v42  ;;  %p9152_p1 = pnand %p9151_p11, %p13208_p10 }
  0x72   : > { %333 = vmatprep.subr.mxu0 %v271_v30  ;;  %7174 = vmatpush3.msra.mxu1 %v284_v42 }
  0x73   : > { %334 = vmatpush1.msra.mxu0 %v270_v32  ;;  %7175 = vmatprep.subr.mxu1 %v281_v43  ;;  %p9153_p2 = pneg %p9152_p1 }
  0x74   : > { %335 = vmatprep.subr.mxu0 %v268_v33  ;;  %7176 = vmatpush3.msra.mxu1 %v281_v43 }
  0x75   : > { %336 = vmatpush1.msra.mxu0 %v267_v35  ;;  %7177 = vmatprep.subr.mxu1 %v278_v45 }
  0x76   : > { %337 = vmatprep.subr.mxu0 %v265_v36  ;;  %7178 = vmatpush3.msra.mxu1 %v278_v45 }
  0x77   : > { %338 = vmatpush1.msra.mxu0 %v264_v38  ;;  %7179 = vmatprep.subr.mxu1 %v275_v46 }
  0x78   : > { %339 = vmatprep.subr.mxu0 %v262_v39  ;;  %7180 = vmatpush3.msra.mxu1 %v275_v46 }
  0x79   : > { %340 = vmatpush1.msra.mxu0 %v261_v41  ;;  %7181 = vmatprep.subr.mxu1 %v272_v48 }
  0x7a   : > { %374 = vmatmul.mubr.f32.vlgmr.msra.gmra.mxu0 %v9414_v14  ;;  %7182 = vmatpush3.msra.mxu1 %v272_v48 }
  0x7b   : > { %379 = vmatprep.mubr.f32.mxu0 %v9227_v0  ;;  %7183 = vmatprep.subr.mxu1 %v269_v49 }
  0x7c   : > { %7184 = vmatpush3.msra.mxu1 %v269_v49 }
  0x7d   : > { %7185 = vmatprep.subr.mxu1 %v266_v51 }
  0x7e   : > { %380 = vmatmul.mubr.f32.gmra.mxu0 %v246_v44  ;;  %7186 = vmatpush3.msra.mxu1 %v266_v51 }
  0x7f   : > { %385 = vmatprep.mubr.f32.mxu0 %v9227_v0  ;;  %7187 = vmatprep.subr.mxu1 %v263_v52 }
  0x80   : > { %7188 = vmatpush3.msra.mxu1 %v263_v52 }
  0x81   : > { %7190 = vmatmul.mubr.f32.vlgmr.msra.gmra.mxu1 %v246_v44 }
  0x82   : > { %386 = vmatmul.mubr.f32.gmra.mxu0 %v247_v47  ;;  %7192 = vmatprep.mubr.f32.mxu1 %v247_v47 }
  0x83   : > { %391 = vmatprep.mubr.f32.mxu0 %v9227_v0 }
  0x85   : > { %7193 = vmatmul.mubr.f32.gmra.mxu1 %v248_v50 }
  0x86   : > { %392 = vmatmul.mubr.f32.gmra.mxu0 %v248_v50  ;;  %7195 = vmatprep.mubr.f32.mxu1 %v249_v53 }
  0x87   : > { %397 = vmatprep.mubr.f32.mxu0 %v9227_v0 }
  0x89   : > { %7196 = vmatmul.mubr.f32.gmra.mxu1 %v250_v54 }
  0x8a   : > { %398 = vmatmul.mubr.f32.gmra.mxu0 %v249_v53  ;;  %7198 = vmatprep.mubr.f32.mxu1 %v251_v55 }
  0x8b   : > { %403 = vmatprep.mubr.f32.mxu0 %v9227_v0 }
  0x8d   : > { %7199 = vmatmul.mubr.f32.gmra.mxu1 %v252_v56 }
  0x8e   : > { %404 = vmatmul.mubr.f32.gmra.mxu0 %v250_v54  ;;  %7201 = vmatprep.mubr.f32.mxu1 %v253_v57 }
  0x8f   : > { %409 = vmatprep.mubr.f32.mxu0 %v9227_v0 }
  0x91   : > { %7202 = vmatmul.mubr.f32.gmra.mxu1 %v254_v58 }
  0x92   : > { %410 = vmatmul.mubr.f32.gmra.mxu0 %v251_v55  ;;  %7204 = vmatprep.mubr.f32.mxu1 %v255_v59 }
  0x93   : > { %415 = vmatprep.mubr.f32.mxu0 %v9227_v0 }
  0x95   : > { %7205 = vmatmul.mubr.f32.gmra.mxu1 %v256_v60 }
  0x96   : > { %416 = vmatmul.mubr.f32.gmra.mxu0 %v252_v56  ;;  %7207 = vmatprep.mubr.f32.mxu1 %v257_v61 }
  0x97   : > { %421 = vmatprep.mubr.f32.mxu0 %v9227_v0 }
  0x99   : > { %7208 = vmatmul.mubr.f32.gmra.mxu1 %v258_v62 }
  0x9a   : > { %422 = vmatmul.mubr.f32.gmra.mxu0 %v253_v57  ;;  %7210 = vmatprep.mubr.f32.mxu1 %v259_v63 }
  0x9b   : > { %427 = vmatprep.mubr.f32.mxu0 %v9227_v0 }
  0x9d   : > { %7211 = vmatmul.mubr.f32.gmra.mxu1 %v260_v1 }
  0x9e   : > { %428 = vmatmul.mubr.f32.gmra.mxu0 %v254_v58 }
  0x9f   : > { %433 = vmatprep.mubr.f32.mxu0 %v9227_v0 }
  0xa2   : > { %434 = vmatmul.mubr.f32.gmra.mxu0 %v255_v59 }
  0xa3   : > { %439 = vmatprep.mubr.f32.mxu0 %v9227_v0 }
  0xa6   : > { %440 = vmatmul.mubr.f32.gmra.mxu0 %v256_v60 }
  0xa7   : > { %445 = vmatprep.mubr.f32.mxu0 %v9227_v0 }
  0xaa   : > { %446 = vmatmul.mubr.f32.gmra.mxu0 %v257_v61 }
  0xab   : > { %451 = vmatprep.mubr.f32.mxu0 %v9227_v0 }
  0xae   : > { %452 = vmatmul.mubr.f32.gmra.mxu0 %v258_v62 }
  0xaf   : > { %457 = vmatprep.mubr.f32.mxu0 %v9227_v0 }
  0xb2   : > { %458 = vmatmul.mubr.f32.gmra.mxu0 %v259_v63 }
  0xb3   : > { %463 = vmatprep.mubr.f32.mxu0 %v9227_v0 }
  0xb6   : > { %464 = vmatmul.mubr.f32.gmra.mxu0 %v260_v1 }
 0x13a   : > { %v375_v2 = vpop.f32.mrf.mxu0 }
 0x13b   : > { %v9448_v3 = vmul.f32 0.25, %v375_v2 }
 0x13c   : > { %v9450_v4 = vpop.f32.mrf.mxu0 }
 0x13d   : > { %7245 = vmatprep.mubr.msk.f32.mxu0 %vm631_vm0, %v9448_v3 }
 0x13e   : > { %v9454_v5 = vpop.f32.mrf.mxu0 }
 0x13f   : > { %v9655_v50 = vmul.f32 0.25, %v9454_v5 }
 0x140   : > { %v9456_v6 = vpop.f32.mrf.mxu0 }
 0x141   : > { %12765 = vst [vmem:[#allocation12_spill] sm:$0xff] %v9456_v6  ;;  %v9468_v11 = vpop.f32.mrf.mxu1  ;;  %12794 = vst [vmem:[#allocation41_spill] sm:$0xff] %v9655_v50 }
 0x142   : > { %v9458_v7 = vpop.f32.mrf.mxu0  ;;  %12768 = vst [vmem:[#allocation15_spill] sm:$0xff] %v9468_v11 }
 0x143   : > { %v9472_v13 = vpop.f32.mrf.mxu1  ;;  %v9658_v51 = vmul.f32 0.25, %v9458_v7 }
 0x144   : > { %v9460_v8 = vpop.f32.mrf.mxu0  ;;  %12770 = vst [vmem:[#allocation17_spill] sm:$0xff] %v9472_v13 }
 0x145   : > { %12766 = vst [vmem:[#allocation13_spill] sm:$0xff] %v9460_v8  ;;  %v9476_v15 = vpop.f32.mrf.mxu1  ;;  %12795 = vst [vmem:[#allocation42_spill] sm:$0xff] %v9658_v51 }
 0x146   : > { %v9462_v9 = vpop.f32.mrf.mxu0  ;;  %12771 = vst [vmem:[#allocation18_spill] sm:$0xff] %v9476_v15 }
 0x147   : > { %v9480_v17 = vpop.f32.mrf.mxu1  ;;  %v9665_v52 = vmul.f32 0.25, %v9462_v9 }
 0x148   : > { %v9464_v0 = vpop.f32.mrf.mxu0  ;;  %12773 = vst [vmem:[#allocation20_spill] sm:$0xff] %v9480_v17 }
 0x149   : > { %12767 = vst [vmem:[#allocation14_spill] sm:$0xff] %v9464_v0  ;;  %v9484_v19 = vpop.f32.mrf.mxu1 }
 0x14a   : > { %v9466_v10 = vpop.f32.mrf.mxu0  ;;  %12774 = vst [vmem:[#allocation21_spill] sm:$0xff] %v9484_v19 }
 0x14b   : > { %v9488_v21 = vpop.f32.mrf.mxu1  ;;  %v9668_v53 = vmul.f32 0.25, %v9466_v10 }
 0x14c   : > { %v9470_v12 = vpop.f32.mrf.mxu0  ;;  %12776 = vst [vmem:[#allocation23_spill] sm:$0xff] %v9488_v21 }
 0x14d   : > { %12769 = vst [vmem:[#allocation16_spill] sm:$0xff] %v9470_v12  ;;  %v9492_v23 = vpop.f32.mrf.mxu1  ;;  %12796 = vst [vmem:[#allocation43_spill] sm:$0xff] %v9668_v53 }
 0x14e   : > { %v9474_v14 = vpop.f32.mrf.mxu0  ;;  %12777 = vst [vmem:[#allocation24_spill] sm:$0xff] %v9492_v23 }
 0x14f   : > { %v9496_v25 = vpop.f32.mrf.mxu1  ;;  %v9675_v54 = vmul.f32 0.25, %v9474_v14 }
 0x150   : > { %v9478_v16 = vpop.f32.mrf.mxu0  ;;  %12779 = vst [vmem:[#allocation26_spill] sm:$0xff] %v9496_v25 }
 0x151   : > { %12772 = vst [vmem:[#allocation19_spill] sm:$0xff] %v9478_v16  ;;  %v9500_v27 = vpop.f32.mrf.mxu1 }
 0x152   : > { %v9482_v18 = vpop.f32.mrf.mxu0  ;;  %12780 = vst [vmem:[#allocation27_spill] sm:$0xff] %v9500_v27 }
 0x153   : > { %v9504_v29 = vpop.f32.mrf.mxu1  ;;  %v9678_v55 = vmul.f32 0.25, %v9482_v18 }
 0x154   : > { %v9486_v20 = vpop.f32.mrf.mxu0  ;;  %12782 = vst [vmem:[#allocation29_spill] sm:$0xff] %v9504_v29 }
 0x155   : > { %12775 = vst [vmem:[#allocation22_spill] sm:$0xff] %v9486_v20  ;;  %v9508_v31 = vpop.f32.mrf.mxu1  ;;  %12797 = vst [vmem:[#allocation44_spill] sm:$0xff] %v9678_v55 }
 0x156   : > { %v9490_v22 = vpop.f32.mrf.mxu0  ;;  %12783 = vst [vmem:[#allocation30_spill] sm:$0xff] %v9508_v31 }
 0x157   : > { %v9512_v33 = vpop.f32.mrf.mxu1  ;;  %v9685_v56 = vmul.f32 0.25, %v9490_v22 }
 0x158   : > { %v9494_v24 = vpop.f32.mrf.mxu0  ;;  %12785 = vst [vmem:[#allocation32_spill] sm:$0xff] %v9512_v33 }
 0x159   : > { %12778 = vst [vmem:[#allocation25_spill] sm:$0xff] %v9494_v24  ;;  %v9516_v35 = vpop.f32.mrf.mxu1 }
 0x15a   : > { %v9498_v26 = vpop.f32.mrf.mxu0 }
 0x15b   : > { %v9520_v37 = vpop.f32.mrf.mxu1  ;;  %v9688_v57 = vmul.f32 0.25, %v9498_v26 }
 0x15c   : > { %v9502_v28 = vpop.f32.mrf.mxu0  ;;  %12787 = vst [vmem:[#allocation34_spill] sm:$0xff] %v9520_v37 }
 0x15d   : > { %12781 = vst [vmem:[#allocation28_spill] sm:$0xff] %v9502_v28  ;;  %v9526_v39 = vpop.f32.mrf.mxu1  ;;  %12798 = vst [vmem:[#allocation45_spill] sm:$0xff] %v9688_v57 }
 0x15e   : > { %v9506_v30 = vpop.f32.mrf.mxu0  ;;  %7269 = vmatprep.subr.mxu1 %v9526_v39 }
 0x15f   : > { %v9531_v41 = vpop.f32.mrf.mxu1  ;;  %7270 = vmatpush3.msra.mxu1 %v9526_v39  ;;  %v9695_v58 = vmul.f32 0.25, %v9506_v30 }
 0x160   : > { %v9510_v32 = vpop.f32.mrf.mxu0  ;;  %12789 = vst [vmem:[#allocation36_spill] sm:$0xff] %v9531_v41  ;;  %7271 = vmatprep.subr.mxu1 %v9531_v41 }
 0x161   : > { %12784 = vst [vmem:[#allocation31_spill] sm:$0xff] %v9510_v32  ;;  %7272 = vmatpush3.msra.mxu1 %v9531_v41 }
 0x162   : > { %v9514_v34 = vpop.f32.mrf.mxu0  ;;  %7273 = vmatprep.subr.mxu1 %v9516_v35 }
 0x163   : > { %7274 = vmatpush3.msra.mxu1 %v9516_v35  ;;  %v9698_v59 = vmul.f32 0.25, %v9514_v34 }
 0x164   : > { %v9518_v36 = vpop.f32.mrf.mxu0  ;;  %7275 = vmatprep.subr.mxu1 %v9520_v37 }
 0x165   : > { %12786 = vst [vmem:[#allocation33_spill] sm:$0xff] %v9518_v36  ;;  %1214 = vrot.lane.b32.xlu1 %v9518_v36, %s9228_s21  ;;  %7276 = vmatpush3.msra.mxu1 %v9520_v37  ;;  %12799 = vst [vmem:[#allocation46_spill] sm:$0xff] %v9698_v59 }
 0x166   : > { %v9524_v38 = vpop.f32.mrf.mxu0  ;;  %7277 = vmatprep.subr.mxu1 %v9508_v31 }
 0x167   : > { %7278 = vmatpush3.msra.mxu1 %v9508_v31  ;;  %v9705_v60 = vmul.f32 0.25, %v9524_v38 }
 0x168   : > { %v9529_v40 = vpop.f32.mrf.mxu0  ;;  %7279 = vmatprep.subr.mxu1 %v9512_v33 }
 0x169   : > { %12788 = vst [vmem:[#allocation35_spill] sm:$0xff] %v9529_v40  ;;  %1216 = vrot.lane.b32.xlu0 %v9529_v40, %s9228_s21  ;;  %7280 = vmatpush3.msra.mxu1 %v9512_v33 }
 0x16a   : > { %v9537_v42 = vpop.f32.mrf.mxu0  ;;  %7281 = vmatprep.subr.mxu1 %v9500_v27 }
 0x16b   : > { %7282 = vmatpush3.msra.mxu1 %v9500_v27  ;;  %v9708_v61 = vmul.f32 0.25, %v9537_v42 }
 0x16c   : > { %v9541_v43 = vpop.f32.mrf.mxu0  ;;  %7283 = vmatprep.subr.mxu1 %v9504_v29 }
 0x16d   : > { %12790 = vst [vmem:[#allocation37_spill] sm:$0xff] %v9541_v43  ;;  %1218 = vrot.lane.b32.xlu1 %v9541_v43, %s9228_s21  ;;  %7284 = vmatpush3.msra.mxu1 %v9504_v29  ;;  %12800 = vst [vmem:[#allocation47_spill] sm:$0xff] %v9708_v61 }
 0x16e   : > { %v9547_v44 = vpop.f32.mrf.mxu0  ;;  %7285 = vmatprep.subr.mxu1 %v9492_v23 }
 0x16f   : > { %7286 = vmatpush3.msra.mxu1 %v9492_v23  ;;  %v9715_v62 = vmul.f32 0.25, %v9547_v44 }
 0x170   : > { %v9551_v45 = vpop.f32.mrf.mxu0  ;;  %7287 = vmatprep.subr.mxu1 %v9496_v25 }
 0x171   : > { %12791 = vst [vmem:[#allocation38_spill] sm:$0xff] %v9551_v45  ;;  %1220 = vrot.lane.b32.xlu0 %v9551_v45, %s9228_s21  ;;  %7288 = vmatpush3.msra.mxu1 %v9496_v25 }
 0x172   : > { %v9557_v46 = vpop.f32.mrf.mxu0  ;;  %7289 = vmatprep.subr.mxu1 %v9484_v19 }
 0x173   : > { %7290 = vmatpush3.msra.mxu1 %v9484_v19  ;;  %v9718_v63 = vmul.f32 0.25, %v9557_v46 }
 0x174   : > { %v9561_v47 = vpop.f32.mrf.mxu0  ;;  %7291 = vmatprep.subr.mxu1 %v9488_v21 }
 0x175   : > { %12792 = vst [vmem:[#allocation39_spill] sm:$0xff] %v9561_v47  ;;  %1222 = vrot.lane.b32.xlu1 %v9561_v47, %s9228_s21  ;;  %7292 = vmatpush3.msra.mxu1 %v9488_v21  ;;  %12801 = vst [vmem:[#allocation48_spill] sm:$0xff] %v9718_v63 }
 0x176   : > { %v9567_v48 = vpop.f32.mrf.mxu0  ;;  %7293 = vmatprep.subr.mxu1 %v9476_v15 }
 0x177   : > { %7294 = vmatpush3.msra.mxu1 %v9476_v15  ;;  %v9725_v1 = vmul.f32 0.25, %v9567_v48 }
 0x178   : > { %v9571_v49 = vpop.f32.mrf.mxu0  ;;  %7295 = vmatprep.subr.mxu1 %v9480_v17 }
 0x179   : > { %12793 = vst [vmem:[#allocation40_spill] sm:$0xff] %v9571_v49  ;;  %1224 = vrot.lane.b32.xlu0 %v9571_v49, %s9228_s21  ;;  %7213 = vmatprep.subr.msk.mxu0 %vm631_vm0, %v9571_v49 }
 0x17a   : > { %7214 = vmatpush3.xpose.msk.msra.mxu0 %vm631_vm0, %v9571_v49  ;;  %7296 = vmatpush3.msra.mxu1 %v9480_v17 }
 0x17b   : > { %7215 = vmatprep.subr.msk.mxu0 %vm631_vm0, %v9561_v47  ;;  %7297 = vmatprep.subr.mxu1 %v9468_v11 }
 0x17c   : > { %7298 = vmatpush3.msra.mxu1 %v9468_v11 }
 0x17d   : > { %7299 = vmatprep.subr.mxu1 %v9472_v13 }
 0x17e   : > { %7216 = vmatpush3.xpose.msk.msra.mxu0 %vm631_vm0, %v9561_v47  ;;  %7300 = vmatpush3.msra.mxu1 %v9472_v13 }
 0x17f   : > { %7217 = vmatprep.subr.msk.mxu0 %vm631_vm0, %v9551_v45 }
 0x182   : > { %7218 = vmatpush3.xpose.msk.msra.mxu0 %vm631_vm0, %v9551_v45 }
 0x183   : > { %7219 = vmatprep.subr.msk.mxu0 %vm631_vm0, %v9541_v43 }
 0x186   : > { %7220 = vmatpush3.xpose.msk.msra.mxu0 %vm631_vm0, %v9541_v43 }
 0x187   : > { %7221 = vmatprep.subr.msk.mxu0 %vm631_vm0, %v9529_v40 }
 0x18a   : > { %7222 = vmatpush3.xpose.msk.msra.mxu0 %vm631_vm0, %v9529_v40 }
 0x18b   : > { %7223 = vmatprep.subr.msk.mxu0 %vm631_vm0, %v9518_v36 }
 0x18e   : > { %7224 = vmatpush3.xpose.msk.msra.mxu0 %vm631_vm0, %v9518_v36 }
 0x18f   : > { %7225 = vmatprep.subr.msk.mxu0 %vm631_vm0, %v9510_v32 }
 0x192   : > { %7226 = vmatpush3.xpose.msk.msra.mxu0 %vm631_vm0, %v9510_v32 }
 0x193   : > { %7227 = vmatprep.subr.msk.mxu0 %vm631_vm0, %v9502_v28 }
 0x196   : > { %7228 = vmatpush3.xpose.msk.msra.mxu0 %vm631_vm0, %v9502_v28 }
 0x197   : > { %7229 = vmatprep.subr.msk.mxu0 %vm631_vm0, %v9494_v24 }
 0x19a   : > { %7230 = vmatpush3.xpose.msk.msra.mxu0 %vm631_vm0, %v9494_v24 }
 0x19b   : > { %7231 = vmatprep.subr.msk.mxu0 %vm631_vm0, %v9486_v20 }
 0x19e   : > { %7232 = vmatpush3.xpose.msk.msra.mxu0 %vm631_vm0, %v9486_v20 }
 0x19f   : > { %7233 = vmatprep.subr.msk.mxu0 %vm631_vm0, %v9478_v16 }
 0x1a2   : > { %7234 = vmatpush3.xpose.msk.msra.mxu0 %vm631_vm0, %v9478_v16 }
 0x1a3   : > { %7235 = vmatprep.subr.msk.mxu0 %vm631_vm0, %v9470_v12 }
 0x1a6   : > { %7236 = vmatpush3.xpose.msk.msra.mxu0 %vm631_vm0, %v9470_v12 }
 0x1a7   : > { %7237 = vmatprep.subr.msk.mxu0 %vm631_vm0, %v9464_v0 }
 0x1aa   : > { %7238 = vmatpush3.xpose.msk.msra.mxu0 %vm631_vm0, %v9464_v0 }
 0x1ab   : > { %7239 = vmatprep.subr.msk.mxu0 %vm631_vm0, %v9460_v8 }
 0x1ae   : > { %7240 = vmatpush3.xpose.msk.msra.mxu0 %vm631_vm0, %v9460_v8 }
 0x1af   : > { %7241 = vmatprep.subr.msk.mxu0 %vm631_vm0, %v9456_v6 }
 0x1b2   : > { %7242 = vmatpush3.xpose.msk.msra.mxu0 %vm631_vm0, %v9456_v6 }
 0x1b3   : > { %7243 = vmatprep.subr.msk.mxu0 %vm631_vm0, %v9450_v4 }
 0x1b6   : > { %7244 = vmatpush3.xpose.msk.msra.mxu0 %vm631_vm0, %v9450_v4 }
 0x1b9   : > { %7246 = vmatmul.mubr.msk.f32.vlgmr.msra.gmra.mxu0 %vm631_vm0, %v9655_v50 }
 0x1ba   : > { %7248 = vmatprep.mubr.msk.f32.mxu0 %vm631_vm0, %v9658_v51 }
 0x1bd   : > { %7249 = vmatmul.mubr.msk.f32.gmra.mxu0 %vm631_vm0, %v9665_v52 }
 0x1be   : > { %7251 = vmatprep.mubr.msk.f32.mxu0 %vm631_vm0, %v9668_v53 }
 0x1c1   : > { %7252 = vmatmul.mubr.msk.f32.gmra.mxu0 %vm631_vm0, %v9675_v54 }
 0x1c2   : > { %7254 = vmatprep.mubr.msk.f32.mxu0 %vm631_vm0, %v9678_v55 }
 0x1c5   : > { %7255 = vmatmul.mubr.msk.f32.gmra.mxu0 %vm631_vm0, %v9685_v56 }
 0x1c6   : > { %7257 = vmatprep.mubr.msk.f32.mxu0 %vm631_vm0, %v9688_v57 }
 0x1c9   : > { %7258 = vmatmul.mubr.msk.f32.gmra.mxu0 %vm631_vm0, %v9695_v58 }
 0x1ca   : > { %7260 = vmatprep.mubr.msk.f32.mxu0 %vm631_vm0, %v9698_v59 }
 0x1cd   : > { %7261 = vmatmul.mubr.msk.f32.gmra.mxu0 %vm631_vm0, %v9705_v60 }
 0x1ce   : > { %7263 = vmatprep.mubr.msk.f32.mxu0 %vm631_vm0, %v9708_v61 }
 0x1d1   : > { %7264 = vmatmul.mubr.msk.f32.gmra.mxu0 %vm631_vm0, %v9715_v62 }
 0x1d2   : > { %7266 = vmatprep.mubr.msk.f32.mxu0 %vm631_vm0, %v9718_v63 }
 0x1d5   : > { %7267 = vmatmul.mubr.msk.f32.gmra.mxu0 %vm631_vm0, %v9725_v1 }
 0x1d7   : > { %v9769_v37 = vpop.permute.xlu1 %1214 }
 0x1d8   : > { %12804 = vst [vmem:[#allocation51_spill] sm:$0xff] %v9769_v37 }
 0x1db   : > { %v9729_v2 = vpop.permute.xlu0 %1216 }
 0x1dc   : > { %12802 = vst [vmem:[#allocation49_spill] sm:$0xff] %v9729_v2 }
 0x1df   : > { %v9771_v41 = vpop.permute.xlu1 %1218 }
 0x1e0   : > { %12805 = vst [vmem:[#allocation52_spill] sm:$0xff] %v9771_v41 }
 0x1e3   : > { %v9731_v5 = vpop.permute.xlu0 %1220 }
 0x1e4   : > { %12803 = vst [vmem:[#allocation50_spill] sm:$0xff] %v9731_v5 }
 0x1e7   : > { %v9773_v63 = vpop.permute.xlu1 %1222 }
 0x1eb   : > { %v9733_v7 = vpop.permute.xlu0 %1224 }
 0x1ec   : > { %7325 = vmatprep.subr.msk.mxu1 %vm631_vm0, %v9733_v7 }
 0x279   : > { %v7247_v9 = vpop.f32.mrf.mxu0 }
 0x27a   : > { %875 = vmax.xlane.f32.xlu0 %v7247_v9 }
 0x27b   : > { %v794_v10 = vpop.f32.mrf.mxu0 }
 0x27d   : > { %v7250_v14 = vpop.f32.mrf.mxu0 }
 0x27e   : > { %873 = vmax.xlane.f32.xlu0 %v794_v10  ;;  %879 = vmax.xlane.f32.xlu1 %v7250_v14 }
 0x27f   : > { %v9737_v18 = vpop.f32.mrf.mxu0 }
 0x281   : > { %v9739_v22 = vpop.f32.mrf.mxu0 }
 0x282   : > { %877 = vmax.xlane.f32.xlu1 %v9737_v18 }
 0x283   : > { %v9742_v26 = vpop.f32.mrf.mxu0 }
 0x284   : > { %881 = vmax.xlane.f32.xlu0 %v9742_v26 }
 0x285   : > { %v9745_v30 = vpop.f32.mrf.mxu0 }
 0x286   : > { %883 = vmax.xlane.f32.xlu1 %v9739_v22 }
 0x287   : > { %v824_v34 = vpop.f32.mrf.mxu0 }
 0x288   : > { %885 = vmax.xlane.f32.xlu0 %v824_v34 }
 0x289   : > { %v9748_v38 = vpop.f32.mrf.mxu0 }
 0x28a   : > { %887 = vmax.xlane.f32.xlu1 %v9745_v30 }
 0x28b   : > { %v9751_v42 = vpop.f32.mrf.mxu0 }
 0x28c   : > { %889 = vmax.xlane.f32.xlu0 %v9751_v42 }
 0x28d   : > { %v9754_v44 = vpop.f32.mrf.mxu0 }
 0x28e   : > { %891 = vmax.xlane.f32.xlu1 %v9748_v38 }
 0x28f   : > { %v844_v46 = vpop.f32.mrf.mxu0 }
 0x290   : > { %893 = vmax.xlane.f32.xlu0 %v844_v46 }
 0x291   : > { %v9757_v48 = vpop.f32.mrf.mxu0 }
 0x292   : > { %895 = vmax.xlane.f32.xlu1 %v9754_v44 }
 0x293   : > { %v9760_v36 = vpop.f32.mrf.mxu0 }
 0x294   : > { %897 = vmax.xlane.f32.xlu0 %v9760_v36 }
 0x295   : > { %v7268_v43 = vpop.f32.mrf.mxu0 }
 0x296   : > { %899 = vmax.xlane.f32.xlu1 %v9757_v48 }
 0x297   : > { %v9764_v49 = vpop.f32.mrf.mxu0 }
 0x298   : > { %901 = vmax.xlane.f32.xlu0 %v9764_v49 }
 0x29a   : > { %903 = vmax.xlane.f32.xlu1 %v7268_v43 }
 0x2ae   : > { %1212 = vrot.lane.b32.xlu0 %v9510_v32, %s9228_s21 }
 0x303   : > { %v876_v11 = vpop.xlane.xlu0 %875 }
 0x304   : > { %v906_v15 = vsub.f32 %v7247_v9, %v876_v11 }
 0x306   : > { %v923_v19 = vmul.f32 1.442695, %v906_v15 }
 0x307   : > { %v874_v23 = vpop.xlane.xlu0 %873  ;;  %v880_v59 = vpop.xlane.xlu1 %879 }
 0x308   : > { %8558 = vpow2.f32 %v923_v19  ;;  %v905_v27 = vsub.f32 %v794_v10, %v874_v23  ;;  %v908_v55 = vsub.f32 %v7250_v14, %v880_v59 }
 0x30a   : > { %v921_v33 = vmul.f32 1.442695, %v905_v27  ;;  %v927_v51 = vmul.f32 1.442695, %v908_v55 }
 0x30b   : > { %v878_v11 = vpop.xlane.xlu1 %877 }
 0x30c   : > { %8560 = vpow2.f32 %v921_v33 }
 0x30d   : > { %v882_v23 = vpop.xlane.xlu0 %881  ;;  %8562 = vpow2.f32 %v927_v51 }
 0x30e   : > { %v909_v59 = vsub.f32 %v9742_v26, %v882_v23 }
 0x30f   : > { %v884_v15 = vpop.xlane.xlu1 %883 }
 0x310   : > { %v929_v14 = vmul.f32 1.442695, %v909_v59 }
 0x311   : > { %v886_v33 = vpop.xlane.xlu0 %885 }
 0x312   : > { %v911_v50 = vsub.f32 %v824_v34, %v886_v33 }
 0x313   : > { %v888_v19 = vpop.xlane.xlu1 %887 }
 0x314   : > { %v933_v2 = vmul.f32 1.442695, %v911_v50 }
 0x315   : > { %v9775_v61 = vpop.eup %8558  ;;  %v890_v10 = vpop.xlane.xlu0 %889 }
 0x316   : > { %955 = vadd.xlane.f32.xlu1 %v9775_v61  ;;  %8564 = vpow2.f32 %v933_v2 }
 0x317   : > { %v892_v27 = vpop.xlane.xlu1 %891 }
 0x319   : > { %v9778_v57 = vpop.eup %8560  ;;  %v894_v37 = vpop.xlane.xlu0 %893 }
 0x31a   : > { %953 = vadd.xlane.f32.xlu0 %v9778_v57  ;;  %v9795_v50 = vpop.eup %8562 }
 0x31b   : > { %v896_v9 = vpop.xlane.xlu1 %895 }
 0x31c   : > { %v916_v51 = vsub.f32 %v9754_v44, %v896_v9 }
 0x31f   : > { %v900_v53 = vpop.xlane.xlu1 %899 }
 0x327   : > { %1208 = vrot.lane.b32.xlu1 %v9494_v24, %s9228_s21  ;;  %v904_v24 = vpop.xlane.xlu1 %903 }
 0x328   : > { %v920_v5 = vsub.f32 %v7268_v43, %v904_v24  ;;  %v9799_v24 = vpop.eup %8564 }
 0x32a   : > { %v951_v55 = vmul.f32 1.442695, %v920_v5  ;;  %v943_v5 = vmul.f32 1.442695, %v916_v51 }
 0x32b   : > { %1206 = vrot.lane.b32.xlu1 %v9486_v20, %s9228_s21  ;;  %v907_v20 = vsub.f32 %v9737_v18, %v878_v11  ;;  %v912_v18 = vsub.f32 %v9745_v30, %v888_v19  ;;  %v898_v30 = vpop.xlane.xlu0 %897 }
 0x32c   : > { %v917_v34 = vsub.f32 %v9760_v36, %v898_v30 }
 0x32d   : > { %v925_v41 = vmul.f32 1.442695, %v907_v20  ;;  %v935_v20 = vmul.f32 1.442695, %v912_v18  ;;  %v12809_v18 = vld [vmem:[#allocation25_spill] sm:$0xff] }
 0x32e   : > { %v945_v44 = vmul.f32 1.442695, %v917_v34 }
 0x32f   : > { %1204 = vrot.lane.b32.xlu1 %v9478_v16, %s9228_s21  ;;  %v915_v16 = vsub.f32 %v844_v46, %v894_v37  ;;  %8566 = vpow2.f32 %v925_v41 }
 0x330   : > { %1210 = vrot.lane.b32.xlu0 %v9502_v28, %s9228_s21  ;;  %v910_v28 = vsub.f32 %v9739_v22, %v884_v15  ;;  %v918_v22 = vsub.f32 %v9757_v48, %v900_v53  ;;  %v902_v15 = vpop.xlane.xlu0 %901 }
 0x331   : > { %v941_v32 = vmul.f32 1.442695, %v915_v16  ;;  %v914_v16 = vsub.f32 %v9748_v38, %v892_v27  ;;  %v919_v27 = vsub.f32 %v9764_v49, %v902_v15 }
 0x332   : > { %v947_v38 = vmul.f32 1.442695, %v918_v22  ;;  %v12815_v22 = vld [vmem:[#allocation44_spill] sm:$0xff] }
 0x333   : > { %1202 = vrot.lane.b32.xlu1 %v9470_v12, %s9228_s21  ;;  %v931_v12 = vmul.f32 1.442695, %v910_v28  ;;  %8568 = vpow2.f32 %v941_v32  ;;  %v939_v32 = vmul.f32 1.442695, %v914_v16  ;;  %v949_v9 = vmul.f32 1.442695, %v919_v27 }
 0x334   : > { %v1213_v19 = vpop.permute.xlu0 %1212  ;;  %v12812_v16 = vld [vmem:[#allocation41_spill] sm:$0xff] }
 0x335   : > { %8570 = vpow2.f32 %v931_v12  ;;  %v913_v12 = vsub.f32 %v9751_v42, %v890_v10 }
 0x336   : > { %8572 = vpow2.f32 %v951_v55 }
 0x337   : > { %8574 = vpow2.f32 %v929_v14  ;;  %v937_v43 = vmul.f32 1.442695, %v913_v12 }
 0x338   : > { %8576 = vpow2.f32 %v935_v20  ;;  %v12810_v20 = vld [vmem:[#allocation49_spill] sm:$0xff] }
 0x339   : > { %8578 = vpow2.f32 %v939_v32  ;;  %v12813_v32 = vld [vmem:[#allocation42_spill] sm:$0xff] }
 0x33a   : > { %8580 = vpow2.f32 %v937_v43 }
 0x33b   : > { %8582 = vpow2.f32 %v943_v5  ;;  %v12814_v5 = vld [vmem:[#allocation43_spill] sm:$0xff] }
 0x33c   : > { %v9802_v28 = vpop.eup %8566  ;;  %8584 = vpow2.f32 %v947_v38  ;;  %v12816_v38 = vld [vmem:[#allocation45_spill] sm:$0xff] }
 0x33d   : > { %8586 = vpow2.f32 %v945_v44 }
 0x340   : > { %v9805_v37 = vpop.eup %8568 }
 0x342   : > { %v9809_v41 = vpop.eup %8570 }
 0x343   : > { %v9812_v2 = vpop.eup %8572 }
 0x344   : > { %v9817_v26 = vpop.eup %8574 }
 0x345   : > { %v9821_v42 = vpop.eup %8576 }
 0x346   : > { %v9824_v46 = vpop.eup %8578 }
 0x347   : > { %v9827_v53 = vpop.eup %8580 }
 0x348   : > { %v9830_v48 = vpop.eup %8582 }
 0x349   : > { %v9835_v36 = vpop.eup %8584 }
 0x34a   : > { %v9840_v11 = vpop.eup %8586 }
 0x34f   : > { %959 = vadd.xlane.f32.xlu0 %v9795_v50 }
 0x353   : > { %965 = vadd.xlane.f32.xlu0 %v9799_v24 }
 0x357   : > { %957 = vadd.xlane.f32.xlu1 %v9802_v28  ;;  %973 = vadd.xlane.f32.xlu0 %v9805_v37 }
 0x35b   : > { %963 = vadd.xlane.f32.xlu1 %v9809_v41  ;;  %983 = vadd.xlane.f32.xlu0 %v9812_v2 }
 0x35f   : > { %961 = vadd.xlane.f32.xlu1 %v9817_v26 }
 0x363   : > { %967 = vadd.xlane.f32.xlu1 %v9821_v42 }
 0x367   : > { %971 = vadd.xlane.f32.xlu1 %v9824_v46 }
 0x36b   : > { %969 = vadd.xlane.f32.xlu1 %v9827_v53 }
 0x36f   : > { %975 = vadd.xlane.f32.xlu1 %v9830_v48 }
 0x371   : > { %1200 = vrot.lane.b32.xlu0 %v9464_v0, %s9228_s21 }
 0x373   : > { %979 = vadd.xlane.f32.xlu1 %v9835_v36 }
 0x375   : > { %1168 = vrot.lane.b32.xlu0 %v9665_v52, %s9228_s21 }
 0x377   : > { %977 = vadd.xlane.f32.xlu1 %v9840_v11 }
 0x379   : > { %1172 = vrot.lane.b32.xlu0 %v9675_v54, %s9228_s21 }
 0x37d   : > { %1176 = vrot.lane.b32.xlu0 %v9685_v56, %s9228_s21 }
 0x381   : > { %1180 = vrot.lane.b32.xlu0 %v9695_v58, %s9228_s21 }
 0x385   : > { %1184 = vrot.lane.b32.xlu0 %v9705_v60, %s9228_s21 }
 0x388   : > { %1198 = vrot.lane.b32.xlu1 %v9460_v8, %s9228_s21 }
 0x389   : > { %1188 = vrot.lane.b32.xlu0 %v9715_v62, %s9228_s21 }
 0x38c   : > { %1196 = vrot.lane.b32.xlu1 %v9456_v6, %s9228_s21 }
 0x38d   : > { %1192 = vrot.lane.b32.xlu0 %v9725_v1, %s9228_s21 }
 0x390   : > { %1194 = vrot.lane.b32.xlu1 %v9450_v4, %s9228_s21 }
 0x391   : > { %1625 = vrot.lane.b32.xlu0 %v9526_v39, %s9228_s21 }
 0x394   : > { %1162 = vrot.lane.b32.xlu1 %v9448_v3, %s9228_s21 }
 0x395   : > { %1621 = vrot.lane.b32.xlu0 %v9516_v35, %s9228_s21 }
 0x399   : > { %1617 = vrot.lane.b32.xlu0 %v9508_v31, %s9228_s21 }
 0x39d   : > { %1611 = vrot.lane.b32.xlu0 %v9504_v29, %s9228_s21 }
 0x39f   : > { %v956_v23 = vpop.xlane.xlu1 %955 }
 0x3a0   : > { %8588 = vrcp.f32 %v956_v23 }
 0x3a1   : > { %1607 = vrot.lane.b32.xlu0 %v9496_v25, %s9228_s21 }
 0x3a3   : > { %v954_v33 = vpop.xlane.xlu0 %953  ;;  %v1209_v12 = vpop.permute.xlu1 %1208 }
 0x3a4   : > { %8590 = vrcp.f32 %v954_v33  ;;  %v12818_v33 = vld [vmem:[#allocation47_spill] sm:$0xff] }
 0x3a5   : > { %1603 = vrot.lane.b32.xlu0 %v9488_v21, %s9228_s21  ;;  %8592 = vpow2.f32 %v949_v9 }
 0x3a7   : > { %v1211_v43 = vpop.permute.xlu0 %1210  ;;  %v1207_v51 = vpop.permute.xlu1 %1206 }
 0x3a9   : > { %1599 = vrot.lane.b32.xlu0 %v9480_v17, %s9228_s21 }
 0x3ab   : > { %v1205_v30 = vpop.permute.xlu1 %1204 }
 0x3ad   : > { %1595 = vrot.lane.b32.xlu0 %v9472_v13, %s9228_s21  ;;  %v8589_v10 = vpop.eup %8588 }
 0x3ae   : > { %v1002_v55 = vmul.f32 %v8589_v10, %v9775_v61  ;;  %v12807_v61 = vld [vmem:[#allocation31_spill] sm:$0xff] }
 0x3af   : > { %v1203_v44 = vpop.permute.xlu1 %1202 }
 0x3b1   : > { %v8591_v59 = vpop.eup %8590  ;;  %1848 = vrot.lane.b32.xlu0 %v9561_v47, %s9229_s23 }
 0x3b2   : > { %v1001_v49 = vmul.f32 %v8591_v59, %v9778_v57  ;;  %v9888_v14 = vpop.eup %8592  ;;  %v12806_v57 = vld [vmem:[#allocation50_spill] sm:$0xff]  ;;  %v12819_v59 = vld [vmem:[#allocation48_spill] sm:$0xff] }
 0x3b4   : > { %7301 = vmatprep.mubr.f32.mxu1 %v1001_v49 }
 0x3b5   : > { %1846 = vrot.lane.b32.xlu0 %v9551_v45, %s9229_s23  ;;  %7302 = vmatmul.mubr.f32.vlgmr.msra.gmra.mxu1 %v1002_v55 }
 0x3b6   : > { %7326 = vmatpush3.xpose.msk.msra.mxu1 %vm631_vm0, %v9733_v7  ;;  %v12808_v7 = vld [vmem:[#allocation52_spill] sm:$0xff] }
 0x3b7   : > { %7327 = vmatprep.subr.msk.mxu1 %vm631_vm0, %v9773_v63 }
 0x3b8   : > { %981 = vadd.xlane.f32.xlu1 %v9888_v14 }
 0x3b9   : > { %1842 = vrot.lane.b32.xlu0 %v9529_v40, %s9229_s23  ;;  %v12828_v40 = vld [vmem:[#allocation40_spill] sm:$0xff] }
 0x3ba   : > { %7328 = vmatpush3.xpose.msk.msra.mxu1 %vm631_vm0, %v9773_v63  ;;  %v12811_v63 = vld [vmem:[#allocation51_spill] sm:$0xff] }
 0x3bb   : > { %7329 = vmatprep.subr.msk.mxu1 %vm631_vm0, %v12806_v57 }
 0x3bd   : > { %1838 = vrot.lane.b32.xlu0 %v12807_v61, %s9229_s23 }
 0x3be   : > { %7330 = vmatpush3.xpose.msk.msra.mxu1 %vm631_vm0, %v12806_v57  ;;  %v12820_v57 = vld [vmem:[#allocation36_spill] sm:$0xff] }
 0x3bf   : > { %7331 = vmatprep.subr.msk.mxu1 %vm631_vm0, %v12808_v7 }
 0x3c1   : > { %1834 = vrot.lane.b32.xlu0 %v12809_v18, %s9229_s23 }
 0x3c2   : > { %7332 = vmatpush3.xpose.msk.msra.mxu1 %vm631_vm0, %v12808_v7 }
 0x3c3   : > { %7333 = vmatprep.subr.msk.mxu1 %vm631_vm0, %v12810_v20 }
 0x3c6   : > { %7334 = vmatpush3.xpose.msk.msra.mxu1 %vm631_vm0, %v12810_v20 }
 0x3c7   : > { %7335 = vmatprep.subr.msk.mxu1 %vm631_vm0, %v12811_v63 }
 0x3c9   : > { %1164 = vrot.lane.b32.xlu1 %v12812_v16, %s9228_s21 }
 0x3ca   : > { %7336 = vmatpush3.xpose.msk.msra.mxu1 %vm631_vm0, %v12811_v63 }
 0x3cb   : > { %7337 = vmatprep.subr.msk.mxu1 %vm631_vm0, %v1213_v19 }
 0x3cd   : > { %1166 = vrot.lane.b32.xlu1 %v12813_v32, %s9228_s21 }
 0x3ce   : > { %7338 = vmatpush3.xpose.msk.msra.mxu1 %vm631_vm0, %v1213_v19  ;;  %v12817_v19 = vld [vmem:[#allocation46_spill] sm:$0xff] }
 0x3cf   : > { %7339 = vmatprep.subr.msk.mxu1 %vm631_vm0, %v1211_v43 }
 0x3d1   : > { %1170 = vrot.lane.b32.xlu1 %v12814_v5, %s9228_s21 }
 0x3d2   : > { %7340 = vmatpush3.xpose.msk.msra.mxu1 %vm631_vm0, %v1211_v43 }
 0x3d3   : > { %7341 = vmatprep.subr.msk.mxu1 %vm631_vm0, %v1209_v12 }
 0x3d5   : > { %1174 = vrot.lane.b32.xlu1 %v12815_v22, %s9228_s21 }
 0x3d6   : > { %7342 = vmatpush3.xpose.msk.msra.mxu1 %vm631_vm0, %v1209_v12  ;;  %v12821_v12 = vld [vmem:[#allocation34_spill] sm:$0xff] }
 0x3d7   : > { %7343 = vmatprep.subr.msk.mxu1 %vm631_vm0, %v1207_v51 }
 0x3d8   : > { %v960_v34 = vpop.xlane.xlu0 %959 }
 0x3d9   : > { %1178 = vrot.lane.b32.xlu1 %v12816_v38, %s9228_s21  ;;  %8594 = vrcp.f32 %v960_v34 }
 0x3da   : > { %7344 = vmatpush3.xpose.msk.msra.mxu1 %vm631_vm0, %v1207_v51 }
 0x3db   : > { %7345 = vmatprep.subr.msk.mxu1 %vm631_vm0, %v1205_v30 }
 0x3dc   : > { %v966_v15 = vpop.xlane.xlu0 %965 }
 0x3dd   : > { %1182 = vrot.lane.b32.xlu1 %v12817_v19, %s9228_s21 }
 0x3de   : > { %7346 = vmatpush3.xpose.msk.msra.mxu1 %vm631_vm0, %v1205_v30 }
 0x3df   : > { %7347 = vmatprep.subr.msk.mxu1 %vm631_vm0, %v1203_v44 }
 0x3e0   : > { %v958_v23 = vpop.xlane.xlu1 %957  ;;  %v974_v27 = vpop.xlane.xlu0 %973 }
 0x3e1   : > { %8596 = vrcp.f32 %v958_v23  ;;  %1186 = vrot.lane.b32.xlu1 %v12818_v33, %s9228_s21 }
 0x3e2   : > { %7348 = vmatpush3.xpose.msk.msra.mxu1 %vm631_vm0, %v1203_v44  ;;  %8598 = vrcp.f32 %v966_v15  ;;  %v12822_v15 = vld [vmem:[#allocation32_spill] sm:$0xff] }
 0x3e4   : > { %v964_v9 = vpop.xlane.xlu1 %963  ;;  %v9943_v10 = vpop.xlane.xlu0 %983 }
 0x3e5   : > { %1190 = vrot.lane.b32.xlu1 %v12819_v59, %s9228_s21  ;;  %8600 = vrcp.f32 %v964_v9 }
 0x3e6   : > { %v8595_v63 = vpop.eup %8594 }
 0x3e7   : > { %v1004_v44 = vmul.f32 %v8595_v63, %v9795_v50 }
 0x3e8   : > { %v962_v49 = vpop.xlane.xlu1 %961  ;;  %v1201_v55 = vpop.permute.xlu0 %1200 }
 0x3e9   : > { %8602 = vrcp.f32 %v962_v49  ;;  %1623 = vrot.lane.b32.xlu1 %v12820_v57, %s9228_s21  ;;  %7349 = vmatprep.subr.msk.mxu1 %vm631_vm0, %v1201_v55 }
 0x3ea   : > { %7350 = vmatpush3.xpose.msk.msra.mxu1 %vm631_vm0, %v1201_v55 }
 0x3ec   : > { %v968_v7 = vpop.xlane.xlu1 %967  ;;  %v9951_v20 = vpop.permute.xlu0 %1168 }
 0x3ed   : > { %8604 = vrcp.f32 %v968_v7  ;;  %1619 = vrot.lane.b32.xlu1 %v12821_v12, %s9228_s21 }
 0x3ee   : > { %v8597_v43 = vpop.eup %8596  ;;  %8606 = vrcp.f32 %v974_v27  ;;  %v12824_v27 = vld [vmem:[#allocation24_spill] sm:$0xff] }
 0x3ef   : > { %v1003_v51 = vmul.f32 %v8597_v43, %v9802_v28  ;;  %v8599_v23 = vpop.eup %8598  ;;  %v12823_v28 = vld [vmem:[#allocation27_spill] sm:$0xff] }
 0x3f0   : > { %v972_v30 = vpop.xlane.xlu1 %971  ;;  %v9956_v34 = vpop.permute.xlu0 %1172 }
 0x3f1   : > { %1615 = vrot.lane.b32.xlu1 %v12822_v15, %s9228_s21  ;;  %7304 = vmatprep.mubr.f32.mxu1 %v1003_v51  ;;  %8608 = vrcp.f32 %v972_v30  ;;  %v1007_v30 = vmul.f32 %v8599_v23, %v9799_v24  ;;  %v12826_v24 = vld [vmem:[#allocation18_spill] sm:$0xff] }
 0x3f2   : > { %7305 = vmatmul.mubr.f32.gmra.mxu1 %v1004_v44  ;;  %v8601_v55 = vpop.eup %8600 }
 0x3f3   : > { %v1006_v51 = vmul.f32 %v8601_v55, %v9809_v41 }
 0x3f4   : > { %v970_v9 = vpop.xlane.xlu1 %969  ;;  %v9961_v49 = vpop.permute.xlu0 %1176 }
 0x3f5   : > { %8610 = vrcp.f32 %v970_v9  ;;  %1613 = vrot.lane.b32.xlu1 %v12823_v28, %s9228_s21 }
 0x3f6   : > { %v8603_v7 = vpop.eup %8602 }
 0x3f7   : > { %v1005_v43 = vmul.f32 %v8603_v7, %v9817_v26  ;;  %v12825_v26 = vld [vmem:[#allocation21_spill] sm:$0xff] }
 0x3f8   : > { %v976_v50 = vpop.xlane.xlu1 %975  ;;  %v9966_v63 = vpop.permute.xlu0 %1180 }
 0x3f9   : > { %8612 = vrcp.f32 %v976_v50  ;;  %1609 = vrot.lane.b32.xlu1 %v12824_v27, %s9228_s21  ;;  %7307 = vmatprep.mubr.f32.mxu1 %v1005_v43 }
 0x3fa   : > { %v8605_v44 = vpop.eup %8604  ;;  %7308 = vmatmul.mubr.f32.gmra.mxu1 %v1006_v51 }
 0x3fb   : > { %7310 = vmatprep.mubr.f32.mxu1 %v1007_v30  ;;  %v1008_v9 = vmul.f32 %v8605_v44, %v9821_v42  ;;  %v8607_v41 = vpop.eup %8606  ;;  %v12827_v44 = vld [vmem:[#allocation15_spill] sm:$0xff] }
 0x3fc   : > { %v980_v18 = vpop.xlane.xlu1 %979  ;;  %v9973_v61 = vpop.permute.xlu0 %1184 }
 0x3fd   : > { %1605 = vrot.lane.b32.xlu1 %v12825_v26, %s9228_s21  ;;  %8614 = vrcp.f32 %v980_v18  ;;  %v1011_v18 = vmul.f32 %v8607_v41, %v9805_v37  ;;  %v12829_v41 = vld [vmem:[#allocation37_spill] sm:$0xff] }
 0x3fe   : > { %7311 = vmatmul.mubr.f32.gmra.mxu1 %v1008_v9  ;;  %v8609_v43 = vpop.eup %8608 }
 0x3ff   : > { %v1010_v30 = vmul.f32 %v8609_v43, %v9824_v46 }
 0x400   : > { %v978_v55 = vpop.xlane.xlu1 %977  ;;  %v9977_v7 = vpop.permute.xlu0 %1188 }
 0x401   : > { %8616 = vrcp.f32 %v978_v55  ;;  %1601 = vrot.lane.b32.xlu1 %v12826_v24, %s9228_s21 }
 0x402   : > { %v8611_v23 = vpop.eup %8610  ;;  %8618 = vrcp.f32 %v9943_v10 }
 0x403   : > { %v1009_v42 = vmul.f32 %v8611_v23, %v9827_v53 }
 0x404   : > { %v1199_v50 = vpop.permute.xlu1 %1198  ;;  %v9982_v51 = vpop.permute.xlu0 %1192 }
 0x405   : > { %1597 = vrot.lane.b32.xlu1 %v12827_v44, %s9228_s21  ;;  %7313 = vmatprep.mubr.f32.mxu1 %v1009_v42 }
 0x406   : > { %v8613_v9 = vpop.eup %8612  ;;  %7351 = vmatprep.subr.msk.mxu1 %vm631_vm0, %v1199_v50  ;;  %7314 = vmatmul.mubr.f32.gmra.mxu1 %v1010_v30  ;;  %v12831_v30 = vld [vmem:[#allocation28_spill] sm:$0xff] }
 0x407   : > { %7352 = vmatpush3.xpose.msk.msra.mxu1 %vm631_vm0, %v1199_v50  ;;  %7316 = vmatprep.mubr.f32.mxu1 %v1011_v18  ;;  %v1012_v53 = vmul.f32 %v8613_v9, %v9830_v48  ;;  %v12830_v50 = vld [vmem:[#allocation33_spill] sm:$0xff] }
 0x408   : > { %v1197_v55 = vpop.permute.xlu1 %1196  ;;  %v1626_v23 = vpop.permute.xlu0 %1625 }
 0x409   : > { %1850 = vrot.lane.b32.xlu1 %v12828_v40, %s9229_s23  ;;  %7353 = vmatprep.subr.msk.mxu1 %vm631_vm0, %v1197_v55 }
 0x40a   : > { %7317 = vmatmul.mubr.f32.gmra.mxu1 %v1012_v53  ;;  %7381 = vmatprep.subr.mxu0 %v1626_v23  ;;  %v8615_v46 = vpop.eup %8614 }
 0x40b   : > { %7354 = vmatpush3.xpose.msk.msra.mxu1 %vm631_vm0, %v1197_v55  ;;  %7382 = vmatpush3.msra.mxu0 %v1626_v23  ;;  %v1014_v42 = vmul.f32 %v8615_v46, %v9835_v36 }
 0x40c   : > { %v1195_v37 = vpop.permute.xlu1 %1194 }
 0x40d   : > { %1844 = vrot.lane.b32.xlu1 %v12829_v41, %s9229_s23  ;;  %7355 = vmatprep.subr.msk.mxu1 %vm631_vm0, %v1195_v37 }
 0x40e   : > { %v8617_v48 = vpop.eup %8616 }
 0x40f   : > { %7356 = vmatpush3.xpose.msk.msra.mxu1 %vm631_vm0, %v1195_v37  ;;  %v1013_v43 = vmul.f32 %v8617_v48, %v9840_v11  ;;  %v8619_v37 = vpop.eup %8618 }
 0x410   : > { %v1163_v18 = vpop.permute.xlu1 %1162  ;;  %v1016_v48 = vmul.f32 %v8619_v37, %v9812_v2 }
 0x411   : > { %1840 = vrot.lane.b32.xlu1 %v12830_v50, %s9229_s23  ;;  %7319 = vmatprep.mubr.f32.mxu1 %v1013_v43 }
 0x412   : > { %7320 = vmatmul.mubr.f32.gmra.mxu1 %v1014_v42 }
 0x415   : > { %1836 = vrot.lane.b32.xlu1 %v12831_v30, %s9229_s23 }
 0x441   : > { %v982_v9 = vpop.xlane.xlu1 %981 }
 0x442   : > { %8620 = vrcp.f32 %v982_v9 }
 0x445   : > { %v1165_v53 = vpop.permute.xlu1 %1164 }
 0x449   : > { %v1167_v55 = vpop.permute.xlu1 %1166 }
 0x44d   : > { %v1171_v23 = vpop.permute.xlu1 %1170 }
 0x44f   : > { %v8621_v11 = vpop.eup %8620 }
 0x450   : > { %v1015_v36 = vmul.f32 %v8621_v11, %v9888_v14  ;;  %v1622_v14 = vpop.permute.xlu0 %1621 }
 0x451   : > { %v1175_v46 = vpop.permute.xlu1 %1174 }
 0x452   : > { %7322 = vmatprep.mubr.f32.mxu1 %v1015_v36 }
 0x453   : > { %7323 = vmatmul.mubr.f32.gmra.mxu1 %v1016_v48 }
 0x454   : > { %7357 = vmatprep.mubr.msk.f32.mxu1 %vm631_vm0, %v1163_v18  ;;  %v1618_v18 = vpop.permute.xlu0 %1617 }
 0x455   : > { %v1179_v43 = vpop.permute.xlu1 %1178 }
 0x457   : > { %7358 = vmatmul.mubr.msk.f32.vlgmr.msra.gmra.mxu1 %vm631_vm0, %v1165_v53 }
 0x458   : > { %7360 = vmatprep.mubr.msk.f32.mxu1 %vm631_vm0, %v1167_v55 }
 0x459   : > { %v1183_v10 = vpop.permute.xlu1 %1182 }
 0x45b   : > { %7361 = vmatmul.mubr.msk.f32.gmra.mxu1 %vm631_vm0, %v9951_v20 }
 0x45c   : > { %7363 = vmatprep.mubr.msk.f32.mxu1 %vm631_vm0, %v1171_v23 }
 0x45d   : > { %v1187_v42 = vpop.permute.xlu1 %1186 }
 0x45f   : > { %7364 = vmatmul.mubr.msk.f32.gmra.mxu1 %vm631_vm0, %v9956_v34  ;;  %v1612_v34 = vpop.permute.xlu0 %1611 }
 0x460   : > { %7366 = vmatprep.mubr.msk.f32.mxu1 %vm631_vm0, %v1175_v46 }
 0x461   : > { %v1191_v2 = vpop.permute.xlu1 %1190 }
 0x463   : > { %7367 = vmatmul.mubr.msk.f32.gmra.mxu1 %vm631_vm0, %v9961_v49 }
 0x464   : > { %7369 = vmatprep.mubr.msk.f32.mxu1 %vm631_vm0, %v1179_v43 }
 0x465   : > { %v1624_v9 = vpop.permute.xlu1 %1623 }
 0x466   : > { %7383 = vmatprep.subr.mxu0 %v1624_v9 }
 0x467   : > { %7370 = vmatmul.mubr.msk.f32.gmra.mxu1 %vm631_vm0, %v9966_v63  ;;  %7384 = vmatpush3.msra.mxu0 %v1624_v9  ;;  %v1608_v63 = vpop.permute.xlu0 %1607 }
 0x468   : > { %7372 = vmatprep.mubr.msk.f32.mxu1 %vm631_vm0, %v1183_v10  ;;  %7385 = vmatprep.subr.mxu0 %v1622_v14 }
 0x469   : > { %v1620_v20 = vpop.permute.xlu1 %1619  ;;  %7386 = vmatpush3.msra.mxu0 %v1622_v14 }
 0x46a   : > { %7387 = vmatprep.subr.mxu0 %v1620_v20 }
 0x46b   : > { %7373 = vmatmul.mubr.msk.f32.gmra.mxu1 %vm631_vm0, %v9973_v61  ;;  %7388 = vmatpush3.msra.mxu0 %v1620_v20  ;;  %v1604_v55 = vpop.permute.xlu0 %1603 }
 0x46c   : > { %7375 = vmatprep.mubr.msk.f32.mxu1 %vm631_vm0, %v1187_v42  ;;  %7389 = vmatprep.subr.mxu0 %v1618_v18 }
 0x46d   : > { %v1616_v49 = vpop.permute.xlu1 %1615  ;;  %7390 = vmatpush3.msra.mxu0 %v1618_v18 }
 0x46e   : > { %7391 = vmatprep.subr.mxu0 %v1616_v49 }
 0x46f   : > { %7376 = vmatmul.mubr.msk.f32.gmra.mxu1 %vm631_vm0, %v9977_v7  ;;  %7392 = vmatpush3.msra.mxu0 %v1616_v49  ;;  %v1600_v7 = vpop.permute.xlu0 %1599 }
 0x470   : > { %7378 = vmatprep.mubr.msk.f32.mxu1 %vm631_vm0, %v1191_v2 }
 0x471   : > { %v1614_v53 = vpop.permute.xlu1 %1613 }
 0x472   : > { %7393 = vmatprep.subr.mxu0 %v1614_v53 }
 0x473   : > { %7379 = vmatmul.mubr.msk.f32.gmra.mxu1 %vm631_vm0, %v9982_v51  ;;  %7394 = vmatpush3.msra.mxu0 %v1614_v53  ;;  %v1596_v11 = vpop.permute.xlu0 %1595 }
 0x474   : > { %7395 = vmatprep.subr.mxu0 %v1612_v34 }
 0x475   : > { %v1610_v61 = vpop.permute.xlu1 %1609  ;;  %7396 = vmatpush3.msra.mxu0 %v1612_v34  ;;  %v10035_v46 = vpop.f32.mrf.mxu1 }
 0x476   : > { %7397 = vmatprep.subr.mxu0 %v1610_v61  ;;  %12832 = vst [vmem:[#allocation50_spill] sm:$0xff] %v10035_v46 }
 0x477   : > { %7398 = vmatpush3.msra.mxu0 %v1610_v61  ;;  %v10037_v48 = vpop.f32.mrf.mxu1 }
 0x478   : > { %7399 = vmatprep.subr.mxu0 %v1608_v63  ;;  %12833 = vst [vmem:[#allocation52_spill] sm:$0xff] %v10037_v48 }
 0x479   : > { %v1606_v23 = vpop.permute.xlu1 %1605  ;;  %7400 = vmatpush3.msra.mxu0 %v1608_v63 }
 0x47a   : > { %7401 = vmatprep.subr.mxu0 %v1606_v23 }
 0x47b   : > { %7402 = vmatpush3.msra.mxu0 %v1606_v23 }
 0x47c   : > { %7403 = vmatprep.subr.mxu0 %v1604_v55 }
 0x47d   : > { %v1602_v37 = vpop.permute.xlu1 %1601  ;;  %7404 = vmatpush3.msra.mxu0 %v1604_v55 }
 0x47e   : > { %7405 = vmatprep.subr.mxu0 %v1602_v37 }
 0x47f   : > { %7406 = vmatpush3.msra.mxu0 %v1602_v37  ;;  %v12848_v37 = vld [vmem:[#allocation22_spill] sm:$0xff] }
 0x480   : > { %7407 = vmatprep.subr.mxu0 %v1600_v7 }
 0x481   : > { %v1598_v51 = vpop.permute.xlu1 %1597  ;;  %7408 = vmatpush3.msra.mxu0 %v1600_v7 }
 0x482   : > { %7409 = vmatprep.subr.mxu0 %v1598_v51 }
 0x483   : > { %7410 = vmatpush3.msra.mxu0 %v1598_v51  ;;  %v12849_v51 = vld [vmem:[#allocation19_spill] sm:$0xff] }
 0x484   : > { %7411 = vmatprep.subr.mxu0 %v1596_v11 }
 0x485   : > { %v10031_v36 = vpop.permute.xlu1 %1850  ;;  %7412 = vmatpush3.msra.mxu0 %v1596_v11  ;;  %v12850_v11 = vld [vmem:[#allocation16_spill] sm:$0xff] }
 0x486   : > { %7437 = vmatprep.subr.msk.mxu0 %vm631_vm0, %v10031_v36 }
 0x4b2   : > { %v10039_v43 = vpop.f32.mrf.mxu1 }
 0x4b3   : > { %12834 = vst [vmem:[#allocation49_spill] sm:$0xff] %v10039_v43 }
 0x4b4   : > { %v10041_v10 = vpop.f32.mrf.mxu1 }
 0x4b5   : > { %12835 = vst [vmem:[#allocation51_spill] sm:$0xff] %v10041_v10 }
 0x4ba   : > { %v10043_v42 = vpop.f32.mrf.mxu1 }
 0x4bb   : > { %12836 = vst [vmem:[#allocation41_spill] sm:$0xff] %v10043_v42 }
 0x4bc   : > { %v10045_v14 = vpop.f32.mrf.mxu1 }
 0x4bd   : > { %12837 = vst [vmem:[#allocation42_spill] sm:$0xff] %v10045_v14 }
 0x4be   : > { %v10047_v2 = vpop.f32.mrf.mxu1 }
 0x4bf   : > { %12838 = vst [vmem:[#allocation43_spill] sm:$0xff] %v10047_v2 }
 0x4c0   : > { %v10049_v18 = vpop.f32.mrf.mxu1 }
 0x4c1   : > { %12839 = vst [vmem:[#allocation44_spill] sm:$0xff] %v10049_v18 }
 0x4c6   : > { %v10051_v9 = vpop.f32.mrf.mxu1 }
 0x4c7   : > { %12840 = vst [vmem:[#allocation45_spill] sm:$0xff] %v10051_v9  ;;  %v10108_v9 = vpop.permute.xlu0 %1848 }
 0x4c8   : > { %v10053_v20 = vpop.f32.mrf.mxu1 }
 0x4c9   : > { %12841 = vst [vmem:[#allocation46_spill] sm:$0xff] %v10053_v20 }
 0x4ca   : > { %v10055_v34 = vpop.f32.mrf.mxu1 }
 0x4cb   : > { %12842 = vst [vmem:[#allocation47_spill] sm:$0xff] %v10055_v34  ;;  %v10110_v20 = vpop.permute.xlu0 %1846 }
 0x4cc   : > { %v10057_v49 = vpop.f32.mrf.mxu1 }
 0x4cd   : > { %12843 = vst [vmem:[#allocation48_spill] sm:$0xff] %v10057_v49 }
 0x4d2   : > { %v10059_v63 = vpop.f32.mrf.mxu1 }
 0x4d3   : > { %12844 = vst [vmem:[#allocation36_spill] sm:$0xff] %v10059_v63 }
 0x4d4   : > { %v10061_v53 = vpop.f32.mrf.mxu1 }
 0x4d5   : > { %12845 = vst [vmem:[#allocation53_spill] sm:$0xff] %v10061_v53 }
 0x513   : > { %v10063_v61 = vpop.f32.mrf.mxu1 }
 0x514   : > { %12846 = vst [vmem:[#allocation54_spill] sm:$0xff] %v10063_v61 }
 0x515   : > { %v10065_v55 = vpop.f32.mrf.mxu1 }
 0x516   : > { %12847 = vst [vmem:[#allocation55_spill] sm:$0xff] %v10065_v55 }
 0x517   : > { %v7359_v23 = vpop.f32.mrf.mxu1 }
 0x518   : > { %1437 = vmax.xlane.f32.xlu0 %v7359_v23 }
 0x519   : > { %v1356_v7 = vpop.f32.mrf.mxu1 }
 0x51a   : > { %1435 = vmax.xlane.f32.xlu1 %v1356_v7 }
 0x51b   : > { %v7362_v2 = vpop.f32.mrf.mxu1 }
 0x51d   : > { %v1366_v18 = vpop.f32.mrf.mxu1 }
 0x51f   : > { %v7365_v42 = vpop.f32.mrf.mxu1 }
 0x521   : > { %v10073_v63 = vpop.f32.mrf.mxu1 }
 0x523   : > { %v10075_v61 = vpop.f32.mrf.mxu1 }
 0x525   : > { %v10077_v55 = vpop.f32.mrf.mxu1 }
 0x527   : > { %v10079_v14 = vpop.f32.mrf.mxu1 }
 0x529   : > { %v10081_v53 = vpop.f32.mrf.mxu1 }
 0x52b   : > { %1832 = vrot.lane.b32.xlu1 %v12848_v37, %s9229_s23  ;;  %v10083_v43 = vpop.f32.mrf.mxu1 }
 0x52d   : > { %v10087_v34 = vpop.f32.mrf.mxu1 }
 0x52e   : > { %1830 = vrot.lane.b32.xlu0 %v12849_v51, %s9229_s23  ;;  %v10114_v51 = vpop.permute.xlu1 %1844 }
 0x52f   : > { %v10091_v10 = vpop.f32.mrf.mxu1 }
 0x531   : > { %v10095_v49 = vpop.f32.mrf.mxu1 }
 0x532   : > { %1828 = vrot.lane.b32.xlu0 %v12850_v11, %s9229_s23  ;;  %v10112_v11 = vpop.permute.xlu0 %1842  ;;  %v10118_v30 = vpop.permute.xlu1 %1840 }
 0x533   : > { %v10099_v48 = vpop.f32.mrf.mxu1 }
 0x535   : > { %v10103_v46 = vpop.f32.mrf.mxu1 }
 0x536   : > { %v10116_v37 = vpop.permute.xlu0 %1838  ;;  %v10122_v41 = vpop.permute.xlu1 %1836 }
 0x53a   : > { %v10120_v50 = vpop.permute.xlu0 %1834 }
 0x54f   : > { %1441 = vmax.xlane.f32.xlu1 %v7362_v2 }
 0x551   : > { %1439 = vmax.xlane.f32.xlu0 %v1366_v18 }
 0x553   : > { %1445 = vmax.xlane.f32.xlu1 %v7365_v42 }
 0x555   : > { %1443 = vmax.xlane.f32.xlu0 %v10073_v63 }
 0x557   : > { %1449 = vmax.xlane.f32.xlu1 %v10075_v61 }
 0x559   : > { %1447 = vmax.xlane.f32.xlu0 %v10077_v55 }
 0x55b   : > { %1453 = vmax.xlane.f32.xlu1 %v10079_v14 }
 0x55d   : > { %1451 = vmax.xlane.f32.xlu0 %v10081_v53 }
 0x55f   : > { %1457 = vmax.xlane.f32.xlu1 %v10083_v43 }
 0x561   : > { %1455 = vmax.xlane.f32.xlu0 %v10087_v34 }
 0x563   : > { %1461 = vmax.xlane.f32.xlu1 %v10091_v10 }
 0x565   : > { %1459 = vmax.xlane.f32.xlu0 %v10095_v49 }
 0x567   : > { %1465 = vmax.xlane.f32.xlu1 %v10099_v48 }
 0x569   : > { %1463 = vmax.xlane.f32.xlu0 %v10103_v46 }
 0x57f   : > { %1826 = vrot.lane.b32.xlu0 %v9464_v0, %s9229_s23 }
 0x5a1   : > { %v1438_v45 = vpop.xlane.xlu0 %1437 }
 0x5a2   : > { %v1468_v40 = vsub.f32 %v7359_v23, %v1438_v45 }
 0x5a3   : > { %v1436_v47 = vpop.xlane.xlu1 %1435 }
 0x5a4   : > { %v1485_v0 = vmul.f32 1.442695, %v1468_v40  ;;  %v1467_v44 = vsub.f32 %v1356_v7, %v1436_v47 }
 0x5a5   : > { %v10130_v26 = vpop.permute.xlu0 %1830 }
 0x5a6   : > { %8622 = vpow2.f32 %v1485_v0  ;;  %v1483_v13 = vmul.f32 1.442695, %v1467_v44  ;;  %12851 = vst [vmem:[#allocation56_spill] sm:$0xff] %v10130_v26 }
 0x5a7   : > { %v10132_v21 = vpop.permute.xlu1 %1832 }
 0x5a8   : > { %8624 = vpow2.f32 %v1483_v13 }
 0x5a9   : > { %v10134_v27 = vpop.permute.xlu0 %1828 }
 0x5aa   : > { %12852 = vst [vmem:[#allocation57_spill] sm:$0xff] %v10134_v27 }
 0x5b3   : > { %v10124_v24 = vpop.eup %8622 }
 0x5b4   : > { %1517 = vadd.xlane.f32.xlu0 %v10124_v24 }
 0x5b5   : > { %v10127_v17 = vpop.eup %8624 }
 0x5b6   : > { %1515 = vadd.xlane.f32.xlu1 %v10127_v17 }
 0x5d8   : > { %v1442_v45 = vpop.xlane.xlu1 %1441 }
 0x5d9   : > { %v1470_v40 = vsub.f32 %v7362_v2, %v1442_v45 }
 0x5da   : > { %v1440_v47 = vpop.xlane.xlu0 %1439 }
 0x5db   : > { %v1489_v0 = vmul.f32 1.442695, %v1470_v40  ;;  %v1469_v44 = vsub.f32 %v1366_v18, %v1440_v47 }
 0x5dc   : > { %v1446_v13 = vpop.xlane.xlu1 %1445 }
 0x5dd   : > { %8626 = vpow2.f32 %v1489_v0  ;;  %v1487_v23 = vmul.f32 1.442695, %v1469_v44  ;;  %v1472_v7 = vsub.f32 %v7365_v42, %v1446_v13 }
 0x5de   : > { %v1444_v25 = vpop.xlane.xlu0 %1443 }
 0x5df   : > { %8628 = vpow2.f32 %v1487_v23  ;;  %v1493_v28 = vmul.f32 1.442695, %v1472_v7  ;;  %v1471_v29 = vsub.f32 %v10073_v63, %v1444_v25 }
 0x5e0   : > { %v1450_v15 = vpop.xlane.xlu1 %1449 }
 0x5e1   : > { %v1491_v26 = vmul.f32 1.442695, %v1471_v29  ;;  %8630 = vpow2.f32 %v1493_v28  ;;  %v1474_v27 = vsub.f32 %v10075_v61, %v1450_v15 }
 0x5e2   : > { %v1448_v31 = vpop.xlane.xlu0 %1447 }
 0x5e3   : > { %v1473_v2 = vsub.f32 %v10077_v55, %v1448_v31  ;;  %8632 = vpow2.f32 %v1491_v26  ;;  %v1497_v18 = vmul.f32 1.442695, %v1474_v27 }
 0x5e4   : > { %v1454_v28 = vpop.xlane.xlu1 %1453 }
 0x5e5   : > { %v1495_v45 = vmul.f32 1.442695, %v1473_v2  ;;  %v1476_v47 = vsub.f32 %v10079_v14, %v1454_v28 }
 0x5e6   : > { %v1452_v27 = vpop.xlane.xlu0 %1451 }
 0x5e7   : > { %8634 = vpow2.f32 %v1495_v45  ;;  %v1501_v23 = vmul.f32 1.442695, %v1476_v47  ;;  %v1475_v7 = vsub.f32 %v10081_v53, %v1452_v27 }
 0x5e8   : > { %8636 = vpow2.f32 %v1497_v18  ;;  %v1458_v26 = vpop.xlane.xlu1 %1457 }
 0x5e9   : > { %v1499_v18 = vmul.f32 1.442695, %v1475_v7 }
 0x5ea   : > { %v10139_v40 = vpop.eup %8626  ;;  %v1456_v63 = vpop.xlane.xlu0 %1455 }
 0x5eb   : > { %1521 = vadd.xlane.f32.xlu0 %v10139_v40  ;;  %v1477_v55 = vsub.f32 %v10087_v34, %v1456_v63 }
 0x5ec   : > { %v10142_v42 = vpop.eup %8628  ;;  %v1462_v61 = vpop.xlane.xlu1 %1461 }
 0x5ed   : > { %1519 = vadd.xlane.f32.xlu1 %v10142_v42  ;;  %v1503_v0 = vmul.f32 1.442695, %v1477_v55  ;;  %v1480_v44 = vsub.f32 %v10091_v10, %v1462_v61 }
 0x5ee   : > { %v10145_v25 = vpop.eup %8630 }
 0x5ef   : > { %8638 = vpow2.f32 %v1503_v0  ;;  %v1509_v2 = vmul.f32 1.442695, %v1480_v44 }
 0x5f0   : > { %v10148_v29 = vpop.eup %8632  ;;  %v1466_v13 = vpop.xlane.xlu1 %1465  ;;  %8640 = vpow2.f32 %v1501_v23 }
 0x5f1   : > { %1525 = vadd.xlane.f32.xlu1 %v10145_v25  ;;  %v1482_v45 = vsub.f32 %v10099_v48, %v1466_v13  ;;  %8642 = vpow2.f32 %v1509_v2  ;;  %v12860_v2 = vld [vmem:[#allocation24_spill] sm:$0xff] }
 0x5f2   : > { %8644 = vpow2.f32 %v1499_v18 }
 0x5f3   : > { %v1513_v34 = vmul.f32 1.442695, %v1482_v45  ;;  %v12861_v45 = vld [vmem:[#allocation23_spill] sm:$0xff] }
 0x5f4   : > { %v10150_v31 = vpop.eup %8634 }
 0x5f5   : > { %1523 = vadd.xlane.f32.xlu1 %v10148_v29  ;;  %1527 = vadd.xlane.f32.xlu0 %v10150_v31  ;;  %v10154_v15 = vpop.eup %8636  ;;  %8646 = vpow2.f32 %v1513_v34 }
 0x5f9   : > { %1529 = vadd.xlane.f32.xlu1 %v10154_v15 }
 0x5fc   : > { %v10169_v27 = vpop.eup %8638 }
 0x5fd   : > { %v10172_v48 = vpop.eup %8640 }
 0x60a   : > { %1822 = vrot.lane.b32.xlu1 %v9456_v6, %s9229_s23  ;;  %v1478_v6 = vsub.f32 %v10083_v43, %v1458_v26  ;;  %v10174_v26 = vpop.eup %8642 }
 0x60b   : > { %1824 = vrot.lane.b32.xlu0 %v9460_v8, %s9229_s23  ;;  %v1460_v8 = vpop.xlane.xlu0 %1459 }
 0x60c   : > { %v1505_v14 = vmul.f32 1.442695, %v1478_v6  ;;  %v1479_v28 = vsub.f32 %v10095_v49, %v1460_v8  ;;  %v10178_v6 = vpop.eup %8644 }
 0x60d   : > { %v10180_v8 = vpop.eup %8646 }
 0x60e   : > { %8648 = vpow2.f32 %v1505_v14  ;;  %v1507_v63 = vmul.f32 1.442695, %v1479_v28  ;;  %v12862_v28 = vld [vmem:[#allocation21_spill] sm:$0xff] }
 0x60f   : > { %v1464_v10 = vpop.xlane.xlu0 %1463 }
 0x610   : > { %v1481_v53 = vsub.f32 %v10103_v46, %v1464_v10  ;;  %8650 = vpow2.f32 %v1507_v63  ;;  %v12863_v63 = vld [vmem:[#allocation20_spill] sm:$0xff] }
 0x612   : > { %v1511_v43 = vmul.f32 1.442695, %v1481_v53 }
 0x613   : > { %v10189_v61 = vpop.permute.xlu0 %1826 }
 0x614   : > { %8652 = vpow2.f32 %v1511_v43 }
 0x61b   : > { %v10184_v46 = vpop.eup %8648 }
 0x61d   : > { %v10187_v49 = vpop.eup %8650 }
 0x621   : > { %v10192_v55 = vpop.eup %8652 }
 0x62a   : > { %1535 = vadd.xlane.f32.xlu0 %v10169_v27 }
 0x62e   : > { %1533 = vadd.xlane.f32.xlu1 %v10172_v48  ;;  %1541 = vadd.xlane.f32.xlu0 %v10174_v26 }
 0x632   : > { %1531 = vadd.xlane.f32.xlu1 %v10178_v6  ;;  %1545 = vadd.xlane.f32.xlu0 %v10180_v8 }
 0x636   : > { %1537 = vadd.xlane.f32.xlu1 %v10184_v46 }
 0x63a   : > { %1539 = vadd.xlane.f32.xlu1 %v10187_v49 }
 0x63d   : > { %v1518_v47 = vpop.xlane.xlu0 %1517 }
 0x63e   : > { %1543 = vadd.xlane.f32.xlu1 %v10192_v55  ;;  %8654 = vrcp.f32 %v1518_v47 }
 0x63f   : > { %v1516_v0 = vpop.xlane.xlu1 %1515 }
 0x640   : > { %8656 = vrcp.f32 %v1516_v0  ;;  %v12865_v0 = vld [vmem:[#allocation17_spill] sm:$0xff] }
 0x648   : > { %1820 = vrot.lane.b32.xlu0 %v9450_v4, %s9229_s23 }
 0x64b   : > { %v8655_v44 = vpop.eup %8654 }
 0x64c   : > { %1790 = vrot.lane.b32.xlu0 %v12812_v16, %s9229_s23  ;;  %v1564_v7 = vmul.f32 %v8655_v44, %v10124_v24 }
 0x64d   : > { %v8657_v13 = vpop.eup %8656 }
 0x64e   : > { %v1563_v23 = vmul.f32 %v8657_v13, %v10127_v17  ;;  %v12853_v17 = vld [vmem:[#allocation30_spill] sm:$0xff] }
 0x64f   : > { %1788 = vrot.lane.b32.xlu1 %v9448_v3, %s9229_s23 }
 0x650   : > { %7413 = vmatprep.mubr.f32.mxu0 %v1563_v23  ;;  %1794 = vrot.lane.b32.xlu0 %v9665_v52, %s9229_s23  ;;  %v12867_v23 = vld [vmem:[#allocation39_spill] sm:$0xff] }
 0x651   : > { %7414 = vmatmul.mubr.f32.vlgmr.msra.gmra.mxu0 %v1564_v7 }
 0x652   : > { %7438 = vmatpush3.xpose.msk.msra.mxu0 %vm631_vm0, %v10031_v36  ;;  %v12856_v36 = vld [vmem:[#allocation29_spill] sm:$0xff] }
 0x653   : > { %7439 = vmatprep.subr.msk.mxu0 %vm631_vm0, %v10108_v9  ;;  %1792 = vrot.lane.b32.xlu1 %v12813_v32, %s9229_s23 }
 0x654   : > { %1798 = vrot.lane.b32.xlu0 %v9675_v54, %s9229_s23 }
 0x656   : > { %7440 = vmatpush3.xpose.msk.msra.mxu0 %vm631_vm0, %v10108_v9 }
 0x657   : > { %7441 = vmatprep.subr.msk.mxu0 %vm631_vm0, %v10110_v20  ;;  %1796 = vrot.lane.b32.xlu1 %v12814_v5, %s9229_s23 }
 0x658   : > { %1802 = vrot.lane.b32.xlu0 %v9685_v56, %s9229_s23 }
 0x65a   : > { %7442 = vmatpush3.xpose.msk.msra.mxu0 %vm631_vm0, %v10110_v20  ;;  %v12857_v20 = vld [vmem:[#allocation57_spill] sm:$0xff] }
 0x65b   : > { %7443 = vmatprep.subr.msk.mxu0 %vm631_vm0, %v10114_v51  ;;  %1800 = vrot.lane.b32.xlu1 %v12815_v22, %s9229_s23 }
 0x65c   : > { %1806 = vrot.lane.b32.xlu0 %v9695_v58, %s9229_s23 }
 0x65e   : > { %7444 = vmatpush3.xpose.msk.msra.mxu0 %vm631_vm0, %v10114_v51 }
 0x65f   : > { %7445 = vmatprep.subr.msk.mxu0 %vm631_vm0, %v10112_v11  ;;  %1804 = vrot.lane.b32.xlu1 %v12816_v38, %s9229_s23 }
 0x660   : > { %1810 = vrot.lane.b32.xlu0 %v9705_v60, %s9229_s23 }
 0x662   : > { %7446 = vmatpush3.xpose.msk.msra.mxu0 %vm631_vm0, %v10112_v11 }
 0x663   : > { %7447 = vmatprep.subr.msk.mxu0 %vm631_vm0, %v10118_v30  ;;  %1808 = vrot.lane.b32.xlu1 %v12817_v19, %s9229_s23 }
 0x664   : > { %1814 = vrot.lane.b32.xlu0 %v9715_v62, %s9229_s23 }
 0x666   : > { %7448 = vmatpush3.xpose.msk.msra.mxu0 %vm631_vm0, %v10118_v30  ;;  %v12854_v30 = vld [vmem:[#allocation56_spill] sm:$0xff] }
 0x667   : > { %7449 = vmatprep.subr.msk.mxu0 %vm631_vm0, %v10116_v37  ;;  %1812 = vrot.lane.b32.xlu1 %v12818_v33, %s9229_s23 }
 0x668   : > { %1818 = vrot.lane.b32.xlu0 %v9725_v1, %s9229_s23 }
 0x66a   : > { %7450 = vmatpush3.xpose.msk.msra.mxu0 %vm631_vm0, %v10116_v37  ;;  %v12859_v37 = vld [vmem:[#allocation26_spill] sm:$0xff] }
 0x66b   : > { %7451 = vmatprep.subr.msk.mxu0 %vm631_vm0, %v10122_v41  ;;  %1816 = vrot.lane.b32.xlu1 %v12819_v59, %s9229_s23 }
 0x66c   : > { %2235 = vrot.lane.b32.xlu0 %v9526_v39, %s9229_s23 }
 0x66e   : > { %7452 = vmatpush3.xpose.msk.msra.mxu0 %vm631_vm0, %v10122_v41 }
 0x66f   : > { %7453 = vmatprep.subr.msk.mxu0 %vm631_vm0, %v10120_v50  ;;  %2233 = vrot.lane.b32.xlu1 %v12820_v57, %s9229_s23 }
 0x670   : > { %2231 = vrot.lane.b32.xlu0 %v9516_v35, %s9229_s23 }
 0x672   : > { %7454 = vmatpush3.xpose.msk.msra.mxu0 %vm631_vm0, %v10120_v50  ;;  %v12855_v50 = vld [vmem:[#allocation32_spill] sm:$0xff] }
 0x673   : > { %7455 = vmatprep.subr.msk.mxu0 %vm631_vm0, %v10132_v21  ;;  %2229 = vrot.lane.b32.xlu1 %v12821_v12, %s9229_s23 }
 0x674   : > { %2227 = vrot.lane.b32.xlu0 %v12853_v17, %s9229_s23  ;;  %v1522_v24 = vpop.xlane.xlu0 %1521 }
 0x675   : > { %8658 = vrcp.f32 %v1522_v24 }
 0x676   : > { %7456 = vmatpush3.xpose.msk.msra.mxu0 %vm631_vm0, %v10132_v21  ;;  %v1520_v41 = vpop.xlane.xlu1 %1519  ;;  %v12858_v21 = vld [vmem:[#allocation27_spill] sm:$0xff] }
 0x677   : > { %8660 = vrcp.f32 %v1520_v41  ;;  %7457 = vmatprep.subr.msk.mxu0 %vm631_vm0, %v12854_v30  ;;  %2225 = vrot.lane.b32.xlu1 %v12855_v50, %s9229_s23  ;;  %v12868_v41 = vld [vmem:[#allocation40_spill] sm:$0xff] }
 0x678   : > { %2221 = vrot.lane.b32.xlu0 %v12856_v36, %s9229_s23 }
 0x67a   : > { %7458 = vmatpush3.xpose.msk.msra.mxu0 %vm631_vm0, %v12854_v30  ;;  %v1526_v9 = vpop.xlane.xlu1 %1525 }
 0x67b   : > { %7459 = vmatprep.subr.msk.mxu0 %vm631_vm0, %v12857_v20  ;;  %2223 = vrot.lane.b32.xlu1 %v12858_v21, %s9229_s23  ;;  %8662 = vrcp.f32 %v1526_v9 }
 0x67c   : > { %2217 = vrot.lane.b32.xlu0 %v12859_v37, %s9229_s23 }
 0x67e   : > { %7460 = vmatpush3.xpose.msk.msra.mxu0 %vm631_vm0, %v12857_v20  ;;  %v1524_v51 = vpop.xlane.xlu1 %1523  ;;  %v1528_v11 = vpop.xlane.xlu0 %1527  ;;  %v12869_v20 = vld [vmem:[#allocation38_spill] sm:$0xff] }
 0x67f   : > { %8664 = vrcp.f32 %v1524_v51  ;;  %7461 = vmatprep.subr.msk.mxu0 %vm631_vm0, %v10189_v61  ;;  %2219 = vrot.lane.b32.xlu1 %v12860_v2, %s9229_s23 }
 0x680   : > { %8666 = vrcp.f32 %v1528_v11  ;;  %2213 = vrot.lane.b32.xlu0 %v12861_v45, %s9229_s23  ;;  %v12870_v11 = vld [vmem:[#allocation37_spill] sm:$0xff] }
 0x682   : > { %7462 = vmatpush3.xpose.msk.msra.mxu0 %vm631_vm0, %v10189_v61  ;;  %v1530_v18 = vpop.xlane.xlu1 %1529  ;;  %v1825_v34 = vpop.permute.xlu0 %1824  ;;  %v12864_v61 = vld [vmem:[#allocation18_spill] sm:$0xff] }
 0x683   : > { %v8659_v14 = vpop.eup %8658  ;;  %8668 = vrcp.f32 %v1530_v18  ;;  %2215 = vrot.lane.b32.xlu1 %v12862_v28, %s9229_s23  ;;  %7463 = vmatprep.subr.msk.mxu0 %vm631_vm0, %v1825_v34  ;;  %v12874_v18 = vld [vmem:[#allocation28_spill] sm:$0xff] }
 0x684   : > { %v8661_v10 = vpop.eup %8660  ;;  %2209 = vrot.lane.b32.xlu0 %v12863_v63, %s9229_s23  ;;  %v1566_v47 = vmul.f32 %v8659_v14, %v10139_v40 }
 0x685   : > { %v1565_v53 = vmul.f32 %v8661_v10, %v10142_v42  ;;  %v12866_v42 = vld [vmem:[#allocation15_spill] sm:$0xff] }
 0x686   : > { %7464 = vmatpush3.xpose.msk.msra.mxu0 %vm631_vm0, %v1825_v34  ;;  %v1823_v43 = vpop.permute.xlu1 %1822  ;;  %v12875_v34 = vld [vmem:[#allocation25_spill] sm:$0xff] }
 0x687   : > { %2211 = vrot.lane.b32.xlu1 %v12864_v61, %s9229_s23  ;;  %7416 = vmatprep.mubr.f32.mxu0 %v1565_v53 }
 0x688   : > { %7465 = vmatprep.subr.msk.mxu0 %vm631_vm0, %v1823_v43  ;;  %2205 = vrot.lane.b32.xlu0 %v12865_v0, %s9229_s23  ;;  %v8663_v44 = vpop.eup %8662 }
 0x689   : > { %7417 = vmatmul.mubr.f32.gmra.mxu0 %v1566_v47  ;;  %v1568_v24 = vmul.f32 %v8663_v44, %v10145_v25  ;;  %v12872_v25 = vld [vmem:[#allocation33_spill] sm:$0xff] }
 0x68a   : > { %7466 = vmatpush3.xpose.msk.msra.mxu0 %vm631_vm0, %v1823_v43 }
 0x68b   : > { %2207 = vrot.lane.b32.xlu1 %v12866_v42, %s9229_s23 }
 0x68c   : > { %v8665_v13 = vpop.eup %8664  ;;  %2458 = vrot.lane.b32.xlu0 %v12867_v23, %s9230_s9 }
 0x68d   : > { %v8667_v7 = vpop.eup %8666  ;;  %v1567_v40 = vmul.f32 %v8665_v13, %v10148_v29  ;;  %v12871_v29 = vld [vmem:[#allocation35_spill] sm:$0xff] }
 0x68e   : > { %v1569_v30 = vmul.f32 %v8667_v7, %v10150_v31  ;;  %v12873_v31 = vld [vmem:[#allocation31_spill] sm:$0xff] }
 0x68f   : > { %2460 = vrot.lane.b32.xlu1 %v12868_v41, %s9230_s9  ;;  %7419 = vmatprep.mubr.f32.mxu0 %v1567_v40 }
 0x690   : > { %v8669_v9 = vpop.eup %8668  ;;  %2456 = vrot.lane.b32.xlu0 %v12869_v20, %s9230_s9  ;;  %7420 = vmatmul.mubr.f32.gmra.mxu0 %v1568_v24 }
 0x691   : > { %7422 = vmatprep.mubr.f32.mxu0 %v1569_v30  ;;  %v1570_v51 = vmul.f32 %v8669_v9, %v10154_v15 }
 0x693   : > { %2454 = vrot.lane.b32.xlu1 %v12870_v11, %s9230_s9 }
 0x694   : > { %2452 = vrot.lane.b32.xlu0 %v12871_v29, %s9230_s9  ;;  %7423 = vmatmul.mubr.f32.gmra.mxu0 %v1570_v51 }
 0x697   : > { %2450 = vrot.lane.b32.xlu1 %v12872_v25, %s9230_s9 }
 0x698   : > { %2448 = vrot.lane.b32.xlu0 %v12873_v31, %s9230_s9 }
 0x69b   : > { %2446 = vrot.lane.b32.xlu1 %v12874_v18, %s9230_s9 }
 0x69c   : > { %2444 = vrot.lane.b32.xlu0 %v12875_v34, %s9230_s9 }
 0x6b3   : > { %v1536_v15 = vpop.xlane.xlu0 %1535 }
 0x6b4   : > { %8670 = vrcp.f32 %v1536_v15 }
 0x6b7   : > { %v1534_v14 = vpop.xlane.xlu1 %1533  ;;  %v1542_v10 = vpop.xlane.xlu0 %1541 }
 0x6b8   : > { %8672 = vrcp.f32 %v1534_v14 }
 0x6bb   : > { %v1532_v53 = vpop.xlane.xlu1 %1531  ;;  %v1546_v43 = vpop.xlane.xlu0 %1545 }
 0x6bc   : > { %8674 = vrcp.f32 %v1532_v53 }
 0x6bf   : > { %v1538_v47 = vpop.xlane.xlu1 %1537  ;;  %v1821_v44 = vpop.permute.xlu0 %1820 }
 0x6c0   : > { %8676 = vrcp.f32 %v1538_v47  ;;  %7467 = vmatprep.subr.msk.mxu0 %vm631_vm0, %v1821_v44 }
 0x6c1   : > { %7468 = vmatpush3.xpose.msk.msra.mxu0 %vm631_vm0, %v1821_v44  ;;  %8678 = vrcp.f32 %v1542_v10  ;;  %v8671_v40 = vpop.eup %8670 }
 0x6c2   : > { %v1573_v44 = vmul.f32 %v8671_v40, %v10169_v27 }
 0x6c3   : > { %v1540_v13 = vpop.xlane.xlu1 %1539  ;;  %v1791_v7 = vpop.permute.xlu0 %1790 }
 0x6c4   : > { %8680 = vrcp.f32 %v1540_v13 }
 0x6c5   : > { %8682 = vrcp.f32 %v1546_v43  ;;  %v8673_v9 = vpop.eup %8672 }
 0x6c6   : > { %v1572_v47 = vmul.f32 %v8673_v9, %v10172_v48 }
 0x6c7   : > { %v1544_v24 = vpop.xlane.xlu1 %1543  ;;  %v1795_v30 = vpop.permute.xlu0 %1794 }
 0x6c8   : > { %8684 = vrcp.f32 %v1544_v24 }
 0x6c9   : > { %v8675_v51 = vpop.eup %8674 }
 0x6ca   : > { %v1571_v15 = vmul.f32 %v8675_v51, %v10178_v6 }
 0x6cb   : > { %v1789_v14 = vpop.permute.xlu1 %1788  ;;  %v1799_v53 = vpop.permute.xlu0 %1798 }
 0x6cc   : > { %7425 = vmatprep.mubr.f32.mxu0 %v1571_v15 }
 0x6cd   : > { %v8677_v10 = vpop.eup %8676  ;;  %7426 = vmatmul.mubr.f32.gmra.mxu0 %v1572_v47 }
 0x6ce   : > { %7428 = vmatprep.mubr.f32.mxu0 %v1573_v44  ;;  %v1574_v13 = vmul.f32 %v8677_v10, %v10184_v46  ;;  %v8679_v18 = vpop.eup %8678 }
 0x6cf   : > { %v1793_v43 = vpop.permute.xlu1 %1792  ;;  %v1803_v34 = vpop.permute.xlu0 %1802  ;;  %v1576_v25 = vmul.f32 %v8679_v18, %v10174_v26 }
 0x6d1   : > { %v8681_v31 = vpop.eup %8680  ;;  %7429 = vmatmul.mubr.f32.gmra.mxu0 %v1574_v13 }
 0x6d2   : > { %v1575_v24 = vmul.f32 %v8681_v31, %v10187_v49  ;;  %v8683_v48 = vpop.eup %8682 }
 0x6d3   : > { %v1797_v6 = vpop.permute.xlu1 %1796  ;;  %v1807_v51 = vpop.permute.xlu0 %1806  ;;  %v1578_v46 = vmul.f32 %v8683_v48, %v10180_v8 }
 0x6d4   : > { %7431 = vmatprep.mubr.f32.mxu0 %v1575_v24 }
 0x6d5   : > { %v8685_v9 = vpop.eup %8684  ;;  %7432 = vmatmul.mubr.f32.gmra.mxu0 %v1576_v25 }
 0x6d6   : > { %v1577_v27 = vmul.f32 %v8685_v9, %v10192_v55 }
 0x6d7   : > { %v1801_v40 = vpop.permute.xlu1 %1800  ;;  %v1811_v15 = vpop.permute.xlu0 %1810 }
 0x6d8   : > { %7434 = vmatprep.mubr.f32.mxu0 %v1577_v27 }
 0x6d9   : > { %7435 = vmatmul.mubr.f32.gmra.mxu0 %v1578_v46 }
 0x6da   : > { %7469 = vmatprep.mubr.msk.f32.mxu0 %vm631_vm0, %v1789_v14 }
 0x6db   : > { %v1805_v47 = vpop.permute.xlu1 %1804  ;;  %v1815_v49 = vpop.permute.xlu0 %1814 }
 0x6dd   : > { %7470 = vmatmul.mubr.msk.f32.vlgmr.msra.gmra.mxu0 %vm631_vm0, %v1791_v7 }
 0x6de   : > { %7472 = vmatprep.mubr.msk.f32.mxu0 %vm631_vm0, %v1793_v43 }
 0x6df   : > { %v1809_v26 = vpop.permute.xlu1 %1808  ;;  %v1819_v31 = vpop.permute.xlu0 %1818 }
 0x6e1   : > { %7473 = vmatmul.mubr.msk.f32.gmra.mxu0 %vm631_vm0, %v1795_v30 }
 0x6e2   : > { %7475 = vmatprep.mubr.msk.f32.mxu0 %vm631_vm0, %v1797_v6 }
 0x6e3   : > { %v1813_v55 = vpop.permute.xlu1 %1812  ;;  %v2236_v25 = vpop.permute.xlu0 %2235 }
 0x6e4   : > { %7493 = vmatprep.subr.mxu1 %v2236_v25 }
 0x6e5   : > { %7476 = vmatmul.mubr.msk.f32.gmra.mxu0 %vm631_vm0, %v1799_v53  ;;  %7494 = vmatpush3.msra.mxu1 %v2236_v25 }
 0x6e6   : > { %7478 = vmatprep.mubr.msk.f32.mxu0 %vm631_vm0, %v1801_v40 }
 0x6e7   : > { %v1817_v8 = vpop.permute.xlu1 %1816  ;;  %v2232_v18 = vpop.permute.xlu0 %2231 }
 0x6e9   : > { %7479 = vmatmul.mubr.msk.f32.gmra.mxu0 %vm631_vm0, %v1803_v34 }
 0x6ea   : > { %7481 = vmatprep.mubr.msk.f32.mxu0 %vm631_vm0, %v1805_v47 }
 0x6eb   : > { %v2234_v7 = vpop.permute.xlu1 %2233  ;;  %v2228_v14 = vpop.permute.xlu0 %2227 }
 0x6ec   : > { %7495 = vmatprep.subr.mxu1 %v2234_v7 }
 0x6ed   : > { %7482 = vmatmul.mubr.msk.f32.gmra.mxu0 %vm631_vm0, %v1807_v51  ;;  %7496 = vmatpush3.msra.mxu1 %v2234_v7 }
 0x6ee   : > { %7484 = vmatprep.mubr.msk.f32.mxu0 %vm631_vm0, %v1809_v26  ;;  %7497 = vmatprep.subr.mxu1 %v2232_v18 }
 0x6ef   : > { %v2230_v30 = vpop.permute.xlu1 %2229  ;;  %7498 = vmatpush3.msra.mxu1 %v2232_v18  ;;  %v2222_v53 = vpop.permute.xlu0 %2221 }
 0x6f0   : > { %7499 = vmatprep.subr.mxu1 %v2230_v30 }
 0x6f1   : > { %7485 = vmatmul.mubr.msk.f32.gmra.mxu0 %vm631_vm0, %v1811_v15  ;;  %7500 = vmatpush3.msra.mxu1 %v2230_v30 }
 0x6f2   : > { %7487 = vmatprep.mubr.msk.f32.mxu0 %vm631_vm0, %v1813_v55  ;;  %7501 = vmatprep.subr.mxu1 %v2228_v14 }
 0x6f3   : > { %v2226_v34 = vpop.permute.xlu1 %2225  ;;  %7502 = vmatpush3.msra.mxu1 %v2228_v14  ;;  %v2218_v44 = vpop.permute.xlu0 %2217 }
 0x6f4   : > { %7503 = vmatprep.subr.mxu1 %v2226_v34 }
 0x6f5   : > { %7488 = vmatmul.mubr.msk.f32.gmra.mxu0 %vm631_vm0, %v1815_v49  ;;  %7504 = vmatpush3.msra.mxu1 %v2226_v34 }
 0x6f6   : > { %7490 = vmatprep.mubr.msk.f32.mxu0 %vm631_vm0, %v1817_v8 }
 0x6f7   : > { %v2224_v10 = vpop.permute.xlu1 %2223  ;;  %v2214_v43 = vpop.permute.xlu0 %2213 }
 0x6f8   : > { %7505 = vmatprep.subr.mxu1 %v2224_v10 }
 0x6f9   : > { %7491 = vmatmul.mubr.msk.f32.gmra.mxu0 %vm631_vm0, %v1819_v31  ;;  %7506 = vmatpush3.msra.mxu1 %v2224_v10 }
 0x6fa   : > { %7507 = vmatprep.subr.mxu1 %v2222_v53 }
 0x6fb   : > { %v2220_v13 = vpop.permute.xlu1 %2219  ;;  %7508 = vmatpush3.msra.mxu1 %v2222_v53  ;;  %v2210_v6 = vpop.permute.xlu0 %2209 }
 0x6fc   : > { %7509 = vmatprep.subr.mxu1 %v2220_v13 }
 0x6fd   : > { %7510 = vmatpush3.msra.mxu1 %v2220_v13  ;;  %v12892_v13 = vld [vmem:[#allocation22_spill] sm:$0xff] }
 0x6fe   : > { %7511 = vmatprep.subr.mxu1 %v2218_v44 }
 0x6ff   : > { %v2216_v24 = vpop.permute.xlu1 %2215  ;;  %7512 = vmatpush3.msra.mxu1 %v2218_v44  ;;  %v2206_v9 = vpop.permute.xlu0 %2205 }
 0x700   : > { %7513 = vmatprep.subr.mxu1 %v2216_v24 }
 0x701   : > { %7514 = vmatpush3.msra.mxu1 %v2216_v24  ;;  %v12894_v24 = vld [vmem:[#allocation16_spill] sm:$0xff] }
 0x702   : > { %7515 = vmatprep.subr.mxu1 %v2214_v43 }
 0x703   : > { %v2212_v51 = vpop.permute.xlu1 %2211  ;;  %7516 = vmatpush3.msra.mxu1 %v2214_v43  ;;  %v12893_v43 = vld [vmem:[#allocation19_spill] sm:$0xff] }
 0x704   : > { %7517 = vmatprep.subr.mxu1 %v2212_v51 }
 0x705   : > { %7518 = vmatpush3.msra.mxu1 %v2212_v51 }
 0x706   : > { %7519 = vmatprep.subr.mxu1 %v2210_v6 }
 0x707   : > { %v2208_v48 = vpop.permute.xlu1 %2207  ;;  %7520 = vmatpush3.msra.mxu1 %v2210_v6 }
 0x708   : > { %7521 = vmatprep.subr.mxu1 %v2208_v48 }
 0x709   : > { %7522 = vmatpush3.msra.mxu1 %v2208_v48 }
 0x70a   : > { %7523 = vmatprep.subr.mxu1 %v2206_v9 }
 0x70b   : > { %v10367_v27 = vpop.permute.xlu1 %2460  ;;  %7524 = vmatpush3.msra.mxu1 %v2206_v9 }
 0x70c   : > { %7549 = vmatprep.subr.msk.mxu1 %vm631_vm0, %v10367_v27 }
 0x711   : > { %v10371_v40 = vpop.f32.mrf.mxu0 }
 0x712   : > { %12876 = vst [vmem:[#allocation30_spill] sm:$0xff] %v10371_v40 }
 0x713   : > { %v10373_v15 = vpop.f32.mrf.mxu0 }
 0x714   : > { %12877 = vst [vmem:[#allocation56_spill] sm:$0xff] %v10373_v15 }
 0x749   : > { %v10375_v46 = vpop.f32.mrf.mxu0 }
 0x74a   : > { %12878 = vst [vmem:[#allocation57_spill] sm:$0xff] %v10375_v46 }
 0x74b   : > { %v10377_v47 = vpop.f32.mrf.mxu0 }
 0x74c   : > { %12879 = vst [vmem:[#allocation58_spill] sm:$0xff] %v10377_v47  ;;  %v10444_v47 = vpop.permute.xlu0 %2458 }
 0x750   : > { %v10379_v49 = vpop.f32.mrf.mxu0 }
 0x751   : > { %12880 = vst [vmem:[#allocation59_spill] sm:$0xff] %v10379_v49 }
 0x752   : > { %v10381_v26 = vpop.f32.mrf.mxu0 }
 0x753   : > { %12881 = vst [vmem:[#allocation60_spill] sm:$0xff] %v10381_v26 }
 0x754   : > { %v10383_v31 = vpop.f32.mrf.mxu0 }
 0x755   : > { %12882 = vst [vmem:[#allocation61_spill] sm:$0xff] %v10383_v31 }
 0x756   : > { %v10385_v55 = vpop.f32.mrf.mxu0 }
 0x757   : > { %12883 = vst [vmem:[#allocation62_spill] sm:$0xff] %v10385_v55 }
 0x78d   : > { %v10387_v25 = vpop.f32.mrf.mxu0 }
 0x78e   : > { %12884 = vst [vmem:[#allocation63_spill] sm:$0xff] %v10387_v25  ;;  %v10450_v25 = vpop.permute.xlu1 %2454 }
 0x78f   : > { %v10389_v8 = vpop.f32.mrf.mxu0 }
 0x790   : > { %12885 = vst [vmem:[#allocation64_spill] sm:$0xff] %v10389_v8  ;;  %v10446_v8 = vpop.permute.xlu0 %2456 }
 0x791   : > { %v10391_v18 = vpop.f32.mrf.mxu0 }
 0x792   : > { %12886 = vst [vmem:[#allocation65_spill] sm:$0xff] %v10391_v18 }
 0x793   : > { %v10393_v7 = vpop.f32.mrf.mxu0 }
 0x794   : > { %12887 = vst [vmem:[#allocation66_spill] sm:$0xff] %v10393_v7  ;;  %v12895_v7 = vld [vmem:[#allocation14_spill] sm:$0xff]  ;;  %v10448_v15 = vpop.permute.xlu0 %2452 }
 0x795   : > { %v10395_v14 = vpop.f32.mrf.mxu0 }
 0x796   : > { %12888 = vst [vmem:[#allocation67_spill] sm:$0xff] %v10395_v14 }
 0x797   : > { %v10397_v30 = vpop.f32.mrf.mxu0 }
 0x798   : > { %12889 = vst [vmem:[#allocation68_spill] sm:$0xff] %v10397_v30  ;;  %v10452_v40 = vpop.permute.xlu0 %2448 }
 0x799   : > { %v10399_v53 = vpop.f32.mrf.mxu0 }
 0x79a   : > { %12890 = vst [vmem:[#allocation69_spill] sm:$0xff] %v10399_v53 }
 0x79b   : > { %v10401_v34 = vpop.f32.mrf.mxu0 }
 0x79c   : > { %12891 = vst [vmem:[#allocation70_spill] sm:$0xff] %v10401_v34 }
 0x79d   : > { %v7471_v44 = vpop.f32.mrf.mxu0 }
 0x79e   : > { %2063 = vmax.xlane.f32.xlu0 %v7471_v44 }
 0x79f   : > { %v1982_v10 = vpop.f32.mrf.mxu0 }
 0x7a0   : > { %2061 = vmax.xlane.f32.xlu1 %v1982_v10 }
 0x7a1   : > { %v7474_v6 = vpop.f32.mrf.mxu0 }
 0x7a3   : > { %v1992_v51 = vpop.f32.mrf.mxu0 }
 0x7a5   : > { %v7477_v48 = vpop.f32.mrf.mxu0 }
 0x7a7   : > { %v10409_v9 = vpop.f32.mrf.mxu0 }
 0x7a9   : > { %v10411_v53 = vpop.f32.mrf.mxu0 }
 0x7ab   : > { %v10413_v31 = vpop.f32.mrf.mxu0 }
 0x7ad   : > { %v10415_v34 = vpop.f32.mrf.mxu0 }
 0x7af   : > { %v10417_v55 = vpop.f32.mrf.mxu0 }
 0x7b1   : > { %2442 = vrot.lane.b32.xlu1 %v12892_v13, %s9230_s9  ;;  %v10419_v14 = vpop.f32.mrf.mxu0 }
 0x7b3   : > { %v10423_v49 = vpop.f32.mrf.mxu0 }
 0x7b4   : > { %2440 = vrot.lane.b32.xlu0 %v12893_v43, %s9230_s9  ;;  %v10456_v43 = vpop.permute.xlu0 %2444 }
 0x7b5   : > { %v10427_v30 = vpop.f32.mrf.mxu0 }
 0x7b7   : > { %v10431_v26 = vpop.f32.mrf.mxu0 }
 0x7b8   : > { %2438 = vrot.lane.b32.xlu0 %v12894_v24, %s9230_s9  ;;  %v10454_v24 = vpop.permute.xlu1 %2450 }
 0x7b9   : > { %v10435_v18 = vpop.f32.mrf.mxu0 }
 0x7bb   : > { %v10439_v46 = vpop.f32.mrf.mxu0 }
 0x7bc   : > { %v10458_v13 = vpop.permute.xlu1 %2446 }
 0x7d5   : > { %2067 = vmax.xlane.f32.xlu1 %v7474_v6 }
 0x7d7   : > { %2065 = vmax.xlane.f32.xlu0 %v1992_v51 }
 0x7d9   : > { %2071 = vmax.xlane.f32.xlu1 %v7477_v48 }
 0x7db   : > { %2069 = vmax.xlane.f32.xlu0 %v10409_v9 }
 0x7dd   : > { %2075 = vmax.xlane.f32.xlu1 %v10411_v53 }
 0x7df   : > { %2073 = vmax.xlane.f32.xlu0 %v10413_v31 }
 0x7e1   : > { %2079 = vmax.xlane.f32.xlu1 %v10415_v34 }
 0x7e3   : > { %2077 = vmax.xlane.f32.xlu0 %v10417_v55 }
 0x7e5   : > { %2083 = vmax.xlane.f32.xlu1 %v10419_v14 }
 0x7e7   : > { %2081 = vmax.xlane.f32.xlu0 %v10423_v49 }
 0x7e9   : > { %2087 = vmax.xlane.f32.xlu1 %v10427_v30 }
 0x7eb   : > { %2085 = vmax.xlane.f32.xlu0 %v10431_v26 }
 0x7ed   : > { %2091 = vmax.xlane.f32.xlu1 %v10435_v18 }
 0x7ef   : > { %2089 = vmax.xlane.f32.xlu0 %v10439_v46 }
 0x805   : > { %2436 = vrot.lane.b32.xlu0 %v12895_v7, %s9230_s9 }
 0x827   : > { %v2064_v29 = vpop.xlane.xlu0 %2063 }
 0x828   : > { %v2094_v11 = vsub.f32 %v7471_v44, %v2064_v29 }
 0x829   : > { %v2062_v20 = vpop.xlane.xlu1 %2061 }
 0x82a   : > { %v2111_v7 = vmul.f32 1.442695, %v2094_v11  ;;  %v2093_v41 = vsub.f32 %v1982_v10, %v2062_v20 }
 0x82b   : > { %v10466_v61 = vpop.permute.xlu0 %2440 }
 0x82c   : > { %8686 = vpow2.f32 %v2111_v7  ;;  %v2109_v23 = vmul.f32 1.442695, %v2093_v41 }
 0x82d   : > { %v10468_v63 = vpop.permute.xlu1 %2442 }
 0x82e   : > { %8688 = vpow2.f32 %v2109_v23 }
 0x82f   : > { %v10470_v28 = vpop.permute.xlu0 %2438 }
 0x830   : > { %12896 = vst [vmem:[#allocation71_spill] sm:$0xff] %v10470_v28 }
 0x839   : > { %v10460_v42 = vpop.eup %8686 }
 0x83a   : > { %2143 = vadd.xlane.f32.xlu0 %v10460_v42 }
 0x83b   : > { %v10463_v0 = vpop.eup %8688 }
 0x83c   : > { %2141 = vadd.xlane.f32.xlu1 %v10463_v0 }
 0x85e   : > { %v2068_v29 = vpop.xlane.xlu1 %2067 }
 0x85f   : > { %v2096_v11 = vsub.f32 %v7474_v6, %v2068_v29 }
 0x860   : > { %v2066_v20 = vpop.xlane.xlu0 %2065 }
 0x861   : > { %v2115_v7 = vmul.f32 1.442695, %v2096_v11  ;;  %v2095_v41 = vsub.f32 %v1992_v51, %v2066_v20 }
 0x862   : > { %v2072_v23 = vpop.xlane.xlu1 %2071 }
 0x863   : > { %8690 = vpow2.f32 %v2115_v7  ;;  %v2113_v44 = vmul.f32 1.442695, %v2095_v41  ;;  %v2098_v10 = vsub.f32 %v7477_v48, %v2072_v23 }
 0x864   : > { %v2070_v45 = vpop.xlane.xlu0 %2069 }
 0x865   : > { %8692 = vpow2.f32 %v2113_v44  ;;  %v2119_v2 = vmul.f32 1.442695, %v2098_v10  ;;  %v2097_v37 = vsub.f32 %v10409_v9, %v2070_v45  ;;  %v12899_v45 = vld [vmem:[#allocation12_spill] sm:$0xff] }
 0x866   : > { %v2076_v21 = vpop.xlane.xlu1 %2075 }
 0x867   : > { %v2117_v36 = vmul.f32 1.442695, %v2097_v37  ;;  %8694 = vpow2.f32 %v2119_v2  ;;  %v2100_v28 = vsub.f32 %v10411_v53, %v2076_v21 }
 0x868   : > { %v2074_v50 = vpop.xlane.xlu0 %2073 }
 0x869   : > { %v2099_v6 = vsub.f32 %v10413_v31, %v2074_v50  ;;  %8696 = vpow2.f32 %v2117_v36  ;;  %v2123_v51 = vmul.f32 1.442695, %v2100_v28  ;;  %v12900_v31 = vld [vmem:[#allocation13_spill] sm:$0xff] }
 0x86a   : > { %v2080_v2 = vpop.xlane.xlu1 %2079 }
 0x86b   : > { %v2121_v29 = vmul.f32 1.442695, %v2099_v6  ;;  %v2102_v41 = vsub.f32 %v10415_v34, %v2080_v2 }
 0x86c   : > { %v2078_v28 = vpop.xlane.xlu0 %2077 }
 0x86d   : > { %8698 = vpow2.f32 %v2121_v29  ;;  %v2127_v6 = vmul.f32 1.442695, %v2102_v41  ;;  %v2101_v29 = vsub.f32 %v10417_v55, %v2078_v28 }
 0x86e   : > { %8700 = vpow2.f32 %v2123_v51  ;;  %v2084_v53 = vpop.xlane.xlu1 %2083 }
 0x870   : > { %v10475_v11 = vpop.eup %8690  ;;  %v2082_v9 = vpop.xlane.xlu0 %2081 }
 0x871   : > { %2147 = vadd.xlane.f32.xlu0 %v10475_v11  ;;  %v2103_v7 = vsub.f32 %v10423_v49, %v2082_v9 }
 0x872   : > { %v10478_v48 = vpop.eup %8692  ;;  %v2088_v20 = vpop.xlane.xlu1 %2087 }
 0x873   : > { %2145 = vadd.xlane.f32.xlu1 %v10478_v48  ;;  %v2129_v23 = vmul.f32 1.442695, %v2103_v7  ;;  %v2106_v44 = vsub.f32 %v10427_v30, %v2088_v20 }
 0x874   : > { %v10481_v37 = vpop.eup %8694 }
 0x875   : > { %8702 = vpow2.f32 %v2129_v23  ;;  %v2135_v51 = vmul.f32 1.442695, %v2106_v44 }
 0x876   : > { %v10484_v21 = vpop.eup %8696  ;;  %v2092_v10 = vpop.xlane.xlu1 %2091  ;;  %8704 = vpow2.f32 %v2127_v6 }
 0x877   : > { %2151 = vadd.xlane.f32.xlu1 %v10481_v37  ;;  %8706 = vpow2.f32 %v2135_v51  ;;  %v12908_v51 = vld [vmem:[#allocation21_spill] sm:$0xff] }
 0x87a   : > { %v10486_v50 = vpop.eup %8698 }
 0x87b   : > { %12897 = vst [vmem:[#allocation72_spill] sm:$0xff] %v10486_v50  ;;  %2149 = vadd.xlane.f32.xlu1 %v10484_v21  ;;  %2153 = vadd.xlane.f32.xlu0 %v10486_v50  ;;  %v10490_v36 = vpop.eup %8700  ;;  %v2104_v50 = vsub.f32 %v10419_v14, %v2084_v53 }
 0x87c   : > { %12898 = vst [vmem:[#allocation73_spill] sm:$0xff] %v10490_v36 }
 0x87d   : > { %v2131_v34 = vmul.f32 1.442695, %v2104_v50 }
 0x87f   : > { %2155 = vadd.xlane.f32.xlu1 %v10490_v36  ;;  %v2086_v36 = vpop.xlane.xlu0 %2085 }
 0x880   : > { %v2105_v2 = vsub.f32 %v10431_v26, %v2086_v36 }
 0x882   : > { %v2133_v9 = vmul.f32 1.442695, %v2105_v2  ;;  %v10505_v28 = vpop.eup %8702 }
 0x883   : > { %v2090_v30 = vpop.xlane.xlu0 %2089 }
 0x884   : > { %v2107_v55 = vsub.f32 %v10439_v46, %v2090_v30 }
 0x886   : > { %v2137_v14 = vmul.f32 1.442695, %v2107_v55 }
 0x890   : > { %2432 = vrot.lane.b32.xlu1 %v12899_v45, %s9230_s9  ;;  %v2108_v45 = vsub.f32 %v10435_v18, %v2092_v10  ;;  %v10508_v18 = vpop.eup %8704 }
 0x891   : > { %2434 = vrot.lane.b32.xlu0 %v12900_v31, %s9230_s9  ;;  %v2125_v31 = vmul.f32 1.442695, %v2101_v29  ;;  %v10510_v53 = vpop.eup %8706 }
 0x892   : > { %v2139_v49 = vmul.f32 1.442695, %v2108_v45  ;;  %v10525_v45 = vpop.permute.xlu0 %2436 }
 0x893   : > { %8708 = vpow2.f32 %v2125_v31 }
 0x894   : > { %8710 = vpow2.f32 %v2139_v49 }
 0x895   : > { %8712 = vpow2.f32 %v2131_v34  ;;  %v12909_v34 = vld [vmem:[#allocation20_spill] sm:$0xff] }
 0x896   : > { %8714 = vpow2.f32 %v2133_v9  ;;  %v12910_v9 = vld [vmem:[#allocation18_spill] sm:$0xff] }
 0x897   : > { %8716 = vpow2.f32 %v2137_v14  ;;  %v12911_v14 = vld [vmem:[#allocation17_spill] sm:$0xff] }
 0x8a0   : > { %v10514_v26 = vpop.eup %8708 }
 0x8a1   : > { %v10516_v50 = vpop.eup %8710 }
 0x8a2   : > { %v10520_v46 = vpop.eup %8712 }
 0x8a3   : > { %v10523_v36 = vpop.eup %8714 }
 0x8a4   : > { %v10528_v31 = vpop.eup %8716 }
 0x8b0   : > { %2161 = vadd.xlane.f32.xlu0 %v10505_v28 }
 0x8b4   : > { %2159 = vadd.xlane.f32.xlu1 %v10508_v18  ;;  %2167 = vadd.xlane.f32.xlu0 %v10510_v53 }
 0x8b8   : > { %2157 = vadd.xlane.f32.xlu1 %v10514_v26  ;;  %2171 = vadd.xlane.f32.xlu0 %v10516_v50 }
 0x8bc   : > { %2163 = vadd.xlane.f32.xlu1 %v10520_v46 }
 0x8c0   : > { %2165 = vadd.xlane.f32.xlu1 %v10523_v36 }
 0x8c3   : > { %v2144_v20 = vpop.xlane.xlu0 %2143 }
 0x8c4   : > { %2169 = vadd.xlane.f32.xlu1 %v10528_v31  ;;  %8718 = vrcp.f32 %v2144_v20 }
 0x8c5   : > { %v2142_v7 = vpop.xlane.xlu1 %2141 }
 0x8c6   : > { %8720 = vrcp.f32 %v2142_v7  ;;  %v12913_v7 = vld [vmem:[#allocation39_spill] sm:$0xff] }
 0x8ce   : > { %2430 = vrot.lane.b32.xlu0 %v9450_v4, %s9230_s9 }
 0x8d1   : > { %v8719_v41 = vpop.eup %8718 }
 0x8d2   : > { %2400 = vrot.lane.b32.xlu0 %v12812_v16, %s9230_s9  ;;  %v2190_v10 = vmul.f32 %v8719_v41, %v10460_v42 }
 0x8d3   : > { %v8721_v23 = vpop.eup %8720 }
 0x8d4   : > { %v2189_v44 = vmul.f32 %v8721_v23, %v10463_v0 }
 0x8d5   : > { %2398 = vrot.lane.b32.xlu1 %v9448_v3, %s9230_s9 }
 0x8d6   : > { %7525 = vmatprep.mubr.f32.mxu1 %v2189_v44  ;;  %2404 = vrot.lane.b32.xlu0 %v9665_v52, %s9230_s9  ;;  %v12914_v44 = vld [vmem:[#allocation40_spill] sm:$0xff] }
 0x8d7   : > { %7526 = vmatmul.mubr.f32.vlgmr.msra.gmra.mxu1 %v2190_v10  ;;  %v12915_v10 = vld [vmem:[#allocation72_spill] sm:$0xff] }
 0x8d8   : > { %7550 = vmatpush3.xpose.msk.msra.mxu1 %vm631_vm0, %v10367_v27  ;;  %v12901_v27 = vld [vmem:[#allocation32_spill] sm:$0xff] }
 0x8d9   : > { %7551 = vmatprep.subr.msk.mxu1 %vm631_vm0, %v10444_v47  ;;  %2402 = vrot.lane.b32.xlu1 %v12813_v32, %s9230_s9 }
 0x8da   : > { %2408 = vrot.lane.b32.xlu0 %v9675_v54, %s9230_s9 }
 0x8dc   : > { %7552 = vmatpush3.xpose.msk.msra.mxu1 %vm631_vm0, %v10444_v47  ;;  %v12903_v47 = vld [vmem:[#allocation71_spill] sm:$0xff] }
 0x8dd   : > { %7553 = vmatprep.subr.msk.mxu1 %vm631_vm0, %v10446_v8  ;;  %2406 = vrot.lane.b32.xlu1 %v12814_v5, %s9230_s9 }
 0x8de   : > { %2412 = vrot.lane.b32.xlu0 %v9685_v56, %s9230_s9 }
 0x8e0   : > { %7554 = vmatpush3.xpose.msk.msra.mxu1 %vm631_vm0, %v10446_v8 }
 0x8e1   : > { %7555 = vmatprep.subr.msk.mxu1 %vm631_vm0, %v10450_v25  ;;  %2410 = vrot.lane.b32.xlu1 %v12815_v22, %s9230_s9 }
 0x8e2   : > { %2416 = vrot.lane.b32.xlu0 %v9695_v58, %s9230_s9 }
 0x8e4   : > { %7556 = vmatpush3.xpose.msk.msra.mxu1 %vm631_vm0, %v10450_v25  ;;  %v12905_v25 = vld [vmem:[#allocation26_spill] sm:$0xff] }
 0x8e5   : > { %7557 = vmatprep.subr.msk.mxu1 %vm631_vm0, %v10448_v15  ;;  %2414 = vrot.lane.b32.xlu1 %v12816_v38, %s9230_s9 }
 0x8e6   : > { %2420 = vrot.lane.b32.xlu0 %v9705_v60, %s9230_s9 }
 0x8e8   : > { %7558 = vmatpush3.xpose.msk.msra.mxu1 %vm631_vm0, %v10448_v15 }
 0x8e9   : > { %7559 = vmatprep.subr.msk.mxu1 %vm631_vm0, %v10454_v24  ;;  %2418 = vrot.lane.b32.xlu1 %v12817_v19, %s9230_s9 }
 0x8ea   : > { %2424 = vrot.lane.b32.xlu0 %v9715_v62, %s9230_s9 }
 0x8ec   : > { %7560 = vmatpush3.xpose.msk.msra.mxu1 %vm631_vm0, %v10454_v24 }
 0x8ed   : > { %7561 = vmatprep.subr.msk.mxu1 %vm631_vm0, %v10452_v40  ;;  %2422 = vrot.lane.b32.xlu1 %v12818_v33, %s9230_s9 }
 0x8ee   : > { %2428 = vrot.lane.b32.xlu0 %v9725_v1, %s9230_s9 }
 0x8f0   : > { %7562 = vmatpush3.xpose.msk.msra.mxu1 %vm631_vm0, %v10452_v40  ;;  %v12902_v40 = vld [vmem:[#allocation29_spill] sm:$0xff] }
 0x8f1   : > { %7563 = vmatprep.subr.msk.mxu1 %vm631_vm0, %v10458_v13  ;;  %2426 = vrot.lane.b32.xlu1 %v12819_v59, %s9230_s9 }
 0x8f2   : > { %2845 = vrot.lane.b32.xlu0 %v9526_v39, %s9230_s9 }
 0x8f4   : > { %7564 = vmatpush3.xpose.msk.msra.mxu1 %vm631_vm0, %v10458_v13 }
 0x8f5   : > { %7565 = vmatprep.subr.msk.mxu1 %vm631_vm0, %v10456_v43  ;;  %2843 = vrot.lane.b32.xlu1 %v12820_v57, %s9230_s9 }
 0x8f6   : > { %2841 = vrot.lane.b32.xlu0 %v9516_v35, %s9230_s9 }
 0x8f8   : > { %7566 = vmatpush3.xpose.msk.msra.mxu1 %vm631_vm0, %v10456_v43  ;;  %v12907_v43 = vld [vmem:[#allocation23_spill] sm:$0xff] }
 0x8f9   : > { %7567 = vmatprep.subr.msk.mxu1 %vm631_vm0, %v10468_v63  ;;  %2839 = vrot.lane.b32.xlu1 %v12821_v12, %s9230_s9 }
 0x8fa   : > { %2837 = vrot.lane.b32.xlu0 %v12853_v17, %s9230_s9  ;;  %v2148_v0 = vpop.xlane.xlu0 %2147 }
 0x8fb   : > { %8722 = vrcp.f32 %v2148_v0 }
 0x8fc   : > { %7568 = vmatpush3.xpose.msk.msra.mxu1 %vm631_vm0, %v10468_v63  ;;  %v2146_v42 = vpop.xlane.xlu1 %2145  ;;  %v12904_v63 = vld [vmem:[#allocation27_spill] sm:$0xff] }
 0x8fd   : > { %8724 = vrcp.f32 %v2146_v42  ;;  %7569 = vmatprep.subr.msk.mxu1 %vm631_vm0, %v10466_v61  ;;  %2835 = vrot.lane.b32.xlu1 %v12901_v27, %s9230_s9 }
 0x8fe   : > { %2831 = vrot.lane.b32.xlu0 %v12902_v40, %s9230_s9 }
 0x900   : > { %7570 = vmatpush3.xpose.msk.msra.mxu1 %vm631_vm0, %v10466_v61  ;;  %v2152_v15 = vpop.xlane.xlu1 %2151  ;;  %v12906_v61 = vld [vmem:[#allocation24_spill] sm:$0xff] }
 0x901   : > { %7571 = vmatprep.subr.msk.mxu1 %vm631_vm0, %v12903_v47  ;;  %2833 = vrot.lane.b32.xlu1 %v12904_v63, %s9230_s9  ;;  %8726 = vrcp.f32 %v2152_v15  ;;  %v12916_v15 = vld [vmem:[#allocation38_spill] sm:$0xff] }
 0x902   : > { %2827 = vrot.lane.b32.xlu0 %v12905_v25, %s9230_s9 }
 0x904   : > { %7572 = vmatpush3.xpose.msk.msra.mxu1 %vm631_vm0, %v12903_v47  ;;  %v2150_v8 = vpop.xlane.xlu1 %2149  ;;  %v2154_v13 = vpop.xlane.xlu0 %2153  ;;  %v12917_v47 = vld [vmem:[#allocation73_spill] sm:$0xff] }
 0x905   : > { %8728 = vrcp.f32 %v2150_v8  ;;  %7573 = vmatprep.subr.msk.mxu1 %vm631_vm0, %v10525_v45  ;;  %2829 = vrot.lane.b32.xlu1 %v12906_v61, %s9230_s9 }
 0x906   : > { %8730 = vrcp.f32 %v2154_v13  ;;  %2823 = vrot.lane.b32.xlu0 %v12907_v43, %s9230_s9  ;;  %v12918_v13 = vld [vmem:[#allocation37_spill] sm:$0xff] }
 0x908   : > { %7574 = vmatpush3.xpose.msk.msra.mxu1 %vm631_vm0, %v10525_v45  ;;  %v2156_v24 = vpop.xlane.xlu1 %2155  ;;  %v2435_v6 = vpop.permute.xlu0 %2434 }
 0x909   : > { %v8723_v29 = vpop.eup %8722  ;;  %8732 = vrcp.f32 %v2156_v24  ;;  %2825 = vrot.lane.b32.xlu1 %v12908_v51, %s9230_s9  ;;  %7575 = vmatprep.subr.msk.mxu1 %vm631_vm0, %v2435_v6  ;;  %v12921_v24 = vld [vmem:[#allocation31_spill] sm:$0xff] }
 0x90a   : > { %v8725_v49 = vpop.eup %8724  ;;  %2819 = vrot.lane.b32.xlu0 %v12909_v34, %s9230_s9  ;;  %v2192_v55 = vmul.f32 %v8723_v29, %v10475_v11  ;;  %v12923_v29 = vld [vmem:[#allocation25_spill] sm:$0xff] }
 0x90b   : > { %v2191_v2 = vmul.f32 %v8725_v49, %v10478_v48  ;;  %v12912_v48 = vld [vmem:[#allocation15_spill] sm:$0xff] }
 0x90c   : > { %7576 = vmatpush3.xpose.msk.msra.mxu1 %vm631_vm0, %v2435_v6  ;;  %v2433_v30 = vpop.permute.xlu1 %2432  ;;  %v12922_v6 = vld [vmem:[#allocation28_spill] sm:$0xff] }
 0x90d   : > { %2821 = vrot.lane.b32.xlu1 %v12910_v9, %s9230_s9  ;;  %7528 = vmatprep.mubr.f32.mxu1 %v2191_v2 }
 0x90e   : > { %7577 = vmatprep.subr.msk.mxu1 %vm631_vm0, %v2433_v30  ;;  %2815 = vrot.lane.b32.xlu0 %v12911_v14, %s9230_s9  ;;  %v8727_v45 = vpop.eup %8726 }
 0x90f   : > { %7529 = vmatmul.mubr.f32.gmra.mxu1 %v2192_v55  ;;  %v2194_v23 = vmul.f32 %v8727_v45, %v10481_v37  ;;  %v12920_v37 = vld [vmem:[#allocation33_spill] sm:$0xff] }
 0x910   : > { %7578 = vmatpush3.xpose.msk.msra.mxu1 %vm631_vm0, %v2433_v30 }
 0x911   : > { %2817 = vrot.lane.b32.xlu1 %v12912_v48, %s9230_s9 }
 0x912   : > { %v8729_v20 = vpop.eup %8728  ;;  %3068 = vrot.lane.b32.xlu0 %v12913_v7, %s9231_s10 }
 0x913   : > { %v8731_v41 = vpop.eup %8730  ;;  %v2193_v11 = vmul.f32 %v8729_v20, %v10484_v21  ;;  %v12919_v21 = vld [vmem:[#allocation35_spill] sm:$0xff] }
 0x914   : > { %v2195_v0 = vmul.f32 %v8731_v41, %v12915_v10 }
 0x915   : > { %3070 = vrot.lane.b32.xlu1 %v12914_v44, %s9231_s10  ;;  %7531 = vmatprep.mubr.f32.mxu1 %v2193_v11 }
 0x916   : > { %v8733_v42 = vpop.eup %8732  ;;  %3066 = vrot.lane.b32.xlu0 %v12916_v15, %s9231_s10  ;;  %7532 = vmatmul.mubr.f32.gmra.mxu1 %v2194_v23 }
 0x917   : > { %7534 = vmatprep.mubr.f32.mxu1 %v2195_v0  ;;  %v2196_v8 = vmul.f32 %v8733_v42, %v12917_v47 }
 0x919   : > { %3064 = vrot.lane.b32.xlu1 %v12918_v13, %s9231_s10 }
 0x91a   : > { %3062 = vrot.lane.b32.xlu0 %v12919_v21, %s9231_s10  ;;  %7535 = vmatmul.mubr.f32.gmra.mxu1 %v2196_v8 }
 0x91d   : > { %3060 = vrot.lane.b32.xlu1 %v12920_v37, %s9231_s10 }
 0x91e   : > { %3058 = vrot.lane.b32.xlu0 %v12921_v24, %s9231_s10 }
 0x921   : > { %3056 = vrot.lane.b32.xlu1 %v12922_v6, %s9231_s10 }
 0x922   : > { %3054 = vrot.lane.b32.xlu0 %v12923_v29, %s9231_s10 }
 0x939   : > { %v2162_v49 = vpop.xlane.xlu0 %2161 }
 0x93a   : > { %8734 = vrcp.f32 %v2162_v49 }
 0x93d   : > { %v2160_v2 = vpop.xlane.xlu1 %2159  ;;  %v2168_v30 = vpop.xlane.xlu0 %2167 }
 0x93e   : > { %8736 = vrcp.f32 %v2160_v2 }
 0x941   : > { %v2158_v55 = vpop.xlane.xlu1 %2157  ;;  %v2172_v45 = vpop.xlane.xlu0 %2171 }
 0x942   : > { %8738 = vrcp.f32 %v2158_v55 }
 0x945   : > { %v2164_v20 = vpop.xlane.xlu1 %2163  ;;  %v2431_v41 = vpop.permute.xlu0 %2430 }
 0x946   : > { %8740 = vrcp.f32 %v2164_v20  ;;  %7579 = vmatprep.subr.msk.mxu1 %vm631_vm0, %v2431_v41 }
 0x947   : > { %7580 = vmatpush3.xpose.msk.msra.mxu1 %vm631_vm0, %v2431_v41  ;;  %8742 = vrcp.f32 %v2168_v30  ;;  %v8735_v10 = vpop.eup %8734 }
 0x948   : > { %v2199_v41 = vmul.f32 %v8735_v10, %v10505_v28 }
 0x949   : > { %v2166_v11 = vpop.xlane.xlu1 %2165  ;;  %v2401_v23 = vpop.permute.xlu0 %2400 }
 0x94a   : > { %8744 = vrcp.f32 %v2166_v11 }
 0x94b   : > { %8746 = vrcp.f32 %v2172_v45  ;;  %v8737_v47 = vpop.eup %8736 }
 0x94c   : > { %v2198_v20 = vmul.f32 %v8737_v47, %v10508_v18 }
 0x94d   : > { %v2170_v0 = vpop.xlane.xlu1 %2169  ;;  %v2405_v42 = vpop.permute.xlu0 %2404 }
 0x94e   : > { %8748 = vrcp.f32 %v2170_v0 }
 0x94f   : > { %v8739_v8 = vpop.eup %8738 }
 0x950   : > { %v2197_v49 = vmul.f32 %v8739_v8, %v10514_v26 }
 0x951   : > { %v2399_v2 = vpop.permute.xlu1 %2398  ;;  %v2409_v55 = vpop.permute.xlu0 %2408 }
 0x952   : > { %7537 = vmatprep.mubr.f32.mxu1 %v2197_v49 }
 0x953   : > { %v8741_v30 = vpop.eup %8740  ;;  %7538 = vmatmul.mubr.f32.gmra.mxu1 %v2198_v20 }
 0x954   : > { %7540 = vmatprep.mubr.f32.mxu1 %v2199_v41  ;;  %v2200_v11 = vmul.f32 %v8741_v30, %v10520_v46  ;;  %v8743_v6 = vpop.eup %8742 }
 0x955   : > { %v2403_v45 = vpop.permute.xlu1 %2402  ;;  %v2413_v29 = vpop.permute.xlu0 %2412  ;;  %v2202_v37 = vmul.f32 %v8743_v6, %v10510_v53 }
 0x957   : > { %v8745_v24 = vpop.eup %8744  ;;  %7541 = vmatmul.mubr.f32.gmra.mxu1 %v2200_v11 }
 0x958   : > { %v2201_v0 = vmul.f32 %v8745_v24, %v10523_v36  ;;  %v8747_v18 = vpop.eup %8746 }
 0x959   : > { %v2407_v26 = vpop.permute.xlu1 %2406  ;;  %v2417_v8 = vpop.permute.xlu0 %2416  ;;  %v2204_v46 = vmul.f32 %v8747_v18, %v10516_v50 }
 0x95a   : > { %7543 = vmatprep.mubr.f32.mxu1 %v2201_v0 }
 0x95b   : > { %v8749_v47 = vpop.eup %8748  ;;  %7544 = vmatmul.mubr.f32.gmra.mxu1 %v2202_v37 }
 0x95c   : > { %v2203_v28 = vmul.f32 %v8749_v47, %v10528_v31 }
 0x95d   : > { %v2411_v10 = vpop.permute.xlu1 %2410  ;;  %v2421_v49 = vpop.permute.xlu0 %2420 }
 0x95e   : > { %7546 = vmatprep.mubr.f32.mxu1 %v2203_v28 }
 0x95f   : > { %7547 = vmatmul.mubr.f32.gmra.mxu1 %v2204_v46 }
 0x960   : > { %7581 = vmatprep.mubr.msk.f32.mxu1 %vm631_vm0, %v2399_v2 }
 0x961   : > { %v2415_v20 = vpop.permute.xlu1 %2414  ;;  %v2425_v36 = vpop.permute.xlu0 %2424 }
 0x963   : > { %7582 = vmatmul.mubr.msk.f32.vlgmr.msra.gmra.mxu1 %vm631_vm0, %v2401_v23 }
 0x964   : > { %7584 = vmatprep.mubr.msk.f32.mxu1 %vm631_vm0, %v2403_v45 }
 0x965   : > { %v2419_v53 = vpop.permute.xlu1 %2418  ;;  %v2429_v24 = vpop.permute.xlu0 %2428 }
 0x967   : > { %7585 = vmatmul.mubr.msk.f32.gmra.mxu1 %vm631_vm0, %v2405_v42 }
 0x968   : > { %7587 = vmatprep.mubr.msk.f32.mxu1 %vm631_vm0, %v2407_v26 }
 0x969   : > { %v2423_v31 = vpop.permute.xlu1 %2422  ;;  %v2846_v37 = vpop.permute.xlu0 %2845 }
 0x96a   : > { %7605 = vmatprep.subr.mxu0 %v2846_v37 }
 0x96b   : > { %7588 = vmatmul.mubr.msk.f32.gmra.mxu1 %vm631_vm0, %v2409_v55  ;;  %7606 = vmatpush3.msra.mxu0 %v2846_v37 }
 0x96c   : > { %7590 = vmatprep.mubr.msk.f32.mxu1 %vm631_vm0, %v2411_v10 }
 0x96d   : > { %v2427_v50 = vpop.permute.xlu1 %2426  ;;  %v2842_v6 = vpop.permute.xlu0 %2841 }
 0x96f   : > { %7591 = vmatmul.mubr.msk.f32.gmra.mxu1 %vm631_vm0, %v2413_v29 }
 0x970   : > { %7593 = vmatprep.mubr.msk.f32.mxu1 %vm631_vm0, %v2415_v20 }
 0x971   : > { %v2844_v23 = vpop.permute.xlu1 %2843  ;;  %v2838_v2 = vpop.permute.xlu0 %2837 }
 0x972   : > { %7607 = vmatprep.subr.mxu0 %v2844_v23 }
 0x973   : > { %7594 = vmatmul.mubr.msk.f32.gmra.mxu1 %vm631_vm0, %v2417_v8  ;;  %7608 = vmatpush3.msra.mxu0 %v2844_v23 }
 0x974   : > { %7596 = vmatprep.mubr.msk.f32.mxu1 %vm631_vm0, %v2419_v53  ;;  %7609 = vmatprep.subr.mxu0 %v2842_v6 }
 0x975   : > { %v2840_v42 = vpop.permute.xlu1 %2839  ;;  %7610 = vmatpush3.msra.mxu0 %v2842_v6  ;;  %v2832_v55 = vpop.permute.xlu0 %2831 }
 0x976   : > { %7611 = vmatprep.subr.mxu0 %v2840_v42 }
 0x977   : > { %7597 = vmatmul.mubr.msk.f32.gmra.mxu1 %vm631_vm0, %v2421_v49  ;;  %7612 = vmatpush3.msra.mxu0 %v2840_v42 }
 0x978   : > { %7599 = vmatprep.mubr.msk.f32.mxu1 %vm631_vm0, %v2423_v31  ;;  %7613 = vmatprep.subr.mxu0 %v2838_v2 }
 0x979   : > { %v2836_v29 = vpop.permute.xlu1 %2835  ;;  %7614 = vmatpush3.msra.mxu0 %v2838_v2  ;;  %v2828_v41 = vpop.permute.xlu0 %2827 }
 0x97a   : > { %7615 = vmatprep.subr.mxu0 %v2836_v29 }
 0x97b   : > { %7600 = vmatmul.mubr.msk.f32.gmra.mxu1 %vm631_vm0, %v2425_v36  ;;  %7616 = vmatpush3.msra.mxu0 %v2836_v29 }
 0x97c   : > { %7602 = vmatprep.mubr.msk.f32.mxu1 %vm631_vm0, %v2427_v50 }
 0x97d   : > { %v2834_v30 = vpop.permute.xlu1 %2833  ;;  %v2824_v45 = vpop.permute.xlu0 %2823 }
 0x97e   : > { %7617 = vmatprep.subr.mxu0 %v2834_v30 }
 0x97f   : > { %7603 = vmatmul.mubr.msk.f32.gmra.mxu1 %vm631_vm0, %v2429_v24  ;;  %7618 = vmatpush3.msra.mxu0 %v2834_v30 }
 0x980   : > { %7619 = vmatprep.subr.mxu0 %v2832_v55 }
 0x981   : > { %v2830_v11 = vpop.permute.xlu1 %2829  ;;  %7620 = vmatpush3.msra.mxu0 %v2832_v55  ;;  %v2820_v26 = vpop.permute.xlu0 %2819 }
 0x982   : > { %7621 = vmatprep.subr.mxu0 %v2830_v11 }
 0x983   : > { %7622 = vmatpush3.msra.mxu0 %v2830_v11 }
 0x984   : > { %7623 = vmatprep.subr.mxu0 %v2828_v41 }
 0x985   : > { %v2826_v0 = vpop.permute.xlu1 %2825  ;;  %7624 = vmatpush3.msra.mxu0 %v2828_v41  ;;  %v2816_v47 = vpop.permute.xlu0 %2815 }
 0x986   : > { %7625 = vmatprep.subr.mxu0 %v2826_v0 }
 0x987   : > { %7626 = vmatpush3.msra.mxu0 %v2826_v0  ;;  %v12941_v0 = vld [vmem:[#allocation19_spill] sm:$0xff] }
 0x988   : > { %7627 = vmatprep.subr.mxu0 %v2824_v45 }
 0x989   : > { %v2822_v8 = vpop.permute.xlu1 %2821  ;;  %7628 = vmatpush3.msra.mxu0 %v2824_v45  ;;  %v12940_v45 = vld [vmem:[#allocation22_spill] sm:$0xff] }
 0x98a   : > { %7629 = vmatprep.subr.mxu0 %v2822_v8 }
 0x98b   : > { %7630 = vmatpush3.msra.mxu0 %v2822_v8 }
 0x98c   : > { %7631 = vmatprep.subr.mxu0 %v2820_v26 }
 0x98d   : > { %v2818_v18 = vpop.permute.xlu1 %2817  ;;  %7632 = vmatpush3.msra.mxu0 %v2820_v26  ;;  %v12942_v26 = vld [vmem:[#allocation16_spill] sm:$0xff] }
 0x98e   : > { %7633 = vmatprep.subr.mxu0 %v2818_v18 }
 0x98f   : > { %7634 = vmatpush3.msra.mxu0 %v2818_v18 }
 0x990   : > { %7635 = vmatprep.subr.mxu0 %v2816_v47 }
 0x991   : > { %v10703_v28 = vpop.permute.xlu1 %3070  ;;  %7636 = vmatpush3.msra.mxu0 %v2816_v47 }
 0x992   : > { %7661 = vmatprep.subr.msk.mxu0 %vm631_vm0, %v10703_v28 }
 0x997   : > { %v10707_v10 = vpop.f32.mrf.mxu1 }
 0x998   : > { %12924 = vst [vmem:[#allocation71_spill] sm:$0xff] %v10707_v10 }
 0x999   : > { %v10709_v49 = vpop.f32.mrf.mxu1 }
 0x99a   : > { %12925 = vst [vmem:[#allocation72_spill] sm:$0xff] %v10709_v49 }
 0x9cf   : > { %v10711_v46 = vpop.f32.mrf.mxu1 }
 0x9d0   : > { %12926 = vst [vmem:[#allocation73_spill] sm:$0xff] %v10711_v46 }
 0x9d1   : > { %v10713_v20 = vpop.f32.mrf.mxu1 }
 0x9d2   : > { %12927 = vst [vmem:[#allocation74_spill] sm:$0xff] %v10713_v20  ;;  %v10782_v20 = vpop.permute.xlu0 %3068 }
 0x9d6   : > { %v10715_v36 = vpop.f32.mrf.mxu1 }
 0x9d7   : > { %12928 = vst [vmem:[#allocation75_spill] sm:$0xff] %v10715_v36 }
 0x9d8   : > { %v10717_v53 = vpop.f32.mrf.mxu1 }
 0x9d9   : > { %12929 = vst [vmem:[#allocation76_spill] sm:$0xff] %v10717_v53 }
 0x9da   : > { %v10719_v24 = vpop.f32.mrf.mxu1 }
 0x9db   : > { %12930 = vst [vmem:[#allocation77_spill] sm:$0xff] %v10719_v24 }
 0x9dc   : > { %v10721_v31 = vpop.f32.mrf.mxu1 }
 0x9dd   : > { %12931 = vst [vmem:[#allocation78_spill] sm:$0xff] %v10721_v31 }
 0xa13   : > { %v10723_v37 = vpop.f32.mrf.mxu1 }
 0xa14   : > { %12932 = vst [vmem:[#allocation79_spill] sm:$0xff] %v10723_v37  ;;  %v10784_v37 = vpop.permute.xlu0 %3066 }
 0xa15   : > { %v10725_v50 = vpop.f32.mrf.mxu1 }
 0xa16   : > { %12933 = vst [vmem:[#allocation80_spill] sm:$0xff] %v10725_v50  ;;  %v10788_v50 = vpop.permute.xlu1 %3064 }
 0xa17   : > { %v10727_v6 = vpop.f32.mrf.mxu1 }
 0xa18   : > { %12934 = vst [vmem:[#allocation81_spill] sm:$0xff] %v10727_v6  ;;  %v10786_v10 = vpop.permute.xlu0 %3062 }
 0xa19   : > { %v10729_v23 = vpop.f32.mrf.mxu1 }
 0xa1a   : > { %12935 = vst [vmem:[#allocation82_spill] sm:$0xff] %v10729_v23  ;;  %v12943_v23 = vld [vmem:[#allocation14_spill] sm:$0xff] }
 0xa1b   : > { %v10731_v2 = vpop.f32.mrf.mxu1 }
 0xa1c   : > { %12936 = vst [vmem:[#allocation83_spill] sm:$0xff] %v10731_v2  ;;  %v10790_v49 = vpop.permute.xlu0 %3058 }
 0xa1d   : > { %v10733_v42 = vpop.f32.mrf.mxu1 }
 0xa1e   : > { %12937 = vst [vmem:[#allocation84_spill] sm:$0xff] %v10733_v42 }
 0xa1f   : > { %v10735_v55 = vpop.f32.mrf.mxu1 }
 0xa20   : > { %12938 = vst [vmem:[#allocation85_spill] sm:$0xff] %v10735_v55 }
 0xa21   : > { %v10737_v29 = vpop.f32.mrf.mxu1 }
 0xa22   : > { %12939 = vst [vmem:[#allocation86_spill] sm:$0xff] %v10737_v29 }
 0xa23   : > { %v7583_v30 = vpop.f32.mrf.mxu1 }
 0xa24   : > { %2673 = vmax.xlane.f32.xlu0 %v7583_v30 }
 0xa25   : > { %v2592_v11 = vpop.f32.mrf.mxu1 }
 0xa26   : > { %2671 = vmax.xlane.f32.xlu1 %v2592_v11 }
 0xa27   : > { %v7586_v8 = vpop.f32.mrf.mxu1 }
 0xa29   : > { %v2602_v18 = vpop.f32.mrf.mxu1 }
 0xa2b   : > { %v7589_v47 = vpop.f32.mrf.mxu1 }
 0xa2d   : > { %v10747_v55 = vpop.f32.mrf.mxu1 }
 0xa2f   : > { %v10749_v24 = vpop.f32.mrf.mxu1 }
 0xa31   : > { %v10751_v41 = vpop.f32.mrf.mxu1 }
 0xa33   : > { %v10753_v31 = vpop.f32.mrf.mxu1 }
 0xa35   : > { %v10755_v29 = vpop.f32.mrf.mxu1 }
 0xa37   : > { %3052 = vrot.lane.b32.xlu1 %v12940_v45, %s9231_s10  ;;  %v10757_v2 = vpop.f32.mrf.mxu1 }
 0xa39   : > { %v10761_v36 = vpop.f32.mrf.mxu1 }
 0xa3a   : > { %3050 = vrot.lane.b32.xlu0 %v12941_v0, %s9231_s10  ;;  %v10794_v0 = vpop.permute.xlu0 %3054 }
 0xa3b   : > { %v10765_v42 = vpop.f32.mrf.mxu1 }
 0xa3d   : > { %v10769_v53 = vpop.f32.mrf.mxu1 }
 0xa3e   : > { %3048 = vrot.lane.b32.xlu0 %v12942_v26, %s9231_s10  ;;  %v10792_v26 = vpop.permute.xlu1 %3060 }
 0xa3f   : > { %v10773_v6 = vpop.f32.mrf.mxu1 }
 0xa41   : > { %v10777_v46 = vpop.f32.mrf.mxu1 }
 0xa42   : > { %v10796_v45 = vpop.permute.xlu1 %3056 }
 0xa5b   : > { %2677 = vmax.xlane.f32.xlu1 %v7586_v8 }
 0xa5d   : > { %2675 = vmax.xlane.f32.xlu0 %v2602_v18 }
 0xa5f   : > { %2681 = vmax.xlane.f32.xlu1 %v7589_v47 }
 0xa61   : > { %2679 = vmax.xlane.f32.xlu0 %v10747_v55 }
 0xa63   : > { %2685 = vmax.xlane.f32.xlu1 %v10749_v24 }
 0xa65   : > { %2683 = vmax.xlane.f32.xlu0 %v10751_v41 }
 0xa67   : > { %2689 = vmax.xlane.f32.xlu1 %v10753_v31 }
 0xa69   : > { %2687 = vmax.xlane.f32.xlu0 %v10755_v29 }
 0xa6b   : > { %2693 = vmax.xlane.f32.xlu1 %v10757_v2 }
 0xa6d   : > { %2691 = vmax.xlane.f32.xlu0 %v10761_v36 }
 0xa6f   : > { %2697 = vmax.xlane.f32.xlu1 %v10765_v42 }
 0xa71   : > { %2695 = vmax.xlane.f32.xlu0 %v10769_v53 }
 0xa73   : > { %2701 = vmax.xlane.f32.xlu1 %v10773_v6 }
 0xa75   : > { %2699 = vmax.xlane.f32.xlu0 %v10777_v46 }
 0xa8b   : > { %3046 = vrot.lane.b32.xlu0 %v12943_v23, %s9231_s10 }
 0xaad   : > { %v2674_v21 = vpop.xlane.xlu0 %2673 }
 0xaae   : > { %v2704_v13 = vsub.f32 %v7583_v30, %v2674_v21 }
 0xaaf   : > { %v2672_v15 = vpop.xlane.xlu1 %2671 }
 0xab0   : > { %v2721_v23 = vmul.f32 1.442695, %v2704_v13  ;;  %v2703_v44 = vsub.f32 %v2592_v11, %v2672_v15 }
 0xab1   : > { %v10804_v9 = vpop.permute.xlu0 %3050 }
 0xab2   : > { %8750 = vpow2.f32 %v2721_v23  ;;  %v2719_v7 = vmul.f32 1.442695, %v2703_v44 }
 0xab3   : > { %v10806_v34 = vpop.permute.xlu1 %3052 }
 0xab4   : > { %8752 = vpow2.f32 %v2719_v7 }
 0xab5   : > { %v10808_v51 = vpop.permute.xlu0 %3048 }
 0xab6   : > { %12944 = vst [vmem:[#allocation87_spill] sm:$0xff] %v10808_v51 }
 0xabf   : > { %v10798_v48 = vpop.eup %8750 }
 0xac0   : > { %2753 = vadd.xlane.f32.xlu0 %v10798_v48 }
 0xac1   : > { %v10801_v14 = vpop.eup %8752 }
 0xac2   : > { %2751 = vadd.xlane.f32.xlu1 %v10801_v14 }
 0xae4   : > { %v2678_v21 = vpop.xlane.xlu1 %2677 }
 0xae5   : > { %v2706_v13 = vsub.f32 %v7586_v8, %v2678_v21 }
 0xae6   : > { %v2676_v15 = vpop.xlane.xlu0 %2675 }
 0xae7   : > { %v2725_v23 = vmul.f32 1.442695, %v2706_v13  ;;  %v2705_v44 = vsub.f32 %v2602_v18, %v2676_v15 }
 0xae8   : > { %v2682_v7 = vpop.xlane.xlu1 %2681 }
 0xae9   : > { %8754 = vpow2.f32 %v2725_v23  ;;  %v2723_v30 = vmul.f32 1.442695, %v2705_v44  ;;  %v2708_v11 = vsub.f32 %v7589_v47, %v2682_v7 }
 0xaea   : > { %v2680_v43 = vpop.xlane.xlu0 %2679 }
 0xaeb   : > { %8756 = vpow2.f32 %v2723_v30  ;;  %v2729_v61 = vmul.f32 1.442695, %v2708_v11  ;;  %v2707_v25 = vsub.f32 %v10747_v55, %v2680_v43  ;;  %v12947_v43 = vld [vmem:[#allocation12_spill] sm:$0xff] }
 0xaec   : > { %v2686_v63 = vpop.xlane.xlu1 %2685 }
 0xaed   : > { %v2727_v40 = vmul.f32 1.442695, %v2707_v25  ;;  %8758 = vpow2.f32 %v2729_v61  ;;  %v2710_v51 = vsub.f32 %v10749_v24, %v2686_v63  ;;  %v12948_v24 = vld [vmem:[#allocation13_spill] sm:$0xff] }
 0xaee   : > { %v2684_v27 = vpop.xlane.xlu0 %2683 }
 0xaef   : > { %v2709_v8 = vsub.f32 %v10751_v41, %v2684_v27  ;;  %8760 = vpow2.f32 %v2727_v40  ;;  %v2733_v18 = vmul.f32 1.442695, %v2710_v51 }
 0xaf0   : > { %v2690_v61 = vpop.xlane.xlu1 %2689 }
 0xaf1   : > { %v2731_v21 = vmul.f32 1.442695, %v2709_v8  ;;  %v2712_v44 = vsub.f32 %v10753_v31, %v2690_v61 }
 0xaf2   : > { %v2688_v51 = vpop.xlane.xlu0 %2687 }
 0xaf3   : > { %8762 = vpow2.f32 %v2731_v21  ;;  %v2737_v8 = vmul.f32 1.442695, %v2712_v44  ;;  %v2711_v21 = vsub.f32 %v10755_v29, %v2688_v51 }
 0xaf4   : > { %8764 = vpow2.f32 %v2733_v18  ;;  %v2694_v55 = vpop.xlane.xlu1 %2693 }
 0xaf6   : > { %v10813_v13 = vpop.eup %8754  ;;  %v2692_v41 = vpop.xlane.xlu0 %2691 }
 0xaf7   : > { %2757 = vadd.xlane.f32.xlu0 %v10813_v13  ;;  %v2713_v23 = vsub.f32 %v10761_v36, %v2692_v41 }
 0xaf8   : > { %v10816_v47 = vpop.eup %8756  ;;  %v2698_v15 = vpop.xlane.xlu1 %2697 }
 0xaf9   : > { %2755 = vadd.xlane.f32.xlu1 %v10816_v47  ;;  %v2739_v7 = vmul.f32 1.442695, %v2713_v23  ;;  %v2716_v30 = vsub.f32 %v10765_v42, %v2698_v15 }
 0xafa   : > { %v10819_v25 = vpop.eup %8758 }
 0xafb   : > { %8766 = vpow2.f32 %v2739_v7  ;;  %v2745_v18 = vmul.f32 1.442695, %v2716_v30 }
 0xafc   : > { %v10822_v63 = vpop.eup %8760  ;;  %v2702_v11 = vpop.xlane.xlu1 %2701  ;;  %8768 = vpow2.f32 %v2737_v8 }
 0xafd   : > { %2761 = vadd.xlane.f32.xlu1 %v10819_v25  ;;  %8770 = vpow2.f32 %v2745_v18  ;;  %v12956_v18 = vld [vmem:[#allocation21_spill] sm:$0xff] }
 0xb00   : > { %v10824_v27 = vpop.eup %8762 }
 0xb01   : > { %12945 = vst [vmem:[#allocation88_spill] sm:$0xff] %v10824_v27  ;;  %2759 = vadd.xlane.f32.xlu1 %v10822_v63  ;;  %2763 = vadd.xlane.f32.xlu0 %v10824_v27  ;;  %v10828_v40 = vpop.eup %8764  ;;  %v2714_v27 = vsub.f32 %v10757_v2, %v2694_v55 }
 0xb02   : > { %12946 = vst [vmem:[#allocation89_spill] sm:$0xff] %v10828_v40 }
 0xb03   : > { %v2741_v31 = vmul.f32 1.442695, %v2714_v27 }
 0xb05   : > { %2765 = vadd.xlane.f32.xlu1 %v10828_v40  ;;  %v2696_v40 = vpop.xlane.xlu0 %2695 }
 0xb06   : > { %v2715_v61 = vsub.f32 %v10769_v53, %v2696_v40 }
 0xb08   : > { %v2743_v41 = vmul.f32 1.442695, %v2715_v61  ;;  %v10843_v51 = vpop.eup %8766 }
 0xb09   : > { %v2700_v42 = vpop.xlane.xlu0 %2699 }
 0xb0a   : > { %v2717_v29 = vsub.f32 %v10777_v46, %v2700_v42 }
 0xb0c   : > { %v2747_v2 = vmul.f32 1.442695, %v2717_v29 }
 0xb16   : > { %3042 = vrot.lane.b32.xlu1 %v12947_v43, %s9231_s10  ;;  %v2718_v43 = vsub.f32 %v10773_v6, %v2702_v11  ;;  %v10846_v6 = vpop.eup %8768 }
 0xb17   : > { %3044 = vrot.lane.b32.xlu0 %v12948_v24, %s9231_s10  ;;  %v2735_v24 = vmul.f32 1.442695, %v2711_v21  ;;  %v10848_v55 = vpop.eup %8770 }
 0xb18   : > { %v2749_v36 = vmul.f32 1.442695, %v2718_v43  ;;  %v10863_v43 = vpop.permute.xlu0 %3046 }
 0xb19   : > { %8772 = vpow2.f32 %v2735_v24 }
 0xb1a   : > { %8774 = vpow2.f32 %v2749_v36 }
 0xb1b   : > { %8776 = vpow2.f32 %v2741_v31  ;;  %v12957_v31 = vld [vmem:[#allocation20_spill] sm:$0xff] }
 0xb1c   : > { %8778 = vpow2.f32 %v2743_v41  ;;  %v12958_v41 = vld [vmem:[#allocation18_spill] sm:$0xff] }
 0xb1d   : > { %8780 = vpow2.f32 %v2747_v2  ;;  %v12959_v2 = vld [vmem:[#allocation17_spill] sm:$0xff] }
 0xb26   : > { %v10852_v53 = vpop.eup %8772 }
 0xb27   : > { %v10854_v27 = vpop.eup %8774 }
 0xb28   : > { %v10858_v46 = vpop.eup %8776 }
 0xb29   : > { %v10861_v40 = vpop.eup %8778 }
 0xb2a   : > { %v10866_v24 = vpop.eup %8780 }
 0xb36   : > { %2771 = vadd.xlane.f32.xlu0 %v10843_v51 }
 0xb3a   : > { %2769 = vadd.xlane.f32.xlu1 %v10846_v6  ;;  %2777 = vadd.xlane.f32.xlu0 %v10848_v55 }
 0xb3e   : > { %2767 = vadd.xlane.f32.xlu1 %v10852_v53  ;;  %2781 = vadd.xlane.f32.xlu0 %v10854_v27 }
 0xb42   : > { %2773 = vadd.xlane.f32.xlu1 %v10858_v46 }
 0xb46   : > { %2775 = vadd.xlane.f32.xlu1 %v10861_v40 }
 0xb49   : > { %v2754_v15 = vpop.xlane.xlu0 %2753 }
 0xb4a   : > { %2779 = vadd.xlane.f32.xlu1 %v10866_v24  ;;  %8782 = vrcp.f32 %v2754_v15 }
 0xb4b   : > { %v2752_v23 = vpop.xlane.xlu1 %2751 }
 0xb4c   : > { %8784 = vrcp.f32 %v2752_v23  ;;  %v12961_v23 = vld [vmem:[#allocation39_spill] sm:$0xff] }
 0xb54   : > { %3040 = vrot.lane.b32.xlu0 %v9450_v4, %s9231_s10 }
 0xb57   : > { %v8783_v44 = vpop.eup %8782 }
 0xb58   : > { %3010 = vrot.lane.b32.xlu0 %v12812_v16, %s9231_s10  ;;  %v2800_v11 = vmul.f32 %v8783_v44, %v10798_v48 }
 0xb59   : > { %v8785_v7 = vpop.eup %8784 }
 0xb5a   : > { %v2799_v30 = vmul.f32 %v8785_v7, %v10801_v14 }
 0xb5b   : > { %3008 = vrot.lane.b32.xlu1 %v9448_v3, %s9231_s10 }
 0xb5c   : > { %7637 = vmatprep.mubr.f32.mxu0 %v2799_v30  ;;  %3014 = vrot.lane.b32.xlu0 %v9665_v52, %s9231_s10  ;;  %v12962_v30 = vld [vmem:[#allocation40_spill] sm:$0xff] }
 0xb5d   : > { %7638 = vmatmul.mubr.f32.vlgmr.msra.gmra.mxu0 %v2800_v11  ;;  %v12963_v11 = vld [vmem:[#allocation88_spill] sm:$0xff] }
 0xb5e   : > { %7662 = vmatpush3.xpose.msk.msra.mxu0 %vm631_vm0, %v10703_v28  ;;  %v12949_v28 = vld [vmem:[#allocation32_spill] sm:$0xff] }
 0xb5f   : > { %7663 = vmatprep.subr.msk.mxu0 %vm631_vm0, %v10782_v20  ;;  %3012 = vrot.lane.b32.xlu1 %v12813_v32, %s9231_s10 }
 0xb60   : > { %3018 = vrot.lane.b32.xlu0 %v9675_v54, %s9231_s10 }
 0xb62   : > { %7664 = vmatpush3.xpose.msk.msra.mxu0 %vm631_vm0, %v10782_v20  ;;  %v12951_v20 = vld [vmem:[#allocation87_spill] sm:$0xff] }
 0xb63   : > { %7665 = vmatprep.subr.msk.mxu0 %vm631_vm0, %v10784_v37  ;;  %3016 = vrot.lane.b32.xlu1 %v12814_v5, %s9231_s10 }
 0xb64   : > { %3022 = vrot.lane.b32.xlu0 %v9685_v56, %s9231_s10 }
 0xb66   : > { %7666 = vmatpush3.xpose.msk.msra.mxu0 %vm631_vm0, %v10784_v37  ;;  %v12953_v37 = vld [vmem:[#allocation26_spill] sm:$0xff] }
 0xb67   : > { %7667 = vmatprep.subr.msk.mxu0 %vm631_vm0, %v10788_v50  ;;  %3020 = vrot.lane.b32.xlu1 %v12815_v22, %s9231_s10 }
 0xb68   : > { %3026 = vrot.lane.b32.xlu0 %v9695_v58, %s9231_s10 }
 0xb6a   : > { %7668 = vmatpush3.xpose.msk.msra.mxu0 %vm631_vm0, %v10788_v50 }
 0xb6b   : > { %7669 = vmatprep.subr.msk.mxu0 %vm631_vm0, %v10786_v10  ;;  %3024 = vrot.lane.b32.xlu1 %v12816_v38, %s9231_s10 }
 0xb6c   : > { %3030 = vrot.lane.b32.xlu0 %v9705_v60, %s9231_s10 }
 0xb6e   : > { %7670 = vmatpush3.xpose.msk.msra.mxu0 %vm631_vm0, %v10786_v10  ;;  %v12950_v10 = vld [vmem:[#allocation29_spill] sm:$0xff] }
 0xb6f   : > { %7671 = vmatprep.subr.msk.mxu0 %vm631_vm0, %v10792_v26  ;;  %3028 = vrot.lane.b32.xlu1 %v12817_v19, %s9231_s10 }
 0xb70   : > { %3034 = vrot.lane.b32.xlu0 %v9715_v62, %s9231_s10 }
 0xb72   : > { %7672 = vmatpush3.xpose.msk.msra.mxu0 %vm631_vm0, %v10792_v26 }
 0xb73   : > { %7673 = vmatprep.subr.msk.mxu0 %vm631_vm0, %v10790_v49  ;;  %3032 = vrot.lane.b32.xlu1 %v12818_v33, %s9231_s10 }
 0xb74   : > { %3038 = vrot.lane.b32.xlu0 %v9725_v1, %s9231_s10 }
 0xb76   : > { %7674 = vmatpush3.xpose.msk.msra.mxu0 %vm631_vm0, %v10790_v49 }
 0xb77   : > { %7675 = vmatprep.subr.msk.mxu0 %vm631_vm0, %v10796_v45  ;;  %3036 = vrot.lane.b32.xlu1 %v12819_v59, %s9231_s10 }
 0xb78   : > { %3455 = vrot.lane.b32.xlu0 %v9526_v39, %s9231_s10 }
 0xb7a   : > { %7676 = vmatpush3.xpose.msk.msra.mxu0 %vm631_vm0, %v10796_v45 }
 0xb7b   : > { %7677 = vmatprep.subr.msk.mxu0 %vm631_vm0, %v10794_v0  ;;  %3453 = vrot.lane.b32.xlu1 %v12820_v57, %s9231_s10 }
 0xb7c   : > { %3451 = vrot.lane.b32.xlu0 %v9516_v35, %s9231_s10 }
 0xb7e   : > { %7678 = vmatpush3.xpose.msk.msra.mxu0 %vm631_vm0, %v10794_v0  ;;  %v12955_v0 = vld [vmem:[#allocation23_spill] sm:$0xff] }
 0xb7f   : > { %7679 = vmatprep.subr.msk.mxu0 %vm631_vm0, %v10806_v34  ;;  %3449 = vrot.lane.b32.xlu1 %v12821_v12, %s9231_s10 }
 0xb80   : > { %3447 = vrot.lane.b32.xlu0 %v12853_v17, %s9231_s10  ;;  %v2758_v14 = vpop.xlane.xlu0 %2757 }
 0xb81   : > { %8786 = vrcp.f32 %v2758_v14 }
 0xb82   : > { %7680 = vmatpush3.xpose.msk.msra.mxu0 %vm631_vm0, %v10806_v34  ;;  %v2756_v48 = vpop.xlane.xlu1 %2755  ;;  %v12952_v34 = vld [vmem:[#allocation27_spill] sm:$0xff] }
 0xb83   : > { %8788 = vrcp.f32 %v2756_v48  ;;  %7681 = vmatprep.subr.msk.mxu0 %vm631_vm0, %v10804_v9  ;;  %3445 = vrot.lane.b32.xlu1 %v12949_v28, %s9231_s10 }
 0xb84   : > { %3441 = vrot.lane.b32.xlu0 %v12950_v10, %s9231_s10 }
 0xb86   : > { %7682 = vmatpush3.xpose.msk.msra.mxu0 %vm631_vm0, %v10804_v9  ;;  %v2762_v49 = vpop.xlane.xlu1 %2761  ;;  %v12954_v9 = vld [vmem:[#allocation24_spill] sm:$0xff] }
 0xb87   : > { %7683 = vmatprep.subr.msk.mxu0 %vm631_vm0, %v12951_v20  ;;  %3443 = vrot.lane.b32.xlu1 %v12952_v34, %s9231_s10  ;;  %8790 = vrcp.f32 %v2762_v49  ;;  %v12964_v49 = vld [vmem:[#allocation38_spill] sm:$0xff] }
 0xb88   : > { %3437 = vrot.lane.b32.xlu0 %v12953_v37, %s9231_s10 }
 0xb8a   : > { %7684 = vmatpush3.xpose.msk.msra.mxu0 %vm631_vm0, %v12951_v20  ;;  %v2760_v50 = vpop.xlane.xlu1 %2759  ;;  %v2764_v45 = vpop.xlane.xlu0 %2763  ;;  %v12965_v20 = vld [vmem:[#allocation89_spill] sm:$0xff] }
 0xb8b   : > { %8792 = vrcp.f32 %v2760_v50  ;;  %7685 = vmatprep.subr.msk.mxu0 %vm631_vm0, %v10863_v43  ;;  %3439 = vrot.lane.b32.xlu1 %v12954_v9, %s9231_s10 }
 0xb8c   : > { %8794 = vrcp.f32 %v2764_v45  ;;  %3433 = vrot.lane.b32.xlu0 %v12955_v0, %s9231_s10  ;;  %v12966_v45 = vld [vmem:[#allocation37_spill] sm:$0xff] }
 0xb8e   : > { %7686 = vmatpush3.xpose.msk.msra.mxu0 %vm631_vm0, %v10863_v43  ;;  %v2766_v26 = vpop.xlane.xlu1 %2765  ;;  %v3045_v8 = vpop.permute.xlu0 %3044 }
 0xb8f   : > { %v8787_v21 = vpop.eup %8786  ;;  %8796 = vrcp.f32 %v2766_v26  ;;  %3435 = vrot.lane.b32.xlu1 %v12956_v18, %s9231_s10  ;;  %7687 = vmatprep.subr.msk.mxu0 %vm631_vm0, %v3045_v8  ;;  %v12969_v26 = vld [vmem:[#allocation31_spill] sm:$0xff] }
 0xb90   : > { %v8789_v36 = vpop.eup %8788  ;;  %3429 = vrot.lane.b32.xlu0 %v12957_v31, %s9231_s10  ;;  %v2802_v29 = vmul.f32 %v8787_v21, %v10813_v13  ;;  %v12971_v21 = vld [vmem:[#allocation25_spill] sm:$0xff] }
 0xb91   : > { %v2801_v61 = vmul.f32 %v8789_v36, %v10816_v47  ;;  %v12960_v47 = vld [vmem:[#allocation15_spill] sm:$0xff] }
 0xb92   : > { %7688 = vmatpush3.xpose.msk.msra.mxu0 %vm631_vm0, %v3045_v8  ;;  %v3043_v42 = vpop.permute.xlu1 %3042  ;;  %v12970_v8 = vld [vmem:[#allocation28_spill] sm:$0xff] }
 0xb93   : > { %3431 = vrot.lane.b32.xlu1 %v12958_v41, %s9231_s10  ;;  %7640 = vmatprep.mubr.f32.mxu0 %v2801_v61 }
 0xb94   : > { %7689 = vmatprep.subr.msk.mxu0 %vm631_vm0, %v3043_v42  ;;  %3425 = vrot.lane.b32.xlu0 %v12959_v2, %s9231_s10  ;;  %v8791_v43 = vpop.eup %8790 }
 0xb95   : > { %7641 = vmatmul.mubr.f32.gmra.mxu0 %v2802_v29  ;;  %v2804_v7 = vmul.f32 %v8791_v43, %v10819_v25  ;;  %v12968_v25 = vld [vmem:[#allocation33_spill] sm:$0xff] }
 0xb96   : > { %7690 = vmatpush3.xpose.msk.msra.mxu0 %vm631_vm0, %v3043_v42 }
 0xb97   : > { %3427 = vrot.lane.b32.xlu1 %v12960_v47, %s9231_s10 }
 0xb98   : > { %v8793_v15 = vpop.eup %8792  ;;  %3678 = vrot.lane.b32.xlu0 %v12961_v23, %s9232_s5 }
 0xb99   : > { %v8795_v44 = vpop.eup %8794  ;;  %v2803_v13 = vmul.f32 %v8793_v15, %v10822_v63  ;;  %v12967_v63 = vld [vmem:[#allocation35_spill] sm:$0xff] }
 0xb9a   : > { %v2805_v14 = vmul.f32 %v8795_v44, %v12963_v11 }
 0xb9b   : > { %3680 = vrot.lane.b32.xlu1 %v12962_v30, %s9232_s5  ;;  %7643 = vmatprep.mubr.f32.mxu0 %v2803_v13 }
 0xb9c   : > { %v8797_v48 = vpop.eup %8796  ;;  %3676 = vrot.lane.b32.xlu0 %v12964_v49, %s9232_s5  ;;  %7644 = vmatmul.mubr.f32.gmra.mxu0 %v2804_v7 }
 0xb9d   : > { %7646 = vmatprep.mubr.f32.mxu0 %v2805_v14  ;;  %v2806_v50 = vmul.f32 %v8797_v48, %v12965_v20 }
 0xb9f   : > { %3674 = vrot.lane.b32.xlu1 %v12966_v45, %s9232_s5 }
 0xba0   : > { %3672 = vrot.lane.b32.xlu0 %v12967_v63, %s9232_s5  ;;  %7647 = vmatmul.mubr.f32.gmra.mxu0 %v2806_v50 }
 0xba3   : > { %3670 = vrot.lane.b32.xlu1 %v12968_v25, %s9232_s5 }
 0xba4   : > { %3668 = vrot.lane.b32.xlu0 %v12969_v26, %s9232_s5 }
 0xba7   : > { %3666 = vrot.lane.b32.xlu1 %v12970_v8, %s9232_s5 }
 0xba8   : > { %3664 = vrot.lane.b32.xlu0 %v12971_v21, %s9232_s5 }
 0xbbf   : > { %v2772_v36 = vpop.xlane.xlu0 %2771 }
 0xbc0   : > { %8798 = vrcp.f32 %v2772_v36 }
 0xbc3   : > { %v2770_v61 = vpop.xlane.xlu1 %2769  ;;  %v2778_v42 = vpop.xlane.xlu0 %2777 }
 0xbc4   : > { %8800 = vrcp.f32 %v2770_v61 }
 0xbc7   : > { %v2768_v29 = vpop.xlane.xlu1 %2767  ;;  %v2782_v43 = vpop.xlane.xlu0 %2781 }
 0xbc8   : > { %8802 = vrcp.f32 %v2768_v29 }
 0xbcb   : > { %v2774_v15 = vpop.xlane.xlu1 %2773  ;;  %v3041_v44 = vpop.permute.xlu0 %3040 }
 0xbcc   : > { %8804 = vrcp.f32 %v2774_v15  ;;  %7691 = vmatprep.subr.msk.mxu0 %vm631_vm0, %v3041_v44 }
 0xbcd   : > { %7692 = vmatpush3.xpose.msk.msra.mxu0 %vm631_vm0, %v3041_v44  ;;  %8806 = vrcp.f32 %v2778_v42  ;;  %v8799_v11 = vpop.eup %8798 }
 0xbce   : > { %v2809_v44 = vmul.f32 %v8799_v11, %v10843_v51 }
 0xbcf   : > { %v2776_v13 = vpop.xlane.xlu1 %2775  ;;  %v3011_v7 = vpop.permute.xlu0 %3010 }
 0xbd0   : > { %8808 = vrcp.f32 %v2776_v13 }
 0xbd1   : > { %8810 = vrcp.f32 %v2782_v43  ;;  %v8801_v20 = vpop.eup %8800 }
 0xbd2   : > { %v2808_v15 = vmul.f32 %v8801_v20, %v10846_v6 }
 0xbd3   : > { %v2780_v14 = vpop.xlane.xlu1 %2779  ;;  %v3015_v48 = vpop.permute.xlu0 %3014 }
 0xbd4   : > { %8812 = vrcp.f32 %v2780_v14 }
 0xbd5   : > { %v8803_v50 = vpop.eup %8802 }
 0xbd6   : > { %v2807_v36 = vmul.f32 %v8803_v50, %v10852_v53 }
 0xbd7   : > { %v3009_v61 = vpop.permute.xlu1 %3008  ;;  %v3019_v29 = vpop.permute.xlu0 %3018 }
 0xbd8   : > { %7649 = vmatprep.mubr.f32.mxu0 %v2807_v36 }
 0xbd9   : > { %v8805_v42 = vpop.eup %8804  ;;  %7650 = vmatmul.mubr.f32.gmra.mxu0 %v2808_v15 }
 0xbda   : > { %7652 = vmatprep.mubr.f32.mxu0 %v2809_v44  ;;  %v2810_v13 = vmul.f32 %v8805_v42, %v10858_v46  ;;  %v8807_v8 = vpop.eup %8806 }
 0xbdb   : > { %v3013_v43 = vpop.permute.xlu1 %3012  ;;  %v3023_v21 = vpop.permute.xlu0 %3022  ;;  %v2812_v25 = vmul.f32 %v8807_v8, %v10848_v55 }
 0xbdd   : > { %v8809_v26 = vpop.eup %8808  ;;  %7653 = vmatmul.mubr.f32.gmra.mxu0 %v2810_v13 }
 0xbde   : > { %v2811_v14 = vmul.f32 %v8809_v26, %v10861_v40  ;;  %v8811_v6 = vpop.eup %8810 }
 0xbdf   : > { %v3017_v53 = vpop.permute.xlu1 %3016  ;;  %v3027_v50 = vpop.permute.xlu0 %3026  ;;  %v2814_v46 = vmul.f32 %v8811_v6, %v10854_v27 }
 0xbe0   : > { %7655 = vmatprep.mubr.f32.mxu0 %v2811_v14 }
 0xbe1   : > { %v8813_v20 = vpop.eup %8812  ;;  %7656 = vmatmul.mubr.f32.gmra.mxu0 %v2812_v25 }
 0xbe2   : > { %v2813_v51 = vmul.f32 %v8813_v20, %v10866_v24 }
 0xbe3   : > { %v3021_v11 = vpop.permute.xlu1 %3020  ;;  %v3031_v36 = vpop.permute.xlu0 %3030 }
 0xbe4   : > { %7658 = vmatprep.mubr.f32.mxu0 %v2813_v51 }
 0xbe5   : > { %7659 = vmatmul.mubr.f32.gmra.mxu0 %v2814_v46 }
 0xbe6   : > { %7693 = vmatprep.mubr.msk.f32.mxu0 %vm631_vm0, %v3009_v61 }
 0xbe7   : > { %v3025_v15 = vpop.permute.xlu1 %3024  ;;  %v3035_v40 = vpop.permute.xlu0 %3034 }
 0xbe9   : > { %7694 = vmatmul.mubr.msk.f32.vlgmr.msra.gmra.mxu0 %vm631_vm0, %v3011_v7 }
 0xbea   : > { %7696 = vmatprep.mubr.msk.f32.mxu0 %vm631_vm0, %v3013_v43 }
 0xbeb   : > { %v3029_v55 = vpop.permute.xlu1 %3028  ;;  %v3039_v26 = vpop.permute.xlu0 %3038 }
 0xbed   : > { %7697 = vmatmul.mubr.msk.f32.gmra.mxu0 %vm631_vm0, %v3015_v48 }
 0xbee   : > { %7699 = vmatprep.mubr.msk.f32.mxu0 %vm631_vm0, %v3017_v53 }
 0xbef   : > { %v3033_v24 = vpop.permute.xlu1 %3032  ;;  %v3456_v25 = vpop.permute.xlu0 %3455 }
 0xbf0   : > { %7717 = vmatprep.subr.mxu1 %v3456_v25 }
 0xbf1   : > { %7700 = vmatmul.mubr.msk.f32.gmra.mxu0 %vm631_vm0, %v3019_v29  ;;  %7718 = vmatpush3.msra.mxu1 %v3456_v25 }
 0xbf2   : > { %7702 = vmatprep.mubr.msk.f32.mxu0 %vm631_vm0, %v3021_v11 }
 0xbf3   : > { %v3037_v27 = vpop.permute.xlu1 %3036  ;;  %v3452_v8 = vpop.permute.xlu0 %3451 }
 0xbf5   : > { %7703 = vmatmul.mubr.msk.f32.gmra.mxu0 %vm631_vm0, %v3023_v21 }
 0xbf6   : > { %7705 = vmatprep.mubr.msk.f32.mxu0 %vm631_vm0, %v3025_v15 }
 0xbf7   : > { %v3454_v7 = vpop.permute.xlu1 %3453  ;;  %v3448_v61 = vpop.permute.xlu0 %3447 }
 0xbf8   : > { %7719 = vmatprep.subr.mxu1 %v3454_v7 }
 0xbf9   : > { %7706 = vmatmul.mubr.msk.f32.gmra.mxu0 %vm631_vm0, %v3027_v50  ;;  %7720 = vmatpush3.msra.mxu1 %v3454_v7 }
 0xbfa   : > { %7708 = vmatprep.mubr.msk.f32.mxu0 %vm631_vm0, %v3029_v55  ;;  %7721 = vmatprep.subr.mxu1 %v3452_v8 }
 0xbfb   : > { %v3450_v48 = vpop.permute.xlu1 %3449  ;;  %7722 = vmatpush3.msra.mxu1 %v3452_v8  ;;  %v3442_v29 = vpop.permute.xlu0 %3441 }
 0xbfc   : > { %7723 = vmatprep.subr.mxu1 %v3450_v48 }
 0xbfd   : > { %7709 = vmatmul.mubr.msk.f32.gmra.mxu0 %vm631_vm0, %v3031_v36  ;;  %7724 = vmatpush3.msra.mxu1 %v3450_v48 }
 0xbfe   : > { %7711 = vmatprep.mubr.msk.f32.mxu0 %vm631_vm0, %v3033_v24  ;;  %7725 = vmatprep.subr.mxu1 %v3448_v61 }
 0xbff   : > { %v3446_v21 = vpop.permute.xlu1 %3445  ;;  %7726 = vmatpush3.msra.mxu1 %v3448_v61  ;;  %v3438_v44 = vpop.permute.xlu0 %3437 }
 0xc00   : > { %7727 = vmatprep.subr.mxu1 %v3446_v21 }
 0xc01   : > { %7712 = vmatmul.mubr.msk.f32.gmra.mxu0 %vm631_vm0, %v3035_v40  ;;  %7728 = vmatpush3.msra.mxu1 %v3446_v21 }
 0xc02   : > { %7714 = vmatprep.mubr.msk.f32.mxu0 %vm631_vm0, %v3037_v27 }
 0xc03   : > { %v3444_v42 = vpop.permute.xlu1 %3443  ;;  %v3434_v43 = vpop.permute.xlu0 %3433 }
 0xc04   : > { %7729 = vmatprep.subr.mxu1 %v3444_v42 }
 0xc05   : > { %7715 = vmatmul.mubr.msk.f32.gmra.mxu0 %vm631_vm0, %v3039_v26  ;;  %7730 = vmatpush3.msra.mxu1 %v3444_v42 }
 0xc06   : > { %7731 = vmatprep.subr.mxu1 %v3442_v29 }
 0xc07   : > { %v3440_v13 = vpop.permute.xlu1 %3439  ;;  %7732 = vmatpush3.msra.mxu1 %v3442_v29  ;;  %v3430_v53 = vpop.permute.xlu0 %3429 }
 0xc08   : > { %7733 = vmatprep.subr.mxu1 %v3440_v13 }
 0xc09   : > { %7734 = vmatpush3.msra.mxu1 %v3440_v13 }
 0xc0a   : > { %7735 = vmatprep.subr.mxu1 %v3438_v44 }
 0xc0b   : > { %v3436_v14 = vpop.permute.xlu1 %3435  ;;  %7736 = vmatpush3.msra.mxu1 %v3438_v44  ;;  %v3426_v20 = vpop.permute.xlu0 %3425 }
 0xc0c   : > { %7737 = vmatprep.subr.mxu1 %v3436_v14 }
 0xc0d   : > { %7738 = vmatpush3.msra.mxu1 %v3436_v14  ;;  %v12989_v14 = vld [vmem:[#allocation19_spill] sm:$0xff] }
 0xc0e   : > { %7739 = vmatprep.subr.mxu1 %v3434_v43 }
 0xc0f   : > { %v3432_v50 = vpop.permute.xlu1 %3431  ;;  %7740 = vmatpush3.msra.mxu1 %v3434_v43  ;;  %v12988_v43 = vld [vmem:[#allocation22_spill] sm:$0xff] }
 0xc10   : > { %7741 = vmatprep.subr.mxu1 %v3432_v50 }
 0xc11   : > { %7742 = vmatpush3.msra.mxu1 %v3432_v50 }
 0xc12   : > { %7743 = vmatprep.subr.mxu1 %v3430_v53 }
 0xc13   : > { %v3428_v6 = vpop.permute.xlu1 %3427  ;;  %7744 = vmatpush3.msra.mxu1 %v3430_v53  ;;  %v12990_v53 = vld [vmem:[#allocation16_spill] sm:$0xff] }
 0xc14   : > { %7745 = vmatprep.subr.mxu1 %v3428_v6 }
 0xc15   : > { %7746 = vmatpush3.msra.mxu1 %v3428_v6 }
 0xc16   : > { %7747 = vmatprep.subr.mxu1 %v3426_v20 }
 0xc17   : > { %v11041_v51 = vpop.permute.xlu1 %3680  ;;  %7748 = vmatpush3.msra.mxu1 %v3426_v20 }
 0xc18   : > { %7773 = vmatprep.subr.msk.mxu1 %vm631_vm0, %v11041_v51 }
 0xc1d   : > { %v11045_v11 = vpop.f32.mrf.mxu0 }
 0xc1e   : > { %12972 = vst [vmem:[#allocation87_spill] sm:$0xff] %v11045_v11 }
 0xc1f   : > { %v11047_v36 = vpop.f32.mrf.mxu0 }
 0xc20   : > { %12973 = vst [vmem:[#allocation88_spill] sm:$0xff] %v11047_v36 }
 0xc55   : > { %v11049_v46 = vpop.f32.mrf.mxu0 }
 0xc56   : > { %12974 = vst [vmem:[#allocation89_spill] sm:$0xff] %v11049_v46 }
 0xc57   : > { %v11051_v15 = vpop.f32.mrf.mxu0 }
 0xc58   : > { %12975 = vst [vmem:[#allocation90_spill] sm:$0xff] %v11051_v15  ;;  %v11120_v15 = vpop.permute.xlu0 %3678 }
 0xc5c   : > { %v11053_v40 = vpop.f32.mrf.mxu0 }
 0xc5d   : > { %12976 = vst [vmem:[#allocation91_spill] sm:$0xff] %v11053_v40 }
 0xc5e   : > { %v11055_v55 = vpop.f32.mrf.mxu0 }
 0xc5f   : > { %12977 = vst [vmem:[#allocation92_spill] sm:$0xff] %v11055_v55 }
 0xc60   : > { %v11057_v26 = vpop.f32.mrf.mxu0 }
 0xc61   : > { %12978 = vst [vmem:[#allocation93_spill] sm:$0xff] %v11057_v26 }
 0xc62   : > { %v11059_v24 = vpop.f32.mrf.mxu0 }
 0xc63   : > { %12979 = vst [vmem:[#allocation94_spill] sm:$0xff] %v11059_v24 }
 0xc99   : > { %v11061_v25 = vpop.f32.mrf.mxu0 }
 0xc9a   : > { %12980 = vst [vmem:[#allocation95_spill] sm:$0xff] %v11061_v25  ;;  %v11122_v25 = vpop.permute.xlu0 %3676 }
 0xc9b   : > { %v11063_v27 = vpop.f32.mrf.mxu0 }
 0xc9c   : > { %12981 = vst [vmem:[#allocation96_spill] sm:$0xff] %v11063_v27  ;;  %v11126_v27 = vpop.permute.xlu1 %3674 }
 0xc9d   : > { %v11065_v8 = vpop.f32.mrf.mxu0 }
 0xc9e   : > { %12982 = vst [vmem:[#allocation97_spill] sm:$0xff] %v11065_v8  ;;  %v11124_v11 = vpop.permute.xlu0 %3672 }
 0xc9f   : > { %v11067_v7 = vpop.f32.mrf.mxu0 }
 0xca0   : > { %12983 = vst [vmem:[#allocation98_spill] sm:$0xff] %v11067_v7  ;;  %v12991_v7 = vld [vmem:[#allocation14_spill] sm:$0xff] }
 0xca1   : > { %v11069_v61 = vpop.f32.mrf.mxu0 }
 0xca2   : > { %12984 = vst [vmem:[#allocation99_spill] sm:$0xff] %v11069_v61  ;;  %v11128_v36 = vpop.permute.xlu0 %3668 }
 0xca3   : > { %v11071_v48 = vpop.f32.mrf.mxu0 }
 0xca4   : > { %12985 = vst [vmem:[#allocation100_spill] sm:$0xff] %v11071_v48 }
 0xca5   : > { %v11073_v29 = vpop.f32.mrf.mxu0 }
 0xca6   : > { %12986 = vst [vmem:[#allocation101_spill] sm:$0xff] %v11073_v29 }
 0xca7   : > { %v11075_v21 = vpop.f32.mrf.mxu0 }
 0xca8   : > { %12987 = vst [vmem:[#allocation102_spill] sm:$0xff] %v11075_v21 }
 0xca9   : > { %v7695_v42 = vpop.f32.mrf.mxu0 }
 0xcaa   : > { %3283 = vmax.xlane.f32.xlu0 %v7695_v42 }
 0xcab   : > { %v3202_v13 = vpop.f32.mrf.mxu0 }
 0xcac   : > { %3281 = vmax.xlane.f32.xlu1 %v3202_v13 }
 0xcad   : > { %v7698_v50 = vpop.f32.mrf.mxu0 }
 0xcaf   : > { %v3212_v6 = vpop.f32.mrf.mxu0 }
 0xcb1   : > { %v7701_v20 = vpop.f32.mrf.mxu0 }
 0xcb3   : > { %v11085_v29 = vpop.f32.mrf.mxu0 }
 0xcb5   : > { %v11087_v26 = vpop.f32.mrf.mxu0 }
 0xcb7   : > { %v11089_v44 = vpop.f32.mrf.mxu0 }
 0xcb9   : > { %v11091_v24 = vpop.f32.mrf.mxu0 }
 0xcbb   : > { %v11093_v21 = vpop.f32.mrf.mxu0 }
 0xcbd   : > { %3662 = vrot.lane.b32.xlu1 %v12988_v43, %s9232_s5  ;;  %v11095_v61 = vpop.f32.mrf.mxu0 }
 0xcbf   : > { %v11099_v40 = vpop.f32.mrf.mxu0 }
 0xcc0   : > { %3660 = vrot.lane.b32.xlu0 %v12989_v14, %s9232_s5  ;;  %v11132_v14 = vpop.permute.xlu0 %3664 }
 0xcc1   : > { %v11103_v48 = vpop.f32.mrf.mxu0 }
 0xcc3   : > { %v11107_v55 = vpop.f32.mrf.mxu0 }
 0xcc4   : > { %3658 = vrot.lane.b32.xlu0 %v12990_v53, %s9232_s5  ;;  %v11130_v53 = vpop.permute.xlu1 %3670 }
 0xcc5   : > { %v11111_v8 = vpop.f32.mrf.mxu0 }
 0xcc7   : > { %v11115_v46 = vpop.f32.mrf.mxu0 }
 0xcc8   : > { %v11134_v43 = vpop.permute.xlu1 %3666 }
 0xce1   : > { %3287 = vmax.xlane.f32.xlu1 %v7698_v50 }
 0xce3   : > { %3285 = vmax.xlane.f32.xlu0 %v3212_v6 }
 0xce5   : > { %3291 = vmax.xlane.f32.xlu1 %v7701_v20 }
 0xce7   : > { %3289 = vmax.xlane.f32.xlu0 %v11085_v29 }
 0xce9   : > { %3295 = vmax.xlane.f32.xlu1 %v11087_v26 }
 0xceb   : > { %3293 = vmax.xlane.f32.xlu0 %v11089_v44 }
 0xced   : > { %3299 = vmax.xlane.f32.xlu1 %v11091_v24 }
 0xcef   : > { %3297 = vmax.xlane.f32.xlu0 %v11093_v21 }
 0xcf1   : > { %3303 = vmax.xlane.f32.xlu1 %v11095_v61 }
 0xcf3   : > { %3301 = vmax.xlane.f32.xlu0 %v11099_v40 }
 0xcf5   : > { %3307 = vmax.xlane.f32.xlu1 %v11103_v48 }
 0xcf7   : > { %3305 = vmax.xlane.f32.xlu0 %v11107_v55 }
 0xcf9   : > { %3311 = vmax.xlane.f32.xlu1 %v11111_v8 }
 0xcfb   : > { %3309 = vmax.xlane.f32.xlu0 %v11115_v46 }
 0xd11   : > { %3656 = vrot.lane.b32.xlu0 %v12991_v7, %s9232_s5 }
 0xd33   : > { %v3284_v63 = vpop.xlane.xlu0 %3283 }
 0xd34   : > { %v3314_v45 = vsub.f32 %v7695_v42, %v3284_v63 }
 0xd35   : > { %v3282_v49 = vpop.xlane.xlu1 %3281 }
 0xd36   : > { %v3331_v7 = vmul.f32 1.442695, %v3314_v45  ;;  %v3313_v30 = vsub.f32 %v3202_v13, %v3282_v49 }
 0xd37   : > { %v11142_v41 = vpop.permute.xlu0 %3660 }
 0xd38   : > { %8814 = vpow2.f32 %v3331_v7  ;;  %v3329_v23 = vmul.f32 1.442695, %v3313_v30 }
 0xd39   : > { %v11144_v31 = vpop.permute.xlu1 %3662 }
 0xd3a   : > { %8816 = vpow2.f32 %v3329_v23 }
 0xd3b   : > { %v11146_v18 = vpop.permute.xlu0 %3658 }
 0xd3c   : > { %12992 = vst [vmem:[#allocation103_spill] sm:$0xff] %v11146_v18 }
 0xd45   : > { %v11136_v47 = vpop.eup %8814 }
 0xd46   : > { %3363 = vadd.xlane.f32.xlu0 %v11136_v47 }
 0xd47   : > { %v11139_v2 = vpop.eup %8816 }
 0xd48   : > { %3361 = vadd.xlane.f32.xlu1 %v11139_v2 }
 0xd6a   : > { %v3288_v63 = vpop.xlane.xlu1 %3287 }
 0xd6b   : > { %v3316_v45 = vsub.f32 %v7698_v50, %v3288_v63 }
 0xd6c   : > { %v3286_v49 = vpop.xlane.xlu0 %3285 }
 0xd6d   : > { %v3335_v7 = vmul.f32 1.442695, %v3316_v45  ;;  %v3315_v30 = vsub.f32 %v3212_v6, %v3286_v49 }
 0xd6e   : > { %v3292_v23 = vpop.xlane.xlu1 %3291 }
 0xd6f   : > { %8818 = vpow2.f32 %v3335_v7  ;;  %v3333_v42 = vmul.f32 1.442695, %v3315_v30  ;;  %v3318_v13 = vsub.f32 %v7701_v20, %v3292_v23 }
 0xd70   : > { %v3290_v0 = vpop.xlane.xlu0 %3289 }
 0xd71   : > { %8820 = vpow2.f32 %v3333_v42  ;;  %v3339_v9 = vmul.f32 1.442695, %v3318_v13  ;;  %v3317_v37 = vsub.f32 %v11085_v29, %v3290_v0  ;;  %v12995_v0 = vld [vmem:[#allocation12_spill] sm:$0xff] }
 0xd72   : > { %v3296_v34 = vpop.xlane.xlu1 %3295 }
 0xd73   : > { %v3337_v10 = vmul.f32 1.442695, %v3317_v37  ;;  %8822 = vpow2.f32 %v3339_v9  ;;  %v3320_v18 = vsub.f32 %v11087_v26, %v3296_v34  ;;  %v12996_v26 = vld [vmem:[#allocation13_spill] sm:$0xff] }
 0xd74   : > { %v3294_v28 = vpop.xlane.xlu0 %3293 }
 0xd75   : > { %v3319_v50 = vsub.f32 %v11089_v44, %v3294_v28  ;;  %8824 = vpow2.f32 %v3337_v10  ;;  %v3343_v6 = vmul.f32 1.442695, %v3320_v18 }
 0xd76   : > { %v3300_v9 = vpop.xlane.xlu1 %3299 }
 0xd77   : > { %v3341_v63 = vmul.f32 1.442695, %v3319_v50  ;;  %v3322_v30 = vsub.f32 %v11091_v24, %v3300_v9 }
 0xd78   : > { %v3298_v18 = vpop.xlane.xlu0 %3297 }
 0xd79   : > { %8826 = vpow2.f32 %v3341_v63  ;;  %v3347_v50 = vmul.f32 1.442695, %v3322_v30  ;;  %v3321_v63 = vsub.f32 %v11093_v21, %v3298_v18 }
 0xd7a   : > { %8828 = vpow2.f32 %v3343_v6  ;;  %v3304_v29 = vpop.xlane.xlu1 %3303 }
 0xd7c   : > { %v11151_v45 = vpop.eup %8818  ;;  %v3302_v44 = vpop.xlane.xlu0 %3301 }
 0xd7d   : > { %3367 = vadd.xlane.f32.xlu0 %v11151_v45  ;;  %v3323_v7 = vsub.f32 %v11099_v40, %v3302_v44 }
 0xd7e   : > { %v11154_v20 = vpop.eup %8820  ;;  %v3308_v49 = vpop.xlane.xlu1 %3307 }
 0xd7f   : > { %3365 = vadd.xlane.f32.xlu1 %v11154_v20  ;;  %v3349_v23 = vmul.f32 1.442695, %v3323_v7  ;;  %v3326_v42 = vsub.f32 %v11103_v48, %v3308_v49 }
 0xd80   : > { %v11157_v37 = vpop.eup %8822 }
 0xd81   : > { %8830 = vpow2.f32 %v3349_v23  ;;  %v3355_v6 = vmul.f32 1.442695, %v3326_v42 }
 0xd82   : > { %v11160_v34 = vpop.eup %8824  ;;  %v3312_v13 = vpop.xlane.xlu1 %3311  ;;  %8832 = vpow2.f32 %v3347_v50 }
 0xd83   : > { %3371 = vadd.xlane.f32.xlu1 %v11157_v37  ;;  %8834 = vpow2.f32 %v3355_v6  ;;  %v13004_v6 = vld [vmem:[#allocation21_spill] sm:$0xff] }
 0xd86   : > { %v11162_v28 = vpop.eup %8826 }
 0xd87   : > { %12993 = vst [vmem:[#allocation104_spill] sm:$0xff] %v11162_v28  ;;  %3369 = vadd.xlane.f32.xlu1 %v11160_v34  ;;  %3373 = vadd.xlane.f32.xlu0 %v11162_v28  ;;  %v11166_v10 = vpop.eup %8828  ;;  %v3324_v28 = vsub.f32 %v11095_v61, %v3304_v29 }
 0xd88   : > { %12994 = vst [vmem:[#allocation105_spill] sm:$0xff] %v11166_v10 }
 0xd89   : > { %v3351_v24 = vmul.f32 1.442695, %v3324_v28 }
 0xd8b   : > { %3375 = vadd.xlane.f32.xlu1 %v11166_v10  ;;  %v3306_v10 = vpop.xlane.xlu0 %3305 }
 0xd8c   : > { %v3325_v9 = vsub.f32 %v11107_v55, %v3306_v10 }
 0xd8e   : > { %v3353_v44 = vmul.f32 1.442695, %v3325_v9  ;;  %v11181_v18 = vpop.eup %8830 }
 0xd8f   : > { %v3310_v48 = vpop.xlane.xlu0 %3309 }
 0xd90   : > { %v3327_v21 = vsub.f32 %v11115_v46, %v3310_v48 }
 0xd92   : > { %v3357_v61 = vmul.f32 1.442695, %v3327_v21 }
 0xd9c   : > { %3652 = vrot.lane.b32.xlu1 %v12995_v0, %s9232_s5  ;;  %v3328_v0 = vsub.f32 %v11111_v8, %v3312_v13  ;;  %v11184_v8 = vpop.eup %8832 }
 0xd9d   : > { %3654 = vrot.lane.b32.xlu0 %v12996_v26, %s9232_s5  ;;  %v3345_v26 = vmul.f32 1.442695, %v3321_v63  ;;  %v11186_v29 = vpop.eup %8834 }
 0xd9e   : > { %v3359_v40 = vmul.f32 1.442695, %v3328_v0  ;;  %v11201_v0 = vpop.permute.xlu0 %3656 }
 0xd9f   : > { %8836 = vpow2.f32 %v3345_v26 }
 0xda0   : > { %8838 = vpow2.f32 %v3359_v40 }
 0xda1   : > { %8840 = vpow2.f32 %v3351_v24  ;;  %v13005_v24 = vld [vmem:[#allocation20_spill] sm:$0xff] }
 0xda2   : > { %8842 = vpow2.f32 %v3353_v44  ;;  %v13006_v44 = vld [vmem:[#allocation18_spill] sm:$0xff] }
 0xda3   : > { %8844 = vpow2.f32 %v3357_v61  ;;  %v13007_v61 = vld [vmem:[#allocation17_spill] sm:$0xff] }
 0xdac   : > { %v11190_v55 = vpop.eup %8836 }
 0xdad   : > { %v11192_v28 = vpop.eup %8838 }
 0xdae   : > { %v11196_v46 = vpop.eup %8840 }
 0xdaf   : > { %v11199_v10 = vpop.eup %8842 }
 0xdb0   : > { %v11204_v26 = vpop.eup %8844 }
 0xdbc   : > { %3381 = vadd.xlane.f32.xlu0 %v11181_v18 }
 0xdc0   : > { %3379 = vadd.xlane.f32.xlu1 %v11184_v8  ;;  %3387 = vadd.xlane.f32.xlu0 %v11186_v29 }
 0xdc4   : > { %3377 = vadd.xlane.f32.xlu1 %v11190_v55  ;;  %3391 = vadd.xlane.f32.xlu0 %v11192_v28 }
 0xdc8   : > { %3383 = vadd.xlane.f32.xlu1 %v11196_v46 }
 0xdcc   : > { %3385 = vadd.xlane.f32.xlu1 %v11199_v10 }
 0xdcf   : > { %v3364_v49 = vpop.xlane.xlu0 %3363 }
 0xdd0   : > { %3389 = vadd.xlane.f32.xlu1 %v11204_v26  ;;  %8846 = vrcp.f32 %v3364_v49 }
 0xdd1   : > { %v3362_v7 = vpop.xlane.xlu1 %3361 }
 0xdd2   : > { %8848 = vrcp.f32 %v3362_v7  ;;  %v13009_v7 = vld [vmem:[#allocation39_spill] sm:$0xff] }
 0xdda   : > { %3650 = vrot.lane.b32.xlu0 %v9450_v4, %s9232_s5 }
 0xddd   : > { %v8847_v30 = vpop.eup %8846 }
 0xdde   : > { %3620 = vrot.lane.b32.xlu0 %v12812_v16, %s9232_s5  ;;  %v3410_v13 = vmul.f32 %v8847_v30, %v11136_v47 }
 0xddf   : > { %v8849_v23 = vpop.eup %8848 }
 0xde0   : > { %v3409_v42 = vmul.f32 %v8849_v23, %v11139_v2 }
 0xde1   : > { %3618 = vrot.lane.b32.xlu1 %v9448_v3, %s9232_s5 }
 0xde2   : > { %7749 = vmatprep.mubr.f32.mxu1 %v3409_v42  ;;  %3624 = vrot.lane.b32.xlu0 %v9665_v52, %s9232_s5  ;;  %v13010_v42 = vld [vmem:[#allocation40_spill] sm:$0xff] }
 0xde3   : > { %7750 = vmatmul.mubr.f32.vlgmr.msra.gmra.mxu1 %v3410_v13  ;;  %v13011_v13 = vld [vmem:[#allocation104_spill] sm:$0xff] }
 0xde4   : > { %7774 = vmatpush3.xpose.msk.msra.mxu1 %vm631_vm0, %v11041_v51  ;;  %v12997_v51 = vld [vmem:[#allocation32_spill] sm:$0xff] }
 0xde5   : > { %7775 = vmatprep.subr.msk.mxu1 %vm631_vm0, %v11120_v15  ;;  %3622 = vrot.lane.b32.xlu1 %v12813_v32, %s9232_s5 }
 0xde6   : > { %3628 = vrot.lane.b32.xlu0 %v9675_v54, %s9232_s5 }
 0xde8   : > { %7776 = vmatpush3.xpose.msk.msra.mxu1 %vm631_vm0, %v11120_v15  ;;  %v12999_v15 = vld [vmem:[#allocation103_spill] sm:$0xff] }
 0xde9   : > { %7777 = vmatprep.subr.msk.mxu1 %vm631_vm0, %v11122_v25  ;;  %3626 = vrot.lane.b32.xlu1 %v12814_v5, %s9232_s5 }
 0xdea   : > { %3632 = vrot.lane.b32.xlu0 %v9685_v56, %s9232_s5 }
 0xdec   : > { %7778 = vmatpush3.xpose.msk.msra.mxu1 %vm631_vm0, %v11122_v25  ;;  %v13001_v25 = vld [vmem:[#allocation26_spill] sm:$0xff] }
 0xded   : > { %7779 = vmatprep.subr.msk.mxu1 %vm631_vm0, %v11126_v27  ;;  %3630 = vrot.lane.b32.xlu1 %v12815_v22, %s9232_s5 }
 0xdee   : > { %3636 = vrot.lane.b32.xlu0 %v9695_v58, %s9232_s5 }
 0xdf0   : > { %7780 = vmatpush3.xpose.msk.msra.mxu1 %vm631_vm0, %v11126_v27 }
 0xdf1   : > { %7781 = vmatprep.subr.msk.mxu1 %vm631_vm0, %v11124_v11  ;;  %3634 = vrot.lane.b32.xlu1 %v12816_v38, %s9232_s5 }
 0xdf2   : > { %3640 = vrot.lane.b32.xlu0 %v9705_v60, %s9232_s5 }
 0xdf4   : > { %7782 = vmatpush3.xpose.msk.msra.mxu1 %vm631_vm0, %v11124_v11  ;;  %v12998_v11 = vld [vmem:[#allocation29_spill] sm:$0xff] }
 0xdf5   : > { %7783 = vmatprep.subr.msk.mxu1 %vm631_vm0, %v11130_v53  ;;  %3638 = vrot.lane.b32.xlu1 %v12817_v19, %s9232_s5 }
 0xdf6   : > { %3644 = vrot.lane.b32.xlu0 %v9715_v62, %s9232_s5 }
 0xdf8   : > { %7784 = vmatpush3.xpose.msk.msra.mxu1 %vm631_vm0, %v11130_v53 }
 0xdf9   : > { %7785 = vmatprep.subr.msk.mxu1 %vm631_vm0, %v11128_v36  ;;  %3642 = vrot.lane.b32.xlu1 %v12818_v33, %s9232_s5 }
 0xdfa   : > { %3648 = vrot.lane.b32.xlu0 %v9725_v1, %s9232_s5 }
 0xdfc   : > { %7786 = vmatpush3.xpose.msk.msra.mxu1 %vm631_vm0, %v11128_v36 }
 0xdfd   : > { %7787 = vmatprep.subr.msk.mxu1 %vm631_vm0, %v11134_v43  ;;  %3646 = vrot.lane.b32.xlu1 %v12819_v59, %s9232_s5 }
 0xdfe   : > { %4065 = vrot.lane.b32.xlu0 %v9526_v39, %s9232_s5 }
 0xe00   : > { %7788 = vmatpush3.xpose.msk.msra.mxu1 %vm631_vm0, %v11134_v43 }
 0xe01   : > { %7789 = vmatprep.subr.msk.mxu1 %vm631_vm0, %v11132_v14  ;;  %4063 = vrot.lane.b32.xlu1 %v12820_v57, %s9232_s5 }
 0xe02   : > { %4061 = vrot.lane.b32.xlu0 %v9516_v35, %s9232_s5 }
 0xe04   : > { %7790 = vmatpush3.xpose.msk.msra.mxu1 %vm631_vm0, %v11132_v14  ;;  %v13003_v14 = vld [vmem:[#allocation23_spill] sm:$0xff] }
 0xe05   : > { %7791 = vmatprep.subr.msk.mxu1 %vm631_vm0, %v11144_v31  ;;  %4059 = vrot.lane.b32.xlu1 %v12821_v12, %s9232_s5 }
 0xe06   : > { %4057 = vrot.lane.b32.xlu0 %v12853_v17, %s9232_s5  ;;  %v3368_v2 = vpop.xlane.xlu0 %3367 }
 0xe07   : > { %8850 = vrcp.f32 %v3368_v2 }
 0xe08   : > { %7792 = vmatpush3.xpose.msk.msra.mxu1 %vm631_vm0, %v11144_v31  ;;  %v3366_v47 = vpop.xlane.xlu1 %3365  ;;  %v13000_v31 = vld [vmem:[#allocation27_spill] sm:$0xff] }
 0xe09   : > { %8852 = vrcp.f32 %v3366_v47  ;;  %7793 = vmatprep.subr.msk.mxu1 %vm631_vm0, %v11142_v41  ;;  %4055 = vrot.lane.b32.xlu1 %v12997_v51, %s9232_s5 }
 0xe0a   : > { %4051 = vrot.lane.b32.xlu0 %v12998_v11, %s9232_s5 }
 0xe0c   : > { %7794 = vmatpush3.xpose.msk.msra.mxu1 %vm631_vm0, %v11142_v41  ;;  %v3372_v36 = vpop.xlane.xlu1 %3371  ;;  %v13002_v41 = vld [vmem:[#allocation24_spill] sm:$0xff] }
 0xe0d   : > { %7795 = vmatprep.subr.msk.mxu1 %vm631_vm0, %v12999_v15  ;;  %4053 = vrot.lane.b32.xlu1 %v13000_v31, %s9232_s5  ;;  %8854 = vrcp.f32 %v3372_v36  ;;  %v13012_v36 = vld [vmem:[#allocation38_spill] sm:$0xff] }
 0xe0e   : > { %4047 = vrot.lane.b32.xlu0 %v13001_v25, %s9232_s5 }
 0xe10   : > { %7796 = vmatpush3.xpose.msk.msra.mxu1 %vm631_vm0, %v12999_v15  ;;  %v3370_v27 = vpop.xlane.xlu1 %3369  ;;  %v3374_v43 = vpop.xlane.xlu0 %3373  ;;  %v13013_v15 = vld [vmem:[#allocation105_spill] sm:$0xff] }
 0xe11   : > { %8856 = vrcp.f32 %v3370_v27  ;;  %7797 = vmatprep.subr.msk.mxu1 %vm631_vm0, %v11201_v0  ;;  %4049 = vrot.lane.b32.xlu1 %v13002_v41, %s9232_s5 }
 0xe12   : > { %8858 = vrcp.f32 %v3374_v43  ;;  %4043 = vrot.lane.b32.xlu0 %v13003_v14, %s9232_s5  ;;  %v13014_v43 = vld [vmem:[#allocation37_spill] sm:$0xff] }
 0xe14   : > { %7798 = vmatpush3.xpose.msk.msra.mxu1 %vm631_vm0, %v11201_v0  ;;  %v3376_v53 = vpop.xlane.xlu1 %3375  ;;  %v3655_v50 = vpop.permute.xlu0 %3654 }
 0xe15   : > { %v8851_v63 = vpop.eup %8850  ;;  %8860 = vrcp.f32 %v3376_v53  ;;  %4045 = vrot.lane.b32.xlu1 %v13004_v6, %s9232_s5  ;;  %7799 = vmatprep.subr.msk.mxu1 %vm631_vm0, %v3655_v50  ;;  %v13017_v53 = vld [vmem:[#allocation31_spill] sm:$0xff] }
 0xe16   : > { %v8853_v40 = vpop.eup %8852  ;;  %4039 = vrot.lane.b32.xlu0 %v13005_v24, %s9232_s5  ;;  %v3412_v21 = vmul.f32 %v8851_v63, %v11151_v45  ;;  %v13019_v63 = vld [vmem:[#allocation25_spill] sm:$0xff] }
 0xe17   : > { %v3411_v9 = vmul.f32 %v8853_v40, %v11154_v20  ;;  %v13008_v20 = vld [vmem:[#allocation15_spill] sm:$0xff] }
 0xe18   : > { %7800 = vmatpush3.xpose.msk.msra.mxu1 %vm631_vm0, %v3655_v50  ;;  %v3653_v48 = vpop.permute.xlu1 %3652  ;;  %v13018_v50 = vld [vmem:[#allocation28_spill] sm:$0xff] }
 0xe19   : > { %4041 = vrot.lane.b32.xlu1 %v13006_v44, %s9232_s5  ;;  %7752 = vmatprep.mubr.f32.mxu1 %v3411_v9 }
 0xe1a   : > { %7801 = vmatprep.subr.msk.mxu1 %vm631_vm0, %v3653_v48  ;;  %4035 = vrot.lane.b32.xlu0 %v13007_v61, %s9232_s5  ;;  %v8855_v0 = vpop.eup %8854 }
 0xe1b   : > { %7753 = vmatmul.mubr.f32.gmra.mxu1 %v3412_v21  ;;  %v3414_v23 = vmul.f32 %v8855_v0, %v11157_v37  ;;  %v13016_v37 = vld [vmem:[#allocation33_spill] sm:$0xff] }
 0xe1c   : > { %7802 = vmatpush3.xpose.msk.msra.mxu1 %vm631_vm0, %v3653_v48 }
 0xe1d   : > { %4037 = vrot.lane.b32.xlu1 %v13008_v20, %s9232_s5 }
 0xe1e   : > { %v8857_v49 = vpop.eup %8856  ;;  %4288 = vrot.lane.b32.xlu0 %v13009_v7, %s9233_s7 }
 0xe1f   : > { %v8859_v30 = vpop.eup %8858  ;;  %v3413_v45 = vmul.f32 %v8857_v49, %v11160_v34  ;;  %v13015_v34 = vld [vmem:[#allocation35_spill] sm:$0xff] }
 0xe20   : > { %v3415_v2 = vmul.f32 %v8859_v30, %v13011_v13 }
 0xe21   : > { %4290 = vrot.lane.b32.xlu1 %v13010_v42, %s9233_s7  ;;  %7755 = vmatprep.mubr.f32.mxu1 %v3413_v45 }
 0xe22   : > { %v8861_v47 = vpop.eup %8860  ;;  %4286 = vrot.lane.b32.xlu0 %v13012_v36, %s9233_s7  ;;  %7756 = vmatmul.mubr.f32.gmra.mxu1 %v3414_v23 }
 0xe23   : > { %7758 = vmatprep.mubr.f32.mxu1 %v3415_v2  ;;  %v3416_v27 = vmul.f32 %v8861_v47, %v13013_v15 }
 0xe25   : > { %4284 = vrot.lane.b32.xlu1 %v13014_v43, %s9233_s7 }
 0xe26   : > { %4282 = vrot.lane.b32.xlu0 %v13015_v34, %s9233_s7  ;;  %7759 = vmatmul.mubr.f32.gmra.mxu1 %v3416_v27 }
 0xe29   : > { %4280 = vrot.lane.b32.xlu1 %v13016_v37, %s9233_s7 }
 0xe2a   : > { %4278 = vrot.lane.b32.xlu0 %v13017_v53, %s9233_s7 }
 0xe2d   : > { %4276 = vrot.lane.b32.xlu1 %v13018_v50, %s9233_s7 }
 0xe2e   : > { %4274 = vrot.lane.b32.xlu0 %v13019_v63, %s9233_s7 }
 0xe45   : > { %v3382_v40 = vpop.xlane.xlu0 %3381 }
 0xe46   : > { %8862 = vrcp.f32 %v3382_v40 }
 0xe49   : > { %v3380_v9 = vpop.xlane.xlu1 %3379  ;;  %v3388_v48 = vpop.xlane.xlu0 %3387 }
 0xe4a   : > { %8864 = vrcp.f32 %v3380_v9 }
 0xe4d   : > { %v3378_v21 = vpop.xlane.xlu1 %3377  ;;  %v3392_v0 = vpop.xlane.xlu0 %3391 }
 0xe4e   : > { %8866 = vrcp.f32 %v3378_v21 }
 0xe51   : > { %v3384_v49 = vpop.xlane.xlu1 %3383  ;;  %v3651_v30 = vpop.permute.xlu0 %3650 }
 0xe52   : > { %8868 = vrcp.f32 %v3384_v49  ;;  %7803 = vmatprep.subr.msk.mxu1 %vm631_vm0, %v3651_v30 }
 0xe53   : > { %7804 = vmatpush3.xpose.msk.msra.mxu1 %vm631_vm0, %v3651_v30  ;;  %8870 = vrcp.f32 %v3388_v48  ;;  %v8863_v13 = vpop.eup %8862 }
 0xe54   : > { %v3419_v30 = vmul.f32 %v8863_v13, %v11181_v18 }
 0xe55   : > { %v3386_v45 = vpop.xlane.xlu1 %3385  ;;  %v3621_v23 = vpop.permute.xlu0 %3620 }
 0xe56   : > { %8872 = vrcp.f32 %v3386_v45 }
 0xe57   : > { %8874 = vrcp.f32 %v3392_v0  ;;  %v8865_v15 = vpop.eup %8864 }
 0xe58   : > { %v3418_v49 = vmul.f32 %v8865_v15, %v11184_v8 }
 0xe59   : > { %v3390_v2 = vpop.xlane.xlu1 %3389  ;;  %v3625_v47 = vpop.permute.xlu0 %3624 }
 0xe5a   : > { %8876 = vrcp.f32 %v3390_v2 }
 0xe5b   : > { %v8867_v27 = vpop.eup %8866 }
 0xe5c   : > { %v3417_v40 = vmul.f32 %v8867_v27, %v11190_v55 }
 0xe5d   : > { %v3619_v9 = vpop.permute.xlu1 %3618  ;;  %v3629_v21 = vpop.permute.xlu0 %3628 }
 0xe5e   : > { %7761 = vmatprep.mubr.f32.mxu1 %v3417_v40 }
 0xe5f   : > { %v8869_v48 = vpop.eup %8868  ;;  %7762 = vmatmul.mubr.f32.gmra.mxu1 %v3418_v49 }
 0xe60   : > { %7764 = vmatprep.mubr.f32.mxu1 %v3419_v30  ;;  %v3420_v45 = vmul.f32 %v8869_v48, %v11196_v46  ;;  %v8871_v50 = vpop.eup %8870 }
 0xe61   : > { %v3623_v0 = vpop.permute.xlu1 %3622  ;;  %v3633_v63 = vpop.permute.xlu0 %3632  ;;  %v3422_v37 = vmul.f32 %v8871_v50, %v11186_v29 }
 0xe63   : > { %v8873_v53 = vpop.eup %8872  ;;  %7765 = vmatmul.mubr.f32.gmra.mxu1 %v3420_v45 }
 0xe64   : > { %v3421_v2 = vmul.f32 %v8873_v53, %v11199_v10  ;;  %v8875_v8 = vpop.eup %8874 }
 0xe65   : > { %v3627_v55 = vpop.permute.xlu1 %3626  ;;  %v3637_v27 = vpop.permute.xlu0 %3636  ;;  %v3424_v46 = vmul.f32 %v8875_v8, %v11192_v28 }
 0xe66   : > { %7767 = vmatprep.mubr.f32.mxu1 %v3421_v2 }
 0xe67   : > { %v8877_v15 = vpop.eup %8876  ;;  %7768 = vmatmul.mubr.f32.gmra.mxu1 %v3422_v37 }
 0xe68   : > { %v3423_v18 = vmul.f32 %v8877_v15, %v11204_v26 }
 0xe69   : > { %v3631_v13 = vpop.permute.xlu1 %3630  ;;  %v3641_v40 = vpop.permute.xlu0 %3640 }
 0xe6a   : > { %7770 = vmatprep.mubr.f32.mxu1 %v3423_v18 }
 0xe6b   : > { %7771 = vmatmul.mubr.f32.gmra.mxu1 %v3424_v46 }
 0xe6c   : > { %7805 = vmatprep.mubr.msk.f32.mxu1 %vm631_vm0, %v3619_v9 }
 0xe6d   : > { %v3635_v49 = vpop.permute.xlu1 %3634  ;;  %v3645_v10 = vpop.permute.xlu0 %3644 }
 0xe6f   : > { %7806 = vmatmul.mubr.msk.f32.vlgmr.msra.gmra.mxu1 %vm631_vm0, %v3621_v23 }
 0xe70   : > { %7808 = vmatprep.mubr.msk.f32.mxu1 %vm631_vm0, %v3623_v0 }
 0xe71   : > { %v3639_v29 = vpop.permute.xlu1 %3638  ;;  %v3649_v53 = vpop.permute.xlu0 %3648 }
 0xe73   : > { %7809 = vmatmul.mubr.msk.f32.gmra.mxu1 %vm631_vm0, %v3625_v47 }
 0xe74   : > { %7811 = vmatprep.mubr.msk.f32.mxu1 %vm631_vm0, %v3627_v55 }
 0xe75   : > { %v3643_v26 = vpop.permute.xlu1 %3642  ;;  %v4066_v37 = vpop.permute.xlu0 %4065 }
 0xe76   : > { %7829 = vmatprep.subr.mxu0 %v4066_v37 }
 0xe77   : > { %7812 = vmatmul.mubr.msk.f32.gmra.mxu1 %vm631_vm0, %v3629_v21  ;;  %7830 = vmatpush3.msra.mxu0 %v4066_v37 }
 0xe78   : > { %7814 = vmatprep.mubr.msk.f32.mxu1 %vm631_vm0, %v3631_v13 }
 0xe79   : > { %v3647_v28 = vpop.permute.xlu1 %3646  ;;  %v4062_v50 = vpop.permute.xlu0 %4061 }
 0xe7b   : > { %7815 = vmatmul.mubr.msk.f32.gmra.mxu1 %vm631_vm0, %v3633_v63 }
 0xe7c   : > { %7817 = vmatprep.mubr.msk.f32.mxu1 %vm631_vm0, %v3635_v49 }
 0xe7d   : > { %v4064_v23 = vpop.permute.xlu1 %4063  ;;  %v4058_v9 = vpop.permute.xlu0 %4057 }
 0xe7e   : > { %7831 = vmatprep.subr.mxu0 %v4064_v23 }
 0xe7f   : > { %7818 = vmatmul.mubr.msk.f32.gmra.mxu1 %vm631_vm0, %v3637_v27  ;;  %7832 = vmatpush3.msra.mxu0 %v4064_v23 }
 0xe80   : > { %7820 = vmatprep.mubr.msk.f32.mxu1 %vm631_vm0, %v3639_v29  ;;  %7833 = vmatprep.subr.mxu0 %v4062_v50 }
 0xe81   : > { %v4060_v47 = vpop.permute.xlu1 %4059  ;;  %7834 = vmatpush3.msra.mxu0 %v4062_v50  ;;  %v4052_v21 = vpop.permute.xlu0 %4051 }
 0xe82   : > { %7835 = vmatprep.subr.mxu0 %v4060_v47 }
 0xe83   : > { %7821 = vmatmul.mubr.msk.f32.gmra.mxu1 %vm631_vm0, %v3641_v40  ;;  %7836 = vmatpush3.msra.mxu0 %v4060_v47 }
 0xe84   : > { %7823 = vmatprep.mubr.msk.f32.mxu1 %vm631_vm0, %v3643_v26  ;;  %7837 = vmatprep.subr.mxu0 %v4058_v9 }
 0xe85   : > { %v4056_v63 = vpop.permute.xlu1 %4055  ;;  %7838 = vmatpush3.msra.mxu0 %v4058_v9  ;;  %v4048_v30 = vpop.permute.xlu0 %4047 }
 0xe86   : > { %7839 = vmatprep.subr.mxu0 %v4056_v63 }
 0xe87   : > { %7824 = vmatmul.mubr.msk.f32.gmra.mxu1 %vm631_vm0, %v3645_v10  ;;  %7840 = vmatpush3.msra.mxu0 %v4056_v63 }
 0xe88   : > { %7826 = vmatprep.mubr.msk.f32.mxu1 %vm631_vm0, %v3647_v28 }
 0xe89   : > { %v4054_v48 = vpop.permute.xlu1 %4053  ;;  %v4044_v0 = vpop.permute.xlu0 %4043 }
 0xe8a   : > { %7841 = vmatprep.subr.mxu0 %v4054_v48 }
 0xe8b   : > { %7827 = vmatmul.mubr.msk.f32.gmra.mxu1 %vm631_vm0, %v3649_v53  ;;  %7842 = vmatpush3.msra.mxu0 %v4054_v48 }
 0xe8c   : > { %7843 = vmatprep.subr.mxu0 %v4052_v21 }
 0xe8d   : > { %v4050_v45 = vpop.permute.xlu1 %4049  ;;  %7844 = vmatpush3.msra.mxu0 %v4052_v21  ;;  %v4040_v55 = vpop.permute.xlu0 %4039 }
 0xe8e   : > { %7845 = vmatprep.subr.mxu0 %v4050_v45 }
 0xe8f   : > { %7846 = vmatpush3.msra.mxu0 %v4050_v45 }
 0xe90   : > { %7847 = vmatprep.subr.mxu0 %v4048_v30 }
 0xe91   : > { %v4046_v2 = vpop.permute.xlu1 %4045  ;;  %7848 = vmatpush3.msra.mxu0 %v4048_v30  ;;  %v4036_v15 = vpop.permute.xlu0 %4035 }
 0xe92   : > { %7849 = vmatprep.subr.mxu0 %v4046_v2 }
 0xe93   : > { %7850 = vmatpush3.msra.mxu0 %v4046_v2  ;;  %v13037_v2 = vld [vmem:[#allocation19_spill] sm:$0xff] }
 0xe94   : > { %7851 = vmatprep.subr.mxu0 %v4044_v0 }
 0xe95   : > { %v4042_v27 = vpop.permute.xlu1 %4041  ;;  %7852 = vmatpush3.msra.mxu0 %v4044_v0  ;;  %v13036_v0 = vld [vmem:[#allocation22_spill] sm:$0xff] }
 0xe96   : > { %7853 = vmatprep.subr.mxu0 %v4042_v27 }
 0xe97   : > { %7854 = vmatpush3.msra.mxu0 %v4042_v27 }
 0xe98   : > { %7855 = vmatprep.subr.mxu0 %v4040_v55 }
 0xe99   : > { %v4038_v8 = vpop.permute.xlu1 %4037  ;;  %7856 = vmatpush3.msra.mxu0 %v4040_v55  ;;  %v13038_v55 = vld [vmem:[#allocation16_spill] sm:$0xff] }
 0xe9a   : > { %7857 = vmatprep.subr.mxu0 %v4038_v8 }
 0xe9b   : > { %7858 = vmatpush3.msra.mxu0 %v4038_v8 }
 0xe9c   : > { %7859 = vmatprep.subr.mxu0 %v4036_v15 }
 0xe9d   : > { %v11379_v18 = vpop.permute.xlu1 %4290  ;;  %7860 = vmatpush3.msra.mxu0 %v4036_v15 }
 0xe9e   : > { %7885 = vmatprep.subr.msk.mxu0 %vm631_vm0, %v11379_v18 }
 0xea3   : > { %v11383_v13 = vpop.f32.mrf.mxu1 }
 0xea4   : > { %13020 = vst [vmem:[#allocation103_spill] sm:$0xff] %v11383_v13 }
 0xea5   : > { %v11385_v40 = vpop.f32.mrf.mxu1 }
 0xea6   : > { %13021 = vst [vmem:[#allocation104_spill] sm:$0xff] %v11385_v40 }
 0xedb   : > { %v11387_v46 = vpop.f32.mrf.mxu1 }
 0xedc   : > { %13022 = vst [vmem:[#allocation105_spill] sm:$0xff] %v11387_v46 }
 0xedd   : > { %v11389_v49 = vpop.f32.mrf.mxu1 }
 0xede   : > { %13023 = vst [vmem:[#allocation106_spill] sm:$0xff] %v11389_v49  ;;  %v11458_v49 = vpop.permute.xlu0 %4288 }
 0xee2   : > { %v11391_v10 = vpop.f32.mrf.mxu1 }
 0xee3   : > { %13024 = vst [vmem:[#allocation107_spill] sm:$0xff] %v11391_v10 }
 0xee4   : > { %v11393_v29 = vpop.f32.mrf.mxu1 }
 0xee5   : > { %13025 = vst [vmem:[#allocation108_spill] sm:$0xff] %v11393_v29 }
 0xee6   : > { %v11395_v53 = vpop.f32.mrf.mxu1 }
 0xee7   : > { %13026 = vst [vmem:[#allocation109_spill] sm:$0xff] %v11395_v53 }
 0xee8   : > { %v11397_v26 = vpop.f32.mrf.mxu1 }
 0xee9   : > { %13027 = vst [vmem:[#allocation110_spill] sm:$0xff] %v11397_v26 }
 0xf1f   : > { %v11399_v37 = vpop.f32.mrf.mxu1 }
 0xf20   : > { %13028 = vst [vmem:[#allocation111_spill] sm:$0xff] %v11399_v37  ;;  %v11460_v37 = vpop.permute.xlu0 %4286 }
 0xf21   : > { %v11401_v28 = vpop.f32.mrf.mxu1 }
 0xf22   : > { %13029 = vst [vmem:[#allocation112_spill] sm:$0xff] %v11401_v28  ;;  %v11464_v28 = vpop.permute.xlu1 %4284 }
 0xf23   : > { %v11403_v50 = vpop.f32.mrf.mxu1 }
 0xf24   : > { %13030 = vst [vmem:[#allocation113_spill] sm:$0xff] %v11403_v50  ;;  %v11462_v13 = vpop.permute.xlu0 %4282 }
 0xf25   : > { %v11405_v23 = vpop.f32.mrf.mxu1 }
 0xf26   : > { %13031 = vst [vmem:[#allocation114_spill] sm:$0xff] %v11405_v23  ;;  %v13039_v23 = vld [vmem:[#allocation14_spill] sm:$0xff] }
 0xf27   : > { %v11407_v9 = vpop.f32.mrf.mxu1 }
 0xf28   : > { %13032 = vst [vmem:[#allocation115_spill] sm:$0xff] %v11407_v9  ;;  %v11466_v40 = vpop.permute.xlu0 %4278 }
 0xf29   : > { %v11409_v47 = vpop.f32.mrf.mxu1 }
 0xf2a   : > { %13033 = vst [vmem:[#allocation116_spill] sm:$0xff] %v11409_v47 }
 0xf2b   : > { %v11411_v21 = vpop.f32.mrf.mxu1 }
 0xf2c   : > { %13034 = vst [vmem:[#allocation117_spill] sm:$0xff] %v11411_v21 }
 0xf2d   : > { %v11413_v63 = vpop.f32.mrf.mxu1 }
 0xf2e   : > { %13035 = vst [vmem:[#allocation118_spill] sm:$0xff] %v11413_v63 }
 0xf2f   : > { %v7807_v48 = vpop.f32.mrf.mxu1 }
 0xf30   : > { %3893 = vmax.xlane.f32.xlu0 %v7807_v48 }
 0xf31   : > { %v3812_v45 = vpop.f32.mrf.mxu1 }
 0xf32   : > { %3891 = vmax.xlane.f32.xlu1 %v3812_v45 }
 0xf33   : > { %v7810_v27 = vpop.f32.mrf.mxu1 }
 0xf35   : > { %v3822_v8 = vpop.f32.mrf.mxu1 }
 0xf37   : > { %v7813_v15 = vpop.f32.mrf.mxu1 }
 0xf39   : > { %v11423_v21 = vpop.f32.mrf.mxu1 }
 0xf3b   : > { %v11425_v53 = vpop.f32.mrf.mxu1 }
 0xf3d   : > { %v11427_v30 = vpop.f32.mrf.mxu1 }
 0xf3f   : > { %v11429_v26 = vpop.f32.mrf.mxu1 }
 0xf41   : > { %v11431_v63 = vpop.f32.mrf.mxu1 }
 0xf43   : > { %4272 = vrot.lane.b32.xlu1 %v13036_v0, %s9233_s7  ;;  %v11433_v9 = vpop.f32.mrf.mxu1 }
 0xf45   : > { %v11437_v10 = vpop.f32.mrf.mxu1 }
 0xf46   : > { %4270 = vrot.lane.b32.xlu0 %v13037_v2, %s9233_s7  ;;  %v11470_v2 = vpop.permute.xlu0 %4274 }
 0xf47   : > { %v11441_v47 = vpop.f32.mrf.mxu1 }
 0xf49   : > { %v11445_v29 = vpop.f32.mrf.mxu1 }
 0xf4a   : > { %4268 = vrot.lane.b32.xlu0 %v13038_v55, %s9233_s7  ;;  %v11468_v55 = vpop.permute.xlu1 %4280 }
 0xf4b   : > { %v11449_v50 = vpop.f32.mrf.mxu1 }
 0xf4d   : > { %v11453_v46 = vpop.f32.mrf.mxu1 }
 0xf4e   : > { %v11472_v0 = vpop.permute.xlu1 %4276 }
 0xf67   : > { %3897 = vmax.xlane.f32.xlu1 %v7810_v27 }
 0xf69   : > { %3895 = vmax.xlane.f32.xlu0 %v3822_v8 }
 0xf6b   : > { %3901 = vmax.xlane.f32.xlu1 %v7813_v15 }
 0xf6d   : > { %3899 = vmax.xlane.f32.xlu0 %v11423_v21 }
 0xf6f   : > { %3905 = vmax.xlane.f32.xlu1 %v11425_v53 }
 0xf71   : > { %3903 = vmax.xlane.f32.xlu0 %v11427_v30 }
 0xf73   : > { %3909 = vmax.xlane.f32.xlu1 %v11429_v26 }
 0xf75   : > { %3907 = vmax.xlane.f32.xlu0 %v11431_v63 }
 0xf77   : > { %3913 = vmax.xlane.f32.xlu1 %v11433_v9 }
 0xf79   : > { %3911 = vmax.xlane.f32.xlu0 %v11437_v10 }
 0xf7b   : > { %3917 = vmax.xlane.f32.xlu1 %v11441_v47 }
 0xf7d   : > { %3915 = vmax.xlane.f32.xlu0 %v11445_v29 }
 0xf7f   : > { %3921 = vmax.xlane.f32.xlu1 %v11449_v50 }
 0xf81   : > { %3919 = vmax.xlane.f32.xlu0 %v11453_v46 }
 0xf97   : > { %4266 = vrot.lane.b32.xlu0 %v13039_v23, %s9233_s7 }
 0xfb9   : > { %v3894_v34 = vpop.xlane.xlu0 %3893 }
 0xfba   : > { %v3924_v43 = vsub.f32 %v7807_v48, %v3894_v34 }
 0xfbb   : > { %v3892_v36 = vpop.xlane.xlu1 %3891 }
 0xfbc   : > { %v3941_v23 = vmul.f32 1.442695, %v3924_v43  ;;  %v3923_v42 = vsub.f32 %v3812_v45, %v3892_v36 }
 0xfbd   : > { %v11480_v44 = vpop.permute.xlu0 %4270 }
 0xfbe   : > { %8878 = vpow2.f32 %v3941_v23  ;;  %v3939_v7 = vmul.f32 1.442695, %v3923_v42 }
 0xfbf   : > { %v11482_v24 = vpop.permute.xlu1 %4272 }
 0xfc0   : > { %8880 = vpow2.f32 %v3939_v7 }
 0xfc1   : > { %v11484_v6 = vpop.permute.xlu0 %4268 }
 0xfc2   : > { %13040 = vst [vmem:[#allocation119_spill] sm:$0xff] %v11484_v6 }
 0xfcb   : > { %v11474_v20 = vpop.eup %8878 }
 0xfcc   : > { %3973 = vadd.xlane.f32.xlu0 %v11474_v20 }
 0xfcd   : > { %v11477_v61 = vpop.eup %8880 }
 0xfce   : > { %3971 = vadd.xlane.f32.xlu1 %v11477_v61 }
 0xff0   : > { %v3898_v34 = vpop.xlane.xlu1 %3897 }
 0xff1   : > { %v3926_v43 = vsub.f32 %v7810_v27, %v3898_v34 }
 0xff2   : > { %v3896_v36 = vpop.xlane.xlu0 %3895 }
 0xff3   : > { %v3945_v23 = vmul.f32 1.442695, %v3926_v43  ;;  %v3925_v42 = vsub.f32 %v3822_v8, %v3896_v36 }
 0xff4   : > { %v3902_v7 = vpop.xlane.xlu1 %3901 }
 0xff5   : > { %8882 = vpow2.f32 %v3945_v23  ;;  %v3943_v48 = vmul.f32 1.442695, %v3925_v42  ;;  %v3928_v45 = vsub.f32 %v7813_v15, %v3902_v7 }
 0xff6   : > { %v3900_v14 = vpop.xlane.xlu0 %3899 }
 0xff7   : > { %8884 = vpow2.f32 %v3943_v48  ;;  %v3949_v41 = vmul.f32 1.442695, %v3928_v45  ;;  %v3927_v25 = vsub.f32 %v11423_v21, %v3900_v14  ;;  %v13043_v14 = vld [vmem:[#allocation12_spill] sm:$0xff] }
 0xff8   : > { %v3906_v31 = vpop.xlane.xlu1 %3905 }
 0xff9   : > { %v3947_v11 = vmul.f32 1.442695, %v3927_v25  ;;  %8886 = vpow2.f32 %v3949_v41  ;;  %v3930_v6 = vsub.f32 %v11425_v53, %v3906_v31  ;;  %v13044_v53 = vld [vmem:[#allocation13_spill] sm:$0xff] }
 0xffa   : > { %v3904_v51 = vpop.xlane.xlu0 %3903 }
 0xffb   : > { %v3929_v27 = vsub.f32 %v11427_v30, %v3904_v51  ;;  %8888 = vpow2.f32 %v3947_v11  ;;  %v3953_v8 = vmul.f32 1.442695, %v3930_v6 }
 0xffc   : > { %v3910_v41 = vpop.xlane.xlu1 %3909 }
 0xffd   : > { %v3951_v34 = vmul.f32 1.442695, %v3929_v27  ;;  %v3932_v42 = vsub.f32 %v11429_v26, %v3910_v41 }
 0xffe   : > { %v3908_v6 = vpop.xlane.xlu0 %3907 }
 0xfff   : > { %8890 = vpow2.f32 %v3951_v34  ;;  %v3957_v27 = vmul.f32 1.442695, %v3932_v42  ;;  %v3931_v34 = vsub.f32 %v11431_v63, %v3908_v6 }
0x1000   : > { %8892 = vpow2.f32 %v3953_v8  ;;  %v3914_v21 = vpop.xlane.xlu1 %3913 }
0x1002   : > { %v11489_v43 = vpop.eup %8882  ;;  %v3912_v30 = vpop.xlane.xlu0 %3911 }
0x1003   : > { %3977 = vadd.xlane.f32.xlu0 %v11489_v43  ;;  %v3933_v23 = vsub.f32 %v11437_v10, %v3912_v30 }
0x1004   : > { %v11492_v15 = vpop.eup %8884  ;;  %v3918_v36 = vpop.xlane.xlu1 %3917 }
0x1005   : > { %3975 = vadd.xlane.f32.xlu1 %v11492_v15  ;;  %v3959_v7 = vmul.f32 1.442695, %v3933_v23  ;;  %v3936_v48 = vsub.f32 %v11441_v47, %v3918_v36 }
0x1006   : > { %v11495_v25 = vpop.eup %8886 }
0x1007   : > { %8894 = vpow2.f32 %v3959_v7  ;;  %v3965_v8 = vmul.f32 1.442695, %v3936_v48 }
0x1008   : > { %v11498_v31 = vpop.eup %8888  ;;  %v3922_v45 = vpop.xlane.xlu1 %3921  ;;  %8896 = vpow2.f32 %v3957_v27 }
0x1009   : > { %3981 = vadd.xlane.f32.xlu1 %v11495_v25  ;;  %8898 = vpow2.f32 %v3965_v8  ;;  %v13052_v8 = vld [vmem:[#allocation21_spill] sm:$0xff] }
0x100c   : > { %v11500_v51 = vpop.eup %8890 }
0x100d   : > { %13041 = vst [vmem:[#allocation120_spill] sm:$0xff] %v11500_v51  ;;  %3979 = vadd.xlane.f32.xlu1 %v11498_v31  ;;  %3983 = vadd.xlane.f32.xlu0 %v11500_v51  ;;  %v11504_v11 = vpop.eup %8892  ;;  %v3934_v51 = vsub.f32 %v11433_v9, %v3914_v21 }
0x100e   : > { %13042 = vst [vmem:[#allocation121_spill] sm:$0xff] %v11504_v11 }
0x100f   : > { %v3961_v26 = vmul.f32 1.442695, %v3934_v51 }
0x1011   : > { %3985 = vadd.xlane.f32.xlu1 %v11504_v11  ;;  %v3916_v11 = vpop.xlane.xlu0 %3915 }
0x1012   : > { %v3935_v41 = vsub.f32 %v11445_v29, %v3916_v11 }
0x1014   : > { %v3963_v30 = vmul.f32 1.442695, %v3935_v41  ;;  %v11519_v6 = vpop.eup %8894 }
0x1015   : > { %v3920_v47 = vpop.xlane.xlu0 %3919 }
0x1016   : > { %v3937_v63 = vsub.f32 %v11453_v46, %v3920_v47 }
0x1018   : > { %v3967_v9 = vmul.f32 1.442695, %v3937_v63 }
0x1022   : > { %4262 = vrot.lane.b32.xlu1 %v13043_v14, %s9233_s7  ;;  %v3938_v14 = vsub.f32 %v11449_v50, %v3922_v45  ;;  %v11522_v50 = vpop.eup %8896 }
0x1023   : > { %4264 = vrot.lane.b32.xlu0 %v13044_v53, %s9233_s7  ;;  %v3955_v53 = vmul.f32 1.442695, %v3931_v34  ;;  %v11524_v21 = vpop.eup %8898 }
0x1024   : > { %v3969_v10 = vmul.f32 1.442695, %v3938_v14  ;;  %v11539_v14 = vpop.permute.xlu0 %4266 }
0x1025   : > { %8900 = vpow2.f32 %v3955_v53 }
0x1026   : > { %8902 = vpow2.f32 %v3969_v10 }
0x1027   : > { %8904 = vpow2.f32 %v3961_v26  ;;  %v13053_v26 = vld [vmem:[#allocation20_spill] sm:$0xff] }
0x1028   : > { %8906 = vpow2.f32 %v3963_v30  ;;  %v13054_v30 = vld [vmem:[#allocation18_spill] sm:$0xff] }
0x1029   : > { %8908 = vpow2.f32 %v3967_v9  ;;  %v13055_v9 = vld [vmem:[#allocation17_spill] sm:$0xff] }
0x1032   : > { %v11528_v29 = vpop.eup %8900 }
0x1033   : > { %v11530_v51 = vpop.eup %8902 }
0x1034   : > { %v11534_v46 = vpop.eup %8904 }
0x1035   : > { %v11537_v11 = vpop.eup %8906 }
0x1036   : > { %v11542_v53 = vpop.eup %8908 }
0x1042   : > { %3991 = vadd.xlane.f32.xlu0 %v11519_v6 }
0x1046   : > { %3989 = vadd.xlane.f32.xlu1 %v11522_v50  ;;  %3997 = vadd.xlane.f32.xlu0 %v11524_v21 }
0x104a   : > { %3987 = vadd.xlane.f32.xlu1 %v11528_v29  ;;  %4001 = vadd.xlane.f32.xlu0 %v11530_v51 }
0x104e   : > { %3993 = vadd.xlane.f32.xlu1 %v11534_v46 }
0x1052   : > { %3995 = vadd.xlane.f32.xlu1 %v11537_v11 }
0x1055   : > { %v3974_v36 = vpop.xlane.xlu0 %3973 }
0x1056   : > { %3999 = vadd.xlane.f32.xlu1 %v11542_v53  ;;  %8910 = vrcp.f32 %v3974_v36 }
0x1057   : > { %v3972_v23 = vpop.xlane.xlu1 %3971 }
0x1058   : > { %8912 = vrcp.f32 %v3972_v23  ;;  %v13057_v23 = vld [vmem:[#allocation39_spill] sm:$0xff] }
0x1060   : > { %4260 = vrot.lane.b32.xlu0 %v9450_v4, %s9233_s7 }
0x1063   : > { %v8911_v42 = vpop.eup %8910 }
0x1064   : > { %4230 = vrot.lane.b32.xlu0 %v12812_v16, %s9233_s7  ;;  %v4020_v45 = vmul.f32 %v8911_v42, %v11474_v20 }
0x1065   : > { %v8913_v7 = vpop.eup %8912 }
0x1066   : > { %v4019_v48 = vmul.f32 %v8913_v7, %v11477_v61 }
0x1067   : > { %4228 = vrot.lane.b32.xlu1 %v9448_v3, %s9233_s7 }
0x1068   : > { %7861 = vmatprep.mubr.f32.mxu0 %v4019_v48  ;;  %4234 = vrot.lane.b32.xlu0 %v9665_v52, %s9233_s7  ;;  %v13058_v48 = vld [vmem:[#allocation40_spill] sm:$0xff] }
0x1069   : > { %7862 = vmatmul.mubr.f32.vlgmr.msra.gmra.mxu0 %v4020_v45  ;;  %v13059_v45 = vld [vmem:[#allocation120_spill] sm:$0xff] }
0x106a   : > { %7886 = vmatpush3.xpose.msk.msra.mxu0 %vm631_vm0, %v11379_v18  ;;  %v13045_v18 = vld [vmem:[#allocation32_spill] sm:$0xff] }
0x106b   : > { %7887 = vmatprep.subr.msk.mxu0 %vm631_vm0, %v11458_v49  ;;  %4232 = vrot.lane.b32.xlu1 %v12813_v32, %s9233_s7 }
0x106c   : > { %4238 = vrot.lane.b32.xlu0 %v9675_v54, %s9233_s7 }
0x106e   : > { %7888 = vmatpush3.xpose.msk.msra.mxu0 %vm631_vm0, %v11458_v49  ;;  %v13047_v49 = vld [vmem:[#allocation119_spill] sm:$0xff] }
0x106f   : > { %7889 = vmatprep.subr.msk.mxu0 %vm631_vm0, %v11460_v37  ;;  %4236 = vrot.lane.b32.xlu1 %v12814_v5, %s9233_s7 }
0x1070   : > { %4242 = vrot.lane.b32.xlu0 %v9685_v56, %s9233_s7 }
0x1072   : > { %7890 = vmatpush3.xpose.msk.msra.mxu0 %vm631_vm0, %v11460_v37  ;;  %v13049_v37 = vld [vmem:[#allocation26_spill] sm:$0xff] }
0x1073   : > { %7891 = vmatprep.subr.msk.mxu0 %vm631_vm0, %v11464_v28  ;;  %4240 = vrot.lane.b32.xlu1 %v12815_v22, %s9233_s7 }
0x1074   : > { %4246 = vrot.lane.b32.xlu0 %v9695_v58, %s9233_s7 }
0x1076   : > { %7892 = vmatpush3.xpose.msk.msra.mxu0 %vm631_vm0, %v11464_v28 }
0x1077   : > { %7893 = vmatprep.subr.msk.mxu0 %vm631_vm0, %v11462_v13  ;;  %4244 = vrot.lane.b32.xlu1 %v12816_v38, %s9233_s7 }
0x1078   : > { %4250 = vrot.lane.b32.xlu0 %v9705_v60, %s9233_s7 }
0x107a   : > { %7894 = vmatpush3.xpose.msk.msra.mxu0 %vm631_vm0, %v11462_v13  ;;  %v13046_v13 = vld [vmem:[#allocation29_spill] sm:$0xff] }
0x107b   : > { %7895 = vmatprep.subr.msk.mxu0 %vm631_vm0, %v11468_v55  ;;  %4248 = vrot.lane.b32.xlu1 %v12817_v19, %s9233_s7 }
0x107c   : > { %4254 = vrot.lane.b32.xlu0 %v9715_v62, %s9233_s7 }
0x107e   : > { %7896 = vmatpush3.xpose.msk.msra.mxu0 %vm631_vm0, %v11468_v55 }
0x107f   : > { %7897 = vmatprep.subr.msk.mxu0 %vm631_vm0, %v11466_v40  ;;  %4252 = vrot.lane.b32.xlu1 %v12818_v33, %s9233_s7 }
0x1080   : > { %4258 = vrot.lane.b32.xlu0 %v9725_v1, %s9233_s7 }
0x1082   : > { %7898 = vmatpush3.xpose.msk.msra.mxu0 %vm631_vm0, %v11466_v40 }
0x1083   : > { %7899 = vmatprep.subr.msk.mxu0 %vm631_vm0, %v11472_v0  ;;  %4256 = vrot.lane.b32.xlu1 %v12819_v59, %s9233_s7 }
0x1084   : > { %4675 = vrot.lane.b32.xlu0 %v9526_v39, %s9233_s7 }
0x1086   : > { %7900 = vmatpush3.xpose.msk.msra.mxu0 %vm631_vm0, %v11472_v0 }
0x1087   : > { %7901 = vmatprep.subr.msk.mxu0 %vm631_vm0, %v11470_v2  ;;  %4673 = vrot.lane.b32.xlu1 %v12820_v57, %s9233_s7 }
0x1088   : > { %4671 = vrot.lane.b32.xlu0 %v9516_v35, %s9233_s7 }
0x108a   : > { %7902 = vmatpush3.xpose.msk.msra.mxu0 %vm631_vm0, %v11470_v2  ;;  %v13051_v2 = vld [vmem:[#allocation23_spill] sm:$0xff] }
0x108b   : > { %7903 = vmatprep.subr.msk.mxu0 %vm631_vm0, %v11482_v24  ;;  %4669 = vrot.lane.b32.xlu1 %v12821_v12, %s9233_s7 }
0x108c   : > { %4667 = vrot.lane.b32.xlu0 %v12853_v17, %s9233_s7  ;;  %v3978_v61 = vpop.xlane.xlu0 %3977 }
0x108d   : > { %8914 = vrcp.f32 %v3978_v61 }
0x108e   : > { %7904 = vmatpush3.xpose.msk.msra.mxu0 %vm631_vm0, %v11482_v24  ;;  %v3976_v20 = vpop.xlane.xlu1 %3975  ;;  %v13048_v24 = vld [vmem:[#allocation27_spill] sm:$0xff] }
0x108f   : > { %8916 = vrcp.f32 %v3976_v20  ;;  %7905 = vmatprep.subr.msk.mxu0 %vm631_vm0, %v11480_v44  ;;  %4665 = vrot.lane.b32.xlu1 %v13045_v18, %s9233_s7 }
0x1090   : > { %4661 = vrot.lane.b32.xlu0 %v13046_v13, %s9233_s7 }
0x1092   : > { %7906 = vmatpush3.xpose.msk.msra.mxu0 %vm631_vm0, %v11480_v44  ;;  %v3982_v40 = vpop.xlane.xlu1 %3981  ;;  %v13050_v44 = vld [vmem:[#allocation24_spill] sm:$0xff] }
0x1093   : > { %7907 = vmatprep.subr.msk.mxu0 %vm631_vm0, %v13047_v49  ;;  %4663 = vrot.lane.b32.xlu1 %v13048_v24, %s9233_s7  ;;  %8918 = vrcp.f32 %v3982_v40  ;;  %v13060_v40 = vld [vmem:[#allocation38_spill] sm:$0xff] }
0x1094   : > { %4657 = vrot.lane.b32.xlu0 %v13049_v37, %s9233_s7 }
0x1096   : > { %7908 = vmatpush3.xpose.msk.msra.mxu0 %vm631_vm0, %v13047_v49  ;;  %v3980_v28 = vpop.xlane.xlu1 %3979  ;;  %v3984_v0 = vpop.xlane.xlu0 %3983  ;;  %v13061_v49 = vld [vmem:[#allocation121_spill] sm:$0xff] }
0x1097   : > { %8920 = vrcp.f32 %v3980_v28  ;;  %7909 = vmatprep.subr.msk.mxu0 %vm631_vm0, %v11539_v14  ;;  %4659 = vrot.lane.b32.xlu1 %v13050_v44, %s9233_s7 }
0x1098   : > { %8922 = vrcp.f32 %v3984_v0  ;;  %4653 = vrot.lane.b32.xlu0 %v13051_v2, %s9233_s7  ;;  %v13062_v0 = vld [vmem:[#allocation37_spill] sm:$0xff] }
0x109a   : > { %7910 = vmatpush3.xpose.msk.msra.mxu0 %vm631_vm0, %v11539_v14  ;;  %v3986_v55 = vpop.xlane.xlu1 %3985  ;;  %v4265_v27 = vpop.permute.xlu0 %4264 }
0x109b   : > { %v8915_v34 = vpop.eup %8914  ;;  %8924 = vrcp.f32 %v3986_v55  ;;  %4655 = vrot.lane.b32.xlu1 %v13052_v8, %s9233_s7  ;;  %7911 = vmatprep.subr.msk.mxu0 %vm631_vm0, %v4265_v27  ;;  %v13065_v55 = vld [vmem:[#allocation31_spill] sm:$0xff] }
0x109c   : > { %v8917_v10 = vpop.eup %8916  ;;  %4649 = vrot.lane.b32.xlu0 %v13053_v26, %s9233_s7  ;;  %v4022_v63 = vmul.f32 %v8915_v34, %v11489_v43  ;;  %v13067_v34 = vld [vmem:[#allocation25_spill] sm:$0xff] }
0x109d   : > { %v4021_v41 = vmul.f32 %v8917_v10, %v11492_v15  ;;  %v13056_v15 = vld [vmem:[#allocation15_spill] sm:$0xff]  ;;  %v13068_v10 = vld [vmem:[#allocation22_spill] sm:$0xff] }
0x109e   : > { %7912 = vmatpush3.xpose.msk.msra.mxu0 %vm631_vm0, %v4265_v27  ;;  %v4263_v47 = vpop.permute.xlu1 %4262  ;;  %v13066_v27 = vld [vmem:[#allocation28_spill] sm:$0xff] }
0x109f   : > { %4651 = vrot.lane.b32.xlu1 %v13054_v30, %s9233_s7  ;;  %7864 = vmatprep.mubr.f32.mxu0 %v4021_v41  ;;  %v13069_v41 = vld [vmem:[#allocation19_spill] sm:$0xff] }
0x10a0   : > { %7913 = vmatprep.subr.msk.mxu0 %vm631_vm0, %v4263_v47  ;;  %4645 = vrot.lane.b32.xlu0 %v13055_v9, %s9233_s7  ;;  %v8919_v14 = vpop.eup %8918 }
0x10a1   : > { %7865 = vmatmul.mubr.f32.gmra.mxu0 %v4022_v63  ;;  %v4024_v7 = vmul.f32 %v8919_v14, %v11495_v25  ;;  %v13064_v25 = vld [vmem:[#allocation33_spill] sm:$0xff] }
0x10a2   : > { %7914 = vmatpush3.xpose.msk.msra.mxu0 %vm631_vm0, %v4263_v47  ;;  %v13070_v47 = vld [vmem:[#allocation16_spill] sm:$0xff] }
0x10a3   : > { %4647 = vrot.lane.b32.xlu1 %v13056_v15, %s9233_s7 }
0x10a4   : > { %v8921_v36 = vpop.eup %8920  ;;  %4898 = vrot.lane.b32.xlu0 %v13057_v23, %s9234_s11 }
0x10a5   : > { %v8923_v42 = vpop.eup %8922  ;;  %v4023_v43 = vmul.f32 %v8921_v36, %v11498_v31  ;;  %v13063_v31 = vld [vmem:[#allocation35_spill] sm:$0xff] }
0x10a6   : > { %v4025_v61 = vmul.f32 %v8923_v42, %v13059_v45 }
0x10a7   : > { %4900 = vrot.lane.b32.xlu1 %v13058_v48, %s9234_s11  ;;  %7867 = vmatprep.mubr.f32.mxu0 %v4023_v43 }
0x10a8   : > { %v8925_v20 = vpop.eup %8924  ;;  %4896 = vrot.lane.b32.xlu0 %v13060_v40, %s9234_s11  ;;  %7868 = vmatmul.mubr.f32.gmra.mxu0 %v4024_v7 }
0x10a9   : > { %7870 = vmatprep.mubr.f32.mxu0 %v4025_v61  ;;  %v4026_v28 = vmul.f32 %v8925_v20, %v13061_v49 }
0x10ab   : > { %4894 = vrot.lane.b32.xlu1 %v13062_v0, %s9234_s11 }
0x10ac   : > { %4892 = vrot.lane.b32.xlu0 %v13063_v31, %s9234_s11  ;;  %7871 = vmatmul.mubr.f32.gmra.mxu0 %v4026_v28 }
0x10af   : > { %4890 = vrot.lane.b32.xlu1 %v13064_v25, %s9234_s11 }
0x10b0   : > { %4888 = vrot.lane.b32.xlu0 %v13065_v55, %s9234_s11 }
0x10b3   : > { %4886 = vrot.lane.b32.xlu1 %v13066_v27, %s9234_s11 }
0x10b4   : > { %4884 = vrot.lane.b32.xlu0 %v13067_v34, %s9234_s11 }
0x10b7   : > { %4882 = vrot.lane.b32.xlu1 %v13068_v10, %s9234_s11 }
0x10b8   : > { %4880 = vrot.lane.b32.xlu0 %v13069_v41, %s9234_s11 }
0x10bc   : > { %4878 = vrot.lane.b32.xlu0 %v13070_v47, %s9234_s11 }
0x10cb   : > { %v3992_v63 = vpop.xlane.xlu0 %3991 }
0x10cc   : > { %8926 = vrcp.f32 %v3992_v63 }
0x10cf   : > { %v3990_v14 = vpop.xlane.xlu1 %3989  ;;  %v3998_v36 = vpop.xlane.xlu0 %3997 }
0x10d0   : > { %8928 = vrcp.f32 %v3990_v14 }
0x10d3   : > { %v3988_v23 = vpop.xlane.xlu1 %3987  ;;  %v4002_v42 = vpop.xlane.xlu0 %4001 }
0x10d4   : > { %8930 = vrcp.f32 %v3988_v23 }
0x10d7   : > { %v3994_v43 = vpop.xlane.xlu1 %3993  ;;  %v4261_v7 = vpop.permute.xlu0 %4260 }
0x10d8   : > { %8932 = vrcp.f32 %v3994_v43  ;;  %7915 = vmatprep.subr.msk.mxu0 %vm631_vm0, %v4261_v7 }
0x10d9   : > { %7916 = vmatpush3.xpose.msk.msra.mxu0 %vm631_vm0, %v4261_v7  ;;  %8934 = vrcp.f32 %v3998_v36  ;;  %v8927_v61 = vpop.eup %8926 }
0x10da   : > { %v4029_v27 = vmul.f32 %v8927_v61, %v11519_v6 }
0x10db   : > { %v3996_v48 = vpop.xlane.xlu1 %3995  ;;  %v4231_v45 = vpop.permute.xlu0 %4230 }
0x10dc   : > { %8936 = vrcp.f32 %v3996_v48 }
0x10dd   : > { %8938 = vrcp.f32 %v4002_v42  ;;  %v8929_v49 = vpop.eup %8928 }
0x10de   : > { %v4028_v55 = vmul.f32 %v8929_v49, %v11522_v50 }
0x10df   : > { %v4000_v20 = vpop.xlane.xlu1 %3999  ;;  %v4235_v40 = vpop.permute.xlu0 %4234 }
0x10e0   : > { %8940 = vrcp.f32 %v4000_v20 }
0x10e1   : > { %v8931_v28 = vpop.eup %8930 }
0x10e2   : > { %v4027_v0 = vmul.f32 %v8931_v28, %v11528_v29 }
0x10e3   : > { %v4229_v31 = vpop.permute.xlu1 %4228  ;;  %v4239_v25 = vpop.permute.xlu0 %4238 }
0x10e4   : > { %7873 = vmatprep.mubr.f32.mxu0 %v4027_v0 }
0x10e5   : > { %v8933_v34 = vpop.eup %8932  ;;  %7874 = vmatmul.mubr.f32.gmra.mxu0 %v4028_v55 }
0x10e6   : > { %7876 = vmatprep.mubr.f32.mxu0 %v4029_v27  ;;  %v4030_v10 = vmul.f32 %v8933_v34, %v11534_v46  ;;  %v8935_v63 = vpop.eup %8934 }
0x10e7   : > { %v4233_v41 = vpop.permute.xlu1 %4232  ;;  %v4243_v47 = vpop.permute.xlu0 %4242  ;;  %v4032_v42 = vmul.f32 %v8935_v63, %v11524_v21 }
0x10e9   : > { %v8937_v14 = vpop.eup %8936  ;;  %7877 = vmatmul.mubr.f32.gmra.mxu0 %v4030_v10 }
0x10ea   : > { %v4031_v36 = vmul.f32 %v8937_v14, %v11537_v11  ;;  %v8939_v50 = vpop.eup %8938 }
0x10eb   : > { %v4237_v29 = vpop.permute.xlu1 %4236  ;;  %v4247_v23 = vpop.permute.xlu0 %4246  ;;  %v4034_v46 = vmul.f32 %v8939_v50, %v11530_v51 }
0x10ec   : > { %7879 = vmatprep.mubr.f32.mxu0 %v4031_v36 }
0x10ed   : > { %v8941_v43 = vpop.eup %8940  ;;  %7880 = vmatmul.mubr.f32.gmra.mxu0 %v4032_v42 }
0x10ee   : > { %v4033_v6 = vmul.f32 %v8941_v43, %v11542_v53 }
0x10ef   : > { %v4241_v7 = vpop.permute.xlu1 %4240  ;;  %v4251_v48 = vpop.permute.xlu0 %4250 }
0x10f0   : > { %7882 = vmatprep.mubr.f32.mxu0 %v4033_v6 }
0x10f1   : > { %7883 = vmatmul.mubr.f32.gmra.mxu0 %v4034_v46 }
0x10f2   : > { %7917 = vmatprep.mubr.msk.f32.mxu0 %vm631_vm0, %v4229_v31 }
0x10f3   : > { %v4245_v61 = vpop.permute.xlu1 %4244  ;;  %v4255_v11 = vpop.permute.xlu0 %4254 }
0x10f5   : > { %7918 = vmatmul.mubr.msk.f32.vlgmr.msra.gmra.mxu0 %vm631_vm0, %v4231_v45 }
0x10f6   : > { %7920 = vmatprep.mubr.msk.f32.mxu0 %vm631_vm0, %v4233_v41 }
0x10f7   : > { %v4249_v21 = vpop.permute.xlu1 %4248  ;;  %v4259_v20 = vpop.permute.xlu0 %4258 }
0x10f9   : > { %7921 = vmatmul.mubr.msk.f32.gmra.mxu0 %vm631_vm0, %v4235_v40 }
0x10fa   : > { %7923 = vmatprep.mubr.msk.f32.mxu0 %vm631_vm0, %v4237_v29 }
0x10fb   : > { %v4253_v53 = vpop.permute.xlu1 %4252  ;;  %v4676_v49 = vpop.permute.xlu0 %4675 }
0x10fc   : > { %7941 = vmatprep.subr.mxu1 %v4676_v49 }
0x10fd   : > { %7924 = vmatmul.mubr.msk.f32.gmra.mxu0 %vm631_vm0, %v4239_v25  ;;  %7942 = vmatpush3.msra.mxu1 %v4676_v49 }
0x10fe   : > { %7926 = vmatprep.mubr.msk.f32.mxu0 %vm631_vm0, %v4241_v7 }
0x10ff   : > { %v4257_v51 = vpop.permute.xlu1 %4256  ;;  %v4672_v28 = vpop.permute.xlu0 %4671 }
0x1101   : > { %7927 = vmatmul.mubr.msk.f32.gmra.mxu0 %vm631_vm0, %v4243_v47 }
0x1102   : > { %7929 = vmatprep.mubr.msk.f32.mxu0 %vm631_vm0, %v4245_v61 }
0x1103   : > { %v4674_v45 = vpop.permute.xlu1 %4673  ;;  %v4668_v0 = vpop.permute.xlu0 %4667 }
0x1104   : > { %7943 = vmatprep.subr.mxu1 %v4674_v45 }
0x1105   : > { %7930 = vmatmul.mubr.msk.f32.gmra.mxu0 %vm631_vm0, %v4247_v23  ;;  %7944 = vmatpush3.msra.mxu1 %v4674_v45 }
0x1106   : > { %7932 = vmatprep.mubr.msk.f32.mxu0 %vm631_vm0, %v4249_v21  ;;  %7945 = vmatprep.subr.mxu1 %v4672_v28 }
0x1107   : > { %v4670_v40 = vpop.permute.xlu1 %4669  ;;  %7946 = vmatpush3.msra.mxu1 %v4672_v28  ;;  %v4662_v31 = vpop.permute.xlu0 %4661 }
0x1108   : > { %7947 = vmatprep.subr.mxu1 %v4670_v40 }
0x1109   : > { %7933 = vmatmul.mubr.msk.f32.gmra.mxu0 %vm631_vm0, %v4251_v48  ;;  %7948 = vmatpush3.msra.mxu1 %v4670_v40 }
0x110a   : > { %7935 = vmatprep.mubr.msk.f32.mxu0 %vm631_vm0, %v4253_v53  ;;  %7949 = vmatprep.subr.mxu1 %v4668_v0 }
0x110b   : > { %v4666_v25 = vpop.permute.xlu1 %4665  ;;  %7950 = vmatpush3.msra.mxu1 %v4668_v0  ;;  %v4658_v55 = vpop.permute.xlu0 %4657 }
0x110c   : > { %7951 = vmatprep.subr.mxu1 %v4666_v25 }
0x110d   : > { %7936 = vmatmul.mubr.msk.f32.gmra.mxu0 %vm631_vm0, %v4255_v11  ;;  %7952 = vmatpush3.msra.mxu1 %v4666_v25 }
0x110e   : > { %7938 = vmatprep.mubr.msk.f32.mxu0 %vm631_vm0, %v4257_v51 }
0x110f   : > { %v4664_v27 = vpop.permute.xlu1 %4663  ;;  %v4654_v10 = vpop.permute.xlu0 %4653 }
0x1110   : > { %7953 = vmatprep.subr.mxu1 %v4664_v27 }
0x1111   : > { %7939 = vmatmul.mubr.msk.f32.gmra.mxu0 %vm631_vm0, %v4259_v20  ;;  %7954 = vmatpush3.msra.mxu1 %v4664_v27 }
0x1112   : > { %7955 = vmatprep.subr.mxu1 %v4662_v31 }
0x1113   : > { %v4660_v34 = vpop.permute.xlu1 %4659  ;;  %7956 = vmatpush3.msra.mxu1 %v4662_v31  ;;  %v4650_v47 = vpop.permute.xlu0 %4649 }
0x1114   : > { %7957 = vmatprep.subr.mxu1 %v4660_v34 }
0x1115   : > { %7958 = vmatpush3.msra.mxu1 %v4660_v34 }
0x1116   : > { %7959 = vmatprep.subr.mxu1 %v4658_v55 }
0x1117   : > { %v4656_v41 = vpop.permute.xlu1 %4655  ;;  %7960 = vmatpush3.msra.mxu1 %v4658_v55  ;;  %v4646_v36 = vpop.permute.xlu0 %4645 }
0x1118   : > { %7961 = vmatprep.subr.mxu1 %v4656_v41 }
0x1119   : > { %7962 = vmatpush3.msra.mxu1 %v4656_v41 }
0x111a   : > { %7963 = vmatprep.subr.mxu1 %v4654_v10 }
0x111b   : > { %v4652_v63 = vpop.permute.xlu1 %4651  ;;  %7964 = vmatpush3.msra.mxu1 %v4654_v10 }
0x111c   : > { %7965 = vmatprep.subr.mxu1 %v4652_v63 }
0x111d   : > { %7966 = vmatpush3.msra.mxu1 %v4652_v63 }
0x111e   : > { %7967 = vmatprep.subr.mxu1 %v4650_v47 }
0x111f   : > { %v4648_v14 = vpop.permute.xlu1 %4647  ;;  %7968 = vmatpush3.msra.mxu1 %v4650_v47 }
0x1120   : > { %7969 = vmatprep.subr.mxu1 %v4648_v14 }
0x1121   : > { %7970 = vmatpush3.msra.mxu1 %v4648_v14 }
0x1122   : > { %7971 = vmatprep.subr.mxu1 %v4646_v36 }
0x1123   : > { %v11723_v29 = vpop.permute.xlu1 %4900  ;;  %7972 = vmatpush3.msra.mxu1 %v4646_v36 }
0x1124   : > { %7997 = vmatprep.subr.msk.mxu1 %vm631_vm0, %v11723_v29 }
0x1129   : > { %v11727_v23 = vpop.f32.mrf.mxu0 }
0x112a   : > { %13071 = vst [vmem:[#allocation119_spill] sm:$0xff] %v11727_v23 }
0x112b   : > { %v11729_v42 = vpop.f32.mrf.mxu0 }
0x112c   : > { %13072 = vst [vmem:[#allocation27_spill] sm:$0xff] %v11729_v42 }
0x1161   : > { %v11731_v50 = vpop.f32.mrf.mxu0 }
0x1162   : > { %13073 = vst [vmem:[#allocation24_spill] sm:$0xff] %v11731_v50 }
0x1163   : > { %v11733_v43 = vpop.f32.mrf.mxu0 }
0x1164   : > { %13074 = vst [vmem:[#allocation39_spill] sm:$0xff] %v11733_v43 }
0x1168   : > { %v11735_v6 = vpop.f32.mrf.mxu0 }
0x1169   : > { %13075 = vst [vmem:[#allocation40_spill] sm:$0xff] %v11735_v6 }
0x116a   : > { %v11737_v7 = vpop.f32.mrf.mxu0 }
0x116b   : > { %13076 = vst [vmem:[#allocation120_spill] sm:$0xff] %v11737_v7  ;;  %v11798_v7 = vpop.permute.xlu1 %4894 }
0x116c   : > { %v11739_v48 = vpop.f32.mrf.mxu0 }
0x116d   : > { %13077 = vst [vmem:[#allocation38_spill] sm:$0xff] %v11739_v48 }
0x116e   : > { %v11741_v46 = vpop.f32.mrf.mxu0 }
0x116f   : > { %13078 = vst [vmem:[#allocation121_spill] sm:$0xff] %v11741_v46  ;;  %v13087_v46 = vld [vmem:[#allocation14_spill] sm:$0xff]  ;;  %v11802_v50 = vpop.permute.xlu1 %4890 }
0x1173   : > { %v11806_v43 = vpop.permute.xlu1 %4886 }
0x11a5   : > { %v11743_v61 = vpop.f32.mrf.mxu0 }
0x11a6   : > { %13079 = vst [vmem:[#allocation37_spill] sm:$0xff] %v11743_v61 }
0x11a7   : > { %v11745_v11 = vpop.f32.mrf.mxu0 }
0x11a8   : > { %13080 = vst [vmem:[#allocation35_spill] sm:$0xff] %v11745_v11 }
0x11a9   : > { %v11747_v21 = vpop.f32.mrf.mxu0 }
0x11aa   : > { %13081 = vst [vmem:[#allocation33_spill] sm:$0xff] %v11747_v21 }
0x11ab   : > { %v11749_v20 = vpop.f32.mrf.mxu0 }
0x11ac   : > { %13082 = vst [vmem:[#allocation31_spill] sm:$0xff] %v11749_v20 }
0x11ad   : > { %v11751_v53 = vpop.f32.mrf.mxu0 }
0x11ae   : > { %13083 = vst [vmem:[#allocation28_spill] sm:$0xff] %v11751_v53 }
0x11af   : > { %v11753_v49 = vpop.f32.mrf.mxu0 }
0x11b0   : > { %13084 = vst [vmem:[#allocation25_spill] sm:$0xff] %v11753_v49 }
0x11b1   : > { %v11755_v51 = vpop.f32.mrf.mxu0 }
0x11b2   : > { %13085 = vst [vmem:[#allocation22_spill] sm:$0xff] %v11755_v51 }
0x11b3   : > { %v11757_v28 = vpop.f32.mrf.mxu0 }
0x11b4   : > { %13086 = vst [vmem:[#allocation19_spill] sm:$0xff] %v11757_v28  ;;  %v11790_v28 = vpop.permute.xlu0 %4898 }
0x11b5   : > { %v7919_v0 = vpop.f32.mrf.mxu0 }
0x11b6   : > { %4503 = vmax.xlane.f32.xlu0 %v7919_v0 }
0x11b7   : > { %v4422_v40 = vpop.f32.mrf.mxu0 }
0x11b8   : > { %4501 = vmax.xlane.f32.xlu1 %v4422_v40  ;;  %v11792_v53 = vpop.permute.xlu0 %4896 }
0x11b9   : > { %v7922_v31 = vpop.f32.mrf.mxu0 }
0x11bb   : > { %v4432_v25 = vpop.f32.mrf.mxu0 }
0x11bc   : > { %4507 = vmax.xlane.f32.xlu1 %v7922_v31  ;;  %4505 = vmax.xlane.f32.xlu0 %v4432_v25  ;;  %v11794_v6 = vpop.permute.xlu0 %4892 }
0x11bd   : > { %v7925_v55 = vpop.f32.mrf.mxu0 }
0x11bf   : > { %v4442_v27 = vpop.f32.mrf.mxu0 }
0x11c0   : > { %4511 = vmax.xlane.f32.xlu1 %v7925_v55  ;;  %4509 = vmax.xlane.f32.xlu0 %v4442_v27  ;;  %v11796_v49 = vpop.permute.xlu0 %4888 }
0x11c1   : > { %v11761_v34 = vpop.f32.mrf.mxu0 }
0x11c3   : > { %v4452_v10 = vpop.f32.mrf.mxu0 }
0x11c4   : > { %4515 = vmax.xlane.f32.xlu1 %v11761_v34  ;;  %4513 = vmax.xlane.f32.xlu0 %v4452_v10  ;;  %v11800_v21 = vpop.permute.xlu0 %4884 }
0x11c5   : > { %v11764_v41 = vpop.f32.mrf.mxu0  ;;  %13088 = vst [vmem:[#allocation16_spill] sm:$0xff] %v11800_v21 }
0x11c7   : > { %v11766_v47 = vpop.f32.mrf.mxu0 }
0x11c8   : > { %4519 = vmax.xlane.f32.xlu1 %v11764_v41  ;;  %4517 = vmax.xlane.f32.xlu0 %v11766_v47  ;;  %v11804_v20 = vpop.permute.xlu0 %4880 }
0x11c9   : > { %v11770_v63 = vpop.f32.mrf.mxu0  ;;  %13089 = vst [vmem:[#allocation14_spill] sm:$0xff] %v11804_v20 }
0x11cb   : > { %v11772_v14 = vpop.f32.mrf.mxu0 }
0x11cc   : > { %4523 = vmax.xlane.f32.xlu1 %v11770_v63  ;;  %4521 = vmax.xlane.f32.xlu0 %v11772_v14  ;;  %v11808_v61 = vpop.permute.xlu0 %4878 }
0x11cd   : > { %v11776_v36 = vpop.f32.mrf.mxu0  ;;  %13090 = vst [vmem:[#allocation122_spill] sm:$0xff] %v11808_v61 }
0x11cf   : > { %v11778_v45 = vpop.f32.mrf.mxu0 }
0x11d0   : > { %4527 = vmax.xlane.f32.xlu1 %v11776_v36  ;;  %4525 = vmax.xlane.f32.xlu0 %v11778_v45 }
0x11d1   : > { %v11782_v51 = vpop.f32.mrf.mxu0 }
0x11d3   : > { %v11784_v48 = vpop.f32.mrf.mxu0 }
0x11d4   : > { %4531 = vmax.xlane.f32.xlu1 %v11782_v51  ;;  %4529 = vmax.xlane.f32.xlu0 %v11784_v48 }
0x11ea   : > { %4876 = vrot.lane.b32.xlu0 %v13087_v46, %s9234_s11  ;;  %v11810_v46 = vpop.permute.xlu1 %4882 }
0x11eb   : > { %13091 = vst [vmem:[#allocation123_spill] sm:$0xff] %v11810_v46 }
0x123f   : > { %v4504_v23 = vpop.xlane.xlu0 %4503 }
0x1240   : > { %v4534_v11 = vsub.f32 %v7919_v0, %v4504_v23 }
0x1241   : > { %v4502_v42 = vpop.xlane.xlu1 %4501 }
0x1242   : > { %v4551_v15 = vmul.f32 1.442695, %v4534_v11  ;;  %v4533_v30 = vsub.f32 %v4422_v40, %v4502_v42 }
0x1244   : > { %8942 = vpow2.f32 %v4551_v15  ;;  %v4549_v9 = vmul.f32 1.442695, %v4533_v30 }
0x1245   : > { %v4508_v8 = vpop.xlane.xlu1 %4507  ;;  %v4506_v26 = vpop.xlane.xlu0 %4505 }
0x1246   : > { %8944 = vpow2.f32 %v4549_v9  ;;  %v4536_v2 = vsub.f32 %v7922_v31, %v4508_v8  ;;  %v4535_v37 = vsub.f32 %v4432_v25, %v4506_v26  ;;  %v13093_v31 = vld [vmem:[#allocation13_spill] sm:$0xff] }
0x1248   : > { %v4555_v13 = vmul.f32 1.442695, %v4536_v2  ;;  %v4553_v20 = vmul.f32 1.442695, %v4535_v37 }
0x1249   : > { %v4512_v18 = vpop.xlane.xlu1 %4511  ;;  %v4510_v21 = vpop.xlane.xlu0 %4509 }
0x124a   : > { %8946 = vpow2.f32 %v4555_v13  ;;  %v4538_v61 = vsub.f32 %v7925_v55, %v4512_v18  ;;  %v4537_v12 = vsub.f32 %v4442_v27, %v4510_v21 }
0x124b   : > { %8948 = vpow2.f32 %v4553_v20  ;;  %v13092_v20 = vld [vmem:[#allocation12_spill] sm:$0xff] }
0x124c   : > { %v4559_v46 = vmul.f32 1.442695, %v4538_v61  ;;  %v4557_v42 = vmul.f32 1.442695, %v4537_v12 }
0x124d   : > { %v4516_v23 = vpop.xlane.xlu1 %4515  ;;  %v4514_v0 = vpop.xlane.xlu0 %4513 }
0x124e   : > { %8950 = vpow2.f32 %v4559_v46  ;;  %v4539_v15 = vsub.f32 %v4452_v10, %v4514_v0  ;;  %v4540_v30 = vsub.f32 %v11761_v34, %v4516_v23 }
0x124f   : > { %8952 = vpow2.f32 %v4557_v42 }
0x1250   : > { %v4561_v11 = vmul.f32 1.442695, %v4539_v15  ;;  %v4563_v13 = vmul.f32 1.442695, %v4540_v30 }
0x1251   : > { %v11813_v9 = vpop.eup %8942  ;;  %v4520_v21 = vpop.xlane.xlu1 %4519 }
0x1252   : > { %4583 = vadd.xlane.f32.xlu0 %v11813_v9  ;;  %8954 = vpow2.f32 %v4561_v11  ;;  %v4518_v40 = vpop.xlane.xlu0 %4517  ;;  %v4542_v10 = vsub.f32 %v11764_v41, %v4520_v21 }
0x1253   : > { %v11816_v37 = vpop.eup %8944  ;;  %8956 = vpow2.f32 %v4563_v13  ;;  %v4541_v15 = vsub.f32 %v11766_v47, %v4518_v40 }
0x1254   : > { %4581 = vadd.xlane.f32.xlu1 %v11816_v37  ;;  %v4567_v42 = vmul.f32 1.442695, %v4542_v10 }
0x1255   : > { %v4524_v25 = vpop.xlane.xlu1 %4523  ;;  %v4565_v13 = vmul.f32 1.442695, %v4541_v15 }
0x1256   : > { %v4522_v55 = vpop.xlane.xlu0 %4521 }
0x1257   : > { %v11819_v18 = vpop.eup %8946  ;;  %v4543_v34 = vsub.f32 %v11772_v14, %v4522_v55 }
0x1258   : > { %v11821_v2 = vpop.eup %8948  ;;  %4587 = vadd.xlane.f32.xlu0 %v11819_v18 }
0x1259   : > { %4585 = vadd.xlane.f32.xlu1 %v11821_v2  ;;  %v4528_v27 = vpop.xlane.xlu1 %4527  ;;  %v4569_v46 = vmul.f32 1.442695, %v4543_v34 }
0x125a   : > { %v4546_v23 = vsub.f32 %v11776_v36, %v4528_v27  ;;  %v4526_v14 = vpop.xlane.xlu0 %4525 }
0x125b   : > { %v11825_v12 = vpop.eup %8950  ;;  %8958 = vpow2.f32 %v4569_v46  ;;  %v4545_v21 = vsub.f32 %v11778_v45, %v4526_v14 }
0x125c   : > { %v11828_v8 = vpop.eup %8952  ;;  %v4575_v30 = vmul.f32 1.442695, %v4546_v23  ;;  %8960 = vpow2.f32 %v4567_v42 }
0x125d   : > { %4591 = vadd.xlane.f32.xlu1 %v11825_v12  ;;  %v4532_v0 = vpop.xlane.xlu1 %4531  ;;  %v4573_v36 = vmul.f32 1.442695, %v4545_v21 }
0x125e   : > { %v4548_v11 = vsub.f32 %v11782_v51, %v4532_v0  ;;  %8962 = vpow2.f32 %v4575_v30  ;;  %v4530_v27 = vpop.xlane.xlu0 %4529 }
0x125f   : > { %v11830_v26 = vpop.eup %8954  ;;  %8964 = vpow2.f32 %v4565_v13  ;;  %v4547_v34 = vsub.f32 %v11784_v48, %v4530_v27 }
0x1260   : > { %4593 = vadd.xlane.f32.xlu0 %v11830_v26  ;;  %v11834_v61 = vpop.eup %8956 }
0x1261   : > { %4589 = vadd.xlane.f32.xlu1 %v11828_v8 }
0x1265   : > { %4595 = vadd.xlane.f32.xlu1 %v11834_v61 }
0x1268   : > { %v11848_v55 = vpop.eup %8958 }
0x1269   : > { %v11851_v47 = vpop.eup %8960 }
0x126b   : > { %v11853_v51 = vpop.eup %8962 }
0x1276   : > { %4872 = vrot.lane.b32.xlu1 %v13092_v20, %s9234_s11  ;;  %4874 = vrot.lane.b32.xlu0 %v13093_v31, %s9234_s11  ;;  %v4544_v20 = vsub.f32 %v11770_v63, %v4524_v25  ;;  %v4579_v31 = vmul.f32 1.442695, %v4548_v11  ;;  %v11857_v63 = vpop.eup %8964 }
0x1278   : > { %v4571_v41 = vmul.f32 1.442695, %v4544_v20  ;;  %8966 = vpow2.f32 %v4579_v31 }
0x127a   : > { %8968 = vpow2.f32 %v4571_v41 }
0x127b   : > { %8970 = vpow2.f32 %v4573_v36 }
0x1285   : > { %v11859_v40 = vpop.eup %8966 }
0x1287   : > { %v11863_v45 = vpop.eup %8968 }
0x1288   : > { %v11866_v25 = vpop.eup %8970 }
0x1295   : > { %4601 = vadd.xlane.f32.xlu0 %v11848_v55 }
0x1299   : > { %4607 = vadd.xlane.f32.xlu0 %v11853_v51 }
0x129a   : > { %4599 = vadd.xlane.f32.xlu1 %v11851_v47 }
0x129d   : > { %4611 = vadd.xlane.f32.xlu0 %v11859_v40 }
0x129e   : > { %4597 = vadd.xlane.f32.xlu1 %v11857_v63 }
0x12a2   : > { %4603 = vadd.xlane.f32.xlu1 %v11863_v45 }
0x12a6   : > { %4605 = vadd.xlane.f32.xlu1 %v11866_v25 }
0x12b3   : > { %4870 = vrot.lane.b32.xlu0 %v9450_v4, %s9234_s11  ;;  %v4577_v4 = vmul.f32 1.442695, %v4547_v34 }
0x12b5   : > { %8972 = vpow2.f32 %v4577_v4 }
0x12b7   : > { %4838 = vrot.lane.b32.xlu1 %v9448_v3, %s9234_s11  ;;  %4840 = vrot.lane.b32.xlu0 %v12812_v16, %s9234_s11  ;;  %v11890_v3 = vpop.permute.xlu0 %4876 }
0x12bb   : > { %4844 = vrot.lane.b32.xlu0 %v9665_v52, %s9234_s11 }
0x12bf   : > { %4848 = vrot.lane.b32.xlu0 %v9675_v54, %s9234_s11 }
0x12c2   : > { %v11894_v52 = vpop.eup %8972 }
0x12c3   : > { %4852 = vrot.lane.b32.xlu0 %v9685_v56, %s9234_s11 }
0x12c7   : > { %4856 = vrot.lane.b32.xlu0 %v9695_v58, %s9234_s11 }
0x12cb   : > { %4860 = vrot.lane.b32.xlu0 %v9705_v60, %s9234_s11 }
0x12cf   : > { %4864 = vrot.lane.b32.xlu0 %v9715_v62, %s9234_s11 }
0x12d3   : > { %4868 = vrot.lane.b32.xlu0 %v9725_v1, %s9234_s11 }
0x12d7   : > { %5285 = vrot.lane.b32.xlu0 %v9526_v39, %s9234_s11 }
0x12db   : > { %4609 = vadd.xlane.f32.xlu1 %v11894_v52  ;;  %v4584_v54 = vpop.xlane.xlu0 %4583  ;;  %5281 = vrot.lane.b32.xlu0 %v9516_v35, %s9234_s11 }
0x12dc   : > { %8974 = vrcp.f32 %v4584_v54 }
0x12dd   : > { %v4582_v56 = vpop.xlane.xlu1 %4581 }
0x12de   : > { %8976 = vrcp.f32 %v4582_v56 }
0x12df   : > { %5277 = vrot.lane.b32.xlu0 %v12853_v17, %s9234_s11 }
0x12e1   : > { %v4588_v58 = vpop.xlane.xlu0 %4587 }
0x12e2   : > { %v4586_v60 = vpop.xlane.xlu1 %4585  ;;  %8978 = vrcp.f32 %v4588_v58 }
0x12e3   : > { %8980 = vrcp.f32 %v4586_v60  ;;  %5273 = vrot.lane.b32.xlu0 %v13048_v24, %s9234_s11 }
0x12e6   : > { %v4592_v39 = vpop.xlane.xlu1 %4591 }
0x12e7   : > { %5269 = vrot.lane.b32.xlu0 %v13050_v44, %s9234_s11  ;;  %8982 = vrcp.f32 %v4592_v39 }
0x12e9   : > { %v8975_v62 = vpop.eup %8974  ;;  %v4594_v1 = vpop.xlane.xlu0 %4593 }
0x12ea   : > { %v4590_v35 = vpop.xlane.xlu1 %4589  ;;  %v4630_v48 = vmul.f32 %v8975_v62, %v11813_v9 }
0x12eb   : > { %v8977_v16 = vpop.eup %8976  ;;  %8984 = vrcp.f32 %v4590_v35 }
0x12ec   : > { %8986 = vrcp.f32 %v4594_v1  ;;  %4842 = vrot.lane.b32.xlu1 %v12813_v32, %s9234_s11  ;;  %v4629_v17 = vmul.f32 %v8977_v16, %v11816_v37 }
0x12ee   : > { %v4596_v10 = vpop.xlane.xlu1 %4595  ;;  %7973 = vmatprep.mubr.f32.mxu1 %v4629_v17 }
0x12ef   : > { %v8979_v24 = vpop.eup %8978  ;;  %8988 = vrcp.f32 %v4596_v10  ;;  %7974 = vmatmul.mubr.f32.vlgmr.msra.gmra.mxu1 %v4630_v48 }
0x12f0   : > { %v8981_v44 = vpop.eup %8980  ;;  %4846 = vrot.lane.b32.xlu1 %v12814_v5, %s9234_s11  ;;  %7998 = vmatpush3.xpose.msk.msra.mxu1 %vm631_vm0, %v11723_v29  ;;  %v4632_v46 = vmul.f32 %v8979_v24, %v11819_v18 }
0x12f1   : > { %7999 = vmatprep.subr.msk.mxu1 %vm631_vm0, %v11790_v28  ;;  %v4631_v32 = vmul.f32 %v8981_v44, %v11821_v2 }
0x12f3   : > { %7976 = vmatprep.mubr.f32.mxu1 %v4631_v32 }
0x12f4   : > { %4850 = vrot.lane.b32.xlu1 %v12815_v22, %s9234_s11  ;;  %7977 = vmatmul.mubr.f32.gmra.mxu1 %v4632_v46  ;;  %v8983_v5 = vpop.eup %8982 }
0x12f5   : > { %8000 = vmatpush3.xpose.msk.msra.mxu1 %vm631_vm0, %v11790_v28  ;;  %v4634_v22 = vmul.f32 %v8983_v5, %v11825_v12 }
0x12f6   : > { %8001 = vmatprep.subr.msk.mxu1 %vm631_vm0, %v11792_v53 }
0x12f8   : > { %v8985_v29 = vpop.eup %8984  ;;  %4854 = vrot.lane.b32.xlu1 %v12816_v38, %s9234_s11 }
0x12f9   : > { %v8987_v9 = vpop.eup %8986  ;;  %8002 = vmatpush3.xpose.msk.msra.mxu1 %vm631_vm0, %v11792_v53  ;;  %v4633_v37 = vmul.f32 %v8985_v29, %v11828_v8  ;;  %v4875_v53 = vpop.permute.xlu0 %4874 }
0x12fa   : > { %8003 = vmatprep.subr.msk.mxu1 %vm631_vm0, %v11798_v7  ;;  %v4635_v28 = vmul.f32 %v8987_v9, %v11830_v26 }
0x12fb   : > { %7979 = vmatprep.mubr.f32.mxu1 %v4633_v37 }
0x12fc   : > { %v8989_v18 = vpop.eup %8988  ;;  %4858 = vrot.lane.b32.xlu1 %v12817_v19, %s9234_s11  ;;  %7980 = vmatmul.mubr.f32.gmra.mxu1 %v4634_v22  ;;  %v13094_v19 = vld [vmem:[#allocation34_spill] sm:$0xff] }
0x12fd   : > { %8004 = vmatpush3.xpose.msk.msra.mxu1 %vm631_vm0, %v11798_v7  ;;  %7982 = vmatprep.mubr.f32.mxu1 %v4635_v28  ;;  %v4636_v38 = vmul.f32 %v8989_v18, %v11834_v61  ;;  %v13101_v7 = vld [vmem:[#allocation122_spill] sm:$0xff] }
0x12fe   : > { %8005 = vmatprep.subr.msk.mxu1 %vm631_vm0, %v11794_v6 }
0x1300   : > { %4862 = vrot.lane.b32.xlu1 %v12818_v33, %s9234_s11  ;;  %7983 = vmatmul.mubr.f32.gmra.mxu1 %v4636_v38  ;;  %v13095_v33 = vld [vmem:[#allocation16_spill] sm:$0xff] }
0x1301   : > { %8006 = vmatpush3.xpose.msk.msra.mxu1 %vm631_vm0, %v11794_v6  ;;  %v13099_v6 = vld [vmem:[#allocation14_spill] sm:$0xff] }
0x1302   : > { %8007 = vmatprep.subr.msk.mxu1 %vm631_vm0, %v11802_v50 }
0x1304   : > { %4866 = vrot.lane.b32.xlu1 %v12819_v59, %s9234_s11  ;;  %v13096_v59 = vld [vmem:[#allocation32_spill] sm:$0xff] }
0x1305   : > { %8008 = vmatpush3.xpose.msk.msra.mxu1 %vm631_vm0, %v11802_v50  ;;  %v13098_v50 = vld [vmem:[#allocation29_spill] sm:$0xff] }
0x1306   : > { %8009 = vmatprep.subr.msk.mxu1 %vm631_vm0, %v11796_v49 }
0x1308   : > { %5283 = vrot.lane.b32.xlu1 %v12820_v57, %s9234_s11  ;;  %v13097_v57 = vld [vmem:[#allocation123_spill] sm:$0xff] }
0x1309   : > { %8010 = vmatpush3.xpose.msk.msra.mxu1 %vm631_vm0, %v11796_v49  ;;  %v4873_v49 = vpop.permute.xlu1 %4872 }
0x130a   : > { %8011 = vmatprep.subr.msk.mxu1 %vm631_vm0, %v11806_v43 }
0x130c   : > { %5279 = vrot.lane.b32.xlu1 %v13094_v19, %s9234_s11 }
0x130d   : > { %8012 = vmatpush3.xpose.msk.msra.mxu1 %vm631_vm0, %v11806_v43  ;;  %v13100_v43 = vld [vmem:[#allocation26_spill] sm:$0xff] }
0x130e   : > { %8013 = vmatprep.subr.msk.mxu1 %vm631_vm0, %v13095_v33 }
0x1310   : > { %5275 = vrot.lane.b32.xlu1 %v13096_v59, %s9234_s11 }
0x1311   : > { %8014 = vmatpush3.xpose.msk.msra.mxu1 %vm631_vm0, %v13095_v33 }
0x1312   : > { %8015 = vmatprep.subr.msk.mxu1 %vm631_vm0, %v13097_v57 }
0x1314   : > { %5271 = vrot.lane.b32.xlu1 %v13098_v50, %s9234_s11 }
0x1315   : > { %8016 = vmatpush3.xpose.msk.msra.mxu1 %vm631_vm0, %v13097_v57 }
0x1316   : > { %8017 = vmatprep.subr.msk.mxu1 %vm631_vm0, %v13099_v6 }
0x1318   : > { %5267 = vrot.lane.b32.xlu1 %v13100_v43, %s9234_s11 }
0x1319   : > { %8018 = vmatpush3.xpose.msk.msra.mxu1 %vm631_vm0, %v13099_v6 }
0x131a   : > { %8019 = vmatprep.subr.msk.mxu1 %vm631_vm0, %v13101_v7 }
0x131d   : > { %8020 = vmatpush3.xpose.msk.msra.mxu1 %vm631_vm0, %v13101_v7 }
0x131e   : > { %8021 = vmatprep.subr.msk.mxu1 %vm631_vm0, %v11890_v3  ;;  %v4602_v2 = vpop.xlane.xlu0 %4601 }
0x131f   : > { %8990 = vrcp.f32 %v4602_v2 }
0x1321   : > { %8022 = vmatpush3.xpose.msk.msra.mxu1 %vm631_vm0, %v11890_v3 }
0x1322   : > { %8023 = vmatprep.subr.msk.mxu1 %vm631_vm0, %v4875_v53  ;;  %v4608_v8 = vpop.xlane.xlu0 %4607 }
0x1323   : > { %v4600_v12 = vpop.xlane.xlu1 %4599 }
0x1324   : > { %8992 = vrcp.f32 %v4600_v12 }
0x1325   : > { %8024 = vmatpush3.xpose.msk.msra.mxu1 %vm631_vm0, %v4875_v53 }
0x1326   : > { %8025 = vmatprep.subr.msk.mxu1 %vm631_vm0, %v4873_v49  ;;  %v4612_v61 = vpop.xlane.xlu0 %4611 }
0x1327   : > { %v4598_v26 = vpop.xlane.xlu1 %4597 }
0x1328   : > { %8994 = vrcp.f32 %v4598_v26 }
0x1329   : > { %8026 = vmatpush3.xpose.msk.msra.mxu1 %vm631_vm0, %v4873_v49 }
0x132a   : > { %v4871_v0 = vpop.permute.xlu0 %4870 }
0x132b   : > { %v4604_v23 = vpop.xlane.xlu1 %4603  ;;  %8027 = vmatprep.subr.msk.mxu1 %vm631_vm0, %v4871_v0 }
0x132c   : > { %8996 = vrcp.f32 %v4604_v23  ;;  %v8991_v30 = vpop.eup %8990 }
0x132d   : > { %8028 = vmatpush3.xpose.msk.msra.mxu1 %vm631_vm0, %v4871_v0  ;;  %8998 = vrcp.f32 %v4608_v8  ;;  %v4639_v21 = vmul.f32 %v8991_v30, %v11848_v55 }
0x132e   : > { %v4841_v15 = vpop.permute.xlu0 %4840 }
0x132f   : > { %v4606_v42 = vpop.xlane.xlu1 %4605 }
0x1330   : > { %9000 = vrcp.f32 %v4606_v42 }
0x1331   : > { %v8993_v13 = vpop.eup %8992  ;;  %9002 = vrcp.f32 %v4612_v61 }
0x1332   : > { %v4845_v11 = vpop.permute.xlu0 %4844  ;;  %v4638_v41 = vmul.f32 %v8993_v13, %v11851_v47 }
0x1333   : > { %v4839_v39 = vpop.permute.xlu1 %4838 }
0x1335   : > { %v8995_v20 = vpop.eup %8994 }
0x1336   : > { %v4637_v31 = vmul.f32 %v8995_v20, %v11857_v63  ;;  %v4849_v14 = vpop.permute.xlu0 %4848 }
0x1338   : > { %7985 = vmatprep.mubr.f32.mxu1 %v4637_v31 }
0x1339   : > { %v8997_v36 = vpop.eup %8996  ;;  %7986 = vmatmul.mubr.f32.gmra.mxu1 %v4638_v41 }
0x133a   : > { %7988 = vmatprep.mubr.f32.mxu1 %v4639_v21  ;;  %v4640_v27 = vmul.f32 %v8997_v36, %v11863_v45  ;;  %v4853_v34 = vpop.permute.xlu0 %4852  ;;  %v8999_v4 = vpop.eup %8998 }
0x133b   : > { %v4642_v63 = vmul.f32 %v8999_v4, %v11853_v51  ;;  %v13102_v4 = vld [vmem:[#allocation23_spill] sm:$0xff] }
0x133d   : > { %v9001_v3 = vpop.eup %9000  ;;  %7989 = vmatmul.mubr.f32.gmra.mxu1 %v4640_v27 }
0x133e   : > { %v4641_v54 = vmul.f32 %v9001_v3, %v11866_v25  ;;  %v4857_v56 = vpop.permute.xlu0 %4856  ;;  %v9003_v16 = vpop.eup %9002  ;;  %v13103_v3 = vld [vmem:[#allocation20_spill] sm:$0xff] }
0x133f   : > { %v4644_v48 = vmul.f32 %v9003_v16, %v11859_v40 }
0x1340   : > { %7991 = vmatprep.mubr.f32.mxu1 %v4641_v54  ;;  %v13104_v54 = vld [vmem:[#allocation21_spill] sm:$0xff] }
0x1341   : > { %7992 = vmatmul.mubr.f32.gmra.mxu1 %v4642_v63  ;;  %v13106_v63 = vld [vmem:[#allocation18_spill] sm:$0xff] }
0x1342   : > { %v4861_v47 = vpop.permute.xlu0 %4860 }
0x1346   : > { %v4865_v58 = vpop.permute.xlu0 %4864 }
0x134a   : > { %v4869_v60 = vpop.permute.xlu0 %4868 }
0x134e   : > { %v5286_v55 = vpop.permute.xlu0 %5285 }
0x134f   : > { %8053 = vmatprep.subr.mxu0 %v5286_v55 }
0x1350   : > { %8054 = vmatpush3.msra.mxu0 %v5286_v55 }
0x1352   : > { %v5282_v44 = vpop.permute.xlu0 %5281 }
0x1364   : > { %v4610_v45 = vpop.xlane.xlu1 %4609 }
0x1365   : > { %9004 = vrcp.f32 %v4610_v45 }
0x1368   : > { %v4843_v62 = vpop.permute.xlu1 %4842 }
0x136c   : > { %v4847_v35 = vpop.permute.xlu1 %4846 }
0x1370   : > { %v4851_v1 = vpop.permute.xlu1 %4850 }
0x1372   : > { %v9005_v25 = vpop.eup %9004 }
0x1373   : > { %v4643_v17 = vmul.f32 %v9005_v25, %v11894_v52  ;;  %v5278_v52 = vpop.permute.xlu0 %5277 }
0x1374   : > { %v4855_v51 = vpop.permute.xlu1 %4854 }
0x1375   : > { %7994 = vmatprep.mubr.f32.mxu1 %v4643_v17 }
0x1376   : > { %7995 = vmatmul.mubr.f32.gmra.mxu1 %v4644_v48 }
0x1377   : > { %8029 = vmatprep.mubr.msk.f32.mxu1 %vm631_vm0, %v4839_v39  ;;  %v5274_v5 = vpop.permute.xlu0 %5273 }
0x1378   : > { %v4859_v10 = vpop.permute.xlu1 %4858 }
0x137a   : > { %8030 = vmatmul.mubr.msk.f32.vlgmr.msra.gmra.mxu1 %vm631_vm0, %v4841_v15 }
0x137b   : > { %8032 = vmatprep.mubr.msk.f32.mxu1 %vm631_vm0, %v4843_v62  ;;  %v5270_v37 = vpop.permute.xlu0 %5269 }
0x137c   : > { %v4863_v24 = vpop.permute.xlu1 %4862 }
0x137e   : > { %8033 = vmatmul.mubr.msk.f32.gmra.mxu1 %vm631_vm0, %v4845_v11 }
0x137f   : > { %8035 = vmatprep.mubr.msk.f32.mxu1 %vm631_vm0, %v4847_v35 }
0x1380   : > { %v4867_v46 = vpop.permute.xlu1 %4866 }
0x1382   : > { %8036 = vmatmul.mubr.msk.f32.gmra.mxu1 %vm631_vm0, %v4849_v14 }
0x1383   : > { %8038 = vmatprep.mubr.msk.f32.mxu1 %vm631_vm0, %v4851_v1 }
0x1384   : > { %v5284_v40 = vpop.permute.xlu1 %5283 }
0x1385   : > { %8055 = vmatprep.subr.mxu0 %v5284_v40 }
0x1386   : > { %8039 = vmatmul.mubr.msk.f32.gmra.mxu1 %vm631_vm0, %v4853_v34  ;;  %8056 = vmatpush3.msra.mxu0 %v5284_v40 }
0x1387   : > { %8041 = vmatprep.mubr.msk.f32.mxu1 %vm631_vm0, %v4855_v51  ;;  %8057 = vmatprep.subr.mxu0 %v5282_v44 }
0x1388   : > { %v5280_v32 = vpop.permute.xlu1 %5279  ;;  %8058 = vmatpush3.msra.mxu0 %v5282_v44 }
0x1389   : > { %8059 = vmatprep.subr.mxu0 %v5280_v32 }
0x138a   : > { %8042 = vmatmul.mubr.msk.f32.gmra.mxu1 %vm631_vm0, %v4857_v56  ;;  %8060 = vmatpush3.msra.mxu0 %v5280_v32  ;;  %v13105_v56 = vld [vmem:[#allocation17_spill] sm:$0xff] }
0x138b   : > { %8044 = vmatprep.mubr.msk.f32.mxu1 %vm631_vm0, %v4859_v10  ;;  %8061 = vmatprep.subr.mxu0 %v5278_v52 }
0x138c   : > { %v5276_v29 = vpop.permute.xlu1 %5275  ;;  %8062 = vmatpush3.msra.mxu0 %v5278_v52 }
0x138d   : > { %8063 = vmatprep.subr.mxu0 %v5276_v29 }
0x138e   : > { %8045 = vmatmul.mubr.msk.f32.gmra.mxu1 %vm631_vm0, %v4861_v47  ;;  %8064 = vmatpush3.msra.mxu0 %v5276_v29  ;;  %v13107_v47 = vld [vmem:[#allocation15_spill] sm:$0xff] }
0x138f   : > { %8047 = vmatprep.mubr.msk.f32.mxu1 %vm631_vm0, %v4863_v24  ;;  %8065 = vmatprep.subr.mxu0 %v5274_v5 }
0x1390   : > { %v5272_v9 = vpop.permute.xlu1 %5271  ;;  %8066 = vmatpush3.msra.mxu0 %v5274_v5 }
0x1391   : > { %8067 = vmatprep.subr.mxu0 %v5272_v9 }
0x1392   : > { %8048 = vmatmul.mubr.msk.f32.gmra.mxu1 %vm631_vm0, %v4865_v58  ;;  %8068 = vmatpush3.msra.mxu0 %v5272_v9 }
0x1393   : > { %8050 = vmatprep.mubr.msk.f32.mxu1 %vm631_vm0, %v4867_v46  ;;  %8069 = vmatprep.subr.mxu0 %v5270_v37 }
0x1394   : > { %v5268_v22 = vpop.permute.xlu1 %5267  ;;  %8070 = vmatpush3.msra.mxu0 %v5270_v37 }
0x1395   : > { %8071 = vmatprep.subr.mxu0 %v5268_v22 }
0x1396   : > { %8051 = vmatmul.mubr.msk.f32.gmra.mxu1 %vm631_vm0, %v4869_v60  ;;  %8072 = vmatpush3.msra.mxu0 %v5268_v22 }
0x13af   : > { %v12017_v28 = vpop.f32.mrf.mxu1 }
0x13b1   : > { %v12019_v18 = vpop.f32.mrf.mxu1 }
0x13b4   : > { %v12021_v38 = vpop.f32.mrf.mxu1 }
0x13b6   : > { %v12023_v19 = vpop.f32.mrf.mxu1 }
0x13bc   : > { %v12025_v33 = vpop.f32.mrf.mxu1 }
0x13be   : > { %v12027_v59 = vpop.f32.mrf.mxu1 }
0x13c0   : > { %v12029_v57 = vpop.f32.mrf.mxu1 }
0x13c2   : > { %v12031_v50 = vpop.f32.mrf.mxu1 }
0x13f9   : > { %v12033_v6 = vpop.f32.mrf.mxu1 }
0x13fb   : > { %v12035_v43 = vpop.f32.mrf.mxu1 }
0x13fd   : > { %v12037_v7 = vpop.f32.mrf.mxu1 }
0x13ff   : > { %v12039_v53 = vpop.f32.mrf.mxu1 }
0x1401   : > { %v12041_v49 = vpop.f32.mrf.mxu1 }
0x1403   : > { %v12043_v2 = vpop.f32.mrf.mxu1 }
0x1436   : > { %v12045_v12 = vpop.f32.mrf.mxu1 }
0x1438   : > { %v12047_v8 = vpop.f32.mrf.mxu1 }
0x1439   : > { %v8508_v26 = vpack.i.bf16 %v12047_v8, %v12031_v50 }
0x143a   : > { %v8031_v61 = vpop.f32.mrf.mxu1 }
0x143b   : > { %5113 = vmax.xlane.f32.xlu0 %v8031_v61 }
0x143c   : > { %v5032_v23 = vpop.f32.mrf.mxu1 }
0x143d   : > { %5111 = vmax.xlane.f32.xlu1 %v5032_v23 }
0x143e   : > { %v8034_v0 = vpop.f32.mrf.mxu1 }
0x1440   : > { %v5042_v42 = vpop.f32.mrf.mxu1 }
0x1441   : > { %5117 = vmax.xlane.f32.xlu1 %v8034_v0  ;;  %5115 = vmax.xlane.f32.xlu0 %v5042_v42 }
0x1442   : > { %v8037_v15 = vpop.f32.mrf.mxu1 }
0x1444   : > { %v5052_v30 = vpop.f32.mrf.mxu1 }
0x1445   : > { %5121 = vmax.xlane.f32.xlu1 %v8037_v15  ;;  %5119 = vmax.xlane.f32.xlu0 %v5052_v30 }
0x1446   : > { %v8040_v11 = vpop.f32.mrf.mxu1 }
0x1448   : > { %v5062_v13 = vpop.f32.mrf.mxu1 }
0x1449   : > { %5125 = vmax.xlane.f32.xlu1 %v8040_v11  ;;  %5123 = vmax.xlane.f32.xlu0 %v5062_v13 }
0x144a   : > { %v8043_v20 = vpop.f32.mrf.mxu1 }
0x144c   : > { %v5072_v31 = vpop.f32.mrf.mxu1 }
0x144d   : > { %5129 = vmax.xlane.f32.xlu1 %v8043_v20  ;;  %5127 = vmax.xlane.f32.xlu0 %v5072_v31 }
0x144e   : > { %v12051_v14 = vpop.f32.mrf.mxu1 }
0x1450   : > { %v12053_v41 = vpop.f32.mrf.mxu1 }
0x1451   : > { %5133 = vmax.xlane.f32.xlu1 %v12051_v14  ;;  %5131 = vmax.xlane.f32.xlu0 %v12053_v41 }
0x1452   : > { %v12057_v21 = vpop.f32.mrf.mxu1 }
0x1454   : > { %v12059_v36 = vpop.f32.mrf.mxu1 }
0x1455   : > { %5137 = vmax.xlane.f32.xlu1 %v12057_v21  ;;  %5135 = vmax.xlane.f32.xlu0 %v12059_v36 }
0x1456   : > { %v12063_v27 = vpop.f32.mrf.mxu1 }
0x1458   : > { %v12065_v34 = vpop.f32.mrf.mxu1 }
0x1459   : > { %5141 = vmax.xlane.f32.xlu1 %v12063_v27  ;;  %5139 = vmax.xlane.f32.xlu0 %v12065_v34 }
0x146a   : > { %5263 = vrot.lane.b32.xlu1 %v13102_v4, %s9234_s11 }
0x146e   : > { %5259 = vrot.lane.b32.xlu1 %v13103_v3, %s9234_s11 }
0x146f   : > { %5265 = vrot.lane.b32.xlu0 %v13104_v54, %s9234_s11 }
0x1472   : > { %5255 = vrot.lane.b32.xlu1 %v13105_v56, %s9234_s11 }
0x1473   : > { %5261 = vrot.lane.b32.xlu0 %v13106_v63, %s9234_s11 }
0x1477   : > { %5257 = vrot.lane.b32.xlu0 %v13107_v47, %s9234_s11 }
0x14c4   : > { %v5114_v58 = vpop.xlane.xlu0 %5113 }
0x14c5   : > { %v5144_v60 = vsub.f32 %v8031_v61, %v5114_v58 }
0x14c6   : > { %v5112_v55 = vpop.xlane.xlu1 %5111 }
0x14c7   : > { %v5161_v39 = vmul.f32 1.442695, %v5144_v60  ;;  %v5143_v45 = vsub.f32 %v5032_v23, %v5112_v55 }
0x14c9   : > { %9006 = vpow2.f32 %v5161_v39  ;;  %v5159_v62 = vmul.f32 1.442695, %v5143_v45 }
0x14ca   : > { %v5118_v35 = vpop.xlane.xlu1 %5117  ;;  %v5116_v1 = vpop.xlane.xlu0 %5115 }
0x14cb   : > { %9008 = vpow2.f32 %v5159_v62  ;;  %v5146_v16 = vsub.f32 %v8034_v0, %v5118_v35  ;;  %v5145_v25 = vsub.f32 %v5042_v42, %v5116_v1 }
0x14cd   : > { %v5165_v17 = vmul.f32 1.442695, %v5146_v16  ;;  %v5163_v51 = vmul.f32 1.442695, %v5145_v25 }
0x14ce   : > { %v5122_v48 = vpop.xlane.xlu1 %5121  ;;  %v5120_v10 = vpop.xlane.xlu0 %5119 }
0x14cf   : > { %9010 = vpow2.f32 %v5165_v17  ;;  %v5148_v24 = vsub.f32 %v8037_v15, %v5122_v48  ;;  %v5147_v44 = vsub.f32 %v5052_v30, %v5120_v10 }
0x14d0   : > { %9012 = vpow2.f32 %v5163_v51 }
0x14d1   : > { %v5169_v46 = vmul.f32 1.442695, %v5148_v24  ;;  %v5167_v40 = vmul.f32 1.442695, %v5147_v44 }
0x14d2   : > { %v5126_v52 = vpop.xlane.xlu1 %5125  ;;  %v5124_v32 = vpop.xlane.xlu0 %5123 }
0x14d3   : > { %9014 = vpow2.f32 %v5169_v46  ;;  %v5150_v5 = vsub.f32 %v8040_v11, %v5126_v52  ;;  %v5149_v29 = vsub.f32 %v5062_v13, %v5124_v32 }
0x14d4   : > { %9016 = vpow2.f32 %v5167_v40 }
0x14d5   : > { %v5173_v9 = vmul.f32 1.442695, %v5150_v5  ;;  %v5171_v37 = vmul.f32 1.442695, %v5149_v29 }
0x14d6   : > { %v12081_v22 = vpop.eup %9006  ;;  %v5130_v61 = vpop.xlane.xlu1 %5129 }
0x14d7   : > { %v5128_v23 = vpop.xlane.xlu0 %5127  ;;  %9018 = vpow2.f32 %v5173_v9  ;;  %v5152_v0 = vsub.f32 %v8043_v20, %v5130_v61  ;;  %5193 = vadd.xlane.f32.xlu0 %v12081_v22  ;;  %v13109_v61 = vld [vmem:[#allocation63_spill] sm:$0xff] }
0x14d8   : > { %v5151_v42 = vsub.f32 %v5072_v31, %v5128_v23  ;;  %v12084_v15 = vpop.eup %9008  ;;  %9020 = vpow2.f32 %v5171_v37  ;;  %v13108_v37 = vld [vmem:[#allocation30_spill] sm:$0xff] }
0x14d9   : > { %v5177_v30 = vmul.f32 1.442695, %v5152_v0  ;;  %5191 = vadd.xlane.f32.xlu1 %v12084_v15  ;;  %v8283_v23 = vpack.i.bf16 %v13109_v61, %v13108_v37  ;;  %v13110_v0 = vld [vmem:[#allocation56_spill] sm:$0xff]  ;;  %v13129_v37 = vld [vmem:[#allocation35_spill] sm:$0xff] }
0x14da   : > { %v5175_v4 = vmul.f32 1.442695, %v5151_v42  ;;  %v5134_v11 = vpop.xlane.xlu1 %5133  ;;  %v13111_v42 = vld [vmem:[#allocation64_spill] sm:$0xff] }
0x14db   : > { %v5132_v13 = vpop.xlane.xlu0 %5131  ;;  %9022 = vpow2.f32 %v5177_v30  ;;  %v5154_v3 = vsub.f32 %v12051_v14, %v5134_v11  ;;  %v8278_v30 = vpack.i.bf16 %v13111_v42, %v13110_v0  ;;  %v13113_v11 = vld [vmem:[#allocation80_spill] sm:$0xff]  ;;  %v13131_v0 = vld [vmem:[#allocation82_spill] sm:$0xff] }
0x14dc   : > { %v5153_v54 = vsub.f32 %v12053_v41, %v5132_v13  ;;  %v12089_v56 = vpop.eup %9010  ;;  %9024 = vpow2.f32 %v5175_v4  ;;  %v13112_v4 = vld [vmem:[#allocation72_spill] sm:$0xff] }
0x14dd   : > { %v12091_v20 = vpop.eup %9012  ;;  %v5181_v31 = vmul.f32 1.442695, %v5154_v3  ;;  %5197 = vadd.xlane.f32.xlu0 %v12089_v56  ;;  %v8288_v13 = vpack.i.bf16 %v13113_v11, %v13112_v4  ;;  %v13114_v3 = vld [vmem:[#allocation71_spill] sm:$0xff]  ;;  %v13133_v4 = vld [vmem:[#allocation37_spill] sm:$0xff] }
0x14de   : > { %v5179_v63 = vmul.f32 1.442695, %v5153_v54  ;;  %5195 = vadd.xlane.f32.xlu1 %v12091_v20  ;;  %v5138_v47 = vpop.xlane.xlu1 %5137  ;;  %v13115_v54 = vld [vmem:[#allocation79_spill] sm:$0xff] }
0x14df   : > { %v5136_v58 = vpop.xlane.xlu0 %5135  ;;  %9026 = vpow2.f32 %v5181_v31  ;;  %v5156_v60 = vsub.f32 %v12057_v21, %v5138_v47  ;;  %v8293_v31 = vpack.i.bf16 %v13115_v54, %v13114_v3  ;;  %v13117_v47 = vld [vmem:[#allocation96_spill] sm:$0xff]  ;;  %v13135_v3 = vld [vmem:[#allocation81_spill] sm:$0xff] }
0x14e0   : > { %v5155_v14 = vsub.f32 %v12059_v36, %v5136_v58  ;;  %v12097_v55 = vpop.eup %9014  ;;  %9028 = vpow2.f32 %v5179_v63  ;;  %v13116_v63 = vld [vmem:[#allocation88_spill] sm:$0xff] }
0x14e1   : > { %v12099_v41 = vpop.eup %9016  ;;  %v5185_v39 = vmul.f32 1.442695, %v5156_v60  ;;  %5201 = vadd.xlane.f32.xlu0 %v12097_v55  ;;  %v8298_v58 = vpack.i.bf16 %v13117_v47, %v13116_v63  ;;  %v13118_v60 = vld [vmem:[#allocation87_spill] sm:$0xff]  ;;  %v13136_v63 = vld [vmem:[#allocation90_spill] sm:$0xff] }
0x14e2   : > { %v5183_v45 = vmul.f32 1.442695, %v5155_v14  ;;  %5199 = vadd.xlane.f32.xlu1 %v12099_v41  ;;  %v5142_v62 = vpop.xlane.xlu1 %5141  ;;  %v13119_v14 = vld [vmem:[#allocation95_spill] sm:$0xff]  ;;  %v13137_v47 = vld [vmem:[#allocation98_spill] sm:$0xff] }
0x14e3   : > { %v5140_v35 = vpop.xlane.xlu0 %5139  ;;  %9030 = vpow2.f32 %v5185_v39  ;;  %v5158_v1 = vsub.f32 %v12063_v27, %v5142_v62  ;;  %v8303_v39 = vpack.i.bf16 %v13119_v14, %v13118_v60  ;;  %v13121_v62 = vld [vmem:[#allocation112_spill] sm:$0xff]  ;;  %v8358_v60 = vpack.i.bf16 %v12033_v6, %v12017_v28  ;;  %v13138_v14 = vld [vmem:[#allocation89_spill] sm:$0xff]  ;;  %v13146_v6 = vld [vmem:[#allocation59_spill] sm:$0xff] }
0x14e4   : > { %v5157_v21 = vsub.f32 %v12065_v34, %v5140_v35  ;;  %v12105_v16 = vpop.eup %9018  ;;  %9032 = vpow2.f32 %v5183_v45  ;;  %v13120_v45 = vld [vmem:[#allocation104_spill] sm:$0xff] }
0x14e5   : > { %v12107_v36 = vpop.eup %9020  ;;  %v5189_v25 = vmul.f32 1.442695, %v5158_v1  ;;  %5205 = vadd.xlane.f32.xlu0 %v12105_v16  ;;  %v8308_v35 = vpack.i.bf16 %v13121_v62, %v13120_v45  ;;  %v13122_v1 = vld [vmem:[#allocation58_spill] sm:$0xff] }
0x14e6   : > { %v5187_v17 = vmul.f32 1.442695, %v5157_v21  ;;  %5203 = vadd.xlane.f32.xlu1 %v12107_v36  ;;  %v5264_v51 = vpop.permute.xlu1 %5263  ;;  %v13123_v21 = vld [vmem:[#allocation66_spill] sm:$0xff] }
0x14e7   : > { %v5266_v48 = vpop.permute.xlu0 %5265  ;;  %9034 = vpow2.f32 %v5189_v25  ;;  %v8313_v25 = vpack.i.bf16 %v13123_v21, %v13122_v1  ;;  %v13140_v62 = vld [vmem:[#allocation106_spill] sm:$0xff]  ;;  %v13143_v1 = vld [vmem:[#allocation68_spill] sm:$0xff] }
0x14e8   : > { %8073 = vmatprep.subr.mxu0 %v5266_v48  ;;  %v12111_v10 = vpop.eup %9022  ;;  %9036 = vpow2.f32 %v5187_v17  ;;  %v13124_v17 = vld [vmem:[#allocation103_spill] sm:$0xff] }
0x14e9   : > { %8074 = vmatpush3.msra.mxu0 %v5266_v48  ;;  %v12113_v27 = vpop.eup %9024  ;;  %5209 = vadd.xlane.f32.xlu0 %v12111_v10 }
0x14ea   : > { %8075 = vmatprep.subr.mxu0 %v5264_v51  ;;  %5207 = vadd.xlane.f32.xlu1 %v12113_v27  ;;  %v5260_v34 = vpop.permute.xlu1 %5259 }
0x14eb   : > { %8076 = vmatpush3.msra.mxu0 %v5264_v51  ;;  %v5262_v24 = vpop.permute.xlu0 %5261  ;;  %v13125_v51 = vld [vmem:[#allocation111_spill] sm:$0xff] }
0x14ec   : > { %8077 = vmatprep.subr.mxu0 %v5262_v24  ;;  %v12117_v44 = vpop.eup %9026  ;;  %v8318_v48 = vpack.i.bf16 %v13125_v51, %v13124_v17  ;;  %v13145_v17 = vld [vmem:[#allocation113_spill] sm:$0xff]  ;;  %v13147_v51 = vld [vmem:[#allocation67_spill] sm:$0xff] }
0x14ed   : > { %8078 = vmatpush3.msra.mxu0 %v5262_v24  ;;  %v12119_v46 = vpop.eup %9028  ;;  %5213 = vadd.xlane.f32.xlu0 %v12117_v44  ;;  %v13127_v24 = vld [vmem:[#allocation65_spill] sm:$0xff] }
0x14ee   : > { %8079 = vmatprep.subr.mxu0 %v5260_v34  ;;  %5211 = vadd.xlane.f32.xlu1 %v12119_v46  ;;  %v5256_v32 = vpop.permute.xlu1 %5255 }
0x14ef   : > { %8080 = vmatpush3.msra.mxu0 %v5260_v34  ;;  %v5258_v40 = vpop.permute.xlu0 %5257  ;;  %v13126_v34 = vld [vmem:[#allocation57_spill] sm:$0xff] }
0x14f0   : > { %8081 = vmatprep.subr.mxu0 %v5258_v40  ;;  %v12123_v52 = vpop.eup %9030 }
0x14f1   : > { %8082 = vmatpush3.msra.mxu0 %v5258_v40  ;;  %v12125_v5 = vpop.eup %9032  ;;  %5217 = vadd.xlane.f32.xlu0 %v12123_v52  ;;  %v8328_v40 = vpack.i.bf16 %v13127_v24, %v13126_v34  ;;  %v13148_v34 = vld [vmem:[#allocation39_spill] sm:$0xff] }
0x14f2   : > { %8083 = vmatprep.subr.mxu0 %v5256_v32  ;;  %5215 = vadd.xlane.f32.xlu1 %v12125_v5  ;;  %v13149_v24 = vld [vmem:[#allocation31_spill] sm:$0xff] }
0x14f3   : > { %8084 = vmatpush3.msra.mxu0 %v5256_v32  ;;  %v13128_v32 = vld [vmem:[#allocation27_spill] sm:$0xff] }
0x14f4   : > { %v12129_v29 = vpop.eup %9034  ;;  %v8323_v61 = vpack.i.bf16 %v13129_v37, %v13128_v32  ;;  %v13150_v32 = vld [vmem:[#allocation76_spill] sm:$0xff] }
0x14f5   : > { %v12131_v9 = vpop.eup %9036  ;;  %5221 = vadd.xlane.f32.xlu0 %v12129_v29  ;;  %v13151_v37 = vld [vmem:[#allocation84_spill] sm:$0xff] }
0x14f6   : > { %5219 = vadd.xlane.f32.xlu1 %v12131_v9 }
0x1507   : > { %8284 = vrot.lane.b32.xlu1 %v8283_v23, %s9234_s11  ;;  %v13130_v23 = vld [vmem:[#allocation74_spill] sm:$0xff] }
0x1508   : > { %v8333_v42 = vpack.i.bf16 %v13131_v0, %v13130_v23  ;;  %v13152_v23 = vld [vmem:[#allocation24_spill] sm:$0xff]  ;;  %v13153_v0 = vld [vmem:[#allocation33_spill] sm:$0xff] }
0x150b   : > { %8289 = vrot.lane.b32.xlu1 %v8288_v13, %s9233_s7  ;;  %8279 = vrot.lane.b32.xlu0 %v8278_v30, %s9234_s11  ;;  %v13132_v30 = vld [vmem:[#allocation119_spill] sm:$0xff]  ;;  %v13134_v13 = vld [vmem:[#allocation73_spill] sm:$0xff] }
0x150c   : > { %v8338_v11 = vpack.i.bf16 %v13133_v4, %v13132_v30  ;;  %v8348_v54 = vpack.i.bf16 %v13135_v3, %v13134_v13  ;;  %v13154_v30 = vld [vmem:[#allocation75_spill] sm:$0xff]  ;;  %v8403_v13 = vpack.i.bf16 %v12039_v53, %v12023_v19  ;;  %v13156_v3 = vld [vmem:[#allocation92_spill] sm:$0xff]  ;;  %v13162_v53 = vld [vmem:[#allocation62_spill] sm:$0xff] }
0x150d   : > { %v13155_v4 = vld [vmem:[#allocation83_spill] sm:$0xff] }
0x150f   : > { %8299 = vrot.lane.b32.xlu1 %v8298_v58, %s9232_s5  ;;  %8294 = vrot.lane.b32.xlu0 %v8293_v31, %s9233_s7  ;;  %v8343_v31 = vpack.i.bf16 %v12035_v43, %v12019_v18  ;;  %v8353_v58 = vpack.i.bf16 %v13137_v47, %v13136_v63  ;;  %v13142_v43 = vld [vmem:[#allocation60_spill] sm:$0xff]  ;;  %v8418_v63 = vpack.i.bf16 %v12037_v7, %v12021_v38  ;;  %v13158_v47 = vld [vmem:[#allocation91_spill] sm:$0xff]  ;;  %v13166_v7 = vld [vmem:[#allocation61_spill] sm:$0xff] }
0x1510   : > { %v8373_v21 = vpack.i.bf16 %v13143_v1, %v13142_v43  ;;  %v13167_v43 = vld [vmem:[#allocation69_spill] sm:$0xff] }
0x1511   : > { %v8448_v1 = vpack.i.bf16 %v13167_v43, %v13166_v7 }
0x1513   : > { %8309 = vrot.lane.b32.xlu1 %v8308_v35, %s9231_s10  ;;  %8304 = vrot.lane.b32.xlu0 %v8303_v39, %s9232_s5  ;;  %v13139_v39 = vld [vmem:[#allocation97_spill] sm:$0xff]  ;;  %v13141_v35 = vld [vmem:[#allocation114_spill] sm:$0xff] }
0x1514   : > { %v8363_v45 = vpack.i.bf16 %v13139_v39, %v13138_v14  ;;  %v8368_v18 = vpack.i.bf16 %v13141_v35, %v13140_v62  ;;  %v13160_v14 = vld [vmem:[#allocation108_spill] sm:$0xff]  ;;  %v13164_v35 = vld [vmem:[#allocation107_spill] sm:$0xff] }
0x1515   : > { %v13161_v39 = vld [vmem:[#allocation116_spill] sm:$0xff] }
0x1516   : > { %v8428_v19 = vpack.i.bf16 %v13161_v39, %v13160_v14  ;;  %v13191_v14 = vld [vmem:[#allocation22_spill] sm:$0xff] }
0x1517   : > { %8319 = vrot.lane.b32.xlu1 %v8318_v48, %s9231_s10  ;;  %8314 = vrot.lane.b32.xlu0 %v8313_v25, %s9234_s11  ;;  %v13144_v25 = vld [vmem:[#allocation105_spill] sm:$0xff]  ;;  %v8388_v48 = vpack.i.bf16 %v13147_v51, %v13146_v6  ;;  %v13171_v6 = vld [vmem:[#allocation28_spill] sm:$0xff] }
0x1518   : > { %v8378_v28 = vpack.i.bf16 %v13145_v17, %v13144_v25  ;;  %v13169_v25 = vld [vmem:[#allocation25_spill] sm:$0xff] }
0x151b   : > { %8329 = vrot.lane.b32.xlu1 %v8328_v40, %s9234_s11  ;;  %8324 = vrot.lane.b32.xlu0 %v8323_v61, %s9230_s9  ;;  %v8383_v40 = vpack.i.bf16 %v13149_v24, %v13148_v34  ;;  %v8393_v61 = vpack.i.bf16 %v13151_v37, %v13150_v32  ;;  %v13173_v34 = vld [vmem:[#allocation78_spill] sm:$0xff]  ;;  %v13176_v32 = vld [vmem:[#allocation85_spill] sm:$0xff] }
0x151f   : > { %8339 = vrot.lane.b32.xlu1 %v8338_v11, %s9230_s9  ;;  %8334 = vrot.lane.b32.xlu0 %v8333_v42, %s9233_s7  ;;  %v8398_v42 = vpack.i.bf16 %v13153_v0, %v13152_v23  ;;  %v8408_v11 = vpack.i.bf16 %v13155_v4, %v13154_v30  ;;  %v8478_v23 = vpack.i.bf16 %v12041_v49, %v12025_v33  ;;  %v13177_v0 = vld [vmem:[#allocation102_spill] sm:$0xff]  ;;  %v13180_v4 = vld [vmem:[#allocation93_spill] sm:$0xff]  ;;  %v13187_v49 = vld [vmem:[#allocation19_spill] sm:$0xff] }
0x1523   : > { %8349 = vrot.lane.b32.xlu1 %v8348_v54, %s9233_s7  ;;  %8344 = vrot.lane.b32.xlu0 %v8343_v31, %s9229_s23  ;;  %v13157_v54 = vld [vmem:[#allocation100_spill] sm:$0xff] }
0x1524   : > { %v8413_v31 = vpack.i.bf16 %v13157_v54, %v13156_v3  ;;  %v13185_v54 = vld [vmem:[#allocation109_spill] sm:$0xff] }
0x1527   : > { %8359 = vrot.lane.b32.xlu1 %v8358_v60, %s9229_s23  ;;  %8354 = vrot.lane.b32.xlu0 %v8353_v58, %s9232_s5  ;;  %v13159_v58 = vld [vmem:[#allocation99_spill] sm:$0xff] }
0x1528   : > { %v8423_v60 = vpack.i.bf16 %v13159_v58, %v13158_v47 }
0x152b   : > { %8364 = vrot.lane.b32.xlu1 %v8363_v45, %s9232_s5  ;;  %8369 = vrot.lane.b32.xlu0 %v8368_v18, %s9231_s10  ;;  %v13163_v45 = vld [vmem:[#allocation70_spill] sm:$0xff]  ;;  %v13165_v18 = vld [vmem:[#allocation115_spill] sm:$0xff] }
0x152c   : > { %v8433_v62 = vpack.i.bf16 %v13163_v45, %v13162_v53  ;;  %v8438_v38 = vpack.i.bf16 %v13165_v18, %v13164_v35 }
0x152f   : > { %8379 = vrot.lane.b32.xlu1 %v8378_v28, %s9231_s10  ;;  %8374 = vrot.lane.b32.xlu0 %v8373_v21, %s9234_s11  ;;  %v13168_v21 = vld [vmem:[#allocation120_spill] sm:$0xff] }
0x1530   : > { %v8443_v17 = vpack.i.bf16 %v13169_v25, %v13168_v21  ;;  %v13170_v28 = vld [vmem:[#allocation40_spill] sm:$0xff] }
0x1531   : > { %v8458_v51 = vpack.i.bf16 %v13171_v6, %v13170_v28 }
0x1533   : > { %8389 = vrot.lane.b32.xlu1 %v8388_v48, %s9234_s11  ;;  %8384 = vrot.lane.b32.xlu0 %v8383_v40, %s9230_s9  ;;  %v13172_v48 = vld [vmem:[#allocation86_spill] sm:$0xff]  ;;  %v13175_v40 = vld [vmem:[#allocation77_spill] sm:$0xff] }
0x1534   : > { %v13174_v24 = vpack.i.bf16 %v13172_v48, %v13173_v34  ;;  %v8468_v37 = vpack.i.bf16 %v13176_v32, %v13175_v40 }
0x1537   : > { %8399 = vrot.lane.b32.xlu1 %v8398_v42, %s9230_s9  ;;  %8394 = vrot.lane.b32.xlu0 %v8393_v61, %s9233_s7  ;;  %v8463_v61 = vpack.i.bf16 %v12043_v2, %v12027_v59  ;;  %v13178_v42 = vld [vmem:[#allocation94_spill] sm:$0xff] }
0x1538   : > { %v13179_v30 = vpack.i.bf16 %v13177_v0, %v13178_v42  ;;  %v13182_v59 = vld [vmem:[#allocation118_spill] sm:$0xff] }
0x1539   : > { %v13183_v2 = vld [vmem:[#allocation110_spill] sm:$0xff] }
0x153a   : > { %v13184_v3 = vpack.i.bf16 %v13182_v59, %v13183_v2 }
0x153b   : > { %8409 = vrot.lane.b32.xlu1 %v8408_v11, %s9233_s7  ;;  %8404 = vrot.lane.b32.xlu0 %v8403_v13, %s9229_s23  ;;  %v13181_v11 = vld [vmem:[#allocation101_spill] sm:$0xff] }
0x153c   : > { %v8483_v13 = vpack.i.bf16 %v13181_v11, %v13180_v4 }
0x153f   : > { %8419 = vrot.lane.b32.xlu1 %v8418_v63, %s9229_s23  ;;  %8414 = vrot.lane.b32.xlu0 %v8413_v31, %s9232_s5  ;;  %v13186_v31 = vld [vmem:[#allocation117_spill] sm:$0xff] }
0x1540   : > { %v8493_v33 = vpack.i.bf16 %v13186_v31, %v13185_v54  ;;  %v13188_v63 = vld [vmem:[#allocation121_spill] sm:$0xff] }
0x1541   : > { %v13189_v47 = vpack.i.bf16 %v13187_v49, %v13188_v63 }
0x1543   : > { %8424 = vrot.lane.b32.xlu1 %v8423_v60, %s9232_s5  ;;  %8429 = vrot.lane.b32.xlu0 %v8428_v19, %s9231_s10  ;;  %v13190_v60 = vld [vmem:[#allocation38_spill] sm:$0xff] }
0x1544   : > { %v8503_v39 = vpack.i.bf16 %v13191_v14, %v13190_v60  ;;  %v13194_v14 = vld [vmem:[#allocation50_spill] sm:$0xff] }
0x1547   : > { %8439 = vrot.lane.b32.xlu1 %v8438_v38, %s9231_s10  ;;  %8434 = vrot.lane.b32.xlu0 %v8433_v62, %s9234_s11 }
0x154b   : > { %8449 = vrot.lane.b32.xlu1 %v8448_v1, %s9234_s11  ;;  %8444 = vrot.lane.b32.xlu0 %v8443_v17, %s9230_s9 }
0x154f   : > { %8459 = vrot.lane.b32.xlu1 %v8458_v51, %s9230_s9  ;;  %8454 = vrot.lane.b32.xlu0 %v13174_v24, %s9233_s7 }
0x1553   : > { %8469 = vrot.lane.b32.xlu1 %v8468_v37, %s9233_s7  ;;  %8464 = vrot.lane.b32.xlu0 %v8463_v61, %s9229_s23 }
0x1557   : > { %8479 = vrot.lane.b32.xlu1 %v8478_v23, %s9229_s23  ;;  %8474 = vrot.lane.b32.xlu0 %v13179_v30, %s9232_s5 }
0x155b   : > { %8484 = vrot.lane.b32.xlu1 %v8483_v13, %s9232_s5  ;;  %8489 = vrot.lane.b32.xlu0 %v13184_v3, %s9231_s10 }
0x155f   : > { %8499 = vrot.lane.b32.xlu1 %v13189_v47, %s9230_s9  ;;  %8494 = vrot.lane.b32.xlu0 %v8493_v33, %s9231_s10  ;;  %v13192_v33 = vld [vmem:[#allocation46_spill] sm:$0xff] }
0x1560   : > { %v5194_v58 = vpop.xlane.xlu0 %5193 }
0x1561   : > { %9038 = vrcp.f32 %v5194_v58  ;;  %v13193_v58 = vld [vmem:[#allocation45_spill] sm:$0xff] }
0x1562   : > { %v5192_v19 = vpop.xlane.xlu1 %5191 }
0x1563   : > { %9040 = vrcp.f32 %v5192_v19  ;;  %8509 = vrot.lane.b32.xlu1 %v8508_v26, %s9229_s23  ;;  %8504 = vrot.lane.b32.xlu0 %v8503_v39, %s9230_s9 }
0x1566   : > { %v5198_v53 = vpop.xlane.xlu0 %5197 }
0x1567   : > { %v5196_v45 = vpop.xlane.xlu1 %5195  ;;  %9042 = vrcp.f32 %v5198_v53 }
0x1568   : > { %9044 = vrcp.f32 %v5196_v45  ;;  %v13195_v45 = vld [vmem:[#allocation52_spill] sm:$0xff] }
0x156a   : > { %v5202_v62 = vpop.xlane.xlu0 %5201 }
0x156b   : > { %v5200_v35 = vpop.xlane.xlu1 %5199  ;;  %9046 = vrcp.f32 %v5202_v62 }
0x156c   : > { %9048 = vrcp.f32 %v5200_v35 }
0x156e   : > { %v5206_v18 = vpop.xlane.xlu0 %5205  ;;  %v9039_v38 = vpop.eup %9038 }
0x156f   : > { %v5204_v7 = vpop.xlane.xlu1 %5203  ;;  %9050 = vrcp.f32 %v5206_v18  ;;  %v5240_v50 = vmul.f32 %v9039_v38, %v12081_v22 }
0x1570   : > { %v9041_v43 = vpop.eup %9040  ;;  %9052 = vrcp.f32 %v5204_v7 }
0x1571   : > { %v5239_v1 = vmul.f32 %v9041_v43, %v12084_v15 }
0x1572   : > { %v5210_v8 = vpop.xlane.xlu0 %5209 }
0x1573   : > { %v5208_v26 = vpop.xlane.xlu1 %5207  ;;  %9054 = vrcp.f32 %v5210_v8  ;;  %8085 = vmatprep.mubr.f32.mxu0 %v5239_v1 }
0x1574   : > { %v9043_v21 = vpop.eup %9042  ;;  %9056 = vrcp.f32 %v5208_v26  ;;  %8086 = vmatmul.mubr.f32.vlgmr.msra.gmra.mxu0 %v5240_v50 }
0x1575   : > { %v9045_v25 = vpop.eup %9044  ;;  %v5242_v17 = vmul.f32 %v9043_v21, %v12089_v56 }
0x1576   : > { %v5214_v28 = vpop.xlane.xlu0 %5213  ;;  %v5241_v6 = vmul.f32 %v9045_v25, %v12091_v20 }
0x1577   : > { %v5212_v51 = vpop.xlane.xlu1 %5211  ;;  %9058 = vrcp.f32 %v5214_v28 }
0x1578   : > { %v9047_v48 = vpop.eup %9046  ;;  %9060 = vrcp.f32 %v5212_v51  ;;  %8088 = vmatprep.mubr.f32.mxu0 %v5241_v6 }
0x1579   : > { %v9049_v15 = vpop.eup %9048  ;;  %8089 = vmatmul.mubr.f32.gmra.mxu0 %v5242_v17  ;;  %v5244_v22 = vmul.f32 %v9047_v48, %v12097_v55 }
0x157a   : > { %v5218_v34 = vpop.xlane.xlu0 %5217  ;;  %v5243_v24 = vmul.f32 %v9049_v15, %v12099_v41 }
0x157b   : > { %v5216_v40 = vpop.xlane.xlu1 %5215  ;;  %9062 = vrcp.f32 %v5218_v34 }
0x157c   : > { %v9051_v32 = vpop.eup %9050  ;;  %9064 = vrcp.f32 %v5216_v40  ;;  %8091 = vmatprep.mubr.f32.mxu0 %v5243_v24 }
0x157d   : > { %v9053_v56 = vpop.eup %9052  ;;  %8092 = vmatmul.mubr.f32.gmra.mxu0 %v5244_v22  ;;  %v5246_v20 = vmul.f32 %v9051_v32, %v12105_v16 }
0x157e   : > { %v5222_v37 = vpop.xlane.xlu0 %5221  ;;  %v5245_v61 = vmul.f32 %v9053_v56, %v12107_v36 }
0x157f   : > { %v5220_v23 = vpop.xlane.xlu1 %5219  ;;  %9066 = vrcp.f32 %v5222_v37 }
0x1580   : > { %v9055_v0 = vpop.eup %9054  ;;  %9068 = vrcp.f32 %v5220_v23  ;;  %8094 = vmatprep.mubr.f32.mxu0 %v5245_v61 }
0x1581   : > { %v9057_v55 = vpop.eup %9056  ;;  %8095 = vmatmul.mubr.f32.gmra.mxu0 %v5246_v20  ;;  %v5248_v41 = vmul.f32 %v9055_v0, %v12111_v10 }
0x1582   : > { %v8280_v42 = vpop.permute.xlu0 %8279  ;;  %v5247_v30 = vmul.f32 %v9057_v55, %v12113_v27 }
0x1583   : > { %v8285_v4 = vpop.permute.xlu1 %8284  ;;  %v8282_v11 = vunpack.i.h.bf16 %v8280_v42  ;;  %v8281_v36 = vunpack.i.l.bf16 %v8280_v42 }
0x1584   : > { %v9059_v13 = vpop.eup %9058  ;;  %v8287_v59 = vunpack.i.h.bf16 %v8285_v4  ;;  %v8286_v16 = vunpack.i.l.bf16 %v8285_v4  ;;  %8097 = vmatprep.mubr.f32.mxu0 %v5247_v30 }
0x1585   : > { %v9061_v2 = vpop.eup %9060  ;;  %8098 = vmatmul.mubr.f32.gmra.mxu0 %v5248_v41  ;;  %v5250_v3 = vmul.f32 %v9059_v13, %v12117_v44  ;;  %v5904_v10 = vsel %vm631_vm0, %v13192_v33, %v8282_v11 }
0x1586   : > { %v8295_v54 = vpop.permute.xlu0 %8294  ;;  %v5249_v31 = vmul.f32 %v9061_v2, %v12119_v46  ;;  %v5905_v60 = vsel %vm631_vm0, %v13193_v58, %v8287_v59  ;;  %v5897_v39 = vsel %vm631_vm0, %v13194_v14, %v8286_v16  ;;  %v5896_v46 = vsel %vm631_vm0, %v13195_v45, %v8281_v36  ;;  %v13196_v2 = vld [vmem:[#allocation48_spill] sm:$0xff] }
0x1587   : > { %v8290_v49 = vpop.permute.xlu1 %8289  ;;  %v8297_v27 = vunpack.i.h.bf16 %v8295_v54  ;;  %v8296_v63 = vunpack.i.l.bf16 %v8295_v54 }
0x1588   : > { %v9063_v47 = vpop.eup %9062  ;;  %v8292_v19 = vunpack.i.h.bf16 %v8290_v49  ;;  %v8291_v53 = vunpack.i.l.bf16 %v8290_v49  ;;  %8100 = vmatprep.mubr.f32.mxu0 %v5249_v31 }
0x1589   : > { %v9065_v44 = vpop.eup %9064  ;;  %v5922_v62 = vsel %vm5912_vm1, %v5905_v60, %v8297_v27  ;;  %v5914_v35 = vsel %vm5912_vm1, %v5897_v39, %v8296_v63  ;;  %8101 = vmatmul.mubr.f32.gmra.mxu0 %v5250_v3  ;;  %v5252_v18 = vmul.f32 %v9063_v47, %v12123_v52  ;;  %v13197_v3 = vld [vmem:[#allocation51_spill] sm:$0xff] }
0x158a   : > { %v5913_v38 = vsel %vm5912_vm1, %v5896_v46, %v8291_v53  ;;  %v5921_v7 = vsel %vm5912_vm1, %v5904_v10, %v8292_v19  ;;  %v8305_v43 = vpop.permute.xlu0 %8304  ;;  %v5251_v1 = vmul.f32 %v9065_v44, %v12125_v5 }
0x158b   : > { %v8300_v50 = vpop.permute.xlu1 %8299  ;;  %v8307_v8 = vunpack.i.h.bf16 %v8305_v43  ;;  %v8306_v26 = vunpack.i.l.bf16 %v8305_v43 }
0x158c   : > { %v9067_v21 = vpop.eup %9066  ;;  %v8302_v25 = vunpack.i.h.bf16 %v8300_v50  ;;  %v8301_v17 = vunpack.i.l.bf16 %v8300_v50  ;;  %8103 = vmatprep.mubr.f32.mxu0 %v5251_v1  ;;  %v13199_v1 = vld [vmem:[#allocation49_spill] sm:$0xff] }
0x158d   : > { %v9069_v28 = vpop.eup %9068  ;;  %v5931_v6 = vsel %vm5929_vm2, %v5914_v35, %v8306_v26  ;;  %v5939_v52 = vsel %vm5929_vm2, %v5922_v62, %v8307_v8  ;;  %8104 = vmatmul.mubr.f32.gmra.mxu0 %v5252_v18  ;;  %v5254_v51 = vmul.f32 %v9067_v21, %v12129_v29 }
0x158e   : > { %v5930_v48 = vsel %vm5929_vm2, %v5913_v38, %v8301_v17  ;;  %v5938_v15 = vsel %vm5929_vm2, %v5921_v7, %v8302_v25  ;;  %v8315_v5 = vpop.permute.xlu0 %8314  ;;  %v5253_v22 = vmul.f32 %v9069_v28, %v12131_v9  ;;  %v13198_v7 = vld [vmem:[#allocation47_spill] sm:$0xff] }
0x158f   : > { %v8310_v34 = vpop.permute.xlu1 %8309  ;;  %v8317_v23 = vunpack.i.h.bf16 %v8315_v5  ;;  %v8316_v0 = vunpack.i.l.bf16 %v8315_v5  ;;  %v6027_v5 = vld [vmem:[#allocation7 + $0x68] sm:$0xff] }
0x1590   : > { %v8312_v24 = vunpack.i.h.bf16 %v8310_v34  ;;  %v8311_v40 = vunpack.i.l.bf16 %v8310_v34  ;;  %8106 = vmatprep.mubr.f32.mxu0 %v5253_v22  ;;  %v6026_v22 = vld [vmem:[#allocation7 + $0x60] sm:$0xff]  ;;  %v6025_v34 = vld [vmem:[#allocation7 + $0x58] sm:$0xff] }
0x1591   : > { %8107 = vmatmul.mubr.f32.gmra.mxu0 %v5254_v51  ;;  %v5906_v36 = vsel %vm631_vm0, %v13196_v2, %v8317_v23  ;;  %v5898_v54 = vsel %vm631_vm0, %v13197_v3, %v8316_v0 }
0x1592   : > { %v5947_v32 = vsel %vm5946_vm3, %v5930_v48, %v8311_v40  ;;  %v5955_v56 = vsel %vm5946_vm3, %v5938_v15, %v8312_v24  ;;  %v8325_v20 = vpop.permute.xlu0 %8324  ;;  %v6029_v48 = vld [vmem:[#allocation7 + $0x78] sm:$0xff]  ;;  %v6028_v15 = vld [vmem:[#allocation7 + $0x70] sm:$0xff]  ;;  %v6023_v40 = vld [vmem:[#allocation7 + $0x48] sm:$0xff] }
0x1593   : > { %v8320_v29 = vpop.permute.xlu1 %8319  ;;  %v8327_v37 = vunpack.i.h.bf16 %v8325_v20  ;;  %v8326_v61 = vunpack.i.l.bf16 %v8325_v20  ;;  %8109 = vmatprep.subr.mxu0 %v6029_v48  ;;  %8165 = vmatprep.subr.mxu1 %v6029_v48  ;;  %v6024_v24 = vld [vmem:[#allocation7 + $0x50] sm:$0xff] }
0x1594   : > { %v8322_v55 = vunpack.i.h.bf16 %v8320_v29  ;;  %v8321_v41 = vunpack.i.l.bf16 %v8320_v29  ;;  %8110 = vmatpush3.msra.mxu0 %v6029_v48  ;;  %8181 = vmatpush3.msra.mxu1 %v6029_v48  ;;  %v6020_v20 = vld [vmem:[#allocation7 + $0x30] sm:$0xff]  ;;  %v6019_v29 = vld [vmem:[#allocation7 + $0x28] sm:$0xff] }
0x1595   : > { %v5964_v9 = vsel %vm5963_vm4, %v5947_v32, %v8326_v61  ;;  %v5972_v42 = vsel %vm5963_vm4, %v5955_v56, %v8327_v37  ;;  %8111 = vmatprep.subr.mxu0 %v6028_v15  ;;  %8166 = vmatprep.subr.mxu1 %v6028_v15  ;;  %v6022_v32 = vld [vmem:[#allocation7 + $0x40] sm:$0xff]  ;;  %v6021_v56 = vld [vmem:[#allocation7 + $0x38] sm:$0xff] }
0x1596   : > { %v5948_v30 = vsel %vm5946_vm3, %v5931_v6, %v8321_v41  ;;  %v5956_v4 = vsel %vm5946_vm3, %v5939_v52, %v8322_v55  ;;  %v8335_v11 = vpop.permute.xlu0 %8334  ;;  %8112 = vmatpush3.msra.mxu0 %v6028_v15  ;;  %8182 = vmatpush3.msra.mxu1 %v6028_v15  ;;  %v6018_v37 = vld [vmem:[#allocation7 + $0x20] sm:$0xff]  ;;  %v6017_v61 = vld [vmem:[#allocation7 + $0x18] sm:$0xff]  ;;  %v6016_v41 = vld [vmem:[#allocation7 + $0x10] sm:$0xff] }
0x1597   : > { %v8330_v13 = vpop.permute.xlu1 %8329  ;;  %v8337_v59 = vunpack.i.h.bf16 %v8335_v11  ;;  %v8336_v16 = vunpack.i.l.bf16 %v8335_v11  ;;  %8113 = vmatprep.subr.mxu0 %v6027_v5  ;;  %8167 = vmatprep.subr.mxu1 %v6027_v5 }
0x1598   : > { %v8332_v60 = vunpack.i.h.bf16 %v8330_v13  ;;  %v8331_v14 = vunpack.i.l.bf16 %v8330_v13  ;;  %8114 = vmatpush3.msra.mxu0 %v6027_v5  ;;  %8183 = vmatpush3.msra.mxu1 %v6027_v5 }
0x1599   : > { %v5915_v31 = vsel %vm5912_vm1, %v5898_v54, %v8336_v16  ;;  %v5923_v33 = vsel %vm5912_vm1, %v5906_v36, %v8337_v59  ;;  %8115 = vmatprep.subr.mxu0 %v6026_v22  ;;  %8168 = vmatprep.subr.mxu1 %v6026_v22 }
0x159a   : > { %v8345_v10 = vpop.permute.xlu0 %8344  ;;  %v5907_v43 = vsel %vm631_vm0, %v13198_v7, %v8332_v60  ;;  %v5899_v50 = vsel %vm631_vm0, %v13199_v1, %v8331_v14  ;;  %8116 = vmatpush3.msra.mxu0 %v6026_v22  ;;  %8184 = vmatpush3.msra.mxu1 %v6026_v22  ;;  %v8543_v14 = vpack.i.bf16 %v12045_v12, %v12029_v57 }
0x159b   : > { %v8340_v49 = vpop.permute.xlu1 %8339  ;;  %v8347_v27 = vunpack.i.h.bf16 %v8345_v10  ;;  %v8346_v63 = vunpack.i.l.bf16 %v8345_v10  ;;  %8117 = vmatprep.subr.mxu0 %v6025_v34  ;;  %8169 = vmatprep.subr.mxu1 %v6025_v34 }
0x159c   : > { %v8342_v47 = vunpack.i.h.bf16 %v8340_v49  ;;  %v8341_v58 = vunpack.i.l.bf16 %v8340_v49  ;;  %8118 = vmatpush3.msra.mxu0 %v6025_v34  ;;  %8185 = vmatpush3.msra.mxu1 %v6025_v34 }
0x159d   : > { %v12326_v39 = vsel %vm5980_vm5, %v5964_v9, %v8346_v63  ;;  %v12329_v19 = vsel %vm5980_vm5, %v5972_v42, %v8347_v27  ;;  %8119 = vmatprep.subr.mxu0 %v6024_v24  ;;  %8170 = vmatprep.subr.mxu1 %v6024_v24  ;;  %v6015_v42 = vld [vmem:[#allocation7 + $0x8] sm:$0xff] }
0x159e   : > { %v5965_v53 = vsel %vm5963_vm4, %v5948_v30, %v8341_v58  ;;  %v5973_v44 = vsel %vm5963_vm4, %v5956_v4, %v8342_v47  ;;  %v8355_v45 = vpop.permute.xlu0 %8354  ;;  %8120 = vmatpush3.msra.mxu0 %v6024_v24  ;;  %8186 = vmatpush3.msra.mxu1 %v6024_v24  ;;  %v6014_v4 = vld [vmem:[#allocation7] sm:$0xff] }
0x159f   : > { %v8350_v46 = vpop.permute.xlu1 %8349  ;;  %v8357_v62 = vunpack.i.h.bf16 %v8355_v45  ;;  %v8356_v35 = vunpack.i.l.bf16 %v8355_v45  ;;  %8121 = vmatprep.subr.mxu0 %v6023_v40  ;;  %8171 = vmatprep.subr.mxu1 %v6023_v40 }
0x15a0   : > { %v8352_v18 = vunpack.i.h.bf16 %v8350_v46  ;;  %v8351_v38 = vunpack.i.l.bf16 %v8350_v46  ;;  %8122 = vmatpush3.msra.mxu0 %v6023_v40  ;;  %8187 = vmatpush3.msra.mxu1 %v6023_v40 }
0x15a1   : > { %v12338_v8 = vsel %vm5929_vm2, %v5915_v31, %v8356_v35  ;;  %v12341_v26 = vsel %vm5929_vm2, %v5923_v33, %v8357_v62  ;;  %8123 = vmatprep.subr.mxu0 %v6022_v32  ;;  %8172 = vmatprep.subr.mxu1 %v6022_v32 }
0x15a2   : > { %v12344_v21 = vsel %vm5912_vm1, %v5899_v50, %v8351_v38  ;;  %v12347_v25 = vsel %vm5912_vm1, %v5907_v43, %v8352_v18  ;;  %8124 = vmatpush3.msra.mxu0 %v6022_v32  ;;  %8188 = vmatpush3.msra.mxu1 %v6022_v32  ;;  %v8370_v46 = vpop.permute.xlu0 %8369 }
0x15a3   : > { %v8360_v17 = vpop.permute.xlu1 %8359  ;;  %8125 = vmatprep.subr.mxu0 %v6021_v56  ;;  %8173 = vmatprep.subr.mxu1 %v6021_v56 }
0x15a4   : > { %v8362_v28 = vunpack.i.h.bf16 %v8360_v17  ;;  %v8361_v6 = vunpack.i.l.bf16 %v8360_v17  ;;  %8126 = vmatpush3.msra.mxu0 %v6021_v56  ;;  %8189 = vmatpush3.msra.mxu1 %v6021_v56  ;;  %v8372_v56 = vunpack.i.h.bf16 %v8370_v46 }
0x15a5   : > { %8127 = vmatprep.subr.mxu0 %v6020_v20  ;;  %8174 = vmatprep.subr.mxu1 %v6020_v20 }
0x15a6   : > { %v12350_v52 = vsel %vm5980_vm5, %v5965_v53, %v8361_v6  ;;  %v12353_v51 = vsel %vm5980_vm5, %v5973_v44, %v8362_v28  ;;  %8128 = vmatpush3.msra.mxu0 %v6020_v20  ;;  %8190 = vmatpush3.msra.mxu1 %v6020_v20  ;;  %v8375_v35 = vpop.permute.xlu0 %8374  ;;  %v8371_v20 = vunpack.i.l.bf16 %v8370_v46 }
0x15a7   : > { %8129 = vmatprep.subr.mxu0 %v6019_v29  ;;  %8175 = vmatprep.subr.mxu1 %v6019_v29  ;;  %v8365_v45 = vpop.permute.xlu1 %8364 }
0x15a8   : > { %8130 = vmatpush3.msra.mxu0 %v6019_v29  ;;  %8191 = vmatpush3.msra.mxu1 %v6019_v29  ;;  %v8377_v29 = vunpack.i.h.bf16 %v8375_v35 }
0x15a9   : > { %8131 = vmatprep.subr.mxu0 %v6018_v37  ;;  %8176 = vmatprep.subr.mxu1 %v6018_v37 }
0x15aa   : > { %8132 = vmatpush3.msra.mxu0 %v6018_v37  ;;  %8192 = vmatpush3.msra.mxu1 %v6018_v37  ;;  %v8385_v38 = vpop.permute.xlu0 %8384  ;;  %v8367_v37 = vunpack.i.h.bf16 %v8365_v45 }
0x15ab   : > { %8133 = vmatprep.subr.mxu0 %v6017_v61  ;;  %8177 = vmatprep.subr.mxu1 %v6017_v61  ;;  %v8380_v62 = vpop.permute.xlu1 %8379 }
0x15ac   : > { %8134 = vmatpush3.msra.mxu0 %v6017_v61  ;;  %8193 = vmatpush3.msra.mxu1 %v6017_v61  ;;  %v8366_v61 = vunpack.i.l.bf16 %v8365_v45 }
0x15ad   : > { %8135 = vmatprep.subr.mxu0 %v6016_v41  ;;  %8178 = vmatprep.subr.mxu1 %v6016_v41 }
0x15ae   : > { %8136 = vmatpush3.msra.mxu0 %v6016_v41  ;;  %8194 = vmatpush3.msra.mxu1 %v6016_v41  ;;  %v8395_v43 = vpop.permute.xlu0 %8394  ;;  %v8381_v41 = vunpack.i.l.bf16 %v8380_v62 }
0x15af   : > { %8137 = vmatprep.subr.mxu0 %v6015_v42  ;;  %8179 = vmatprep.subr.mxu1 %v6015_v42  ;;  %v8390_v18 = vpop.permute.xlu1 %8389 }
0x15b0   : > { %8138 = vmatpush3.msra.mxu0 %v6015_v42  ;;  %8195 = vmatpush3.msra.mxu1 %v6015_v42  ;;  %v8382_v42 = vunpack.i.h.bf16 %v8380_v62 }
0x15b1   : > { %8139 = vmatprep.subr.mxu0 %v6014_v4  ;;  %8180 = vmatprep.subr.mxu1 %v6014_v4 }
0x15b2   : > { %8140 = vmatpush3.msra.mxu0 %v6014_v4  ;;  %8196 = vmatpush3.msra.mxu1 %v6014_v4  ;;  %v12370_v57 = vpop.permute.xlu0 %8404  ;;  %v5957_v4 = vsel %vm5946_vm3, %v12341_v26, %v8372_v56  ;;  %v8396_v26 = vunpack.i.l.bf16 %v8395_v43 }
0x15b3   : > { %v12366_v7 = vpop.permute.xlu1 %8399 }
0x15b6   : > { %v12374_v50 = vpop.permute.xlu0 %8414 }
0x15b7   : > { %v12368_v1 = vpop.permute.xlu1 %8409 }
0x15ba   : > { %v12378_v28 = vpop.permute.xlu0 %8429 }
0x15bb   : > { %v12372_v12 = vpop.permute.xlu1 %8419  ;;  %v8431_v45 = vunpack.i.l.bf16 %v12378_v28 }
0x15be   : > { %v12382_v48 = vpop.permute.xlu0 %8434 }
0x15bf   : > { %v12376_v17 = vpop.permute.xlu1 %8424 }
0x15c2   : > { %v12386_v5 = vpop.permute.xlu0 %8444 }
0x15c3   : > { %v12380_v6 = vpop.permute.xlu1 %8439 }
0x15c6   : > { %v12390_v34 = vpop.permute.xlu0 %8454 }
0x15c7   : > { %v12384_v15 = vpop.permute.xlu1 %8449 }
0x15ca   : > { %v12394_v40 = vpop.permute.xlu0 %8464 }
0x15cb   : > { %v12388_v22 = vpop.permute.xlu1 %8459 }
0x15cf   : > { %v12392_v24 = vpop.permute.xlu1 %8469 }
0x15d3   : > { %v12396_v32 = vpop.permute.xlu1 %8479 }
0x1634   : > { %v8087_v23 = vpop.f32.mrf.mxu0 }
0x1636   : > { %v5369_v0 = vpop.f32.mrf.mxu0 }
0x1639   : > { %v8090_v55 = vpop.f32.mrf.mxu0 }
0x163b   : > { %v5379_v9 = vpop.f32.mrf.mxu0 }
0x163d   : > { %v8093_v30 = vpop.f32.mrf.mxu0 }
0x163f   : > { %v5389_v11 = vpop.f32.mrf.mxu0 }
0x1641   : > { %v8096_v13 = vpop.f32.mrf.mxu0 }
0x1643   : > { %v5399_v59 = vpop.f32.mrf.mxu0 }
0x1645   : > { %v8099_v16 = vpop.f32.mrf.mxu0 }
0x1646   : > { %v8513_v2 = vpack.i.bf16 %v8099_v16, %v8087_v23  ;;  %v8376_v23 = vunpack.i.l.bf16 %v8375_v35  ;;  %v5941_v16 = vsel %vm5929_vm2, %v12347_v25, %v8367_v37  ;;  %v8421_v35 = vunpack.i.l.bf16 %v12372_v12 }
0x1647   : > { %v5409_v36 = vpop.f32.mrf.mxu0 }
0x1648   : > { %v8518_v3 = vpack.i.bf16 %v5409_v36, %v5369_v0  ;;  %8514 = vrot.lane.b32.xlu1 %v8513_v2, %s9228_s21  ;;  %v8386_v0 = vunpack.i.l.bf16 %v8385_v38  ;;  %v13201_v2 = vld [vmem:[#allocation42_spill] sm:$0xff] }
0x1649   : > { %v8102_v54 = vpop.f32.mrf.mxu0  ;;  %v5900_v36 = vsel %vm631_vm0, %v13201_v2, %v8376_v23  ;;  %v8442_v2 = vunpack.i.h.bf16 %v12380_v6 }
0x164a   : > { %v8523_v31 = vpack.i.bf16 %v8102_v54, %v8090_v55  ;;  %8519 = vrot.lane.b32.xlu0 %v8518_v3, %s9228_s21  ;;  %v12398_v55 = vpop.permute.xlu0 %8474  ;;  %v12412_v3 = vpop.permute.xlu1 %8484  ;;  %v5917_v46 = vsel %vm5912_vm1, %v5900_v36, %v8396_v26  ;;  %v8441_v36 = vunpack.i.l.bf16 %v12380_v6  ;;  %v8457_v26 = vunpack.i.h.bf16 %v12390_v34 }
0x164b   : > { %v5419_v33 = vpop.f32.mrf.mxu0 }
0x164c   : > { %v8528_v10 = vpack.i.bf16 %v5419_v33, %v5379_v9  ;;  %8524 = vrot.lane.b32.xlu1 %v8523_v31, %s9228_s21  ;;  %v8387_v9 = vunpack.i.h.bf16 %v8385_v38  ;;  %v8397_v31 = vunpack.i.h.bf16 %v8395_v43  ;;  %v13202_v38 = vld [vmem:[#allocation36_spill] sm:$0xff]  ;;  %v13203_v43 = vld [vmem:[#allocation41_spill] sm:$0xff] }
0x164d   : > { %v8105_v49 = vpop.f32.mrf.mxu0 }
0x164e   : > { %v8533_v27 = vpack.i.bf16 %v8105_v49, %v8093_v30  ;;  %8529 = vrot.lane.b32.xlu0 %v8528_v10, %s9228_s21  ;;  %v5949_v30 = vsel %vm5946_vm3, %v12338_v8, %v8371_v20  ;;  %v5974_v33 = vsel %vm5963_vm4, %v5957_v4, %v8387_v9  ;;  %v5958_v10 = vsel %vm5946_vm3, %v5941_v16, %v8382_v42  ;;  %v12419_v25 = vpop.permute.xlu0 %8489  ;;  %v12438_v56 = vpop.permute.xlu1 %8499 }
0x164f   : > { %v5429_v63 = vpop.f32.mrf.mxu0  ;;  %v5966_v54 = vsel %vm5963_vm4, %v5949_v30, %v8386_v0  ;;  %v8392_v49 = vunpack.i.h.bf16 %v8390_v18  ;;  %v8437_v42 = vunpack.i.h.bf16 %v12382_v48  ;;  %v8436_v30 = vunpack.i.l.bf16 %v12382_v48 }
0x1650   : > { %v8538_v47 = vpack.i.bf16 %v5429_v63, %v5389_v11  ;;  %8534 = vrot.lane.b32.xlu1 %v8533_v27, %s9228_s21  ;;  %v13200_v11 = vld [vmem:[#allocation53_spill] sm:$0xff]  ;;  %v8406_v27 = vunpack.i.l.bf16 %v12370_v57  ;;  %v8402_v63 = vunpack.i.h.bf16 %v12366_v7  ;;  %v8456_v48 = vunpack.i.l.bf16 %v12390_v34 }
0x1651   : > { %v8108_v58 = vpop.f32.mrf.mxu0  ;;  %v8462_v34 = vunpack.i.h.bf16 %v12388_v22 }
0x1652   : > { %8539 = vrot.lane.b32.xlu0 %v8538_v47, %s9228_s21  ;;  %v8553_v44 = vpack.i.bf16 %v8108_v58, %v8096_v13  ;;  %v5908_v13 = vsel %vm631_vm0, %v13200_v11, %v8377_v29  ;;  %v8401_v47 = vunpack.i.l.bf16 %v12366_v7  ;;  %v8407_v58 = vunpack.i.h.bf16 %v12370_v57 }
0x1653   : > { %v5439_v60 = vpop.f32.mrf.mxu0  ;;  %v5925_v62 = vsel %vm5912_vm1, %v5908_v13, %v8397_v31  ;;  %v5909_v7 = vsel %vm631_vm0, %v13202_v38, %v8392_v49  ;;  %v5975_v29 = vsel %vm5963_vm4, %v5958_v10, %v8402_v63  ;;  %v8427_v11 = vunpack.i.h.bf16 %v12376_v17  ;;  %v13204_v10 = vld [vmem:[#allocation55_spill] sm:$0xff] }
0x1654   : > { %v8548_v53 = vpack.i.bf16 %v5439_v60, %v5399_v59  ;;  %v5933_v59 = vsel %vm5929_vm2, %v12344_v21, %v8366_v61  ;;  %v8391_v21 = vunpack.i.l.bf16 %v8390_v18  ;;  %v8416_v60 = vunpack.i.l.bf16 %v12374_v50 }
0x1655   : > { %v5950_v8 = vsel %vm5946_vm3, %v5933_v59, %v8381_v41  ;;  %v8432_v18 = vunpack.i.h.bf16 %v12378_v28  ;;  %v12447_v28 = vsel %vm5980_vm5, %v5974_v33, %v8407_v58  ;;  %v12453_v41 = vpop.permute.xlu0 %8494  ;;  %v8426_v13 = vunpack.i.l.bf16 %v12376_v17  ;;  %v12475_v33 = vpop.permute.xlu1 %8509 }
0x1656   : > { %8544 = vrot.lane.b32.xlu0 %v8543_v14, %s9229_s23  ;;  %8549 = vrot.lane.b32.xlu1 %v8548_v53, %s9228_s21  ;;  %v8412_v14 = vunpack.i.h.bf16 %v12368_v1  ;;  %v8411_v53 = vunpack.i.l.bf16 %v12368_v1  ;;  %v5901_v57 = vsel %vm631_vm0, %v13203_v43, %v8391_v21  ;;  %v8422_v1 = vunpack.i.h.bf16 %v12372_v12  ;;  %v13205_v21 = vld [vmem:[#allocation44_spill] sm:$0xff] }
0x1657   : > { %v5967_v20 = vsel %vm5963_vm4, %v5950_v8, %v8401_v47  ;;  %v5934_v37 = vsel %vm5929_vm2, %v5917_v46, %v8416_v60  ;;  %v8446_v59 = vunpack.i.l.bf16 %v12386_v5  ;;  %v8452_v8 = vunpack.i.h.bf16 %v12384_v15  ;;  %v13207_v46 = vld [vmem:[#allocation43_spill] sm:$0xff] }
0x1658   : > { %v5918_v61 = vsel %vm5912_vm1, %v5901_v57, %v8411_v53  ;;  %v5926_v23 = vsel %vm5912_vm1, %v5909_v7, %v8412_v14  ;;  %v5951_v0 = vsel %vm5946_vm3, %v5934_v37, %v8431_v45  ;;  %v12459_v4 = vsel %vm5980_vm5, %v5967_v20, %v8421_v35  ;;  %v13206_v45 = vld [vmem:[#allocation54_spill] sm:$0xff] }
0x1659   : > { %v12465_v16 = vsel %vm5980_vm5, %v5975_v29, %v8422_v1  ;;  %v8451_v31 = vunpack.i.l.bf16 %v12384_v15  ;;  %v8466_v17 = vunpack.i.l.bf16 %v12394_v40  ;;  %v5910_v49 = vsel %vm631_vm0, %v13204_v10, %v8437_v42  ;;  %v12486_v47 = vpop.permute.xlu0 %8504 }
0x165a   : > { %8554 = vrot.lane.b32.xlu0 %v8553_v44, %s9228_s21  ;;  %v8417_v44 = vunpack.i.h.bf16 %v12374_v50  ;;  %v12441_v50 = vsel %vm5980_vm5, %v5966_v54, %v8406_v27  ;;  %v8447_v54 = vunpack.i.h.bf16 %v12386_v5  ;;  %v5902_v6 = vsel %vm631_vm0, %v13205_v21, %v8436_v30  ;;  %s9235_s21 = smov [#allocation8]  }
0x165b   : > { %v8461_v5 = vunpack.i.l.bf16 %v12388_v22  ;;  %v8467_v27 = vunpack.i.h.bf16 %v12394_v40  ;;  %v5935_v63 = vsel %vm5929_vm2, %v5918_v61, %v8426_v13  ;;  %v5943_v15 = vsel %vm5929_vm2, %v5926_v23, %v8427_v11  ;;  %s9154_s23 = sshll.u32 %s9235_s21, 4  ;;  %s9155_s23 = int_to_ptr.vmem [resolvable:$false] %s9154_s23 }
0x165c   : > { %v5942_v12 = vsel %vm5929_vm2, %v5925_v62, %v8417_v44  ;;  %v5968_v58 = vsel %vm5963_vm4, %v5951_v0, %v8446_v59  ;;  %v5952_v60 = vsel %vm5946_vm3, %v5935_v63, %v8441_v36  ;;  %v5960_v14 = vsel %vm5946_vm3, %v5943_v15, %v8442_v2  ;;  %s9156_s9 = scalar_lea.vmem %s9155_s23, 4096  ;;  %p9157_p6 = scmp.lt.s32.totalorder %s12593_s6, %s9155_s23 }
0x165d   : > { %v5959_v9 = vsel %vm5946_vm3, %v5942_v12, %v8432_v18  ;;  %v5919_v53 = vsel %vm5912_vm1, %v5902_v6, %v8456_v48  ;;  %v5911_v40 = vsel %vm631_vm0, %v13206_v45, %v8452_v8  ;;  %v5903_v62 = vsel %vm631_vm0, %v13207_v46, %v8451_v31  ;;  %p9158_p12 = scmp.lt.s32.totalorder %s9156_s9, %s9150_s8 }
0x165e   : > { %v5976_v44 = vsel %vm5963_vm4, %v5959_v9, %v8447_v54  ;;  %v5927_v22 = vsel %vm5912_vm1, %v5910_v49, %v8457_v26  ;;  %v12499_v18 = vsel %vm5980_vm5, %v5968_v58, %v8466_v17  ;;  %v5969_v38 = vsel %vm5963_vm4, %v5952_v60, %v8461_v5 }
0x165f   : > { %v8477_v7 = vunpack.i.h.bf16 %v12398_v55  ;;  %v8476_v43 = vunpack.i.l.bf16 %v12398_v55  ;;  %v5993_v57 = vsel %vm5980_vm5, %v5976_v44, %v8467_v27  ;;  %v5977_v1 = vsel %vm5963_vm4, %v5960_v14, %v8462_v34  ;;  %p9159_p3 = por %p9158_p12, %p9157_p6 }
0x1660   : > { %v8472_v20 = vunpack.i.h.bf16 %v12392_v24  ;;  %v8471_v23 = vunpack.i.l.bf16 %v12392_v24  ;;  %v8482_v9 = vunpack.i.h.bf16 %v12396_v32  ;;  %v8481_v42 = vunpack.i.l.bf16 %v12396_v32 }
0x1661   : > { %v8492_v55 = vunpack.i.h.bf16 %v12419_v25  ;;  %v8491_v30 = vunpack.i.l.bf16 %v12419_v25  ;;  %v5936_v13 = vsel %vm5929_vm2, %v5919_v53, %v8476_v43  ;;  %v5944_v59 = vsel %vm5929_vm2, %v5927_v22, %v8477_v7  ;;  %p9160_p9 = pnand %p9159_p3, %p9153_p2 }
0x1662   : > { %v5920_v8 = vsel %vm5912_vm1, %v5903_v62, %v8471_v23  ;;  %v5928_v31 = vsel %vm5912_vm1, %v5911_v40, %v8472_v20  ;;  %v5994_v10 = vsel %vm5980_vm5, %v5977_v1, %v8482_v9  ;;  %v8487_v49 = vunpack.i.h.bf16 %v12412_v3 }
0x1663   : > { %v8486_v21 = vunpack.i.l.bf16 %v12412_v3  ;;  %v8502_v60 = vunpack.i.h.bf16 %v12438_v56  ;;  %v8501_v3 = vunpack.i.l.bf16 %v12438_v56  ;;  %v8496_v53 = vunpack.i.l.bf16 %v12453_v41 }
0x1664   : > { %v8512_v44 = vunpack.i.h.bf16 %v12475_v33  ;;  %v8511_v45 = vunpack.i.l.bf16 %v12475_v33  ;;  %v8507_v46 = vunpack.i.h.bf16 %v12486_v47  ;;  %v8506_v62 = vunpack.i.l.bf16 %v12486_v47 }
0x16ba   : > { %v8515_v35 = vpop.permute.xlu1 %8514 }
0x16bb   : > { %v8517_v29 = vunpack.i.h.bf16 %v8515_v35  ;;  %v8516_v37 = vunpack.i.l.bf16 %v8515_v35 }
0x16bc   : > { %v8520_v61 = vpop.permute.xlu0 %8519 }
0x16bd   : > { %v8522_v12 = vunpack.i.h.bf16 %v8520_v61  ;;  %v8521_v0 = vunpack.i.l.bf16 %v8520_v61  ;;  %v5999_v36 = vsel %vm5997_vm6, %v12350_v52, %v8516_v37  ;;  %v6007_v32 = vsel %vm5997_vm6, %v12353_v51, %v8517_v29 }
0x16be   : > { %v8525_v11 = vpop.permute.xlu1 %8524  ;;  %v5961_v52 = vsel %vm5946_vm3, %v5944_v59, %v8492_v55  ;;  %v5986_v51 = vsel %vm5980_vm5, %v5969_v38, %v8481_v42 }
0x16bf   : > { %v5998_v2 = vsel %vm5997_vm6, %v12326_v39, %v8521_v0  ;;  %v6006_v24 = vsel %vm5997_vm6, %v12329_v19, %v8522_v12  ;;  %v8527_v54 = vunpack.i.h.bf16 %v8525_v11  ;;  %v8526_v48 = vunpack.i.l.bf16 %v8525_v11 }
0x16c0   : > { %v8530_v25 = vpop.permute.xlu0 %8529  ;;  %8141 = vmatprep.mubr.f32.mxu0 %v5998_v2  ;;  %8153 = vmatprep.mubr.f32.mxu1 %v6006_v24  ;;  %v5953_v19 = vsel %vm5946_vm3, %v5936_v13, %v8491_v30  ;;  %v5978_v43 = vsel %vm5963_vm4, %v5961_v52, %v8502_v60  ;;  %v6573_v2 = vld [vmem:[%s12643_s3] ss:$0 sm:$0xff] }
0x16c1   : > { %v8532_v26 = vunpack.i.h.bf16 %v8530_v25  ;;  %v8531_v39 = vunpack.i.l.bf16 %v8530_v25  ;;  %8142 = vmatmul.mubr.f32.vlgmr.msra.gmra.mxu0 %v5999_v36  ;;  %8154 = vmatmul.mubr.f32.vlgmr.msra.gmra.mxu1 %v6007_v32  ;;  %v6001_v34 = vsel %vm5997_vm6, %v12459_v4, %v8526_v48  ;;  %v6009_v58 = vsel %vm5997_vm6, %v12465_v16, %v8527_v54 }
0x16c2   : > { %v8535_v17 = vpop.permute.xlu1 %8534  ;;  %v5937_v4 = vsel %vm5929_vm2, %v5920_v8, %v8486_v21  ;;  %v5945_v16 = vsel %vm5929_vm2, %v5928_v31, %v8487_v49  ;;  %v5995_v20 = vsel %vm5980_vm5, %v5978_v43, %v8512_v44 }
0x16c3   : > { %v6000_v6 = vsel %vm5997_vm6, %v12441_v50, %v8531_v39  ;;  %v6008_v5 = vsel %vm5997_vm6, %v12447_v28, %v8532_v26  ;;  %v8537_v27 = vunpack.i.h.bf16 %v8535_v17  ;;  %v8536_v63 = vunpack.i.l.bf16 %v8535_v17 }
0x16c4   : > { %v8540_v15 = vpop.permute.xlu0 %8539  ;;  %8144 = vmatprep.mubr.f32.mxu0 %v6000_v6  ;;  %8156 = vmatprep.mubr.f32.mxu1 %v6008_v5  ;;  %v8497_v28 = vunpack.i.h.bf16 %v12453_v41  ;;  %v5954_v23 = vsel %vm5946_vm3, %v5937_v4, %v8496_v53 }
0x16c5   : > { %v8542_v14 = vunpack.i.h.bf16 %v8540_v15  ;;  %v8541_v50 = vunpack.i.l.bf16 %v8540_v15  ;;  %8145 = vmatmul.mubr.f32.gmra.mxu0 %v6001_v34  ;;  %8157 = vmatmul.mubr.f32.gmra.mxu1 %v6009_v58  ;;  %v6003_v41 = vsel %vm5997_vm6, %v5986_v51, %v8536_v63  ;;  %v6011_v33 = vsel %vm5997_vm6, %v5994_v10, %v8537_v27 }
0x16c6   : > { %v5962_v61 = vsel %vm5946_vm3, %v5945_v16, %v8497_v28  ;;  %v5971_v0 = vsel %vm5963_vm4, %v5954_v23, %v8506_v62 }
0x16c7   : > { %v6002_v40 = vsel %vm5997_vm6, %v12499_v18, %v8541_v50  ;;  %v6010_v56 = vsel %vm5997_vm6, %v5993_v57, %v8542_v14  ;;  %v5970_v18 = vsel %vm5963_vm4, %v5953_v19, %v8501_v3  ;;  %v5979_v9 = vsel %vm5963_vm4, %v5962_v61, %v8507_v46 }
0x16c8   : > { %v8550_v22 = vpop.permute.xlu1 %8549  ;;  %v8545_v35 = vpop.permute.xlu0 %8544  ;;  %8147 = vmatprep.mubr.f32.mxu0 %v6002_v40  ;;  %8159 = vmatprep.mubr.f32.mxu1 %v6010_v56  ;;  %v5987_v47 = vsel %vm5980_vm5, %v5970_v18, %v8511_v45 }
0x16c9   : > { %v8552_v38 = vunpack.i.h.bf16 %v8550_v22  ;;  %v8551_v7 = vunpack.i.l.bf16 %v8550_v22  ;;  %8148 = vmatmul.mubr.f32.gmra.mxu0 %v6003_v41  ;;  %8160 = vmatmul.mubr.f32.gmra.mxu1 %v6011_v33  ;;  %v8547_v57 = vunpack.i.h.bf16 %v8545_v35  ;;  %v8546_v1 = vunpack.i.l.bf16 %v8545_v35 }
0x16cb   : > { %v6004_v29 = vsel %vm5997_vm6, %v5987_v47, %v8551_v7  ;;  %v6012_v37 = vsel %vm5997_vm6, %v5995_v20, %v8552_v38  ;;  %v5988_v30 = vsel %vm5980_vm5, %v5971_v0, %v8546_v1  ;;  %v5996_v11 = vsel %vm5980_vm5, %v5979_v9, %v8547_v57 }
0x16cc   : > { %v8555_v12 = vpop.permute.xlu0 %8554  ;;  %8150 = vmatprep.mubr.f32.mxu0 %v6004_v29  ;;  %8162 = vmatprep.mubr.f32.mxu1 %v6012_v37 }
0x16cd   : > { %v8557_v42 = vunpack.i.h.bf16 %v8555_v12  ;;  %v8556_v55 = vunpack.i.l.bf16 %v8555_v12 }
0x16cf   : > { %v6005_v13 = vsel %vm5997_vm6, %v5988_v30, %v8556_v55  ;;  %v6013_v59 = vsel %vm5997_vm6, %v5996_v11, %v8557_v42 }
0x16d0   : > { %8151 = vmatmul.mubr.f32.gmra.mxu0 %v6005_v13  ;;  %8163 = vmatmul.mubr.f32.gmra.mxu1 %v6013_v59 }
0x1781   : > { %v8143_v24 = vpop.f32.mrf.mxu0  ;;  %v8155_v36 = vpop.f32.mrf.mxu1 }
0x1782   : > { %v6109_v32 = vadd.f32 %v8143_v24, %v6573_v2  ;;  %v6149_v54 = vadd.f32 %v8155_v36, %v6573_v2 }
0x1783   : > { %v6103_v48 = vpop.f32.mrf.mxu0  ;;  %v6143_v25 = vpop.f32.mrf.mxu1 }
0x1784   : > { %6183 = vst [vmem:[%s12572_s26 + $0x8] sm:$0xff] %v6109_v32  ;;  %6191 = vst [vmem:[%s12572_s26 + $0x48] sm:$0xff] %v6149_v54  ;;  %v6104_v8 = vadd.f32 %v6573_v2, %v6103_v48  ;;  %v6144_v31 = vadd.f32 %v6573_v2, %v6143_v25 }
0x1785   : > { %v8146_v26 = vpop.f32.mrf.mxu0  ;;  %v8158_v39 = vpop.f32.mrf.mxu1 }
0x1786   : > { %6182 = vst [vmem:[%s12572_s26] sm:$0xff] %v6104_v8  ;;  %6190 = vst [vmem:[%s12572_s26 + $0x40] sm:$0xff] %v6144_v31  ;;  %v6119_v19 = vadd.f32 %v8146_v26, %v6573_v2  ;;  %v6159_v52 = vadd.f32 %v8158_v39, %v6573_v2 }
0x1787   : > { %v6113_v17 = vpop.f32.mrf.mxu0  ;;  %v6153_v51 = vpop.f32.mrf.mxu1 }
0x1788   : > { %6185 = vst [vmem:[%s12572_s26 + $0x18] sm:$0xff] %v6119_v19  ;;  %6193 = vst [vmem:[%s12572_s26 + $0x58] sm:$0xff] %v6159_v52  ;;  %v6114_v10 = vadd.f32 %v6573_v2, %v6113_v17  ;;  %v6154_v49 = vadd.f32 %v6573_v2, %v6153_v51 }
0x1789   : > { %v8149_v21 = vpop.f32.mrf.mxu0  ;;  %v8161_v6 = vpop.f32.mrf.mxu1 }
0x178a   : > { %6184 = vst [vmem:[%s12572_s26 + $0x10] sm:$0xff] %v6114_v10  ;;  %6192 = vst [vmem:[%s12572_s26 + $0x50] sm:$0xff] %v6154_v49  ;;  %v6129_v5 = vadd.f32 %v8149_v21, %v6573_v2  ;;  %v6169_v27 = vadd.f32 %v8161_v6, %v6573_v2 }
0x178b   : > { %v6123_v63 = vpop.f32.mrf.mxu0  ;;  %v6163_v15 = vpop.f32.mrf.mxu1 }
0x178c   : > { %6187 = vst [vmem:[%s12572_s26 + $0x28] sm:$0xff] %v6129_v5  ;;  %6195 = vst [vmem:[%s12572_s26 + $0x68] sm:$0xff] %v6169_v27  ;;  %v6124_v34 = vadd.f32 %v6573_v2, %v6123_v63  ;;  %v6164_v58 = vadd.f32 %v6573_v2, %v6163_v15 }
0x178e   : > { %6186 = vst [vmem:[%s12572_s26 + $0x20] sm:$0xff] %v6124_v34  ;;  %6194 = vst [vmem:[%s12572_s26 + $0x60] sm:$0xff] %v6164_v58 }
0x1790   : > { %v8152_v60 = vpop.f32.mrf.mxu0  ;;  %v8164_v3 = vpop.f32.mrf.mxu1 }
0x1791   : > { %v6139_v14 = vadd.f32 %v8152_v60, %v6573_v2  ;;  %v6179_v50 = vadd.f32 %v8164_v3, %v6573_v2 }
0x1792   : > { %v6133_v28 = vpop.f32.mrf.mxu0  ;;  %v6173_v53 = vpop.f32.mrf.mxu1 }
0x1793   : > { %6189 = vst [vmem:[%s12572_s26 + $0x38] sm:$0xff] %v6139_v14  ;;  %6197 = vst [vmem:[%s12572_s26 + $0x78] sm:$0xff] %v6179_v50  ;;  %v6134_v44 = vadd.f32 %v6573_v2, %v6133_v28  ;;  %v6174_v45 = vadd.f32 %v6573_v2, %v6173_v53 }
0x1795   : > { %6188 = vst [vmem:[%s12572_s26 + $0x30] sm:$0xff] %v6134_v44  ;;  %6196 = vst [vmem:[%s12572_s26 + $0x70] sm:$0xff] %v6174_v45 }
0x1796   : > { %9163 = shalt.err (!%p9160_p9)
}
0x1797   : > { %s9164_s10 = scalar_lea.hbm %s12591_s27, 2048  ;;  %s9168_s11 = scalar_lea.hbm %s12644_s4, 4096 }
0x1798   : > { %p9165_p13 = scmp.ne.s32.totalorder %s12591_s27, %s9164_s10  ;;  %p9169_p4 = scmp.lt.s32.totalorder %s12591_s27, %s12644_s4 }
0x1799   : > { %p9170_p8 = scmp.lt.s32.totalorder %s9168_s11, %s9164_s10 }
0x179a   : > { %p9166_p5 = pnand %p9165_p13, %p13208_p10 }
0x179b   : > { %p9171_p7 = por %p9170_p8, %p9169_p4 }
0x179c   : > { %p9167_p0 = pneg %p9166_p5 }
0x179e   : > { %p9172_p11 = pnand %p9171_p7, %p9167_p0 }
0x17a0   : > { %9175 = shalt.err (!%p9172_p11)
}
0x17a1   : > { %s9236_s26 = smov 128   ;;  %s9237_s30 = smov 8  }
0x17a2   : > { %8207 = dma.vmem_to_hbm [thread:$0]  (%p13208_p10), %s12593_s6, 2048, %s12591_s27, %s6199_s19, %s9236_s26, %s9236_s26, %s9237_s30  }
0x17a3 PF: > { %s6227_s14 = sand.u32 1, %s9206_s15   ;;  %p13209_p1 = scmp.ne.s32.totalorder %s12755_s22, 0 }
0x17a4   : > { %p13210_p2 = scmp.ge.s32.totalorder %s9218_s18, 2  ;;  %s6228_s20 = scalar_lea.sflag [#allocation4], %s6227_s14 }
0x17a6   : > { %p8221_p6 = pnand %p13210_p2, %p13209_p1 }
0x17a8   : > { %p8222_p12 = pneg %p8221_p6 }
0x17aa   : > { %9201 = dma.done.wait (%p8222_p12), %s6228_s20, 2048  }
0x17ab   : > { %9203 = vsyncadd (%p8222_p12), %s6228_s20, 4294965248  ;;  %p18_p3 = scmp.ge.s32.totalorder %s9338_s13, 4   ;;  %s13211_s15 = smov %s9210_s16 }
0x17ac   : > { %s13212_s16 = smov %s9214_s17  ;;  %s13213_s17 = smov %s9347_s24 }
0x17ad   : > { %s13214_s18 = smov %s9338_s13  ;;  %20 = sbr.rel (!%p18_p3) target bundleno = 6 (0x6), region = 89 }
0x17b2   :  { %6233 = vsyncpa [#allocation3], 1 }
0x17b3   :  { %6235 = vsyncpa [#allocation3 + $0x1], 1 }
0x17b4   :  { %6236 = vsyncpa [#allocation6], 1 }
0x17b5   :  { %6237 = vsyncpa [#allocation4], 1 }
0x17b6   :  { %6239 = vsyncpa [#allocation4 + $0x1], 1 }

</bundles_post_ra>
